<compile_context>
chip_gen: v7x
topology: tpu7x:2x2x1
jax: 0.10.0
libtpu: 0.0.40
codegen_flags: <defaults>
</compile_context>

<pallas_src>
import jax
import jax.numpy as jnp
from jax.experimental import pallas as pl
from jax.experimental.pallas import tpu as pltpu


def conv_bn_kernel(x_ref, w_ref, gamma_ref, beta_ref, o_ref):
    # x_ref:     [Cin, M]    (M = N*H*W, NCHW-flattened spatial, N == 1 path)
    # w_ref:     [Cout, Cin]
    # gamma_ref: [Cout, 1]
    # beta_ref:  [Cout, 1]
    # o_ref:     [Cout, M]

    # 1x1 convolution == matmul on the MXU.  Feed refs in native dtype; the
    # f32 accumulation is requested via preferred_element_type.
    y = jnp.dot(w_ref[...], x_ref[...],
                preferred_element_type=jnp.float32)        # [Cout, M]

    # BatchNorm2d (training mode): per-output-channel (row) stats over M,
    # computed in a single pass (sum and sum-of-squares).
    m = jnp.float32(y.shape[1])
    s1 = jnp.sum(y, axis=1, keepdims=True)                 # [Cout, 1]
    s2 = jnp.sum(y * y, axis=1, keepdims=True)             # [Cout, 1]
    mean = s1 / m                                          # [Cout, 1]
    var = jnp.maximum(s2 / m - mean * mean, 0.0)           # biased variance

    eps = jnp.float32(1e-3)                                # module eps=0.001
    inv_std = jax.lax.rsqrt(var + eps)                     # [Cout, 1]

    # Fold BN into a single scale/shift so the output pass is one FMA sweep.
    scale = gamma_ref[...] * inv_std                       # [Cout, 1]
    shift = beta_ref[...] - mean * scale                   # [Cout, 1]

    o_ref[...] = (y * scale + shift).astype(o_ref.dtype)


def conv2d_1x1_batchnorm(x_nchw, weight, gamma, beta):
    """x_nchw: [N, Cin, H, W]; weight: [Cout, Cin, 1, 1]; gamma/beta: [Cout]."""
    N, Cin, H, W = x_nchw.shape
    Cout = weight.shape[0]
    M = N * H * W

    # NCHW -> [Cin, M].  For N == 1 this is a free contiguous reshape (no XLA
    # transpose pass over the activation tensor).
    if N == 1:
        x2 = x_nchw.reshape(Cin, M)
    else:
        x2 = jnp.transpose(x_nchw, (1, 0, 2, 3)).reshape(Cin, M)

    w2 = weight.reshape(Cout, Cin)       # [Cout, Cin, 1, 1] -> [Cout, Cin], free
    g2 = gamma.reshape(Cout, 1)
    b2 = beta.reshape(Cout, 1)

    out2 = pl.pallas_call(
        conv_bn_kernel,
        out_shape=jax.ShapeDtypeStruct((Cout, M), x_nchw.dtype),
        grid=(1,),
        in_specs=[
            pl.BlockSpec((Cin, M), lambda i: (0, 0)),
            pl.BlockSpec((Cout, Cin), lambda i: (0, 0)),
            pl.BlockSpec((Cout, 1), lambda i: (0, 0)),
            pl.BlockSpec((Cout, 1), lambda i: (0, 0)),
        ],
        out_specs=pl.BlockSpec((Cout, M), lambda i: (0, 0)),
        compiler_params=pltpu.CompilerParams(
            dimension_semantics=("arbitrary",)),
    )(x2, w2, g2, b2)

    # [Cout, M] -> NCHW [N, Cout, H, W].  Free reshape for N == 1.
    if N == 1:
        return out2.reshape(1, Cout, H, W)
    return jnp.transpose(out2.reshape(Cout, N, H, W), (1, 0, 2, 3))


if __name__ == "__main__":
    key = jax.random.PRNGKey(0)
    kx, kw, kg, kb = jax.random.split(key, 4)

    # Shapes implied by the module's forward: input [1, 160, 14, 14].
    N, Cin, H, W, Cout = 1, 160, 14, 14, 960

    x = jax.random.normal(kx, (N, Cin, H, W), dtype=jnp.float32)
    # Deterministic synthetic parameters (no checkpoint load).
    weight = jax.random.normal(kw, (Cout, Cin, 1, 1), dtype=jnp.float32) * 0.05
    gamma = 1.0 + 0.1 * jax.random.normal(kg, (Cout,), dtype=jnp.float32)
    beta = 0.1 * jax.random.normal(kb, (Cout,), dtype=jnp.float32)

    out = conv2d_1x1_batchnorm(x, weight, gamma, beta)
    jax.block_until_ready(out)

    assert out.shape == (N, Cout, H, W), out.shape
    print("KERNEL_OK")
</pallas_src>

<mosaic_0001>
module attributes {stable_mosaic.version = 11 : i64} {
  func.func @conv_bn_kernel(%arg0: i32, %arg1: memref<160x196xf32, #tpu.memory_space<vmem>>, %arg2: memref<960x160xf32, #tpu.memory_space<vmem>>, %arg3: memref<960x1xf32, #tpu.memory_space<vmem>>, %arg4: memref<960x1xf32, #tpu.memory_space<vmem>>, %arg5: memref<960x196xf32, #tpu.memory_space<vmem>>) attributes {dimension_semantics = [#tpu.dimension_semantics<arbitrary>], iteration_bounds = array<i64: 1>, scalar_prefetch = 0 : i64, scratch_operands = 0 : i64, tpu.core_type = #tpu.core_type<tc>, window_params = [{pipeline_mode = #tpu.pipeline_mode<synchronous>, transform_indices = @transform_0, window_bounds = array<i64: 160, 196>}, {pipeline_mode = #tpu.pipeline_mode<synchronous>, transform_indices = @transform_1, window_bounds = array<i64: 960, 160>}, {pipeline_mode = #tpu.pipeline_mode<synchronous>, transform_indices = @transform_2, window_bounds = array<i64: 960, 1>}, {pipeline_mode = #tpu.pipeline_mode<synchronous>, transform_indices = @transform_3, window_bounds = array<i64: 960, 1>}, {pipeline_mode = #tpu.pipeline_mode<synchronous>, transform_indices = @transform_4, window_bounds = array<i64: 960, 196>}]} {
    %c0 = arith.constant 0 : index
    %c0_0 = arith.constant 0 : index
    %0 = vector.load %arg2[%c0, %c0_0] : memref<960x160xf32, #tpu.memory_space<vmem>>, vector<960x160xf32>
    %c0_1 = arith.constant 0 : index
    %c0_2 = arith.constant 0 : index
    %1 = vector.load %arg1[%c0_1, %c0_2] : memref<160x196xf32, #tpu.memory_space<vmem>>, vector<160x196xf32>
    %cst = arith.constant dense<0.000000e+00> : vector<960x196xf32>
    %2 = tpu.matmul %0, %1, %cst {dimension_numbers = #tpu.dot_dimension_numbers<[1], [0], [0], [1], [0, 0, 1, 1], [], []>} : vector<960x160xf32>, vector<160x196xf32>, vector<960x196xf32> -> vector<960x196xf32>
    %cst_3 = arith.constant dense<0.000000e+00> : vector<960xf32>
    %3 = vector.multi_reduction <add>, %2, %cst_3 [1] : vector<960x196xf32> to vector<960xf32>
    %4 = vector.shape_cast %3 : vector<960xf32> to vector<960x1xf32>
    %5 = arith.mulf %2, %2 : vector<960x196xf32>
    %cst_4 = arith.constant dense<0.000000e+00> : vector<960xf32>
    %6 = vector.multi_reduction <add>, %5, %cst_4 [1] : vector<960x196xf32> to vector<960xf32>
    %7 = vector.shape_cast %6 : vector<960xf32> to vector<960x1xf32>
    %cst_5 = arith.constant 1.960000e+02 : f32
    %8 = vector.broadcast %cst_5 : f32 to vector<960x1xf32>
    %9 = arith.divf %4, %8 : vector<960x1xf32>
    %cst_6 = arith.constant 1.960000e+02 : f32
    %10 = vector.broadcast %cst_6 : f32 to vector<960x1xf32>
    %11 = arith.divf %7, %10 : vector<960x1xf32>
    %12 = arith.mulf %9, %9 : vector<960x1xf32>
    %13 = arith.subf %11, %12 : vector<960x1xf32>
    %cst_7 = arith.constant 0.000000e+00 : f32
    %14 = vector.broadcast %cst_7 : f32 to vector<960x1xf32>
    %15 = arith.maximumf %13, %14 : vector<960x1xf32>
    %cst_8 = arith.constant 1.000000e-03 : f32
    %16 = vector.broadcast %cst_8 : f32 to vector<960x1xf32>
    %17 = arith.addf %15, %16 : vector<960x1xf32>
    %18 = math.rsqrt %17 : vector<960x1xf32>
    %c0_9 = arith.constant 0 : index
    %c0_10 = arith.constant 0 : index
    %19 = vector.load %arg3[%c0_9, %c0_10] : memref<960x1xf32, #tpu.memory_space<vmem>>, vector<960x1xf32>
    %20 = arith.mulf %19, %18 : vector<960x1xf32>
    %c0_11 = arith.constant 0 : index
    %c0_12 = arith.constant 0 : index
    %21 = vector.load %arg4[%c0_11, %c0_12] : memref<960x1xf32, #tpu.memory_space<vmem>>, vector<960x1xf32>
    %22 = arith.mulf %9, %20 : vector<960x1xf32>
    %23 = arith.subf %21, %22 : vector<960x1xf32>
    %24 = vector.broadcast %20 : vector<960x1xf32> to vector<960x196xf32>
    %25 = arith.mulf %2, %24 : vector<960x196xf32>
    %26 = vector.broadcast %23 : vector<960x1xf32> to vector<960x196xf32>
    %27 = arith.addf %25, %26 : vector<960x196xf32>
    %c0_13 = arith.constant 0 : index
    %c0_14 = arith.constant 0 : index
    %28 = vector.load %arg5[%c0_13, %c0_14] : memref<960x196xf32, #tpu.memory_space<vmem>>, vector<960x196xf32>
    tpu.vector_store %arg5[%c0_13, %c0_14], %27 {strides = array<i32>} : memref<960x196xf32, #tpu.memory_space<vmem>>, vector<960x196xf32>,
    return
  }
  func.func @transform_0(%arg0: i32) -> (i32, i32) {
    %c0_i32 = arith.constant 0 : i32
    %c0_i32_0 = arith.constant 0 : i32
    %c0_i32_1 = arith.constant 0 : i32
    return %c0_i32, %c0_i32_0 : i32, i32
  }
  func.func @transform_1(%arg0: i32) -> (i32, i32) {
    %c0_i32 = arith.constant 0 : i32
    %c0_i32_0 = arith.constant 0 : i32
    %c0_i32_1 = arith.constant 0 : i32
    return %c0_i32, %c0_i32_0 : i32, i32
  }
  func.func @transform_2(%arg0: i32) -> (i32, i32) {
    %c0_i32 = arith.constant 0 : i32
    %c0_i32_0 = arith.constant 0 : i32
    %c0_i32_1 = arith.constant 0 : i32
    return %c0_i32, %c0_i32_0 : i32, i32
  }
  func.func @transform_3(%arg0: i32) -> (i32, i32) {
    %c0_i32 = arith.constant 0 : i32
    %c0_i32_0 = arith.constant 0 : i32
    %c0_i32_1 = arith.constant 0 : i32
    return %c0_i32, %c0_i32_0 : i32, i32
  }
  func.func @transform_4(%arg0: i32) -> (i32, i32) {
    %c0_i32 = arith.constant 0 : i32
    %c0_i32_0 = arith.constant 0 : i32
    %c0_i32_1 = arith.constant 0 : i32
    return %c0_i32, %c0_i32_0 : i32, i32
  }
}

</mosaic_0001>

<bundles_post_ra>
// kernel: tpu_custom_call.1
= control target key start
LH: loop header
LB: loop body
LE: loop exit
PB: predicated region body
PF: predicated region fallthrough
CT: control target
= control target key end

     0   :  { %vm297_vm0 = vcmask 261120   ;;  %vm1443_vm1 = vcmask 556032   ;;  %s13778_s0 = inlined_call_operand.vmem [shape: f32[160,196], index: 0, kind: input, shape index: {}]   ;;  %s13779_s1 = inlined_call_operand.vmem [shape: f32[960,160], index: 1, kind: input, shape index: {}]   ;;  %s13780_s2 = inlined_call_operand.vmem [shape: f32[960,1], index: 2, kind: input, shape index: {}]   ;;  %s13781_s3 = inlined_call_operand.vmem [shape: f32[960,1], index: 3, kind: input, shape index: {}]   ;;  %s13782_s4 = inlined_call_operand.vmem [shape: f32[960,196], index: 4, kind: output, shape index: {}]  }
   0x1   :  { %v258_v0 = vld [vmem:[%s13778_s0 + $0x8] sm:$0xff]  ;;  %v260_v1 = vld [vmem:[%s13778_s0 + $0x18] sm:$0xff]  ;;  %v257_v2 = vld [vmem:[%s13778_s0] sm:$0xff] }
   0x2   :  { %v6129_v3 = vpack.c.bf16 %v260_v1, %v258_v0  ;;  %v259_v4 = vld [vmem:[%s13778_s0 + $0x10] sm:$0xff]  ;;  %v262_v5 = vld [vmem:[%s13778_s0 + $0x28] sm:$0xff]  ;;  %v264_v6 = vld [vmem:[%s13778_s0 + $0x38] sm:$0xff] }
   0x3   :  { %v6131_v7 = vpack.c.bf16 %v259_v4, %v257_v2  ;;  %v6133_v8 = vpack.c.bf16 %v264_v6, %v262_v5  ;;  %v261_v9 = vld [vmem:[%s13778_s0 + $0x20] sm:$0xff]  ;;  %v263_v10 = vld [vmem:[%s13778_s0 + $0x30] sm:$0xff]  ;;  %v266_v11 = vld [vmem:[%s13778_s0 + $0x48] sm:$0xff] }
   0x4   :  { %6130 = vmatprep.subr.bf16.mxu0 %v6129_v3  ;;  %6169 = vmatprep.subr.bf16.mxu1 %v6129_v3  ;;  %v268_v12 = vld [vmem:[%s13778_s0 + $0x58] sm:$0xff]  ;;  %v6135_v13 = vpack.c.bf16 %v263_v10, %v261_v9  ;;  %v265_v15 = vld [vmem:[%s13778_s0 + $0x40] sm:$0xff]  ;;  %v267_v16 = vld [vmem:[%s13778_s0 + $0x50] sm:$0xff] }
   0x5   :  { %6132 = vmatpush1.bf16.msra.mxu0 %v6131_v7  ;;  %6179 = vmatpush1.bf16.msra.mxu1 %v6131_v7  ;;  %v6137_v14 = vpack.c.bf16 %v268_v12, %v266_v11  ;;  %v270_v17 = vld [vmem:[%s13778_s0 + $0x68] sm:$0xff]  ;;  %v272_v18 = vld [vmem:[%s13778_s0 + $0x78] sm:$0xff]  ;;  %v6139_v19 = vpack.c.bf16 %v267_v16, %v265_v15  ;;  %v269_v21 = vld [vmem:[%s13778_s0 + $0x60] sm:$0xff] }
   0x6   :  { %6134 = vmatprep.subr.bf16.mxu0 %v6133_v8  ;;  %6170 = vmatprep.subr.bf16.mxu1 %v6133_v8  ;;  %v6141_v20 = vpack.c.bf16 %v272_v18, %v270_v17  ;;  %v271_v22 = vld [vmem:[%s13778_s0 + $0x70] sm:$0xff]  ;;  %v274_v23 = vld [vmem:[%s13778_s0 + $0x88] sm:$0xff]  ;;  %v276_v24 = vld [vmem:[%s13778_s0 + $0x98] sm:$0xff] }
   0x7   :  { %v6143_v25 = vpack.c.bf16 %v271_v22, %v269_v21  ;;  %v273_v26 = vld [vmem:[%s13778_s0 + $0x80] sm:$0xff]  ;;  %v6145_v27 = vpack.c.bf16 %v276_v24, %v274_v23  ;;  %v275_v28 = vld [vmem:[%s13778_s0 + $0x90] sm:$0xff]  ;;  %v18_v29 = vld [vmem:[%s13779_s1 + $0x8] sm:$0xff] }
   0x8   :  { %v138_v30 = vld [vmem:[%s13779_s1 + $0x3c8] sm:$0xff]  ;;  %v280_v32 = vld [vmem:[%s13778_s0 + $0xb8] sm:$0xff]  ;;  %6009 = vmatprep.mubr.msk.f32.mxu0 %vm297_vm0, %v18_v29  ;;  %v6147_v33 = vpack.c.bf16 %v275_v28, %v273_v26  ;;  %v277_v35 = vld [vmem:[%s13778_s0 + $0xa0] sm:$0xff] }
   0x9   :  { %6136 = vmatpush1.bf16.msra.mxu0 %v6135_v13  ;;  %6180 = vmatpush1.bf16.msra.mxu1 %v6135_v13  ;;  %v278_v31 = vld [vmem:[%s13778_s0 + $0xa8] sm:$0xff]  ;;  %v279_v36 = vld [vmem:[%s13778_s0 + $0xb0] sm:$0xff]  ;;  %v284_v38 = vld [vmem:[%s13778_s0 + $0xd8] sm:$0xff] }
   0xa   :  { %6138 = vmatprep.subr.bf16.mxu0 %v6137_v14  ;;  %6171 = vmatprep.subr.bf16.mxu1 %v6137_v14  ;;  %v6149_v34 = vpack.c.bf16 %v280_v32, %v278_v31  ;;  %v282_v37 = vld [vmem:[%s13778_s0 + $0xc8] sm:$0xff]  ;;  %v6151_v39 = vpack.c.bf16 %v279_v36, %v277_v35  ;;  %v281_v41 = vld [vmem:[%s13778_s0 + $0xc0] sm:$0xff]  ;;  %v283_v42 = vld [vmem:[%s13778_s0 + $0xd0] sm:$0xff] }
   0xb   :  { %6069 = vmatprep.mubr.msk.f32.mxu1 %vm297_vm0, %v138_v30  ;;  %v6153_v40 = vpack.c.bf16 %v284_v38, %v282_v37  ;;  %v286_v43 = vld [vmem:[%s13778_s0 + $0xe8] sm:$0xff]  ;;  %v288_v44 = vld [vmem:[%s13778_s0 + $0xf8] sm:$0xff]  ;;  %v6155_v45 = vpack.c.bf16 %v283_v42, %v281_v41  ;;  %v285_v47 = vld [vmem:[%s13778_s0 + $0xe0] sm:$0xff] }
   0xc   :  { %v6157_v46 = vpack.c.bf16 %v288_v44, %v286_v43  ;;  %v287_v48 = vld [vmem:[%s13778_s0 + $0xf0] sm:$0xff]  ;;  %v290_v49 = vld [vmem:[%s13778_s0 + $0x108] sm:$0xff]  ;;  %v292_v50 = vld [vmem:[%s13778_s0 + $0x118] sm:$0xff] }
   0xd   :  { %6140 = vmatpush1.bf16.msra.mxu0 %v6139_v19  ;;  %6181 = vmatpush1.bf16.msra.mxu1 %v6139_v19  ;;  %v6159_v51 = vpack.c.bf16 %v287_v48, %v285_v47  ;;  %v6161_v52 = vpack.c.bf16 %v292_v50, %v290_v49  ;;  %v289_v53 = vld [vmem:[%s13778_s0 + $0x100] sm:$0xff]  ;;  %v291_v54 = vld [vmem:[%s13778_s0 + $0x110] sm:$0xff]  ;;  %v294_v55 = vld [vmem:[%s13778_s0 + $0x128] sm:$0xff] }
   0xe   :  { %6142 = vmatprep.subr.bf16.mxu0 %v6141_v20  ;;  %6172 = vmatprep.subr.bf16.mxu1 %v6141_v20  ;;  %v296_v56 = vld [vmem:[%s13778_s0 + $0x138] sm:$0xff]  ;;  %v6163_v57 = vpack.c.bf16 %v291_v54, %v289_v53  ;;  %v293_v59 = vld [vmem:[%s13778_s0 + $0x120] sm:$0xff]  ;;  %v295_v60 = vld [vmem:[%s13778_s0 + $0x130] sm:$0xff] }
   0xf   :  { %v6165_v58 = vpack.c.bf16 %v296_v56, %v294_v55  ;;  %v6167_v61 = vpack.c.bf16 %v295_v60, %v293_v59  ;;  %v17_v62 = vld [vmem:[%s13779_s1] sm:$0xff]  ;;  %v20_v0 = vld [vmem:[%s13779_s1 + $0x18] sm:$0xff]  ;;  %v19_v2 = vld [vmem:[%s13779_s1 + $0x10] sm:$0xff] }
  0x10   :  { %v137_v63 = vld [vmem:[%s13779_s1 + $0x3c0] sm:$0xff]  ;;  %v140_v1 = vld [vmem:[%s13779_s1 + $0x3d8] sm:$0xff]  ;;  %v139_v3 = vld [vmem:[%s13779_s1 + $0x3d0] sm:$0xff] }
  0x11   :  { %6144 = vmatpush1.bf16.msra.mxu0 %v6143_v25  ;;  %6182 = vmatpush1.bf16.msra.mxu1 %v6143_v25  ;;  %v22_v4 = vld [vmem:[%s13779_s1 + $0x28] sm:$0xff]  ;;  %v21_v6 = vld [vmem:[%s13779_s1 + $0x20] sm:$0xff]  ;;  %v24_v8 = vld [vmem:[%s13779_s1 + $0x38] sm:$0xff] }
  0x12   :  { %6146 = vmatprep.subr.bf16.mxu0 %v6145_v27  ;;  %6173 = vmatprep.subr.bf16.mxu1 %v6145_v27  ;;  %v142_v5 = vld [vmem:[%s13779_s1 + $0x3e8] sm:$0xff]  ;;  %v141_v7 = vld [vmem:[%s13779_s1 + $0x3e0] sm:$0xff]  ;;  %v144_v9 = vld [vmem:[%s13779_s1 + $0x3f8] sm:$0xff] }
  0x13   :  { %v23_v10 = vld [vmem:[%s13779_s1 + $0x30] sm:$0xff]  ;;  %v26_v12 = vld [vmem:[%s13779_s1 + $0x48] sm:$0xff]  ;;  %v25_v14 = vld [vmem:[%s13779_s1 + $0x40] sm:$0xff] }
  0x14   :  { %v143_v11 = vld [vmem:[%s13779_s1 + $0x3f0] sm:$0xff]  ;;  %v146_v13 = vld [vmem:[%s13779_s1 + $0x408] sm:$0xff]  ;;  %v145_v15 = vld [vmem:[%s13779_s1 + $0x400] sm:$0xff] }
  0x15   :  { %6148 = vmatpush1.bf16.msra.mxu0 %v6147_v33  ;;  %6183 = vmatpush1.bf16.msra.mxu1 %v6147_v33  ;;  %v28_v16 = vld [vmem:[%s13779_s1 + $0x58] sm:$0xff]  ;;  %v27_v18 = vld [vmem:[%s13779_s1 + $0x50] sm:$0xff]  ;;  %v30_v20 = vld [vmem:[%s13779_s1 + $0x68] sm:$0xff] }
  0x16   :  { %6150 = vmatprep.subr.bf16.mxu0 %v6149_v34  ;;  %6174 = vmatprep.subr.bf16.mxu1 %v6149_v34  ;;  %v148_v17 = vld [vmem:[%s13779_s1 + $0x418] sm:$0xff]  ;;  %v147_v19 = vld [vmem:[%s13779_s1 + $0x410] sm:$0xff]  ;;  %v150_v21 = vld [vmem:[%s13779_s1 + $0x428] sm:$0xff] }
  0x17   :  { %v29_v22 = vld [vmem:[%s13779_s1 + $0x60] sm:$0xff]  ;;  %v32_v24 = vld [vmem:[%s13779_s1 + $0x78] sm:$0xff]  ;;  %v31_v26 = vld [vmem:[%s13779_s1 + $0x70] sm:$0xff] }
  0x18   :  { %v149_v23 = vld [vmem:[%s13779_s1 + $0x420] sm:$0xff]  ;;  %v152_v25 = vld [vmem:[%s13779_s1 + $0x438] sm:$0xff]  ;;  %v151_v27 = vld [vmem:[%s13779_s1 + $0x430] sm:$0xff] }
  0x19   :  { %6152 = vmatpush1.bf16.msra.mxu0 %v6151_v39  ;;  %6184 = vmatpush1.bf16.msra.mxu1 %v6151_v39  ;;  %v34_v28 = vld [vmem:[%s13779_s1 + $0x88] sm:$0xff]  ;;  %v33_v30 = vld [vmem:[%s13779_s1 + $0x80] sm:$0xff]  ;;  %v36_v32 = vld [vmem:[%s13779_s1 + $0x98] sm:$0xff] }
  0x1a   :  { %6154 = vmatprep.subr.bf16.mxu0 %v6153_v40  ;;  %6175 = vmatprep.subr.bf16.mxu1 %v6153_v40  ;;  %v154_v29 = vld [vmem:[%s13779_s1 + $0x448] sm:$0xff]  ;;  %v153_v31 = vld [vmem:[%s13779_s1 + $0x440] sm:$0xff]  ;;  %v156_v33 = vld [vmem:[%s13779_s1 + $0x458] sm:$0xff] }
  0x1b   :  { %v35_v34 = vld [vmem:[%s13779_s1 + $0x90] sm:$0xff]  ;;  %v38_v36 = vld [vmem:[%s13779_s1 + $0xa8] sm:$0xff]  ;;  %v37_v38 = vld [vmem:[%s13779_s1 + $0xa0] sm:$0xff] }
  0x1c   :  { %v155_v35 = vld [vmem:[%s13779_s1 + $0x450] sm:$0xff]  ;;  %v158_v37 = vld [vmem:[%s13779_s1 + $0x468] sm:$0xff]  ;;  %v157_v39 = vld [vmem:[%s13779_s1 + $0x460] sm:$0xff] }
  0x1d   :  { %6156 = vmatpush1.bf16.msra.mxu0 %v6155_v45  ;;  %6185 = vmatpush1.bf16.msra.mxu1 %v6155_v45  ;;  %v40_v40 = vld [vmem:[%s13779_s1 + $0xb8] sm:$0xff]  ;;  %v39_v42 = vld [vmem:[%s13779_s1 + $0xb0] sm:$0xff]  ;;  %v42_v44 = vld [vmem:[%s13779_s1 + $0xc8] sm:$0xff] }
  0x1e   :  { %6158 = vmatprep.subr.bf16.mxu0 %v6157_v46  ;;  %6176 = vmatprep.subr.bf16.mxu1 %v6157_v46  ;;  %v160_v41 = vld [vmem:[%s13779_s1 + $0x478] sm:$0xff]  ;;  %v159_v43 = vld [vmem:[%s13779_s1 + $0x470] sm:$0xff]  ;;  %v162_v45 = vld [vmem:[%s13779_s1 + $0x488] sm:$0xff] }
  0x1f   :  { %v41_v46 = vld [vmem:[%s13779_s1 + $0xc0] sm:$0xff]  ;;  %v44_v48 = vld [vmem:[%s13779_s1 + $0xd8] sm:$0xff]  ;;  %v43_v50 = vld [vmem:[%s13779_s1 + $0xd0] sm:$0xff] }
  0x20   :  { %v161_v47 = vld [vmem:[%s13779_s1 + $0x480] sm:$0xff]  ;;  %v164_v49 = vld [vmem:[%s13779_s1 + $0x498] sm:$0xff]  ;;  %v166_v53 = vld [vmem:[%s13779_s1 + $0x4a8] sm:$0xff] }
  0x21   :  { %6160 = vmatpush1.bf16.msra.mxu0 %v6159_v51  ;;  %6186 = vmatpush1.bf16.msra.mxu1 %v6159_v51  ;;  %v163_v51 = vld [vmem:[%s13779_s1 + $0x490] sm:$0xff]  ;;  %v45_v54 = vld [vmem:[%s13779_s1 + $0xe0] sm:$0xff]  ;;  %v48_v56 = vld [vmem:[%s13779_s1 + $0xf8] sm:$0xff] }
  0x22   :  { %6162 = vmatprep.subr.bf16.mxu0 %v6161_v52  ;;  %6177 = vmatprep.subr.bf16.mxu1 %v6161_v52  ;;  %v46_v52 = vld [vmem:[%s13779_s1 + $0xe8] sm:$0xff]  ;;  %v165_v55 = vld [vmem:[%s13779_s1 + $0x4a0] sm:$0xff]  ;;  %v167_v59 = vld [vmem:[%s13779_s1 + $0x4b0] sm:$0xff] }
  0x23   :  { %v50_v60 = vld [vmem:[%s13779_s1 + $0x108] sm:$0xff] }
  0x25   :  { %6164 = vmatpush1.bf16.msra.mxu0 %v6163_v57  ;;  %6187 = vmatpush1.bf16.msra.mxu1 %v6163_v57  ;;  %v168_v57 = vld [vmem:[%s13779_s1 + $0x4b8] sm:$0xff] }
  0x26   :  { %6166 = vmatprep.subr.bf16.mxu0 %v6165_v58  ;;  %6178 = vmatprep.subr.bf16.mxu1 %v6165_v58  ;;  %v47_v58 = vld [vmem:[%s13779_s1 + $0xf0] sm:$0xff] }
  0x29   :  { %6168 = vmatpush1.bf16.msra.mxu0 %v6167_v61  ;;  %6188 = vmatpush1.bf16.msra.mxu1 %v6167_v61  ;;  %v170_v61 = vld [vmem:[%s13779_s1 + $0x4c8] sm:$0xff] }
  0x2c   :  { %723 = vmatmul.mubr.f32.vlgmr.msra.gmra.mrb[0].mxu0 %v17_v62  ;;  %1083 = vmatmul.mubr.f32.vlgmr.msra.gmra.mrb[0].mxu1 %v137_v63  ;;  %v49_v62 = vld [vmem:[%s13779_s1 + $0x100] sm:$0xff] }
  0x2d   :  { %6010 = vmatprep.mubr.msk.f32.mxu0 %vm297_vm0, %v20_v0  ;;  %6070 = vmatprep.mubr.msk.f32.mxu1 %vm297_vm0, %v140_v1  ;;  %v169_v63 = vld [vmem:[%s13779_s1 + $0x4c0] sm:$0xff]  ;;  %v52_v0 = vld [vmem:[%s13779_s1 + $0x118] sm:$0xff] }
  0x2e   :  { %v172_v1 = vld [vmem:[%s13779_s1 + $0x4d8] sm:$0xff] }
  0x30   :  { %729 = vmatmul.mubr.f32.gmra.mrb[2].mxu0 %v19_v2  ;;  %1089 = vmatmul.mubr.f32.gmra.mrb[2].mxu1 %v139_v3  ;;  %v51_v2 = vld [vmem:[%s13779_s1 + $0x110] sm:$0xff] }
  0x31   :  { %6011 = vmatprep.mubr.msk.f32.mxu0 %vm297_vm0, %v22_v4  ;;  %6071 = vmatprep.mubr.msk.f32.mxu1 %vm297_vm0, %v142_v5  ;;  %v171_v3 = vld [vmem:[%s13779_s1 + $0x4d0] sm:$0xff]  ;;  %v54_v4 = vld [vmem:[%s13779_s1 + $0x128] sm:$0xff] }
  0x32   :  { %v174_v5 = vld [vmem:[%s13779_s1 + $0x4e8] sm:$0xff] }
  0x34   :  { %735 = vmatmul.mubr.f32.gmra.mrb[4].mxu0 %v21_v6  ;;  %1095 = vmatmul.mubr.f32.gmra.mrb[4].mxu1 %v141_v7  ;;  %v53_v6 = vld [vmem:[%s13779_s1 + $0x120] sm:$0xff] }
  0x35   :  { %6012 = vmatprep.mubr.msk.f32.mxu0 %vm297_vm0, %v24_v8  ;;  %6072 = vmatprep.mubr.msk.f32.mxu1 %vm297_vm0, %v144_v9  ;;  %v173_v7 = vld [vmem:[%s13779_s1 + $0x4e0] sm:$0xff]  ;;  %v56_v8 = vld [vmem:[%s13779_s1 + $0x138] sm:$0xff] }
  0x36   :  { %v176_v9 = vld [vmem:[%s13779_s1 + $0x4f8] sm:$0xff] }
  0x38   :  { %741 = vmatmul.mubr.f32.gmra.mrb[6].mxu0 %v23_v10  ;;  %1101 = vmatmul.mubr.f32.gmra.mrb[6].mxu1 %v143_v11  ;;  %v55_v10 = vld [vmem:[%s13779_s1 + $0x130] sm:$0xff] }
  0x39   :  { %6013 = vmatprep.mubr.msk.f32.mxu0 %vm297_vm0, %v26_v12  ;;  %6073 = vmatprep.mubr.msk.f32.mxu1 %vm297_vm0, %v146_v13  ;;  %v175_v11 = vld [vmem:[%s13779_s1 + $0x4f0] sm:$0xff]  ;;  %v58_v12 = vld [vmem:[%s13779_s1 + $0x148] sm:$0xff] }
  0x3a   :  { %v178_v13 = vld [vmem:[%s13779_s1 + $0x508] sm:$0xff] }
  0x3c   :  { %747 = vmatmul.mubr.f32.gmra.mrb[8].mxu0 %v25_v14  ;;  %1107 = vmatmul.mubr.f32.gmra.mrb[8].mxu1 %v145_v15  ;;  %v57_v14 = vld [vmem:[%s13779_s1 + $0x140] sm:$0xff] }
  0x3d   :  { %6014 = vmatprep.mubr.msk.f32.mxu0 %vm297_vm0, %v28_v16  ;;  %6074 = vmatprep.mubr.msk.f32.mxu1 %vm297_vm0, %v148_v17  ;;  %v177_v15 = vld [vmem:[%s13779_s1 + $0x500] sm:$0xff]  ;;  %v60_v16 = vld [vmem:[%s13779_s1 + $0x158] sm:$0xff] }
  0x3e   :  { %v180_v17 = vld [vmem:[%s13779_s1 + $0x518] sm:$0xff] }
  0x40   :  { %753 = vmatmul.mubr.f32.gmra.mrb[10].mxu0 %v27_v18  ;;  %1113 = vmatmul.mubr.f32.gmra.mrb[10].mxu1 %v147_v19  ;;  %v59_v18 = vld [vmem:[%s13779_s1 + $0x150] sm:$0xff] }
  0x41   :  { %6015 = vmatprep.mubr.msk.f32.mxu0 %vm297_vm0, %v30_v20  ;;  %6075 = vmatprep.mubr.msk.f32.mxu1 %vm297_vm0, %v150_v21  ;;  %v179_v19 = vld [vmem:[%s13779_s1 + $0x510] sm:$0xff]  ;;  %v62_v20 = vld [vmem:[%s13779_s1 + $0x168] sm:$0xff] }
  0x42   :  { %v182_v21 = vld [vmem:[%s13779_s1 + $0x528] sm:$0xff] }
  0x44   :  { %759 = vmatmul.mubr.f32.gmra.mrb[12].mxu0 %v29_v22  ;;  %1119 = vmatmul.mubr.f32.gmra.mrb[12].mxu1 %v149_v23  ;;  %v61_v22 = vld [vmem:[%s13779_s1 + $0x160] sm:$0xff] }
  0x45   :  { %6016 = vmatprep.mubr.msk.f32.mxu0 %vm297_vm0, %v32_v24  ;;  %6076 = vmatprep.mubr.msk.f32.mxu1 %vm297_vm0, %v152_v25  ;;  %v181_v23 = vld [vmem:[%s13779_s1 + $0x520] sm:$0xff]  ;;  %v64_v24 = vld [vmem:[%s13779_s1 + $0x178] sm:$0xff] }
  0x46   :  { %v184_v25 = vld [vmem:[%s13779_s1 + $0x538] sm:$0xff] }
  0x48   :  { %765 = vmatmul.mubr.f32.gmra.mrb[14].mxu0 %v31_v26  ;;  %1125 = vmatmul.mubr.f32.gmra.mrb[14].mxu1 %v151_v27  ;;  %v63_v26 = vld [vmem:[%s13779_s1 + $0x170] sm:$0xff] }
  0x49   :  { %6017 = vmatprep.mubr.msk.f32.mxu0 %vm297_vm0, %v34_v28  ;;  %6077 = vmatprep.mubr.msk.f32.mxu1 %vm297_vm0, %v154_v29  ;;  %v183_v27 = vld [vmem:[%s13779_s1 + $0x530] sm:$0xff]  ;;  %v66_v28 = vld [vmem:[%s13779_s1 + $0x188] sm:$0xff] }
  0x4a   :  { %v186_v29 = vld [vmem:[%s13779_s1 + $0x548] sm:$0xff] }
  0x4c   :  { %771 = vmatmul.mubr.f32.gmra.mrb[16].mxu0 %v33_v30  ;;  %1131 = vmatmul.mubr.f32.gmra.mrb[16].mxu1 %v153_v31  ;;  %v65_v30 = vld [vmem:[%s13779_s1 + $0x180] sm:$0xff] }
  0x4d   :  { %6018 = vmatprep.mubr.msk.f32.mxu0 %vm297_vm0, %v36_v32  ;;  %6078 = vmatprep.mubr.msk.f32.mxu1 %vm297_vm0, %v156_v33  ;;  %v185_v31 = vld [vmem:[%s13779_s1 + $0x540] sm:$0xff]  ;;  %v68_v32 = vld [vmem:[%s13779_s1 + $0x198] sm:$0xff] }
  0x4e   :  { %v188_v33 = vld [vmem:[%s13779_s1 + $0x558] sm:$0xff] }
  0x50   :  { %777 = vmatmul.mubr.f32.gmra.mrb[18].mxu0 %v35_v34  ;;  %1137 = vmatmul.mubr.f32.gmra.mrb[18].mxu1 %v155_v35  ;;  %v67_v34 = vld [vmem:[%s13779_s1 + $0x190] sm:$0xff] }
  0x51   :  { %6019 = vmatprep.mubr.msk.f32.mxu0 %vm297_vm0, %v38_v36  ;;  %6079 = vmatprep.mubr.msk.f32.mxu1 %vm297_vm0, %v158_v37  ;;  %v187_v35 = vld [vmem:[%s13779_s1 + $0x550] sm:$0xff]  ;;  %v70_v36 = vld [vmem:[%s13779_s1 + $0x1a8] sm:$0xff] }
  0x52   :  { %v190_v37 = vld [vmem:[%s13779_s1 + $0x568] sm:$0xff] }
  0x54   :  { %783 = vmatmul.mubr.f32.gmra.mrb[20].mxu0 %v37_v38  ;;  %1143 = vmatmul.mubr.f32.gmra.mrb[20].mxu1 %v157_v39  ;;  %v69_v38 = vld [vmem:[%s13779_s1 + $0x1a0] sm:$0xff] }
  0x55   :  { %6020 = vmatprep.mubr.msk.f32.mxu0 %vm297_vm0, %v40_v40  ;;  %6080 = vmatprep.mubr.msk.f32.mxu1 %vm297_vm0, %v160_v41  ;;  %v189_v39 = vld [vmem:[%s13779_s1 + $0x560] sm:$0xff]  ;;  %v72_v40 = vld [vmem:[%s13779_s1 + $0x1b8] sm:$0xff] }
  0x56   :  { %v192_v41 = vld [vmem:[%s13779_s1 + $0x578] sm:$0xff] }
  0x58   :  { %789 = vmatmul.mubr.f32.gmra.mrb[22].mxu0 %v39_v42  ;;  %1149 = vmatmul.mubr.f32.gmra.mrb[22].mxu1 %v159_v43  ;;  %v71_v42 = vld [vmem:[%s13779_s1 + $0x1b0] sm:$0xff] }
  0x59   :  { %6021 = vmatprep.mubr.msk.f32.mxu0 %vm297_vm0, %v42_v44  ;;  %6081 = vmatprep.mubr.msk.f32.mxu1 %vm297_vm0, %v162_v45  ;;  %v191_v43 = vld [vmem:[%s13779_s1 + $0x570] sm:$0xff]  ;;  %v74_v44 = vld [vmem:[%s13779_s1 + $0x1c8] sm:$0xff] }
  0x5a   :  { %v194_v45 = vld [vmem:[%s13779_s1 + $0x588] sm:$0xff] }
  0x5c   :  { %795 = vmatmul.mubr.f32.gmra.mrb[24].mxu0 %v41_v46  ;;  %1155 = vmatmul.mubr.f32.gmra.mrb[24].mxu1 %v161_v47  ;;  %v73_v46 = vld [vmem:[%s13779_s1 + $0x1c0] sm:$0xff] }
  0x5d   :  { %6022 = vmatprep.mubr.msk.f32.mxu0 %vm297_vm0, %v44_v48  ;;  %6082 = vmatprep.mubr.msk.f32.mxu1 %vm297_vm0, %v164_v49  ;;  %v193_v47 = vld [vmem:[%s13779_s1 + $0x580] sm:$0xff]  ;;  %v76_v48 = vld [vmem:[%s13779_s1 + $0x1d8] sm:$0xff] }
  0x5e   :  { %v196_v49 = vld [vmem:[%s13779_s1 + $0x598] sm:$0xff] }
  0x60   :  { %801 = vmatmul.mubr.f32.gmra.mrb[26].mxu0 %v43_v50  ;;  %1161 = vmatmul.mubr.f32.gmra.mrb[26].mxu1 %v163_v51  ;;  %v75_v50 = vld [vmem:[%s13779_s1 + $0x1d0] sm:$0xff] }
  0x61   :  { %6023 = vmatprep.mubr.msk.f32.mxu0 %vm297_vm0, %v46_v52  ;;  %6083 = vmatprep.mubr.msk.f32.mxu1 %vm297_vm0, %v166_v53  ;;  %v195_v51 = vld [vmem:[%s13779_s1 + $0x590] sm:$0xff]  ;;  %v78_v52 = vld [vmem:[%s13779_s1 + $0x1e8] sm:$0xff] }
  0x62   :  { %v198_v53 = vld [vmem:[%s13779_s1 + $0x5a8] sm:$0xff] }
  0x64   :  { %807 = vmatmul.mubr.f32.gmra.mrb[28].mxu0 %v45_v54  ;;  %1167 = vmatmul.mubr.f32.gmra.mrb[28].mxu1 %v165_v55  ;;  %v77_v54 = vld [vmem:[%s13779_s1 + $0x1e0] sm:$0xff] }
  0x65   :  { %6024 = vmatprep.mubr.msk.f32.mxu0 %vm297_vm0, %v48_v56  ;;  %6084 = vmatprep.mubr.msk.f32.mxu1 %vm297_vm0, %v168_v57  ;;  %v197_v55 = vld [vmem:[%s13779_s1 + $0x5a0] sm:$0xff]  ;;  %v80_v56 = vld [vmem:[%s13779_s1 + $0x1f8] sm:$0xff] }
  0x66   :  { %v200_v57 = vld [vmem:[%s13779_s1 + $0x5b8] sm:$0xff] }
  0x68   :  { %813 = vmatmul.mubr.f32.gmra.mrb[30].mxu0 %v47_v58  ;;  %1173 = vmatmul.mubr.f32.gmra.mrb[30].mxu1 %v167_v59  ;;  %v79_v58 = vld [vmem:[%s13779_s1 + $0x1f0] sm:$0xff] }
  0x69   :  { %6025 = vmatprep.mubr.msk.f32.mxu0 %vm297_vm0, %v50_v60  ;;  %6085 = vmatprep.mubr.msk.f32.mxu1 %vm297_vm0, %v170_v61  ;;  %v199_v59 = vld [vmem:[%s13779_s1 + $0x5b0] sm:$0xff]  ;;  %v82_v60 = vld [vmem:[%s13779_s1 + $0x208] sm:$0xff]  ;;  %v81_v61 = vld [vmem:[%s13779_s1 + $0x200] sm:$0xff] }
  0x6c   :  { %819 = vmatmul.mubr.f32.gmra.mrb[32].mxu0 %v49_v62  ;;  %1179 = vmatmul.mubr.f32.gmra.mrb[32].mxu1 %v169_v63  ;;  %v84_v62 = vld [vmem:[%s13779_s1 + $0x218] sm:$0xff]  ;;  %v202_v63 = vld [vmem:[%s13779_s1 + $0x5c8] sm:$0xff] }
  0x6d   :  { %6026 = vmatprep.mubr.msk.f32.mxu0 %vm297_vm0, %v52_v0  ;;  %6086 = vmatprep.mubr.msk.f32.mxu1 %vm297_vm0, %v172_v1  ;;  %v83_v0 = vld [vmem:[%s13779_s1 + $0x210] sm:$0xff]  ;;  %v201_v1 = vld [vmem:[%s13779_s1 + $0x5c0] sm:$0xff] }
  0x70   :  { %825 = vmatmul.mubr.f32.gmra.mrb[34].mxu0 %v51_v2  ;;  %1185 = vmatmul.mubr.f32.gmra.mrb[34].mxu1 %v171_v3  ;;  %v204_v2 = vld [vmem:[%s13779_s1 + $0x5d8] sm:$0xff]  ;;  %v203_v3 = vld [vmem:[%s13779_s1 + $0x5d0] sm:$0xff] }
  0x71   :  { %6027 = vmatprep.mubr.msk.f32.mxu0 %vm297_vm0, %v54_v4  ;;  %6087 = vmatprep.mubr.msk.f32.mxu1 %vm297_vm0, %v174_v5  ;;  %v86_v4 = vld [vmem:[%s13779_s1 + $0x228] sm:$0xff]  ;;  %v85_v5 = vld [vmem:[%s13779_s1 + $0x220] sm:$0xff] }
  0x74   :  { %831 = vmatmul.mubr.f32.gmra.mrb[36].mxu0 %v53_v6  ;;  %1191 = vmatmul.mubr.f32.gmra.mrb[36].mxu1 %v173_v7  ;;  %v88_v6 = vld [vmem:[%s13779_s1 + $0x238] sm:$0xff]  ;;  %v206_v7 = vld [vmem:[%s13779_s1 + $0x5e8] sm:$0xff] }
  0x75   :  { %6028 = vmatprep.mubr.msk.f32.mxu0 %vm297_vm0, %v56_v8  ;;  %6088 = vmatprep.mubr.msk.f32.mxu1 %vm297_vm0, %v176_v9  ;;  %v87_v8 = vld [vmem:[%s13779_s1 + $0x230] sm:$0xff]  ;;  %v205_v9 = vld [vmem:[%s13779_s1 + $0x5e0] sm:$0xff] }
  0x78   :  { %837 = vmatmul.mubr.f32.gmra.mrb[38].mxu0 %v55_v10  ;;  %1197 = vmatmul.mubr.f32.gmra.mrb[38].mxu1 %v175_v11  ;;  %v208_v10 = vld [vmem:[%s13779_s1 + $0x5f8] sm:$0xff]  ;;  %v207_v11 = vld [vmem:[%s13779_s1 + $0x5f0] sm:$0xff] }
  0x79   :  { %6029 = vmatprep.mubr.msk.f32.mxu0 %vm297_vm0, %v58_v12  ;;  %6089 = vmatprep.mubr.msk.f32.mxu1 %vm297_vm0, %v178_v13  ;;  %v90_v12 = vld [vmem:[%s13779_s1 + $0x248] sm:$0xff]  ;;  %v89_v13 = vld [vmem:[%s13779_s1 + $0x240] sm:$0xff] }
  0x7c   :  { %843 = vmatmul.mubr.f32.gmra.mrb[40].mxu0 %v57_v14  ;;  %1203 = vmatmul.mubr.f32.gmra.mrb[40].mxu1 %v177_v15  ;;  %v92_v14 = vld [vmem:[%s13779_s1 + $0x258] sm:$0xff]  ;;  %v210_v15 = vld [vmem:[%s13779_s1 + $0x608] sm:$0xff] }
  0x7d   :  { %6030 = vmatprep.mubr.msk.f32.mxu0 %vm297_vm0, %v60_v16  ;;  %6090 = vmatprep.mubr.msk.f32.mxu1 %vm297_vm0, %v180_v17  ;;  %v91_v16 = vld [vmem:[%s13779_s1 + $0x250] sm:$0xff]  ;;  %v209_v17 = vld [vmem:[%s13779_s1 + $0x600] sm:$0xff] }
  0x80   :  { %849 = vmatmul.mubr.f32.gmra.mrb[42].mxu0 %v59_v18  ;;  %1209 = vmatmul.mubr.f32.gmra.mrb[42].mxu1 %v179_v19  ;;  %v212_v18 = vld [vmem:[%s13779_s1 + $0x618] sm:$0xff]  ;;  %v211_v19 = vld [vmem:[%s13779_s1 + $0x610] sm:$0xff] }
  0x81   :  { %6031 = vmatprep.mubr.msk.f32.mxu0 %vm297_vm0, %v62_v20  ;;  %6091 = vmatprep.mubr.msk.f32.mxu1 %vm297_vm0, %v182_v21  ;;  %v94_v20 = vld [vmem:[%s13779_s1 + $0x268] sm:$0xff]  ;;  %v93_v21 = vld [vmem:[%s13779_s1 + $0x260] sm:$0xff] }
  0x84   :  { %855 = vmatmul.mubr.f32.gmra.mrb[44].mxu0 %v61_v22  ;;  %1215 = vmatmul.mubr.f32.gmra.mrb[44].mxu1 %v181_v23  ;;  %v96_v22 = vld [vmem:[%s13779_s1 + $0x278] sm:$0xff]  ;;  %v214_v23 = vld [vmem:[%s13779_s1 + $0x628] sm:$0xff] }
  0x85   :  { %6032 = vmatprep.mubr.msk.f32.mxu0 %vm297_vm0, %v64_v24  ;;  %6092 = vmatprep.mubr.msk.f32.mxu1 %vm297_vm0, %v184_v25  ;;  %v95_v24 = vld [vmem:[%s13779_s1 + $0x270] sm:$0xff]  ;;  %v213_v25 = vld [vmem:[%s13779_s1 + $0x620] sm:$0xff] }
  0x88   :  { %861 = vmatmul.mubr.f32.gmra.mrb[46].mxu0 %v63_v26  ;;  %1221 = vmatmul.mubr.f32.gmra.mrb[46].mxu1 %v183_v27  ;;  %v216_v26 = vld [vmem:[%s13779_s1 + $0x638] sm:$0xff]  ;;  %v215_v27 = vld [vmem:[%s13779_s1 + $0x630] sm:$0xff] }
  0x89   :  { %6033 = vmatprep.mubr.msk.f32.mxu0 %vm297_vm0, %v66_v28  ;;  %6093 = vmatprep.mubr.msk.f32.mxu1 %vm297_vm0, %v186_v29  ;;  %v98_v28 = vld [vmem:[%s13779_s1 + $0x288] sm:$0xff]  ;;  %v97_v29 = vld [vmem:[%s13779_s1 + $0x280] sm:$0xff] }
  0x8c   :  { %867 = vmatmul.mubr.f32.gmra.mrb[48].mxu0 %v65_v30  ;;  %1227 = vmatmul.mubr.f32.gmra.mrb[48].mxu1 %v185_v31  ;;  %v100_v30 = vld [vmem:[%s13779_s1 + $0x298] sm:$0xff]  ;;  %v218_v31 = vld [vmem:[%s13779_s1 + $0x648] sm:$0xff] }
  0x8d   :  { %6034 = vmatprep.mubr.msk.f32.mxu0 %vm297_vm0, %v68_v32  ;;  %6094 = vmatprep.mubr.msk.f32.mxu1 %vm297_vm0, %v188_v33  ;;  %v99_v32 = vld [vmem:[%s13779_s1 + $0x290] sm:$0xff]  ;;  %v217_v33 = vld [vmem:[%s13779_s1 + $0x640] sm:$0xff] }
  0x90   :  { %873 = vmatmul.mubr.f32.gmra.mrb[50].mxu0 %v67_v34  ;;  %1233 = vmatmul.mubr.f32.gmra.mrb[50].mxu1 %v187_v35  ;;  %v220_v34 = vld [vmem:[%s13779_s1 + $0x658] sm:$0xff]  ;;  %v219_v35 = vld [vmem:[%s13779_s1 + $0x650] sm:$0xff] }
  0x91   :  { %6035 = vmatprep.mubr.msk.f32.mxu0 %vm297_vm0, %v70_v36  ;;  %6095 = vmatprep.mubr.msk.f32.mxu1 %vm297_vm0, %v190_v37  ;;  %v102_v36 = vld [vmem:[%s13779_s1 + $0x2a8] sm:$0xff]  ;;  %v101_v37 = vld [vmem:[%s13779_s1 + $0x2a0] sm:$0xff] }
  0x94   :  { %879 = vmatmul.mubr.f32.gmra.mrb[52].mxu0 %v69_v38  ;;  %1239 = vmatmul.mubr.f32.gmra.mrb[52].mxu1 %v189_v39  ;;  %v104_v38 = vld [vmem:[%s13779_s1 + $0x2b8] sm:$0xff]  ;;  %v222_v39 = vld [vmem:[%s13779_s1 + $0x668] sm:$0xff] }
  0x95   :  { %6036 = vmatprep.mubr.msk.f32.mxu0 %vm297_vm0, %v72_v40  ;;  %6096 = vmatprep.mubr.msk.f32.mxu1 %vm297_vm0, %v192_v41  ;;  %v103_v40 = vld [vmem:[%s13779_s1 + $0x2b0] sm:$0xff]  ;;  %v221_v41 = vld [vmem:[%s13779_s1 + $0x660] sm:$0xff] }
  0x98   :  { %885 = vmatmul.mubr.f32.gmra.mrb[54].mxu0 %v71_v42  ;;  %1245 = vmatmul.mubr.f32.gmra.mrb[54].mxu1 %v191_v43 }
  0x99   :  { %6037 = vmatprep.mubr.msk.f32.mxu0 %vm297_vm0, %v74_v44  ;;  %6097 = vmatprep.mubr.msk.f32.mxu1 %vm297_vm0, %v194_v45 }
  0x9c   :  { %891 = vmatmul.mubr.f32.gmra.mrb[56].mxu0 %v73_v46  ;;  %1251 = vmatmul.mubr.f32.gmra.mrb[56].mxu1 %v193_v47  ;;  %v224_v47 = vld [vmem:[%s13779_s1 + $0x678] sm:$0xff] }
  0x9d   :  { %6038 = vmatprep.mubr.msk.f32.mxu0 %vm297_vm0, %v76_v48  ;;  %6098 = vmatprep.mubr.msk.f32.mxu1 %vm297_vm0, %v196_v49  ;;  %v223_v48 = vld [vmem:[%s13779_s1 + $0x670] sm:$0xff] }
  0xa0   :  { %897 = vmatmul.mubr.f32.gmra.mrb[58].mxu0 %v75_v50  ;;  %1257 = vmatmul.mubr.f32.gmra.mrb[58].mxu1 %v195_v51 }
  0xa1   :  { %6039 = vmatprep.mubr.msk.f32.mxu0 %vm297_vm0, %v78_v52  ;;  %6099 = vmatprep.mubr.msk.f32.mxu1 %vm297_vm0, %v198_v53 }
  0xa4   :  { %903 = vmatmul.mubr.f32.gmra.mrb[60].mxu0 %v77_v54  ;;  %1263 = vmatmul.mubr.f32.gmra.mrb[60].mxu1 %v197_v55 }
  0xa5   :  { %6040 = vmatprep.mubr.msk.f32.mxu0 %vm297_vm0, %v80_v56  ;;  %6100 = vmatprep.mubr.msk.f32.mxu1 %vm297_vm0, %v200_v57 }
  0xa8   :  { %909 = vmatmul.mubr.f32.gmra.mrb[62].mxu0 %v79_v58  ;;  %1269 = vmatmul.mubr.f32.gmra.mrb[62].mxu1 %v199_v59 }
  0xa9   :  { %6041 = vmatprep.mubr.msk.f32.mxu0 %vm297_vm0, %v82_v60  ;;  %6101 = vmatprep.mubr.msk.f32.mxu1 %vm297_vm0, %v202_v63 }
  0xac   :  { %915 = vmatmul.mubr.f32.gmra.mrb[64].mxu0 %v81_v61  ;;  %1275 = vmatmul.mubr.f32.gmra.mrb[64].mxu1 %v201_v1 }
  0xad   :  { %6042 = vmatprep.mubr.msk.f32.mxu0 %vm297_vm0, %v84_v62  ;;  %6102 = vmatprep.mubr.msk.f32.mxu1 %vm297_vm0, %v204_v2 }
  0xb0   :  { %921 = vmatmul.mubr.f32.gmra.mrb[66].mxu0 %v83_v0  ;;  %1281 = vmatmul.mubr.f32.gmra.mrb[66].mxu1 %v203_v3 }
  0xb1   :  { %6043 = vmatprep.mubr.msk.f32.mxu0 %vm297_vm0, %v86_v4  ;;  %6103 = vmatprep.mubr.msk.f32.mxu1 %vm297_vm0, %v206_v7 }
  0xb4   :  { %927 = vmatmul.mubr.f32.gmra.mrb[68].mxu0 %v85_v5  ;;  %1287 = vmatmul.mubr.f32.gmra.mrb[68].mxu1 %v205_v9 }
  0xb5   :  { %6044 = vmatprep.mubr.msk.f32.mxu0 %vm297_vm0, %v88_v6  ;;  %6104 = vmatprep.mubr.msk.f32.mxu1 %vm297_vm0, %v208_v10 }
  0xb8   :  { %933 = vmatmul.mubr.f32.gmra.mrb[70].mxu0 %v87_v8  ;;  %1293 = vmatmul.mubr.f32.gmra.mrb[70].mxu1 %v207_v11 }
  0xb9   :  { %6045 = vmatprep.mubr.msk.f32.mxu0 %vm297_vm0, %v90_v12  ;;  %6105 = vmatprep.mubr.msk.f32.mxu1 %vm297_vm0, %v210_v15 }
  0xbc   :  { %939 = vmatmul.mubr.f32.gmra.mrb[72].mxu0 %v89_v13  ;;  %1299 = vmatmul.mubr.f32.gmra.mrb[72].mxu1 %v209_v17  ;;  %v106_v17 = vld [vmem:[%s13779_s1 + $0x2c8] sm:$0xff] }
  0xbd   :  { %6046 = vmatprep.mubr.msk.f32.mxu0 %vm297_vm0, %v92_v14  ;;  %6106 = vmatprep.mubr.msk.f32.mxu1 %vm297_vm0, %v212_v18  ;;  %v105_v18 = vld [vmem:[%s13779_s1 + $0x2c0] sm:$0xff] }
  0xc0   :  { %945 = vmatmul.mubr.f32.gmra.mrb[74].mxu0 %v91_v16  ;;  %1305 = vmatmul.mubr.f32.gmra.mrb[74].mxu1 %v211_v19 }
  0xc1   :  { %6047 = vmatprep.mubr.msk.f32.mxu0 %vm297_vm0, %v94_v20  ;;  %6107 = vmatprep.mubr.msk.f32.mxu1 %vm297_vm0, %v214_v23 }
  0xc4   :  { %951 = vmatmul.mubr.f32.gmra.mrb[76].mxu0 %v93_v21  ;;  %1311 = vmatmul.mubr.f32.gmra.mrb[76].mxu1 %v213_v25 }
  0xc5   :  { %6048 = vmatprep.mubr.msk.f32.mxu0 %vm297_vm0, %v96_v22  ;;  %6108 = vmatprep.mubr.msk.f32.mxu1 %vm297_vm0, %v216_v26 }
  0xc8   :  { %957 = vmatmul.mubr.f32.gmra.mrb[78].mxu0 %v95_v24  ;;  %1317 = vmatmul.mubr.f32.gmra.mrb[78].mxu1 %v215_v27 }
  0xc9   :  { %6049 = vmatprep.mubr.msk.f32.mxu0 %vm297_vm0, %v98_v28  ;;  %6109 = vmatprep.mubr.msk.f32.mxu1 %vm297_vm0, %v218_v31 }
  0xcc   :  { %963 = vmatmul.mubr.f32.gmra.mrb[80].mxu0 %v97_v29  ;;  %1323 = vmatmul.mubr.f32.gmra.mrb[80].mxu1 %v217_v33 }
  0xcd   :  { %6050 = vmatprep.mubr.msk.f32.mxu0 %vm297_vm0, %v100_v30  ;;  %6110 = vmatprep.mubr.msk.f32.mxu1 %vm297_vm0, %v220_v34 }
  0xd0   :  { %969 = vmatmul.mubr.f32.gmra.mrb[82].mxu0 %v99_v32  ;;  %1329 = vmatmul.mubr.f32.gmra.mrb[82].mxu1 %v219_v35  ;;  %v108_v35 = vld [vmem:[%s13779_s1 + $0x2d8] sm:$0xff] }
  0xd1   :  { %6051 = vmatprep.mubr.msk.f32.mxu0 %vm297_vm0, %v102_v36  ;;  %6111 = vmatprep.mubr.msk.f32.mxu1 %vm297_vm0, %v222_v39  ;;  %v226_v36 = vld [vmem:[%s13779_s1 + $0x688] sm:$0xff] }
  0xd4   :  { %975 = vmatmul.mubr.f32.gmra.mrb[84].mxu0 %v101_v37  ;;  %1335 = vmatmul.mubr.f32.gmra.mrb[84].mxu1 %v221_v41  ;;  %v107_v37 = vld [vmem:[%s13779_s1 + $0x2d0] sm:$0xff] }
  0xd5   :  { %6052 = vmatprep.mubr.msk.f32.mxu0 %vm297_vm0, %v104_v38  ;;  %6112 = vmatprep.mubr.msk.f32.mxu1 %vm297_vm0, %v224_v47 }
  0xd8   :  { %981 = vmatmul.mubr.f32.gmra.mrb[86].mxu0 %v103_v40  ;;  %1341 = vmatmul.mubr.f32.gmra.mrb[86].mxu1 %v223_v48 }
  0xd9   :  { %6053 = vmatprep.mubr.msk.f32.mxu0 %vm297_vm0, %v106_v17  ;;  %6113 = vmatprep.mubr.msk.f32.mxu1 %vm297_vm0, %v226_v36 }
  0xdc   :  { %987 = vmatmul.mubr.f32.gmra.mrb[88].mxu0 %v105_v18 }
  0xdd   :  { %6054 = vmatprep.mubr.msk.f32.mxu0 %vm297_vm0, %v108_v35 }
  0xe0   :  { %993 = vmatmul.mubr.f32.gmra.mrb[90].mxu0 %v107_v37 }
  0xff   :  { %v7187_v42 = vpop.f32.mrb[0].mxu0  ;;  %v7189_v43 = vpop.f32.mrb[0].mxu1 }
 0x100   :  { %14412 = vst [vmem:[#allocation2_spill] sm:$0xff] %v7187_v42  ;;  %14413 = vst [vmem:[#allocation3_spill] sm:$0xff] %v7189_v43  ;;  %v7191_v44 = vpop.f32.mrb[1].mxu0  ;;  %v7193_v45 = vpop.f32.mrb[1].mxu1  ;;  %v1924_v46 = vmul.f32 %v7187_v42, %v7187_v42  ;;  %v2044_v55 = vmul.f32 %v7189_v43, %v7189_v43 }
 0x101   :  { %14414 = vst [vmem:[#allocation4_spill] sm:$0xff] %v7191_v44  ;;  %14415 = vst [vmem:[#allocation5_spill] sm:$0xff] %v7193_v45  ;;  %v1925_v49 = vmul.f32 %v7191_v44, %v7191_v44  ;;  %v2045_v50 = vmul.f32 %v7193_v45, %v7193_v45  ;;  %v1444_v51 = vsel %vm1443_vm1, %v7191_v44, 0.0  ;;  %v1684_v52 = vsel %vm1443_vm1, %v7193_v45, 0.0  ;;  %v113_v45 = vld [vmem:[%s13779_s1 + $0x300] sm:$0xff] }
 0x102   :  { %v1445_v53 = vadd.f32 %v1444_v51, %v7187_v42  ;;  %v1685_v54 = vadd.f32 %v1684_v52, %v7189_v43 }
 0x103   :  { %v7216_v56 = vpop.f32.mrb[2].mxu0  ;;  %v7218_v57 = vpop.f32.mrb[2].mxu1  ;;  %v2164_v58 = vsel %vm1443_vm1, %v1925_v49, 0.0  ;;  %v2404_v59 = vsel %vm1443_vm1, %v2045_v50, 0.0 }
 0x104   :  { %14416 = vst [vmem:[#allocation6_spill] sm:$0xff] %v7216_v56  ;;  %14417 = vst [vmem:[#allocation7_spill] sm:$0xff] %v7218_v57  ;;  %v7222_v60 = vpop.f32.mrb[3].mxu1  ;;  %1446 = vadd.xlane.f32.xlu0 %v1445_v53  ;;  %v7224_v61 = vpop.f32.mrb[3].mxu0  ;;  %v2165_v62 = vadd.f32 %v2164_v58, %v1924_v46  ;;  %v1926_v63 = vmul.f32 %v7216_v56, %v7216_v56  ;;  %v2405_v0 = vadd.f32 %v2404_v59, %v2044_v55  ;;  %v225_v46 = vld [vmem:[%s13779_s1 + $0x680] sm:$0xff] }
 0x105   :  { %14418 = vst [vmem:[#allocation8_spill] sm:$0xff] %v7222_v60  ;;  %14419 = vst [vmem:[#allocation9_spill] sm:$0xff] %v7224_v61  ;;  %v2047_v1 = vmul.f32 %v7222_v60, %v7222_v60  ;;  %v1927_v2 = vmul.f32 %v7224_v61, %v7224_v61  ;;  %v1688_v3 = vsel %vm1443_vm1, %v7222_v60, 0.0  ;;  %v1448_v4 = vsel %vm1443_vm1, %v7224_v61, 0.0  ;;  %1347 = vmatmul.mubr.f32.gmra.mrb[88].mxu1 %v225_v46 }
 0x106   :  { %v1689_v5 = vadd.f32 %v1688_v3, %v7218_v57  ;;  %v2046_v6 = vmul.f32 %v7218_v57, %v7218_v57  ;;  %v7240_v7 = vadd.f32 %v1448_v4, %v7216_v56  ;;  %v227_v4 = vld [vmem:[%s13779_s1 + $0x690] sm:$0xff] }
 0x107   :  { %v2168_v8 = vsel %vm1443_vm1, %v1927_v2, 0.0  ;;  %v7243_v9 = vpop.f32.mrb[4].mxu0  ;;  %v2408_v10 = vsel %vm1443_vm1, %v2047_v1, 0.0  ;;  %v7246_v11 = vpop.f32.mrb[4].mxu1 }
 0x108   :  { %14420 = vst [vmem:[#allocation10_spill] sm:$0xff] %v7243_v9  ;;  %14421 = vst [vmem:[#allocation11_spill] sm:$0xff] %v7246_v11  ;;  %1690 = vadd.xlane.f32.xlu1 %v1689_v5  ;;  %1686 = vadd.xlane.f32.xlu0 %v1685_v54  ;;  %v2169_v12 = vadd.f32 %v2168_v8, %v1926_v63  ;;  %v7248_v13 = vpop.f32.mrb[5].mxu0  ;;  %v2409_v14 = vadd.f32 %v2408_v10, %v2046_v6  ;;  %v7250_v15 = vpop.f32.mrb[5].mxu1  ;;  %v228_v63 = vld [vmem:[%s13779_s1 + $0x698] sm:$0xff] }
 0x109   :  { %14422 = vst [vmem:[#allocation12_spill] sm:$0xff] %v7248_v13  ;;  %14423 = vst [vmem:[#allocation13_spill] sm:$0xff] %v7250_v15  ;;  %v1928_v16 = vmul.f32 %v7243_v9, %v7243_v9  ;;  %v1929_v19 = vmul.f32 %v7248_v13, %v7248_v13  ;;  %v2049_v20 = vmul.f32 %v7250_v15, %v7250_v15  ;;  %v1452_v21 = vsel %vm1443_vm1, %v7248_v13, 0.0 }
 0x10a   :  { %v1692_v22 = vsel %vm1443_vm1, %v7250_v15, 0.0  ;;  %v1453_v23 = vadd.f32 %v1452_v21, %v7243_v9  ;;  %v2048_v25 = vmul.f32 %v7246_v11, %v7246_v11  ;;  %6114 = vmatprep.mubr.msk.f32.mxu1 %vm297_vm0, %v228_v63  ;;  %v109_v63 = vld [vmem:[%s13779_s1 + $0x2e0] sm:$0xff] }
 0x10b   :  { %v7271_v24 = vadd.f32 %v1692_v22, %v7246_v11  ;;  %v7275_v26 = vpop.f32.mrb[6].mxu0  ;;  %v7277_v27 = vpop.f32.mrb[6].mxu1  ;;  %v2172_v28 = vsel %vm1443_vm1, %v1929_v19, 0.0  ;;  %v2412_v29 = vsel %vm1443_vm1, %v2049_v20, 0.0  ;;  %1353 = vmatmul.mubr.f32.gmra.mrb[90].mxu1 %v227_v4 }
 0x10c   :  { %14424 = vst [vmem:[#allocation14_spill] sm:$0xff] %v7275_v26  ;;  %14425 = vst [vmem:[#allocation15_spill] sm:$0xff] %v7277_v27  ;;  %2166 = vadd.xlane.f32.xlu0 %v2165_v62  ;;  %2170 = vadd.xlane.f32.xlu1 %v2169_v12  ;;  %v7281_v30 = vpop.f32.mrb[7].mxu0  ;;  %v7283_v31 = vpop.f32.mrb[7].mxu1  ;;  %v7285_v32 = vadd.f32 %v2172_v28, %v1928_v16  ;;  %v7287_v33 = vadd.f32 %v2412_v29, %v2048_v25 }
 0x10d   :  { %14426 = vst [vmem:[#allocation16_spill] sm:$0xff] %v7281_v30  ;;  %14427 = vst [vmem:[#allocation17_spill] sm:$0xff] %v7283_v31  ;;  %v1930_v34 = vmul.f32 %v7275_v26, %v7275_v26  ;;  %v1931_v38 = vmul.f32 %v7281_v30, %v7281_v30  ;;  %v2051_v39 = vmul.f32 %v7283_v31, %v7283_v31  ;;  %v1456_v40 = vsel %vm1443_vm1, %v7281_v30, 0.0 }
 0x10e   :  { %v1696_v41 = vsel %vm1443_vm1, %v7283_v31, 0.0  ;;  %v1457_v47 = vadd.f32 %v1456_v40, %v7275_v26  ;;  %v2050_v49 = vmul.f32 %v7277_v27, %v7277_v27 }
 0x10f   :  { %v7315_v48 = vadd.f32 %v1696_v41, %v7277_v27  ;;  %v7319_v50 = vpop.f32.mrb[8].mxu0  ;;  %v2176_v51 = vsel %vm1443_vm1, %v1931_v38, 0.0  ;;  %v7322_v52 = vpop.f32.mrb[8].mxu1  ;;  %v2416_v53 = vsel %vm1443_vm1, %v2051_v39, 0.0 }
 0x110   :  { %14428 = vst [vmem:[#allocation18_spill] sm:$0xff] %v7319_v50  ;;  %14429 = vst [vmem:[#allocation19_spill] sm:$0xff] %v7322_v52  ;;  %2406 = vadd.xlane.f32.xlu0 %v2405_v0  ;;  %2410 = vadd.xlane.f32.xlu1 %v2409_v14  ;;  %v7325_v54 = vpop.f32.mrb[9].mxu0  ;;  %v7327_v55 = vadd.f32 %v2176_v51, %v1930_v34  ;;  %v7329_v58 = vpop.f32.mrb[9].mxu1  ;;  %v7331_v59 = vadd.f32 %v2416_v53, %v2050_v49  ;;  %v110_v51 = vld [vmem:[%s13779_s1 + $0x2e8] sm:$0xff] }
 0x111   :  { %14430 = vst [vmem:[#allocation20_spill] sm:$0xff] %v7325_v54  ;;  %14431 = vst [vmem:[#allocation21_spill] sm:$0xff] %v7329_v58  ;;  %v1932_v62 = vmul.f32 %v7319_v50, %v7319_v50  ;;  %v1933_v1 = vmul.f32 %v7325_v54, %v7325_v54  ;;  %v2053_v0 = vmul.f32 %v7329_v58, %v7329_v58  ;;  %v1460_v2 = vsel %vm1443_vm1, %v7325_v54, 0.0 }
 0x112   :  { %v1700_v3 = vsel %vm1443_vm1, %v7329_v58, 0.0  ;;  %v7351_v5 = vadd.f32 %v1460_v2, %v7319_v50  ;;  %v2052_v8 = vmul.f32 %v7322_v52, %v7322_v52  ;;  %6055 = vmatprep.mubr.msk.f32.mxu0 %vm297_vm0, %v110_v51 }
 0x113   :  { %v7354_v6 = vadd.f32 %v1700_v3, %v7322_v52  ;;  %v7358_v10 = vpop.f32.mrb[10].mxu0  ;;  %v7360_v12 = vpop.f32.mrb[10].mxu1  ;;  %v2180_v14 = vsel %vm1443_vm1, %v1933_v1, 0.0  ;;  %v2420_v16 = vsel %vm1443_vm1, %v2053_v0, 0.0  ;;  %999 = vmatmul.mubr.f32.gmra.mrb[92].mxu0 %v109_v63 }
 0x114   :  { %14432 = vst [vmem:[#allocation22_spill] sm:$0xff] %v7358_v10  ;;  %14433 = vst [vmem:[#allocation23_spill] sm:$0xff] %v7360_v12  ;;  %1450 = vadd.xlane.f32.xlu0 %v7240_v7  ;;  %1454 = vadd.xlane.f32.xlu1 %v1453_v23  ;;  %v7365_v17 = vpop.f32.mrb[11].mxu0  ;;  %v7367_v18 = vpop.f32.mrb[11].mxu1  ;;  %v7369_v19 = vadd.f32 %v2180_v14, %v1932_v62  ;;  %v7371_v20 = vadd.f32 %v2420_v16, %v2052_v8 }
 0x115   :  { %14434 = vst [vmem:[#allocation24_spill] sm:$0xff] %v7365_v17  ;;  %14435 = vst [vmem:[#allocation25_spill] sm:$0xff] %v7367_v18  ;;  %v1934_v21 = vmul.f32 %v7358_v10, %v7358_v10  ;;  %v1935_v22 = vmul.f32 %v7365_v17, %v7365_v17  ;;  %v2055_v25 = vmul.f32 %v7367_v18, %v7367_v18  ;;  %v1464_v7 = vsel %vm1443_vm1, %v7365_v17, 0.0 }
 0x116   :  { %v1704_v23 = vsel %vm1443_vm1, %v7367_v18, 0.0  ;;  %v7384_v28 = vadd.f32 %v1464_v7, %v7358_v10  ;;  %v2054_v34 = vmul.f32 %v7360_v12, %v7360_v12 }
 0x117   :  { %v7387_v29 = vadd.f32 %v1704_v23, %v7360_v12  ;;  %v7391_v35 = vpop.f32.mrb[12].mxu0  ;;  %v2184_v36 = vsel %vm1443_vm1, %v1935_v22, 0.0  ;;  %v7394_v37 = vpop.f32.mrb[12].mxu1  ;;  %v2424_v38 = vsel %vm1443_vm1, %v2055_v25, 0.0  ;;  %v112_v23 = vld [vmem:[%s13779_s1 + $0x2f8] sm:$0xff]  ;;  %v233_v12 = vld [vmem:[%s13779_s1 + $0x6c0] sm:$0xff] }
 0x118   :  { %14436 = vst [vmem:[#allocation26_spill] sm:$0xff] %v7391_v35  ;;  %14437 = vst [vmem:[#allocation27_spill] sm:$0xff] %v7394_v37  ;;  %1694 = vadd.xlane.f32.xlu0 %v7271_v24  ;;  %1458 = vadd.xlane.f32.xlu1 %v1457_v47  ;;  %v7398_v39 = vpop.f32.mrb[13].mxu0  ;;  %v7400_v40 = vadd.f32 %v2184_v36, %v1934_v21  ;;  %v7402_v41 = vpop.f32.mrb[13].mxu1  ;;  %v7404_v46 = vadd.f32 %v2424_v38, %v2054_v34 }
 0x119   :  { %14438 = vst [vmem:[#allocation28_spill] sm:$0xff] %v7398_v39  ;;  %14439 = vst [vmem:[#allocation29_spill] sm:$0xff] %v7402_v41  ;;  %v1936_v49 = vmul.f32 %v7391_v35, %v7391_v35  ;;  %v1937_v53 = vmul.f32 %v7398_v39, %v7398_v39  ;;  %v2057_v24 = vmul.f32 %v7402_v41, %v7402_v41  ;;  %v1468_v47 = vsel %vm1443_vm1, %v7398_v39, 0.0 }
 0x11a   :  { %v1708_v62 = vsel %vm1443_vm1, %v7402_v41, 0.0  ;;  %v7424_v1 = vadd.f32 %v1468_v47, %v7391_v35  ;;  %v2056_v2 = vmul.f32 %v7394_v37, %v7394_v37  ;;  %6056 = vmatprep.mubr.msk.f32.mxu0 %vm297_vm0, %v112_v23  ;;  %v229_v47 = vld [vmem:[%s13779_s1 + $0x6a0] sm:$0xff] }
 0x11b   :  { %v7427_v0 = vadd.f32 %v1708_v62, %v7394_v37  ;;  %v7431_v3 = vpop.f32.mrb[14].mxu0  ;;  %v7433_v4 = vpop.f32.mrb[14].mxu1  ;;  %v2188_v8 = vsel %vm1443_vm1, %v1937_v53, 0.0  ;;  %v2428_v14 = vsel %vm1443_vm1, %v2057_v24, 0.0  ;;  %v111_v24 = vld [vmem:[%s13779_s1 + $0x2f0] sm:$0xff] }
 0x11c   :  { %14440 = vst [vmem:[#allocation30_spill] sm:$0xff] %v7431_v3  ;;  %14441 = vst [vmem:[#allocation31_spill] sm:$0xff] %v7433_v4  ;;  %2174 = vadd.xlane.f32.xlu0 %v7285_v32  ;;  %1698 = vadd.xlane.f32.xlu1 %v7315_v48  ;;  %v7439_v16 = vpop.f32.mrb[15].mxu0  ;;  %v7441_v21 = vpop.f32.mrb[15].mxu1  ;;  %v7443_v22 = vadd.f32 %v2188_v8, %v1936_v49  ;;  %v7445_v25 = vadd.f32 %v2428_v14, %v2056_v2  ;;  %v230_v32 = vld [vmem:[%s13779_s1 + $0x6a8] sm:$0xff] }
 0x11d   :  { %14442 = vst [vmem:[#allocation32_spill] sm:$0xff] %v7439_v16  ;;  %14443 = vst [vmem:[#allocation33_spill] sm:$0xff] %v7441_v21  ;;  %v1938_v7 = vmul.f32 %v7431_v3, %v7431_v3  ;;  %v1939_v48 = vmul.f32 %v7439_v16, %v7439_v16  ;;  %v2059_v34 = vmul.f32 %v7441_v21, %v7441_v21  ;;  %v1472_v36 = vsel %vm1443_vm1, %v7439_v16, 0.0 }
 0x11e   :  { %v1712_v38 = vsel %vm1443_vm1, %v7441_v21, 0.0  ;;  %6115 = vmatprep.mubr.msk.f32.mxu1 %vm297_vm0, %v230_v32  ;;  %v7466_v49 = vadd.f32 %v1472_v36, %v7431_v3  ;;  %v2058_v53 = vmul.f32 %v7433_v4, %v7433_v4  ;;  %1005 = vmatmul.mubr.f32.gmra.mrb[94].mxu0 %v111_v24 }
 0x11f   :  { %v7469_v51 = vadd.f32 %v1712_v38, %v7433_v4  ;;  %v7479_v62 = vpop.f32.mrb[16].mxu0  ;;  %v2192_v63 = vsel %vm1443_vm1, %v1939_v48, 0.0  ;;  %v7482_v2 = vpop.f32.mrb[16].mxu1  ;;  %v2432_v8 = vsel %vm1443_vm1, %v2059_v34, 0.0  ;;  %1359 = vmatmul.mubr.f32.gmra.mrb[92].mxu1 %v229_v47 }
 0x120   :  { %14444 = vst [vmem:[#allocation34_spill] sm:$0xff] %v7479_v62  ;;  %14445 = vst [vmem:[#allocation35_spill] sm:$0xff] %v7482_v2  ;;  %2414 = vadd.xlane.f32.xlu0 %v7287_v33  ;;  %2178 = vadd.xlane.f32.xlu1 %v7327_v55  ;;  %v7487_v14 = vpop.f32.mrb[17].mxu0  ;;  %v7489_v23 = vadd.f32 %v2192_v63, %v1938_v7  ;;  %v7491_v32 = vpop.f32.mrb[17].mxu1  ;;  %v7493_v36 = vadd.f32 %v2432_v8, %v2058_v53  ;;  %v232_v7 = vld [vmem:[%s13779_s1 + $0x6b8] sm:$0xff]  ;;  %v231_v63 = vld [vmem:[%s13779_s1 + $0x6b0] sm:$0xff] }
 0x121   :  { %14446 = vst [vmem:[#allocation36_spill] sm:$0xff] %v7487_v14  ;;  %14447 = vst [vmem:[#allocation37_spill] sm:$0xff] %v7491_v32  ;;  %v1940_v48 = vmul.f32 %v7479_v62, %v7479_v62  ;;  %v1941_v34 = vmul.f32 %v7487_v14, %v7487_v14  ;;  %v2061_v38 = vmul.f32 %v7491_v32, %v7491_v32  ;;  %v1476_v33 = vsel %vm1443_vm1, %v7487_v14, 0.0 }
 0x122   :  { %v1716_v55 = vsel %vm1443_vm1, %v7491_v32, 0.0  ;;  %v7509_v53 = vadd.f32 %v1476_v33, %v7479_v62  ;;  %v2060_v47 = vmul.f32 %v7482_v2, %v7482_v2  ;;  %6116 = vmatprep.mubr.msk.f32.mxu1 %vm297_vm0, %v232_v7 }
 0x123   :  { %v7512_v24 = vadd.f32 %v1716_v55, %v7482_v2  ;;  %v7520_v8 = vpop.f32.mrb[18].mxu0  ;;  %v7522_v32 = vpop.f32.mrb[18].mxu1  ;;  %v2196_v41 = vsel %vm1443_vm1, %v1941_v34, 0.0  ;;  %v2436_v33 = vsel %vm1443_vm1, %v2061_v38, 0.0  ;;  %1365 = vmatmul.mubr.f32.gmra.mrb[94].mxu1 %v231_v63 }
 0x124   :  { %14448 = vst [vmem:[#allocation38_spill] sm:$0xff] %v7520_v8  ;;  %14449 = vst [vmem:[#allocation39_spill] sm:$0xff] %v7522_v32  ;;  %2418 = vadd.xlane.f32.xlu1 %v7331_v59  ;;  %1462 = vadd.xlane.f32.xlu0 %v7351_v5  ;;  %v7528_v55 = vpop.f32.mrb[19].mxu0  ;;  %v7530_v7 = vpop.f32.mrb[19].mxu1  ;;  %v7532_v2 = vadd.f32 %v2196_v41, %v1940_v48  ;;  %v7534_v37 = vadd.f32 %v2436_v33, %v2060_v47 }
 0x125   :  { %14450 = vst [vmem:[#allocation40_spill] sm:$0xff] %v7528_v55  ;;  %14451 = vst [vmem:[#allocation41_spill] sm:$0xff] %v7530_v7  ;;  %v1942_v58 = vmul.f32 %v7520_v8, %v7520_v8  ;;  %v1943_v34 = vmul.f32 %v7528_v55, %v7528_v55  ;;  %v2063_v38 = vmul.f32 %v7530_v7, %v7530_v7  ;;  %v1480_v59 = vsel %vm1443_vm1, %v7528_v55, 0.0 }
 0x126   :  { %v1720_v5 = vsel %vm1443_vm1, %v7530_v7, 0.0  ;;  %v7547_v41 = vadd.f32 %v1480_v59, %v7520_v8  ;;  %v2062_v47 = vmul.f32 %v7522_v32, %v7522_v32 }
 0x127   :  { %v7550_v48 = vadd.f32 %v1720_v5, %v7522_v32  ;;  %v7554_v63 = vpop.f32.mrb[20].mxu0  ;;  %v2200_v33 = vsel %vm1443_vm1, %v1943_v34, 0.0  ;;  %v7557_v52 = vpop.f32.mrb[20].mxu1  ;;  %v2440_v15 = vsel %vm1443_vm1, %v2063_v38, 0.0 }
 0x128   :  { %14452 = vst [vmem:[#allocation42_spill] sm:$0xff] %v7554_v63  ;;  %14453 = vst [vmem:[#allocation43_spill] sm:$0xff] %v7557_v52  ;;  %1702 = vadd.xlane.f32.xlu0 %v7354_v6  ;;  %1466 = vadd.xlane.f32.xlu1 %v7384_v28  ;;  %v7562_v59 = vpop.f32.mrb[21].mxu0  ;;  %v7564_v11 = vadd.f32 %v2200_v33, %v1942_v58  ;;  %v7566_v5 = vpop.f32.mrb[21].mxu1  ;;  %v7568_v7 = vadd.f32 %v2440_v15, %v2062_v47  ;;  %v114_v15 = vld [vmem:[%s13779_s1 + $0x308] sm:$0xff] }
 0x129   :  { %14454 = vst [vmem:[#allocation44_spill] sm:$0xff] %v7562_v59  ;;  %14455 = vst [vmem:[#allocation45_spill] sm:$0xff] %v7566_v5  ;;  %v1944_v32 = vmul.f32 %v7554_v63, %v7554_v63  ;;  %v1945_v34 = vmul.f32 %v7562_v59, %v7562_v59  ;;  %v2065_v38 = vmul.f32 %v7566_v5, %v7566_v5  ;;  %v1484_v6 = vsel %vm1443_vm1, %v7562_v59, 0.0 }
 0x12a   :  { %v1724_v58 = vsel %vm1443_vm1, %v7566_v5, 0.0  ;;  %v7584_v28 = vadd.f32 %v1484_v6, %v7554_v63  ;;  %v2064_v33 = vmul.f32 %v7557_v52, %v7557_v52  ;;  %6057 = vmatprep.mubr.msk.f32.mxu0 %vm297_vm0, %v114_v15 }
 0x12b   :  { %v7587_v47 = vadd.f32 %v1724_v58, %v7557_v52  ;;  %v7595_v5 = vpop.f32.mrb[22].mxu0  ;;  %v7597_v43 = vpop.f32.mrb[22].mxu1  ;;  %v2204_v21 = vsel %vm1443_vm1, %v1945_v34, 0.0  ;;  %v2444_v6 = vsel %vm1443_vm1, %v2065_v38, 0.0  ;;  %1011 = vmatmul.mubr.f32.gmra.mrb[96].mxu0 %v113_v45 }
 0x12c   :  { %14456 = vst [vmem:[#allocation46_spill] sm:$0xff] %v7595_v5  ;;  %14457 = vst [vmem:[#allocation47_spill] sm:$0xff] %v7597_v43  ;;  %2182 = vadd.xlane.f32.xlu0 %v7369_v19  ;;  %1706 = vadd.xlane.f32.xlu1 %v7387_v29  ;;  %v7603_v58 = vpop.f32.mrb[23].mxu0  ;;  %v7605_v15 = vpop.f32.mrb[23].mxu1  ;;  %v7607_v52 = vadd.f32 %v2204_v21, %v1944_v32  ;;  %v7609_v4 = vadd.f32 %v2444_v6, %v2064_v33  ;;  %v116_v21 = vld [vmem:[%s13779_s1 + $0x318] sm:$0xff]  ;;  %v234_v32 = vld [vmem:[%s13779_s1 + $0x6c8] sm:$0xff] }
 0x12d   :  { %14458 = vst [vmem:[#allocation48_spill] sm:$0xff] %v7603_v58  ;;  %14459 = vst [vmem:[#allocation49_spill] sm:$0xff] %v7605_v15  ;;  %v1946_v18 = vmul.f32 %v7595_v5, %v7595_v5  ;;  %v1947_v34 = vmul.f32 %v7603_v58, %v7603_v58  ;;  %v2067_v45 = vmul.f32 %v7605_v15, %v7605_v15  ;;  %v1488_v19 = vsel %vm1443_vm1, %v7603_v58, 0.0 }
 0x12e   :  { %v1728_v29 = vsel %vm1443_vm1, %v7605_v15, 0.0  ;;  %v7628_v38 = vadd.f32 %v1488_v19, %v7595_v5  ;;  %v2066_v6 = vmul.f32 %v7597_v43, %v7597_v43  ;;  %6058 = vmatprep.mubr.msk.f32.mxu0 %vm297_vm0, %v116_v21  ;;  %6117 = vmatprep.mubr.msk.f32.mxu1 %vm297_vm0, %v234_v32  ;;  %v115_v15 = vld [vmem:[%s13779_s1 + $0x310] sm:$0xff] }
 0x12f   :  { %v7631_v33 = vadd.f32 %v1728_v29, %v7597_v43  ;;  %v7643_v19 = vpop.f32.mrb[24].mxu0  ;;  %v2208_v29 = vsel %vm1443_vm1, %v1947_v34, 0.0  ;;  %v7646_v31 = vpop.f32.mrb[24].mxu1  ;;  %v2448_v43 = vsel %vm1443_vm1, %v2067_v45, 0.0  ;;  %1017 = vmatmul.mubr.f32.gmra.mrb[98].mxu0 %v115_v15  ;;  %1371 = vmatmul.mubr.f32.gmra.mrb[96].mxu1 %v233_v12 }
 0x130   :  { %14460 = vst [vmem:[#allocation50_spill] sm:$0xff] %v7643_v19  ;;  %14461 = vst [vmem:[#allocation51_spill] sm:$0xff] %v7646_v31  ;;  %2422 = vadd.xlane.f32.xlu0 %v7371_v20  ;;  %2186 = vadd.xlane.f32.xlu1 %v7400_v40  ;;  %v7651_v21 = vpop.f32.mrb[25].mxu0  ;;  %v7653_v32 = vadd.f32 %v2208_v29, %v1946_v18  ;;  %v7655_v27 = vpop.f32.mrb[25].mxu1  ;;  %v7657_v60 = vadd.f32 %v2448_v43, %v2066_v6  ;;  %v236_v43 = vld [vmem:[%s13779_s1 + $0x6d8] sm:$0xff]  ;;  %v235_v29 = vld [vmem:[%s13779_s1 + $0x6d0] sm:$0xff] }
 0x131   :  { %14462 = vst [vmem:[#allocation52_spill] sm:$0xff] %v7651_v21  ;;  %14463 = vst [vmem:[#allocation53_spill] sm:$0xff] %v7655_v27  ;;  %v1948_v34 = vmul.f32 %v7643_v19, %v7643_v19  ;;  %v1949_v45 = vmul.f32 %v7651_v21, %v7651_v21  ;;  %v2069_v12 = vmul.f32 %v7655_v27, %v7655_v27  ;;  %v1492_v20 = vsel %vm1443_vm1, %v7651_v21, 0.0 }
 0x132   :  { %v1732_v18 = vsel %vm1443_vm1, %v7655_v27, 0.0  ;;  %v7673_v40 = vadd.f32 %v1492_v20, %v7643_v19  ;;  %v2068_v6 = vmul.f32 %v7646_v31, %v7646_v31  ;;  %6118 = vmatprep.mubr.msk.f32.mxu1 %vm297_vm0, %v236_v43 }
 0x133   :  { %v7676_v15 = vadd.f32 %v1732_v18, %v7646_v31  ;;  %v7684_v27 = vpop.f32.mrb[26].mxu0  ;;  %v7686_v57 = vpop.f32.mrb[26].mxu1  ;;  %v2212_v21 = vsel %vm1443_vm1, %v1949_v45, 0.0  ;;  %v2452_v20 = vsel %vm1443_vm1, %v2069_v12, 0.0  ;;  %1377 = vmatmul.mubr.f32.gmra.mrb[98].mxu1 %v235_v29 }
 0x134   :  { %14464 = vst [vmem:[#allocation54_spill] sm:$0xff] %v7684_v27  ;;  %14465 = vst [vmem:[#allocation55_spill] sm:$0xff] %v7686_v57  ;;  %2426 = vadd.xlane.f32.xlu1 %v7404_v46  ;;  %1470 = vadd.xlane.f32.xlu0 %v7424_v1  ;;  %v7692_v18 = vpop.f32.mrb[27].mxu0  ;;  %v7694_v43 = vpop.f32.mrb[27].mxu1  ;;  %v7696_v31 = vadd.f32 %v2212_v21, %v1948_v34  ;;  %v7698_v19 = vadd.f32 %v2452_v20, %v2068_v6 }
 0x135   :  { %14466 = vst [vmem:[#allocation56_spill] sm:$0xff] %v7692_v18  ;;  %14467 = vst [vmem:[#allocation57_spill] sm:$0xff] %v7694_v43  ;;  %v1950_v59 = vmul.f32 %v7684_v27, %v7684_v27  ;;  %v1951_v45 = vmul.f32 %v7692_v18, %v7692_v18  ;;  %v2071_v12 = vmul.f32 %v7694_v43, %v7694_v43  ;;  %v1496_v46 = vsel %vm1443_vm1, %v7692_v18, 0.0 }
 0x136   :  { %v1736_v1 = vsel %vm1443_vm1, %v7694_v43, 0.0  ;;  %v7711_v21 = vadd.f32 %v1496_v46, %v7684_v27  ;;  %v2070_v6 = vmul.f32 %v7686_v57, %v7686_v57 }
 0x137   :  { %v7714_v34 = vadd.f32 %v1736_v1, %v7686_v57  ;;  %v7718_v29 = vpop.f32.mrb[28].mxu0  ;;  %v2216_v20 = vsel %vm1443_vm1, %v1951_v45, 0.0  ;;  %v7721_v63 = vpop.f32.mrb[28].mxu1  ;;  %v2456_v14 = vsel %vm1443_vm1, %v2071_v12, 0.0 }
 0x138   :  { %14468 = vst [vmem:[#allocation58_spill] sm:$0xff] %v7718_v29  ;;  %14469 = vst [vmem:[#allocation59_spill] sm:$0xff] %v7721_v63  ;;  %1710 = vadd.xlane.f32.xlu0 %v7427_v0  ;;  %1474 = vadd.xlane.f32.xlu1 %v7466_v49  ;;  %v7726_v46 = vpop.f32.mrb[29].mxu0  ;;  %v7728_v43 = vadd.f32 %v2216_v20, %v1950_v59  ;;  %v7730_v1 = vpop.f32.mrb[29].mxu1  ;;  %v7732_v62 = vadd.f32 %v2456_v14, %v2070_v6  ;;  %v118_v14 = vld [vmem:[%s13779_s1 + $0x328] sm:$0xff] }
 0x139   :  { %14470 = vst [vmem:[#allocation60_spill] sm:$0xff] %v7726_v46  ;;  %14471 = vst [vmem:[#allocation61_spill] sm:$0xff] %v7730_v1  ;;  %v1952_v57 = vmul.f32 %v7718_v29, %v7718_v29  ;;  %v1953_v45 = vmul.f32 %v7726_v46, %v7726_v46  ;;  %v2073_v12 = vmul.f32 %v7730_v1, %v7730_v1  ;;  %v1500_v0 = vsel %vm1443_vm1, %v7726_v46, 0.0  ;;  %v117_v46 = vld [vmem:[%s13779_s1 + $0x320] sm:$0xff] }
 0x13a   :  { %v1740_v49 = vsel %vm1443_vm1, %v7730_v1, 0.0  ;;  %v7748_v59 = vadd.f32 %v1500_v0, %v7718_v29  ;;  %v2072_v20 = vmul.f32 %v7721_v63, %v7721_v63  ;;  %6059 = vmatprep.mubr.msk.f32.mxu0 %vm297_vm0, %v118_v14 }
 0x13b   :  { %v7751_v6 = vadd.f32 %v1740_v49, %v7721_v63  ;;  %v7759_v1 = vpop.f32.mrb[30].mxu0  ;;  %v7761_v39 = vpop.f32.mrb[30].mxu1  ;;  %v2220_v35 = vsel %vm1443_vm1, %v1953_v45, 0.0  ;;  %v2460_v0 = vsel %vm1443_vm1, %v2073_v12, 0.0  ;;  %1023 = vmatmul.mubr.f32.gmra.mrb[100].mxu0 %v117_v46 }
 0x13c   :  { %14472 = vst [vmem:[#allocation62_spill] sm:$0xff] %v7759_v1  ;;  %14473 = vst [vmem:[#allocation63_spill] sm:$0xff] %v7761_v39  ;;  %2190 = vadd.xlane.f32.xlu0 %v7443_v22  ;;  %1714 = vadd.xlane.f32.xlu1 %v7469_v51  ;;  %v7767_v49 = vpop.f32.mrb[31].mxu0  ;;  %v7769_v14 = vpop.f32.mrb[31].mxu1  ;;  %v7771_v63 = vadd.f32 %v2220_v35, %v1952_v57  ;;  %v7773_v29 = vadd.f32 %v2460_v0, %v2072_v20  ;;  %v120_v57 = vld [vmem:[%s13779_s1 + $0x338] sm:$0xff]  ;;  %v238_v35 = vld [vmem:[%s13779_s1 + $0x6e8] sm:$0xff] }
 0x13d   :  { %14474 = vst [vmem:[#allocation64_spill] sm:$0xff] %v7767_v49  ;;  %14475 = vst [vmem:[#allocation65_spill] sm:$0xff] %v7769_v14  ;;  %v1954_v18 = vmul.f32 %v7759_v1, %v7759_v1  ;;  %v1955_v45 = vmul.f32 %v7767_v49, %v7767_v49  ;;  %v2075_v46 = vmul.f32 %v7769_v14, %v7769_v14  ;;  %v1504_v22 = vsel %vm1443_vm1, %v7767_v49, 0.0  ;;  %v237_v49 = vld [vmem:[%s13779_s1 + $0x6e0] sm:$0xff] }
 0x13e   :  { %v1744_v51 = vsel %vm1443_vm1, %v7769_v14, 0.0  ;;  %v7792_v12 = vadd.f32 %v1504_v22, %v7759_v1  ;;  %v2074_v0 = vmul.f32 %v7761_v39, %v7761_v39  ;;  %6060 = vmatprep.mubr.msk.f32.mxu0 %vm297_vm0, %v120_v57  ;;  %6119 = vmatprep.mubr.msk.f32.mxu1 %vm297_vm0, %v238_v35  ;;  %v119_v14 = vld [vmem:[%s13779_s1 + $0x330] sm:$0xff] }
 0x13f   :  { %v7795_v20 = vadd.f32 %v1744_v51, %v7761_v39  ;;  %v7807_v22 = vpop.f32.mrb[32].mxu0  ;;  %v2224_v51 = vsel %vm1443_vm1, %v1955_v45, 0.0  ;;  %v7810_v1 = vpop.f32.mrb[32].mxu1  ;;  %v2464_v39 = vsel %vm1443_vm1, %v2075_v46, 0.0  ;;  %1029 = vmatmul.mubr.f32.gmra.mrb[102].mxu0 %v119_v14  ;;  %1383 = vmatmul.mubr.f32.gmra.mrb[100].mxu1 %v237_v49 }
 0x140   :  { %14476 = vst [vmem:[#allocation66_spill] sm:$0xff] %v7807_v22  ;;  %14477 = vst [vmem:[#allocation67_spill] sm:$0xff] %v7810_v1  ;;  %2430 = vadd.xlane.f32.xlu0 %v7445_v25  ;;  %2194 = vadd.xlane.f32.xlu1 %v7489_v23  ;;  %v7815_v57 = vpop.f32.mrb[33].mxu0  ;;  %v7817_v35 = vadd.f32 %v2224_v51, %v1954_v18  ;;  %v7819_v27 = vpop.f32.mrb[33].mxu1  ;;  %v7821_v54 = vadd.f32 %v2464_v39, %v2074_v0  ;;  %v240_v39 = vld [vmem:[%s13779_s1 + $0x6f8] sm:$0xff]  ;;  %v239_v51 = vld [vmem:[%s13779_s1 + $0x6f0] sm:$0xff] }
 0x141   :  { %14478 = vst [vmem:[#allocation68_spill] sm:$0xff] %v7815_v57  ;;  %14479 = vst [vmem:[#allocation69_spill] sm:$0xff] %v7819_v27  ;;  %v1956_v45 = vmul.f32 %v7807_v22, %v7807_v22  ;;  %v1957_v46 = vmul.f32 %v7815_v57, %v7815_v57  ;;  %v2077_v49 = vmul.f32 %v7819_v27, %v7819_v27  ;;  %v1508_v25 = vsel %vm1443_vm1, %v7815_v57, 0.0 }
 0x142   :  { %v1748_v23 = vsel %vm1443_vm1, %v7819_v27, 0.0  ;;  %v7837_v18 = vadd.f32 %v1508_v25, %v7807_v22  ;;  %v2076_v0 = vmul.f32 %v7810_v1, %v7810_v1  ;;  %6120 = vmatprep.mubr.msk.f32.mxu1 %vm297_vm0, %v240_v39 }
 0x143   :  { %v7840_v14 = vadd.f32 %v1748_v23, %v7810_v1  ;;  %v7848_v27 = vpop.f32.mrb[34].mxu0  ;;  %v7850_v57 = vpop.f32.mrb[34].mxu1  ;;  %v2228_v50 = vsel %vm1443_vm1, %v1957_v46, 0.0  ;;  %v2468_v25 = vsel %vm1443_vm1, %v2077_v49, 0.0  ;;  %1389 = vmatmul.mubr.f32.gmra.mrb[102].mxu1 %v239_v51 }
 0x144   :  { %14480 = vst [vmem:[#allocation70_spill] sm:$0xff] %v7848_v27  ;;  %14481 = vst [vmem:[#allocation71_spill] sm:$0xff] %v7850_v57  ;;  %2434 = vadd.xlane.f32.xlu1 %v7493_v36  ;;  %1478 = vadd.xlane.f32.xlu0 %v7509_v53  ;;  %v7856_v23 = vpop.f32.mrb[35].mxu0  ;;  %v7858_v39 = vpop.f32.mrb[35].mxu1  ;;  %v7860_v1 = vadd.f32 %v2228_v50, %v1956_v45  ;;  %v7862_v22 = vadd.f32 %v2468_v25, %v2076_v0 }
 0x145   :  { %14482 = vst [vmem:[#allocation72_spill] sm:$0xff] %v7856_v23  ;;  %14483 = vst [vmem:[#allocation73_spill] sm:$0xff] %v7858_v39  ;;  %v1958_v58 = vmul.f32 %v7848_v27, %v7848_v27  ;;  %v1959_v46 = vmul.f32 %v7856_v23, %v7856_v23  ;;  %v2079_v49 = vmul.f32 %v7858_v39, %v7858_v39  ;;  %v1512_v36 = vsel %vm1443_vm1, %v7856_v23, 0.0 }
 0x146   :  { %v1752_v53 = vsel %vm1443_vm1, %v7858_v39, 0.0  ;;  %v7875_v50 = vadd.f32 %v1512_v36, %v7848_v27  ;;  %v2078_v0 = vmul.f32 %v7850_v57, %v7850_v57 }
 0x147   :  { %v7878_v45 = vadd.f32 %v1752_v53, %v7850_v57  ;;  %v7882_v51 = vpop.f32.mrb[36].mxu0  ;;  %v2232_v25 = vsel %vm1443_vm1, %v1959_v46, 0.0  ;;  %v7885_v5 = vpop.f32.mrb[36].mxu1  ;;  %v2472_v23 = vsel %vm1443_vm1, %v2079_v49, 0.0 }
 0x148   :  { %14484 = vst [vmem:[#allocation74_spill] sm:$0xff] %v7882_v51  ;;  %14485 = vst [vmem:[#allocation75_spill] sm:$0xff] %v7885_v5  ;;  %1718 = vadd.xlane.f32.xlu0 %v7512_v24  ;;  %1482 = vadd.xlane.f32.xlu1 %v7547_v41  ;;  %v7890_v36 = vpop.f32.mrb[37].mxu0  ;;  %v7892_v39 = vadd.f32 %v2232_v25, %v1958_v58  ;;  %v7894_v53 = vpop.f32.mrb[37].mxu1  ;;  %v7896_v27 = vadd.f32 %v2472_v23, %v2078_v0  ;;  %v122_v58 = vld [vmem:[%s13779_s1 + $0x348] sm:$0xff] }
 0x149   :  { %14486 = vst [vmem:[#allocation76_spill] sm:$0xff] %v7890_v36  ;;  %14487 = vst [vmem:[#allocation77_spill] sm:$0xff] %v7894_v53  ;;  %v1960_v57 = vmul.f32 %v7882_v51, %v7882_v51  ;;  %v1961_v46 = vmul.f32 %v7890_v36, %v7890_v36  ;;  %v2081_v49 = vmul.f32 %v7894_v53, %v7894_v53  ;;  %v1516_v24 = vsel %vm1443_vm1, %v7890_v36, 0.0  ;;  %v121_v36 = vld [vmem:[%s13779_s1 + $0x340] sm:$0xff] }
 0x14a   :  { %v1756_v41 = vsel %vm1443_vm1, %v7894_v53, 0.0  ;;  %v7912_v23 = vadd.f32 %v1516_v24, %v7882_v51  ;;  %v2080_v25 = vmul.f32 %v7885_v5, %v7885_v5  ;;  %6061 = vmatprep.mubr.msk.f32.mxu0 %vm297_vm0, %v122_v58 }
 0x14b   :  { %v7915_v0 = vadd.f32 %v1756_v41, %v7885_v5  ;;  %v7923_v53 = vpop.f32.mrb[38].mxu0  ;;  %v7925_v13 = vpop.f32.mrb[38].mxu1  ;;  %v2236_v9 = vsel %vm1443_vm1, %v1961_v46, 0.0  ;;  %v2476_v24 = vsel %vm1443_vm1, %v2081_v49, 0.0  ;;  %1035 = vmatmul.mubr.f32.gmra.mrb[104].mxu0 %v121_v36 }
 0x14c   :  { %14488 = vst [vmem:[#allocation78_spill] sm:$0xff] %v7923_v53  ;;  %14489 = vst [vmem:[#allocation79_spill] sm:$0xff] %v7925_v13  ;;  %2198 = vadd.xlane.f32.xlu0 %v7532_v2  ;;  %1722 = vadd.xlane.f32.xlu1 %v7550_v48  ;;  %v7931_v41 = vpop.f32.mrb[39].mxu0  ;;  %v7933_v58 = vpop.f32.mrb[39].mxu1  ;;  %v7935_v5 = vadd.f32 %v2236_v9, %v1960_v57  ;;  %v7937_v51 = vadd.f32 %v2476_v24, %v2080_v25  ;;  %v124_v9 = vld [vmem:[%s13779_s1 + $0x358] sm:$0xff]  ;;  %v242_v57 = vld [vmem:[%s13779_s1 + $0x708] sm:$0xff] }
 0x14d   :  { %14490 = vst [vmem:[#allocation80_spill] sm:$0xff] %v7931_v41  ;;  %14491 = vst [vmem:[#allocation81_spill] sm:$0xff] %v7933_v58  ;;  %v1962_v55 = vmul.f32 %v7923_v53, %v7923_v53  ;;  %v1963_v46 = vmul.f32 %v7931_v41, %v7931_v41  ;;  %v2083_v36 = vmul.f32 %v7933_v58, %v7933_v58  ;;  %v1520_v2 = vsel %vm1443_vm1, %v7931_v41, 0.0  ;;  %v241_v41 = vld [vmem:[%s13779_s1 + $0x700] sm:$0xff] }
 0x14e   :  { %v1760_v48 = vsel %vm1443_vm1, %v7933_v58, 0.0  ;;  %v7956_v49 = vadd.f32 %v1520_v2, %v7923_v53  ;;  %v2082_v24 = vmul.f32 %v7925_v13, %v7925_v13  ;;  %6062 = vmatprep.mubr.msk.f32.mxu0 %vm297_vm0, %v124_v9  ;;  %6121 = vmatprep.mubr.msk.f32.mxu1 %vm297_vm0, %v242_v57  ;;  %v123_v58 = vld [vmem:[%s13779_s1 + $0x350] sm:$0xff] }
 0x14f   :  { %v7959_v25 = vadd.f32 %v1760_v48, %v7925_v13  ;;  %v7971_v2 = vpop.f32.mrb[40].mxu0  ;;  %v2240_v48 = vsel %vm1443_vm1, %v1963_v46, 0.0  ;;  %v7974_v53 = vpop.f32.mrb[40].mxu1  ;;  %v2480_v13 = vsel %vm1443_vm1, %v2083_v36, 0.0  ;;  %1041 = vmatmul.mubr.f32.gmra.mrb[106].mxu0 %v123_v58  ;;  %1395 = vmatmul.mubr.f32.gmra.mrb[104].mxu1 %v241_v41 }
 0x150   :  { %14492 = vst [vmem:[#allocation82_spill] sm:$0xff] %v7971_v2  ;;  %14493 = vst [vmem:[#allocation83_spill] sm:$0xff] %v7974_v53  ;;  %2438 = vadd.xlane.f32.xlu0 %v7534_v37  ;;  %2202 = vadd.xlane.f32.xlu1 %v7564_v11  ;;  %v7979_v9 = vpop.f32.mrb[41].mxu0  ;;  %v7981_v57 = vadd.f32 %v2240_v48, %v1962_v55  ;;  %v7983_v8 = vpop.f32.mrb[41].mxu1  ;;  %v7985_v44 = vadd.f32 %v2480_v13, %v2082_v24  ;;  %v244_v13 = vld [vmem:[%s13779_s1 + $0x718] sm:$0xff]  ;;  %v243_v48 = vld [vmem:[%s13779_s1 + $0x710] sm:$0xff] }
 0x151   :  { %14494 = vst [vmem:[#allocation84_spill] sm:$0xff] %v7979_v9  ;;  %14495 = vst [vmem:[#allocation85_spill] sm:$0xff] %v7983_v8  ;;  %v1964_v46 = vmul.f32 %v7971_v2, %v7971_v2  ;;  %v1965_v36 = vmul.f32 %v7979_v9, %v7979_v9  ;;  %v2085_v41 = vmul.f32 %v7983_v8, %v7983_v8  ;;  %v1524_v11 = vsel %vm1443_vm1, %v7979_v9, 0.0 }
 0x152   :  { %v1764_v37 = vsel %vm1443_vm1, %v7983_v8, 0.0  ;;  %v8001_v55 = vadd.f32 %v1524_v11, %v7971_v2  ;;  %v2084_v24 = vmul.f32 %v7974_v53, %v7974_v53  ;;  %6122 = vmatprep.mubr.msk.f32.mxu1 %vm297_vm0, %v244_v13 }
 0x153   :  { %v8004_v58 = vadd.f32 %v1764_v37, %v7974_v53  ;;  %v8012_v8 = vpop.f32.mrb[42].mxu0  ;;  %v8014_v9 = vpop.f32.mrb[42].mxu1  ;;  %v2244_v42 = vsel %vm1443_vm1, %v1965_v36, 0.0  ;;  %v2484_v11 = vsel %vm1443_vm1, %v2085_v41, 0.0  ;;  %1401 = vmatmul.mubr.f32.gmra.mrb[106].mxu1 %v243_v48 }
 0x154   :  { %14496 = vst [vmem:[#allocation86_spill] sm:$0xff] %v8012_v8  ;;  %14497 = vst [vmem:[#allocation87_spill] sm:$0xff] %v8014_v9  ;;  %2442 = vadd.xlane.f32.xlu1 %v7568_v7  ;;  %1486 = vadd.xlane.f32.xlu0 %v7584_v28  ;;  %v8020_v37 = vpop.f32.mrb[43].mxu0  ;;  %v8022_v13 = vpop.f32.mrb[43].mxu1  ;;  %v8024_v53 = vadd.f32 %v2244_v42, %v1964_v46  ;;  %v8026_v2 = vadd.f32 %v2484_v11, %v2084_v24 }
 0x155   :  { %14498 = vst [vmem:[#allocation88_spill] sm:$0xff] %v8020_v37  ;;  %14499 = vst [vmem:[#allocation89_spill] sm:$0xff] %v8022_v13  ;;  %v1966_v16 = vmul.f32 %v8012_v8, %v8012_v8  ;;  %v1967_v36 = vmul.f32 %v8020_v37, %v8020_v37  ;;  %v2087_v41 = vmul.f32 %v8022_v13, %v8022_v13  ;;  %v1528_v7 = vsel %vm1443_vm1, %v8020_v37, 0.0 }
 0x156   :  { %v1768_v28 = vsel %vm1443_vm1, %v8022_v13, 0.0  ;;  %v8039_v42 = vadd.f32 %v1528_v7, %v8012_v8  ;;  %v2086_v24 = vmul.f32 %v8014_v9, %v8014_v9 }
 0x157   :  { %v8042_v46 = vadd.f32 %v1768_v28, %v8014_v9  ;;  %v8046_v48 = vpop.f32.mrb[44].mxu0  ;;  %v2248_v11 = vsel %vm1443_vm1, %v1967_v36, 0.0  ;;  %v8049_v3 = vpop.f32.mrb[44].mxu1  ;;  %v2488_v37 = vsel %vm1443_vm1, %v2087_v41, 0.0 }
 0x158   :  { %14500 = vst [vmem:[#allocation90_spill] sm:$0xff] %v8046_v48  ;;  %14501 = vst [vmem:[#allocation91_spill] sm:$0xff] %v8049_v3  ;;  %1726 = vadd.xlane.f32.xlu0 %v7587_v47  ;;  %1490 = vadd.xlane.f32.xlu1 %v7628_v38  ;;  %v8054_v7 = vpop.f32.mrb[45].mxu0  ;;  %v8056_v13 = vadd.f32 %v2248_v11, %v1966_v16  ;;  %v8058_v28 = vpop.f32.mrb[45].mxu1  ;;  %v8060_v8 = vadd.f32 %v2488_v37, %v2086_v24  ;;  %v126_v38 = vld [vmem:[%s13779_s1 + $0x368] sm:$0xff] }
 0x159   :  { %14502 = vst [vmem:[#allocation92_spill] sm:$0xff] %v8054_v7  ;;  %14503 = vst [vmem:[#allocation93_spill] sm:$0xff] %v8058_v28  ;;  %v1968_v9 = vmul.f32 %v8046_v48, %v8046_v48  ;;  %v1969_v36 = vmul.f32 %v8054_v7, %v8054_v7  ;;  %v2089_v41 = vmul.f32 %v8058_v28, %v8058_v28  ;;  %v1532_v47 = vsel %vm1443_vm1, %v8054_v7, 0.0  ;;  %v125_v7 = vld [vmem:[%s13779_s1 + $0x360] sm:$0xff] }
 0x15a   :  { %v1772_v16 = vsel %vm1443_vm1, %v8058_v28, 0.0  ;;  %v8076_v37 = vadd.f32 %v1532_v47, %v8046_v48  ;;  %v2088_v11 = vmul.f32 %v8049_v3, %v8049_v3  ;;  %6063 = vmatprep.mubr.msk.f32.mxu0 %vm297_vm0, %v126_v38 }
 0x15b   :  { %v8079_v24 = vadd.f32 %v1772_v16, %v8049_v3  ;;  %v8087_v28 = vpop.f32.mrb[46].mxu0  ;;  %v8089_v17 = vpop.f32.mrb[46].mxu1  ;;  %v2252_v10 = vsel %vm1443_vm1, %v1969_v36, 0.0  ;;  %v2492_v47 = vsel %vm1443_vm1, %v2089_v41, 0.0  ;;  %1047 = vmatmul.mubr.f32.gmra.mrb[108].mxu0 %v125_v7 }
 0x15c   :  { %14504 = vst [vmem:[#allocation94_spill] sm:$0xff] %v8087_v28  ;;  %14505 = vst [vmem:[#allocation95_spill] sm:$0xff] %v8089_v17  ;;  %2206 = vadd.xlane.f32.xlu0 %v7607_v52  ;;  %1730 = vadd.xlane.f32.xlu1 %v7631_v33  ;;  %v8095_v16 = vpop.f32.mrb[47].mxu0  ;;  %v8097_v38 = vpop.f32.mrb[47].mxu1  ;;  %v8099_v3 = vadd.f32 %v2252_v10, %v1968_v9  ;;  %v8101_v48 = vadd.f32 %v2492_v47, %v2088_v11  ;;  %v128_v10 = vld [vmem:[%s13779_s1 + $0x378] sm:$0xff]  ;;  %v246_v9 = vld [vmem:[%s13779_s1 + $0x728] sm:$0xff] }
 0x15d   :  { %14506 = vst [vmem:[#allocation96_spill] sm:$0xff] %v8095_v16  ;;  %14507 = vst [vmem:[#allocation97_spill] sm:$0xff] %v8097_v38  ;;  %v1970_v30 = vmul.f32 %v8087_v28, %v8087_v28  ;;  %v1971_v36 = vmul.f32 %v8095_v16, %v8095_v16  ;;  %v2091_v7 = vmul.f32 %v8097_v38, %v8097_v38  ;;  %v1536_v52 = vsel %vm1443_vm1, %v8095_v16, 0.0  ;;  %v245_v16 = vld [vmem:[%s13779_s1 + $0x720] sm:$0xff] }
 0x15e   :  { %v1776_v33 = vsel %vm1443_vm1, %v8097_v38, 0.0  ;;  %v8120_v41 = vadd.f32 %v1536_v52, %v8087_v28  ;;  %v2090_v47 = vmul.f32 %v8089_v17, %v8089_v17  ;;  %6064 = vmatprep.mubr.msk.f32.mxu0 %vm297_vm0, %v128_v10  ;;  %6123 = vmatprep.mubr.msk.f32.mxu1 %vm297_vm0, %v246_v9  ;;  %v127_v38 = vld [vmem:[%s13779_s1 + $0x370] sm:$0xff] }
 0x15f   :  { %v8123_v11 = vadd.f32 %v1776_v33, %v8089_v17  ;;  %v8135_v52 = vpop.f32.mrb[48].mxu0  ;;  %v2256_v33 = vsel %vm1443_vm1, %v1971_v36, 0.0  ;;  %v8138_v28 = vpop.f32.mrb[48].mxu1  ;;  %v2496_v17 = vsel %vm1443_vm1, %v2091_v7, 0.0  ;;  %1053 = vmatmul.mubr.f32.gmra.mrb[110].mxu0 %v127_v38  ;;  %1407 = vmatmul.mubr.f32.gmra.mrb[108].mxu1 %v245_v16 }
 0x160   :  { %14508 = vst [vmem:[#allocation98_spill] sm:$0xff] %v8135_v52  ;;  %14509 = vst [vmem:[#allocation99_spill] sm:$0xff] %v8138_v28  ;;  %2446 = vadd.xlane.f32.xlu0 %v7609_v4  ;;  %2210 = vadd.xlane.f32.xlu1 %v7653_v32  ;;  %v1972_v10 = vmul.f32 %v8135_v52, %v8135_v52  ;;  %v8145_v9 = vpop.f32.mrb[49].mxu0  ;;  %v8147_v26 = vadd.f32 %v2256_v33, %v1970_v30  ;;  %v8149_v61 = vpop.f32.mrb[49].mxu1  ;;  %v248_v32 = vld [vmem:[%s13779_s1 + $0x738] sm:$0xff] }
 0x161   :  { %14510 = vst [vmem:[#allocation100_spill] sm:$0xff] %v8145_v9  ;;  %14511 = vst [vmem:[#allocation101_spill] sm:$0xff] %v8149_v61  ;;  %v1973_v36 = vmul.f32 %v8145_v9, %v8145_v9  ;;  %v1780_v38 = vsel %vm1443_vm1, %v8149_v61, 0.0  ;;  %v2093_v4 = vmul.f32 %v8149_v61, %v8149_v61  ;;  %v8157_v16 = vadd.f32 %v2496_v17, %v2090_v47  ;;  %v247_v17 = vld [vmem:[%s13779_s1 + $0x730] sm:$0xff] }
 0x162   :  { %v2092_v30 = vmul.f32 %v8138_v28, %v8138_v28  ;;  %v1540_v7 = vsel %vm1443_vm1, %v8145_v9, 0.0  ;;  %v8167_v33 = vadd.f32 %v1780_v38, %v8138_v28  ;;  %6124 = vmatprep.mubr.msk.f32.mxu1 %vm297_vm0, %v248_v32 }
 0x163   :  { %14512 = vst [vmem:[#allocation102_spill] sm:$0xff] %v8157_v16  ;;  %v8173_v47 = vpop.f32.mrb[50].mxu0  ;;  %v8176_v61 = vadd.f32 %v1540_v7, %v8135_v52  ;;  %v8178_v56 = vpop.f32.mrb[50].mxu1  ;;  %v2260_v16 = vsel %vm1443_vm1, %v1973_v36, 0.0  ;;  %v2500_v9 = vsel %vm1443_vm1, %v2093_v4, 0.0  ;;  %1413 = vmatmul.mubr.f32.gmra.mrb[110].mxu1 %v247_v17 }
 0x164   :  { %14513 = vst [vmem:[#allocation103_spill] sm:$0xff] %v8167_v33  ;;  %14514 = vst [vmem:[#allocation104_spill] sm:$0xff] %v8173_v47  ;;  %2450 = vadd.xlane.f32.xlu1 %v7657_v60  ;;  %1494 = vadd.xlane.f32.xlu0 %v7673_v40  ;;  %v1974_v38 = vmul.f32 %v8173_v47, %v8173_v47  ;;  %v8186_v32 = vpop.f32.mrb[51].mxu0  ;;  %v8188_v28 = vpop.f32.mrb[51].mxu1  ;;  %v8190_v7 = vadd.f32 %v2260_v16, %v1972_v10 }
 0x165   :  { %14515 = vst [vmem:[#allocation105_spill] sm:$0xff] %v8176_v61  ;;  %14516 = vst [vmem:[#allocation106_spill] sm:$0xff] %v8178_v56  ;;  %v1975_v52 = vmul.f32 %v8186_v32, %v8186_v32  ;;  %v1784_v36 = vsel %vm1443_vm1, %v8188_v28, 0.0  ;;  %v2095_v60 = vmul.f32 %v8188_v28, %v8188_v28  ;;  %v1544_v40 = vsel %vm1443_vm1, %v8186_v32, 0.0 }
 0x166   :  { %14517 = vst [vmem:[#allocation107_spill] sm:$0xff] %v8186_v32  ;;  %14518 = vst [vmem:[#allocation108_spill] sm:$0xff] %v8188_v28  ;;  %v2094_v4 = vmul.f32 %v8178_v56, %v8178_v56  ;;  %v8203_v17 = vadd.f32 %v1544_v40, %v8173_v47  ;;  %v8206_v10 = vadd.f32 %v1784_v36, %v8178_v56 }
 0x167   :  { %14519 = vst [vmem:[#allocation109_spill] sm:$0xff] %v8190_v7  ;;  %v8208_v16 = vadd.f32 %v2500_v9, %v2092_v30  ;;  %v8210_v7 = vpop.f32.mrb[52].mxu0  ;;  %v2264_v33 = vsel %vm1443_vm1, %v1975_v52, 0.0  ;;  %v8213_v61 = vpop.f32.mrb[52].mxu1  ;;  %v2504_v28 = vsel %vm1443_vm1, %v2095_v60, 0.0  ;;  %v130_v60 = vld [vmem:[%s13779_s1 + $0x388] sm:$0xff] }
 0x168   :  { %14521 = vst [vmem:[#allocation111_spill] sm:$0xff] %v8210_v7  ;;  %14522 = vst [vmem:[#allocation112_spill] sm:$0xff] %v8213_v61  ;;  %1734 = vadd.xlane.f32.xlu0 %v7676_v15  ;;  %1498 = vadd.xlane.f32.xlu1 %v7711_v21  ;;  %v1976_v40 = vmul.f32 %v8210_v7, %v8210_v7  ;;  %v8220_v32 = vpop.f32.mrb[53].mxu0  ;;  %v8222_v36 = vadd.f32 %v2264_v33, %v1974_v38  ;;  %v8224_v9 = vpop.f32.mrb[53].mxu1 }
 0x169   :  { %14520 = vst [vmem:[#allocation110_spill] sm:$0xff] %v8208_v16  ;;  %14523 = vst [vmem:[#allocation113_spill] sm:$0xff] %v8220_v32  ;;  %v1548_v52 = vsel %vm1443_vm1, %v8220_v32, 0.0  ;;  %v1977_v30 = vmul.f32 %v8220_v32, %v8220_v32  ;;  %v1788_v15 = vsel %vm1443_vm1, %v8224_v9, 0.0  ;;  %v2097_v21 = vmul.f32 %v8224_v9, %v8224_v9  ;;  %6065 = vmatprep.mubr.msk.f32.mxu0 %vm297_vm0, %v130_v60 }
 0x16a   :  { %14524 = vst [vmem:[#allocation114_spill] sm:$0xff] %v8222_v36  ;;  %14525 = vst [vmem:[#allocation115_spill] sm:$0xff] %v8224_v9  ;;  %v2096_v33 = vmul.f32 %v8213_v61, %v8213_v61  ;;  %v8239_v38 = vadd.f32 %v2504_v28, %v2094_v4  ;;  %v8242_v56 = vadd.f32 %v1548_v52, %v8210_v7  ;;  %v129_v9 = vld [vmem:[%s13779_s1 + $0x380] sm:$0xff] }
 0x16b   :  { %v8245_v32 = vadd.f32 %v1788_v15, %v8213_v61  ;;  %v8251_v47 = vpop.f32.mrb[54].mxu0  ;;  %v8253_v36 = vpop.f32.mrb[54].mxu1  ;;  %v2268_v16 = vsel %vm1443_vm1, %v1977_v30, 0.0  ;;  %v2508_v28 = vsel %vm1443_vm1, %v2097_v21, 0.0  ;;  %1059 = vmatmul.mubr.f32.gmra.mrb[112].mxu0 %v129_v9  ;;  %v132_v21 = vld [vmem:[%s13779_s1 + $0x398] sm:$0xff] }
 0x16c   :  { %14527 = vst [vmem:[#allocation117_spill] sm:$0xff] %v8251_v47  ;;  %14528 = vst [vmem:[#allocation118_spill] sm:$0xff] %v8253_v36  ;;  %2214 = vadd.xlane.f32.xlu0 %v7696_v31  ;;  %1738 = vadd.xlane.f32.xlu1 %v7714_v34  ;;  %v1978_v4 = vmul.f32 %v8251_v47, %v8251_v47  ;;  %v8261_v52 = vpop.f32.mrb[55].mxu0  ;;  %v2098_v15 = vmul.f32 %v8253_v36, %v8253_v36  ;;  %v8265_v60 = vpop.f32.mrb[55].mxu1 }
 0x16d   :  { %14526 = vst [vmem:[#allocation116_spill] sm:$0xff] %v8245_v32  ;;  %14529 = vst [vmem:[#allocation119_spill] sm:$0xff] %v8261_v52  ;;  %v8267_v61 = vadd.f32 %v2268_v16, %v1976_v40  ;;  %v1552_v30 = vsel %vm1443_vm1, %v8261_v52, 0.0  ;;  %v1979_v31 = vmul.f32 %v8261_v52, %v8261_v52  ;;  %v1792_v34 = vsel %vm1443_vm1, %v8265_v60, 0.0  ;;  %v250_v16 = vld [vmem:[%s13779_s1 + $0x748] sm:$0xff]  ;;  %6066 = vmatprep.mubr.msk.f32.mxu0 %vm297_vm0, %v132_v21 }
 0x16e   :  { %14530 = vst [vmem:[#allocation120_spill] sm:$0xff] %v8265_v60  ;;  %v2099_v9 = vmul.f32 %v8265_v60, %v8265_v60  ;;  %v8284_v40 = vadd.f32 %v1552_v30, %v8251_v47  ;;  %v8287_v7 = vadd.f32 %v1792_v34, %v8253_v36  ;;  %v8289_v52 = vadd.f32 %v2508_v28, %v2096_v33  ;;  %v131_v60 = vld [vmem:[%s13779_s1 + $0x390] sm:$0xff] }
 0x16f   :  { %14531 = vst [vmem:[#allocation121_spill] sm:$0xff] %v8267_v61  ;;  %6125 = vmatprep.mubr.msk.f32.mxu1 %vm297_vm0, %v250_v16  ;;  %v249_v61 = vld [vmem:[%s13779_s1 + $0x740] sm:$0xff]  ;;  %v8299_v32 = vpop.f32.mrb[56].mxu0  ;;  %v2272_v30 = vsel %vm1443_vm1, %v1979_v31, 0.0  ;;  %v8302_v34 = vpop.f32.mrb[56].mxu1  ;;  %1065 = vmatmul.mubr.f32.gmra.mrb[114].mxu0 %v131_v60 }
 0x170   :  { %14532 = vst [vmem:[#allocation122_spill] sm:$0xff] %v8289_v52  ;;  %14533 = vst [vmem:[#allocation123_spill] sm:$0xff] %v8299_v32  ;;  %v2512_v33 = vsel %vm1443_vm1, %v2099_v9, 0.0  ;;  %1419 = vmatmul.mubr.f32.gmra.mrb[112].mxu1 %v249_v61  ;;  %2454 = vadd.xlane.f32.xlu0 %v7698_v19  ;;  %v1980_v28 = vmul.f32 %v8299_v32, %v8299_v32  ;;  %v8309_v21 = vpop.f32.mrb[57].mxu0  ;;  %v8311_v16 = vadd.f32 %v2272_v30, %v1978_v4  ;;  %v8313_v36 = vpop.f32.mrb[57].mxu1 }
 0x171   :  { %14534 = vst [vmem:[#allocation124_spill] sm:$0xff] %v8302_v34  ;;  %2218 = vadd.xlane.f32.xlu1 %v7728_v43  ;;  %14535 = vst [vmem:[#allocation125_spill] sm:$0xff] %v8309_v21  ;;  %v1556_v31 = vsel %vm1443_vm1, %v8309_v21, 0.0  ;;  %v1981_v60 = vmul.f32 %v8309_v21, %v8309_v21  ;;  %v1796_v61 = vsel %vm1443_vm1, %v8313_v36, 0.0  ;;  %v2101_v19 = vmul.f32 %v8313_v36, %v8313_v36  ;;  %v252_v43 = vld [vmem:[%s13779_s1 + $0x758] sm:$0xff] }
 0x172   :  { %14536 = vst [vmem:[#allocation126_spill] sm:$0xff] %v8311_v16  ;;  %14537 = vst [vmem:[#allocation127_spill] sm:$0xff] %v8313_v36  ;;  %v2100_v4 = vmul.f32 %v8302_v34, %v8302_v34  ;;  %v8328_v9 = vadd.f32 %v2512_v33, %v2098_v15  ;;  %v8331_v30 = vadd.f32 %v1556_v31, %v8299_v32  ;;  %6126 = vmatprep.mubr.msk.f32.mxu1 %vm297_vm0, %v252_v43  ;;  %v251_v36 = vld [vmem:[%s13779_s1 + $0x750] sm:$0xff] }
 0x173   :  { %v8334_v21 = vadd.f32 %v1796_v61, %v8302_v34  ;;  %v8340_v47 = vpop.f32.mrb[58].mxu0  ;;  %v8342_v16 = vpop.f32.mrb[58].mxu1  ;;  %v2276_v52 = vsel %vm1443_vm1, %v1981_v60, 0.0  ;;  %v2516_v15 = vsel %vm1443_vm1, %v2101_v19, 0.0 }
 0x174   :  { %14539 = vst [vmem:[#allocation129_spill] sm:$0xff] %v8340_v47  ;;  %14540 = vst [vmem:[#allocation130_spill] sm:$0xff] %v8342_v16  ;;  %1425 = vmatmul.mubr.f32.gmra.mrb[114].mxu1 %v251_v36  ;;  %1502 = vadd.xlane.f32.xlu0 %v7748_v59  ;;  %v1982_v33 = vmul.f32 %v8340_v47, %v8340_v47  ;;  %v8350_v31 = vpop.f32.mrb[59].mxu0  ;;  %v8352_v61 = vpop.f32.mrb[59].mxu1  ;;  %v8354_v43 = vadd.f32 %v2276_v52, %v1980_v28 }
 0x175   :  { %14538 = vst [vmem:[#allocation128_spill] sm:$0xff] %v8334_v21  ;;  %2458 = vadd.xlane.f32.xlu1 %v7732_v62  ;;  %14541 = vst [vmem:[#allocation131_spill] sm:$0xff] %v8350_v31  ;;  %v1560_v34 = vsel %vm1443_vm1, %v8350_v31, 0.0  ;;  %v1983_v60 = vmul.f32 %v8350_v31, %v8350_v31  ;;  %v1800_v62 = vsel %vm1443_vm1, %v8352_v61, 0.0  ;;  %v2103_v59 = vmul.f32 %v8352_v61, %v8352_v61 }
 0x176   :  { %14542 = vst [vmem:[#allocation132_spill] sm:$0xff] %v8352_v61  ;;  %14543 = vst [vmem:[#allocation133_spill] sm:$0xff] %v8354_v43  ;;  %v2102_v36 = vmul.f32 %v8342_v16, %v8342_v16  ;;  %v8367_v19 = vadd.f32 %v1560_v34, %v8340_v47  ;;  %v8370_v52 = vadd.f32 %v1800_v62, %v8342_v16 }
 0x177   :  { %v8372_v28 = vadd.f32 %v2516_v15, %v2100_v4  ;;  %v8374_v32 = vpop.f32.mrb[60].mxu0  ;;  %v2280_v31 = vsel %vm1443_vm1, %v1983_v60, 0.0  ;;  %v8377_v43 = vpop.f32.mrb[60].mxu1  ;;  %v2520_v21 = vsel %vm1443_vm1, %v2103_v59, 0.0 }
 0x178   :  { %14545 = vst [vmem:[#allocation135_spill] sm:$0xff] %v8374_v32  ;;  %14546 = vst [vmem:[#allocation136_spill] sm:$0xff] %v8377_v43  ;;  %1742 = vadd.xlane.f32.xlu0 %v7751_v6  ;;  %v1984_v34 = vmul.f32 %v8374_v32, %v8374_v32  ;;  %v8384_v61 = vpop.f32.mrb[61].mxu0  ;;  %v8386_v62 = vadd.f32 %v2280_v31, %v1982_v33  ;;  %v8388_v4 = vpop.f32.mrb[61].mxu1  ;;  %v2104_v59 = vmul.f32 %v8377_v43, %v8377_v43 }
 0x179   :  { %14544 = vst [vmem:[#allocation134_spill] sm:$0xff] %v8372_v28  ;;  %1506 = vadd.xlane.f32.xlu1 %v7792_v12  ;;  %14547 = vst [vmem:[#allocation137_spill] sm:$0xff] %v8384_v61  ;;  %v1564_v15 = vsel %vm1443_vm1, %v8384_v61, 0.0  ;;  %v1985_v60 = vmul.f32 %v8384_v61, %v8384_v61  ;;  %v1804_v6 = vsel %vm1443_vm1, %v8388_v4, 0.0  ;;  %v2105_v12 = vmul.f32 %v8388_v4, %v8388_v4 }
 0x17a   :  { %14548 = vst [vmem:[#allocation138_spill] sm:$0xff] %v8386_v62  ;;  %14549 = vst [vmem:[#allocation139_spill] sm:$0xff] %v8388_v4  ;;  %v8400_v16 = vadd.f32 %v2520_v21, %v2102_v36  ;;  %v8403_v33 = vadd.f32 %v1564_v15, %v8374_v32  ;;  %v8406_v31 = vadd.f32 %v1804_v6, %v8377_v43  ;;  %v134_v62 = vld [vmem:[%s13779_s1 + $0x3a8] sm:$0xff] }
 0x17b   :  { %v8408_v47 = vpop.f32.mrb[62].mxu0  ;;  %v8410_v61 = vpop.f32.mrb[62].mxu1  ;;  %v2284_v4 = vsel %vm1443_vm1, %v1985_v60, 0.0  ;;  %v2524_v28 = vsel %vm1443_vm1, %v2105_v12, 0.0  ;;  %v133_v60 = vld [vmem:[%s13779_s1 + $0x3a0] sm:$0xff]  ;;  %6067 = vmatprep.mubr.msk.f32.mxu0 %vm297_vm0, %v134_v62 }
 0x17c   :  { %14550 = vst [vmem:[#allocation140_spill] sm:$0xff] %v8403_v33  ;;  %14551 = vst [vmem:[#allocation141_spill] sm:$0xff] %v8406_v31  ;;  %2222 = vadd.xlane.f32.xlu0 %v7771_v63  ;;  %v1986_v21 = vmul.f32 %v8408_v47, %v8408_v47  ;;  %v8421_v36 = vpop.f32.mrb[63].mxu0  ;;  %v2106_v15 = vmul.f32 %v8410_v61, %v8410_v61  ;;  %v8425_v6 = vpop.f32.mrb[63].mxu1  ;;  %v8430_v43 = vadd.f32 %v2284_v4, %v1984_v34 }
 0x17d   :  { %14552 = vst [vmem:[#allocation142_spill] sm:$0xff] %v8408_v47  ;;  %14553 = vst [vmem:[#allocation143_spill] sm:$0xff] %v8410_v61  ;;  %1746 = vadd.xlane.f32.xlu1 %v7795_v20  ;;  %v1568_v63 = vsel %vm1443_vm1, %v8421_v36, 0.0  ;;  %v1987_v20 = vmul.f32 %v8421_v36, %v8421_v36  ;;  %v1808_v12 = vsel %vm1443_vm1, %v8425_v6, 0.0  ;;  %v2107_v32 = vmul.f32 %v8425_v6, %v8425_v6 }
 0x17e   :  { %14554 = vst [vmem:[#allocation144_spill] sm:$0xff] %v8421_v36  ;;  %14555 = vst [vmem:[#allocation145_spill] sm:$0xff] %v8425_v6  ;;  %v8442_v31 = vadd.f32 %v1568_v63, %v8408_v47  ;;  %1071 = vmatmul.mubr.f32.gmra.mrb[116].mxu0 %v133_v60  ;;  %v8445_v34 = vadd.f32 %v1808_v12, %v8410_v61  ;;  %v8447_v4 = vadd.f32 %v2524_v28, %v2104_v59  ;;  %v254_v36 = vld [vmem:[%s13779_s1 + $0x768] sm:$0xff]  ;;  %v253_v28 = vld [vmem:[%s13779_s1 + $0x760] sm:$0xff] }
 0x17f   :  { %14556 = vst [vmem:[#allocation146_spill] sm:$0xff] %v8430_v43  ;;  %v8449_v43 = vpop.f32.mrb[64].mxu0  ;;  %v2288_v33 = vsel %vm1443_vm1, %v1987_v20, 0.0  ;;  %v2528_v6 = vsel %vm1443_vm1, %v2107_v32, 0.0  ;;  %6127 = vmatprep.mubr.msk.f32.mxu1 %vm297_vm0, %v254_v36 }
 0x180   :  { %14557 = vst [vmem:[#allocation147_spill] sm:$0xff] %v8449_v43  ;;  %2462 = vadd.xlane.f32.xlu0 %v7773_v29  ;;  %v8458_v62 = vpop.f32.mrb[65].mxu0  ;;  %v8463_v59 = vadd.f32 %v2288_v33, %v1986_v21  ;;  %v8465_v60 = vadd.f32 %v2528_v6, %v2106_v15  ;;  %v1988_v63 = vmul.f32 %v8449_v43, %v8449_v43 }
 0x181   :  { %2226 = vadd.xlane.f32.xlu1 %v7817_v35  ;;  %14558 = vst [vmem:[#allocation148_spill] sm:$0xff] %v8458_v62  ;;  %v1572_v32 = vsel %vm1443_vm1, %v8458_v62, 0.0  ;;  %v1989_v29 = vmul.f32 %v8458_v62, %v8458_v62  ;;  %1431 = vmatmul.mubr.f32.gmra.mrb[116].mxu1 %v253_v28  ;;  %v8474_v35 = vpop.f32.mrb[64].mxu1 }
 0x182   :  { %14559 = vst [vmem:[#allocation149_spill] sm:$0xff] %v8474_v35  ;;  %v8477_v20 = vadd.f32 %v1572_v32, %v8449_v43  ;;  %v8481_v21 = vpop.f32.mrb[65].mxu1  ;;  %v2108_v32 = vmul.f32 %v8474_v35, %v8474_v35 }
 0x183   :  { %v8479_v33 = vpop.f32.mrb[66].mxu0  ;;  %14561 = vst [vmem:[#allocation151_spill] sm:$0xff] %v8481_v21  ;;  %v2292_v15 = vsel %vm1443_vm1, %v1989_v29, 0.0  ;;  %v1812_v36 = vsel %vm1443_vm1, %v8481_v21, 0.0  ;;  %v2109_v12 = vmul.f32 %v8481_v21, %v8481_v21  ;;  %v8502_v61 = vpop.f32.mrb[66].mxu1 }
 0x184   :  { %14560 = vst [vmem:[#allocation150_spill] sm:$0xff] %v8479_v33  ;;  %1510 = vadd.xlane.f32.xlu0 %v7837_v18  ;;  %v8486_v6 = vpop.f32.mrb[67].mxu0  ;;  %v8492_v28 = vadd.f32 %v2292_v15, %v1988_v63  ;;  %v1990_v29 = vmul.f32 %v8479_v33, %v8479_v33  ;;  %14563 = vst [vmem:[#allocation153_spill] sm:$0xff] %v8502_v61  ;;  %v8505_v62 = vadd.f32 %v1812_v36, %v8474_v35  ;;  %v8511_v21 = vpop.f32.mrb[67].mxu1 }
 0x185   :  { %2466 = vadd.xlane.f32.xlu1 %v7821_v54  ;;  %14562 = vst [vmem:[#allocation152_spill] sm:$0xff] %v8486_v6  ;;  %v1576_v54 = vsel %vm1443_vm1, %v8486_v6, 0.0  ;;  %v1991_v18 = vmul.f32 %v8486_v6, %v8486_v6  ;;  %v2532_v15 = vsel %vm1443_vm1, %v2109_v12, 0.0  ;;  %14564 = vst [vmem:[#allocation154_spill] sm:$0xff] %v8511_v21  ;;  %v1816_v6 = vsel %vm1443_vm1, %v8511_v21, 0.0 }
 0x186   :  { %v8508_v63 = vadd.f32 %v1576_v54, %v8479_v33  ;;  %v8513_v43 = vadd.f32 %v2532_v15, %v2108_v32  ;;  %v2111_v36 = vmul.f32 %v8511_v21, %v8511_v21  ;;  %v2110_v12 = vmul.f32 %v8502_v61, %v8502_v61 }
 0x187   :  { %v2296_v47 = vsel %vm1443_vm1, %v1991_v18, 0.0  ;;  %v8527_v32 = vadd.f32 %v1816_v6, %v8502_v61 }
 0x188   :  { %1750 = vadd.xlane.f32.xlu0 %v7840_v14  ;;  %v8522_v54 = vadd.f32 %v2296_v47, %v1990_v29  ;;  %v2536_v18 = vsel %vm1443_vm1, %v2111_v36, 0.0  ;;  %v8534_v14 = vpop.f32.mrb[68].mxu0  ;;  %v8549_v36 = vpop.f32.mrb[68].mxu1 }
 0x189   :  { %1514 = vadd.xlane.f32.xlu1 %v7875_v50  ;;  %v8530_v15 = vadd.f32 %v2536_v18, %v2110_v12  ;;  %14567 = vst [vmem:[#allocation157_spill] sm:$0xff] %v8534_v14  ;;  %v8536_v50 = vpop.f32.mrb[69].mxu0  ;;  %14570 = vst [vmem:[#allocation160_spill] sm:$0xff] %v8549_v36  ;;  %v8556_v18 = vpop.f32.mrb[69].mxu1 }
 0x18a   :  { %14565 = vst [vmem:[#allocation155_spill] sm:$0xff] %v8522_v54  ;;  %14568 = vst [vmem:[#allocation158_spill] sm:$0xff] %v8536_v50  ;;  %v1580_v47 = vsel %vm1443_vm1, %v8536_v50, 0.0  ;;  %v1993_v6 = vmul.f32 %v8536_v50, %v8536_v50  ;;  %v1820_v61 = vsel %vm1443_vm1, %v8556_v18, 0.0 }
 0x18b   :  { %14566 = vst [vmem:[#allocation156_spill] sm:$0xff] %v8530_v15  ;;  %v8551_v12 = vpop.f32.mrb[70].mxu0  ;;  %14573 = vst [vmem:[#allocation163_spill] sm:$0xff] %v8556_v18 }
 0x18c   :  { %2230 = vadd.xlane.f32.xlu0 %v7860_v1  ;;  %v1992_v1 = vmul.f32 %v8534_v14, %v8534_v14  ;;  %14571 = vst [vmem:[#allocation161_spill] sm:$0xff] %v8551_v12 }
 0x18d   :  { %1754 = vadd.xlane.f32.xlu1 %v7878_v45  ;;  %v8547_v45 = vadd.f32 %v1580_v47, %v8534_v14  ;;  %v2112_v14 = vmul.f32 %v8549_v36, %v8549_v36 }
 0x18f   :  { %14569 = vst [vmem:[#allocation159_spill] sm:$0xff] %v8547_v45 }
 0x190   :  { %2470 = vadd.xlane.f32.xlu0 %v7862_v22  ;;  %v2300_v22 = vsel %vm1443_vm1, %v1993_v6, 0.0 }
 0x191   :  { %2234 = vadd.xlane.f32.xlu1 %v7892_v39  ;;  %v1447_v29 = vpop.xlane.xlu0 %1446  ;;  %v8554_v39 = vpop.f32.mrb[71].mxu0  ;;  %v8558_v35 = vadd.f32 %v2300_v22, %v1992_v1  ;;  %v1994_v1 = vmul.f32 %v8551_v12, %v8551_v12 }
 0x192   :  { %14572 = vst [vmem:[#allocation162_spill] sm:$0xff] %v8554_v39  ;;  %v1584_v47 = vsel %vm1443_vm1, %v8554_v39, 0.0  ;;  %v1995_v21 = vmul.f32 %v8554_v39, %v8554_v39  ;;  %v8577_v22 = vmul.f32 0.0051020407, %v1447_v29  ;;  %v8579_v39 = vpop.f32.mrb[70].mxu1 }
 0x193   :  { %14574 = vst [vmem:[#allocation164_spill] sm:$0xff] %v8558_v35  ;;  %14576 = vst [vmem:[#allocation166_spill] sm:$0xff] %v8579_v39  ;;  %v8582_v33 = vadd.f32 %v1584_v47, %v8551_v12  ;;  %v8585_v45 = vpop.f32.mrb[71].mxu1 }
 0x194   :  { %1518 = vadd.xlane.f32.xlu0 %v7912_v23  ;;  %v8575_v23 = vadd.f32 %v1820_v61, %v8549_v36  ;;  %14575 = vst [vmem:[#allocation165_spill] sm:$0xff] %v8577_v22  ;;  %v2304_v35 = vsel %vm1443_vm1, %v1995_v21, 0.0  ;;  %14577 = vst [vmem:[#allocation167_spill] sm:$0xff] %v8585_v45  ;;  %v1824_v61 = vsel %vm1443_vm1, %v8585_v45, 0.0  ;;  %v2115_v29 = vmul.f32 %v8585_v45, %v8585_v45 }
 0x195   :  { %2474 = vadd.xlane.f32.xlu1 %v7896_v27  ;;  %v1691_v6 = vpop.xlane.xlu1 %1690  ;;  %v1687_v50 = vpop.xlane.xlu0 %1686  ;;  %v2113_v27 = vmul.f32 %v8556_v18, %v8556_v18  ;;  %v8588_v54 = vadd.f32 %v2304_v35, %v1994_v1  ;;  %v2114_v36 = vmul.f32 %v8579_v39, %v8579_v39  ;;  %v8601_v35 = vadd.f32 %v1824_v61, %v8579_v39 }
 0x196   :  { %v8596_v47 = vmul.f32 0.0051020407, %v1691_v6  ;;  %v2544_v6 = vsel %vm1443_vm1, %v2115_v29, 0.0  ;;  %v8632_v29 = vpop.f32.mrb[72].mxu0 }
 0x197   :  { %v2540_v15 = vsel %vm1443_vm1, %v2113_v27, 0.0  ;;  %14578 = vst [vmem:[#allocation168_spill] sm:$0xff] %v8588_v54  ;;  %v8614_v45 = vadd.f32 %v2544_v6, %v2114_v36  ;;  %14588 = vst [vmem:[#allocation178_spill] sm:$0xff] %v8632_v29  ;;  %v8634_v6 = vpop.f32.mrb[73].mxu0 }
 0x198   :  { %1758 = vadd.xlane.f32.xlu0 %v7915_v0  ;;  %14579 = vst [vmem:[#allocation169_spill] sm:$0xff] %v8596_v47  ;;  %v8603_v1 = vadd.f32 %v2540_v15, %v2112_v14  ;;  %v8607_v0 = vmul.f32 %v8577_v22, %v8577_v22  ;;  %v8622_v61 = vmul.f32 %v8596_v47, %v8596_v47  ;;  %14589 = vst [vmem:[#allocation179_spill] sm:$0xff] %v8634_v6  ;;  %v8651_v47 = vpop.f32.mrb[72].mxu1 }
 0x199   :  { %1522 = vadd.xlane.f32.xlu1 %v7956_v49  ;;  %v2167_v18 = vpop.xlane.xlu0 %2166  ;;  %v2171_v21 = vpop.xlane.xlu1 %2170  ;;  %v8609_v49 = vmul.f32 0.0051020407, %v1687_v50  ;;  %14583 = vst [vmem:[#allocation173_spill] sm:$0xff] %v8614_v45  ;;  %14592 = vst [vmem:[#allocation182_spill] sm:$0xff] %v8651_v47 }
 0x19a   :  { %14580 = vst [vmem:[#allocation170_spill] sm:$0xff] %v8607_v0  ;;  %v8611_v27 = vmul.f32 0.0051020407, %v2167_v18  ;;  %14584 = vst [vmem:[#allocation174_spill] sm:$0xff] %v8622_v61  ;;  %v8659_v22 = vmul.f32 0.0051020407, %v2171_v21  ;;  %v1996_v61 = vmul.f32 %v8632_v29, %v8632_v29 }
 0x19b   :  { %14581 = vst [vmem:[#allocation171_spill] sm:$0xff] %v8609_v49  ;;  %v8626_v50 = vmul.f32 %v8609_v49, %v8609_v49 }
 0x19c   :  { %14582 = vst [vmem:[#allocation172_spill] sm:$0xff] %v8611_v27  ;;  %2238 = vadd.xlane.f32.xlu0 %v7935_v5  ;;  %v1997_v5 = vmul.f32 %v8634_v6, %v8634_v6  ;;  %14596 = vst [vmem:[#allocation186_spill] sm:$0xff] %v8659_v22 }
 0x19d   :  { %1762 = vadd.xlane.f32.xlu1 %v7959_v25  ;;  %v2407_v15 = vpop.xlane.xlu0 %2406  ;;  %v2411_v14 = vpop.xlane.xlu1 %2410  ;;  %14585 = vst [vmem:[#allocation175_spill] sm:$0xff] %v8626_v50 }
 0x19e   :  { %v8628_v18 = vmul.f32 0.0051020407, %v2407_v15  ;;  %v8630_v36 = vmul.f32 0.0051020407, %v2411_v14  ;;  %v1588_v15 = vsel %vm1443_vm1, %v8634_v6, 0.0  ;;  %v8653_v25 = vpop.f32.mrb[74].mxu0 }
 0x19f   :  { %v8645_v39 = vadd.f32 %v1588_v15, %v8632_v29  ;;  %14593 = vst [vmem:[#allocation183_spill] sm:$0xff] %v8653_v25 }
 0x1a0   :  { %14586 = vst [vmem:[#allocation176_spill] sm:$0xff] %v8628_v18  ;;  %14587 = vst [vmem:[#allocation177_spill] sm:$0xff] %v8630_v36  ;;  %2478 = vadd.xlane.f32.xlu0 %v7937_v51  ;;  %v8655_v51 = vpop.f32.mrb[75].mxu0 }
 0x1a1   :  { %2242 = vadd.xlane.f32.xlu1 %v7981_v57  ;;  %v1451_v12 = vpop.xlane.xlu0 %1450  ;;  %v1455_v14 = vpop.xlane.xlu1 %1454  ;;  %14590 = vst [vmem:[#allocation180_spill] sm:$0xff] %v8645_v39  ;;  %14594 = vst [vmem:[#allocation184_spill] sm:$0xff] %v8655_v51 }
 0x1a2   :  { %v8647_v49 = vmul.f32 0.0051020407, %v1451_v12  ;;  %v8657_v57 = vpop.f32.mrb[73].mxu1  ;;  %v8665_v15 = vmul.f32 0.0051020407, %v1455_v14  ;;  %v1592_v12 = vsel %vm1443_vm1, %v8655_v51, 0.0 }
 0x1a3   :  { %14595 = vst [vmem:[#allocation185_spill] sm:$0xff] %v8657_v57  ;;  %v8675_v36 = vpop.f32.mrb[74].mxu1  ;;  %v2308_v14 = vsel %vm1443_vm1, %v1997_v5, 0.0  ;;  %v8687_v29 = vadd.f32 %v1592_v12, %v8653_v25  ;;  %v2116_v5 = vmul.f32 %v8651_v47, %v8651_v47 }
 0x1a4   :  { %14591 = vst [vmem:[#allocation181_spill] sm:$0xff] %v8647_v49  ;;  %v8663_v50 = vmul.f32 %v8647_v49, %v8647_v49  ;;  %14598 = vst [vmem:[#allocation188_spill] sm:$0xff] %v8665_v15  ;;  %1526 = vadd.xlane.f32.xlu0 %v8001_v55  ;;  %v1828_v55 = vsel %vm1443_vm1, %v8657_v57, 0.0  ;;  %v2117_v49 = vmul.f32 %v8657_v57, %v8657_v57  ;;  %v8684_v0 = vpop.f32.mrb[75].mxu1 }
 0x1a5   :  { %2482 = vadd.xlane.f32.xlu1 %v7985_v44  ;;  %v1695_v6 = vpop.xlane.xlu0 %1694  ;;  %v1459_v18 = vpop.xlane.xlu1 %1458  ;;  %14599 = vst [vmem:[#allocation189_spill] sm:$0xff] %v8675_v36  ;;  %v1999_v44 = vmul.f32 %v8655_v51, %v8655_v51  ;;  %14600 = vst [vmem:[#allocation190_spill] sm:$0xff] %v8684_v0  ;;  %v8691_v21 = vmul.f32 %v8665_v15, %v8665_v15  ;;  %v1998_v51 = vmul.f32 %v8653_v25, %v8653_v25 }
 0x1a6   :  { %14597 = vst [vmem:[#allocation187_spill] sm:$0xff] %v8663_v50  ;;  %14601 = vst [vmem:[#allocation191_spill] sm:$0xff] %v8687_v29  ;;  %v1832_v57 = vsel %vm1443_vm1, %v8684_v0, 0.0  ;;  %v2118_v50 = vmul.f32 %v8675_v36, %v8675_v36  ;;  %v2119_v15 = vmul.f32 %v8684_v0, %v8684_v0  ;;  %v8710_v22 = vmul.f32 0.0051020407, %v1695_v6 }
 0x1a7   :  { %14602 = vst [vmem:[#allocation192_spill] sm:$0xff] %v8691_v21  ;;  %v8712_v29 = vmul.f32 0.0051020407, %v1459_v18  ;;  %v8717_v39 = vadd.f32 %v1832_v57, %v8675_v36  ;;  %v2548_v45 = vsel %vm1443_vm1, %v2117_v49, 0.0  ;;  %v2312_v54 = vsel %vm1443_vm1, %v1999_v44, 0.0 }
 0x1a8   :  { %1766 = vadd.xlane.f32.xlu0 %v8004_v58  ;;  %v8706_v58 = vadd.f32 %v1828_v55, %v8651_v47  ;;  %14603 = vst [vmem:[#allocation193_spill] sm:$0xff] %v8710_v22  ;;  %v2552_v0 = vsel %vm1443_vm1, %v2119_v15, 0.0  ;;  %v8730_v57 = vadd.f32 %v2312_v54, %v1998_v51  ;;  %v8736_v15 = vmul.f32 %v8710_v22, %v8710_v22  ;;  %v8767_v54 = vpop.f32.mrb[76].mxu1 }
 0x1a9   :  { %1530 = vadd.xlane.f32.xlu1 %v8039_v42  ;;  %v2175_v27 = vpop.xlane.xlu0 %2174  ;;  %v1699_v12 = vpop.xlane.xlu1 %1698  ;;  %v8708_v42 = vadd.f32 %v2308_v14, %v1996_v61  ;;  %14604 = vst [vmem:[#allocation194_spill] sm:$0xff] %v8712_v29  ;;  %v8726_v61 = vadd.f32 %v2548_v45, %v2116_v5  ;;  %v8732_v49 = vadd.f32 %v2552_v0, %v2118_v50  ;;  %14615 = vst [vmem:[#allocation205_spill] sm:$0xff] %v8767_v54 }
 0x1aa   :  { %v8714_v25 = vmul.f32 0.0051020407, %v2175_v27  ;;  %v8728_v27 = vmul.f32 0.0051020407, %v1699_v12  ;;  %14607 = vst [vmem:[#allocation197_spill] sm:$0xff] %v8736_v15  ;;  %v8740_v14 = vmul.f32 %v8712_v29, %v8712_v29  ;;  %v8746_v45 = vpop.f32.mrb[76].mxu0 }
 0x1ab   :  { %14611 = vst [vmem:[#allocation201_spill] sm:$0xff] %v8746_v45  ;;  %v8748_v44 = vpop.f32.mrb[77].mxu0  ;;  %v8776_v55 = vpop.f32.mrb[77].mxu1 }
 0x1ac   :  { %14605 = vst [vmem:[#allocation195_spill] sm:$0xff] %v8714_v25  ;;  %2246 = vadd.xlane.f32.xlu0 %v8024_v53  ;;  %14606 = vst [vmem:[#allocation196_spill] sm:$0xff] %v8728_v27  ;;  %v1596_v50 = vsel %vm1443_vm1, %v8748_v44, 0.0  ;;  %v8769_v0 = vpop.f32.mrb[78].mxu0  ;;  %v8790_v29 = vpop.f32.mrb[78].mxu1  ;;  %v2001_v15 = vmul.f32 %v8748_v44, %v8748_v44 }
 0x1ad   :  { %1770 = vadd.xlane.f32.xlu1 %v8042_v46  ;;  %v2415_v18 = vpop.xlane.xlu0 %2414  ;;  %v2179_v6 = vpop.xlane.xlu1 %2178  ;;  %14608 = vst [vmem:[#allocation198_spill] sm:$0xff] %v8740_v14  ;;  %14612 = vst [vmem:[#allocation202_spill] sm:$0xff] %v8748_v44  ;;  %v8759_v12 = vadd.f32 %v1596_v50, %v8746_v45  ;;  %v135_v50 = vld [vmem:[%s13779_s1 + $0x3b0] sm:$0xff]  ;;  %v2120_v14 = vmul.f32 %v8767_v54, %v8767_v54 }
 0x1ae   :  { %v8742_v53 = vmul.f32 0.0051020407, %v2415_v18  ;;  %v8744_v46 = vmul.f32 0.0051020407, %v2179_v6  ;;  %v8763_v18 = vmul.f32 %v8728_v27, %v8728_v27  ;;  %14616 = vst [vmem:[#allocation206_spill] sm:$0xff] %v8769_v0  ;;  %14618 = vst [vmem:[#allocation208_spill] sm:$0xff] %v8776_v55  ;;  %v2000_v27 = vmul.f32 %v8746_v45, %v8746_v45 }
 0x1af   :  { %14620 = vst [vmem:[#allocation210_spill] sm:$0xff] %v8790_v29  ;;  %v2316_v25 = vsel %vm1443_vm1, %v2001_v15, 0.0 }
 0x1b0   :  { %14609 = vst [vmem:[#allocation199_spill] sm:$0xff] %v8742_v53  ;;  %14610 = vst [vmem:[#allocation200_spill] sm:$0xff] %v8744_v46  ;;  %2486 = vadd.xlane.f32.xlu0 %v8026_v2  ;;  %v8771_v2 = vpop.f32.mrb[79].mxu0  ;;  %v2122_v46 = vmul.f32 %v8790_v29, %v8790_v29 }
 0x1b1   :  { %2250 = vadd.xlane.f32.xlu1 %v8056_v13  ;;  %v2419_v51 = vpop.xlane.xlu1 %2418  ;;  %v1463_v5 = vpop.xlane.xlu0 %1462  ;;  %14613 = vst [vmem:[#allocation203_spill] sm:$0xff] %v8763_v18  ;;  %14617 = vst [vmem:[#allocation207_spill] sm:$0xff] %v8771_v2  ;;  %v136_v13 = vld [vmem:[%s13779_s1 + $0x3b8] sm:$0xff] }
 0x1b2   :  { %v8765_v6 = vmul.f32 0.0051020407, %v2419_v51  ;;  %v8783_v47 = vmul.f32 0.0051020407, %v1463_v5  ;;  %6068 = vmatprep.mubr.msk.f32.mxu0 %vm297_vm0, %v136_v13  ;;  %v1600_v5 = vsel %vm1443_vm1, %v8771_v2, 0.0  ;;  %v8800_v51 = vpop.f32.mrb[79].mxu1 }
 0x1b3   :  { %1077 = vmatmul.mubr.f32.gmra.mrb[118].mxu0 %v135_v50  ;;  %14621 = vst [vmem:[#allocation211_spill] sm:$0xff] %v8800_v51  ;;  %v256_v13 = vld [vmem:[%s13779_s1 + $0x778] sm:$0xff]  ;;  %v255_v50 = vld [vmem:[%s13779_s1 + $0x770] sm:$0xff]  ;;  %v1840_v53 = vsel %vm1443_vm1, %v8800_v51, 0.0  ;;  %v8837_v21 = vadd.f32 %v1600_v5, %v8769_v0  ;;  %v8852_v5 = vadd.f32 %v2316_v25, %v2000_v27  ;;  %v8870_v25 = vpop.f32.mrb[80].mxu0 }
 0x1b4   :  { %14614 = vst [vmem:[#allocation204_spill] sm:$0xff] %v8765_v6  ;;  %14619 = vst [vmem:[#allocation209_spill] sm:$0xff] %v8783_v47  ;;  %1534 = vadd.xlane.f32.xlu0 %v8076_v37  ;;  %v2121_v37 = vmul.f32 %v8776_v55, %v8776_v55  ;;  %v8810_v44 = vmul.f32 %v8783_v47, %v8783_v47  ;;  %v2002_v47 = vmul.f32 %v8769_v0, %v8769_v0  ;;  %v8874_v27 = vpop.f32.mrb[81].mxu0  ;;  %v14640_v0 = vld [vmem:[#allocation105_spill] sm:$0xff] }
 0x1b5   :  { %2490 = vadd.xlane.f32.xlu1 %v8060_v8  ;;  %v1703_v36 = vpop.xlane.xlu0 %1702  ;;  %v1467_v22 = vpop.xlane.xlu1 %1466  ;;  %v1836_v8 = vsel %vm1443_vm1, %v8776_v55, 0.0  ;;  %v2003_v55 = vmul.f32 %v8771_v2, %v8771_v2  ;;  %6128 = vmatprep.mubr.msk.f32.mxu1 %vm297_vm0, %v256_v13  ;;  %14631 = vst [vmem:[#allocation221_spill] sm:$0xff] %v8870_v25  ;;  %14632 = vst [vmem:[#allocation222_spill] sm:$0xff] %v8874_v27 }
 0x1b6   :  { %14622 = vst [vmem:[#allocation212_spill] sm:$0xff] %v8810_v44  ;;  %v8812_v45 = vmul.f32 0.0051020407, %v1703_v36  ;;  %v2123_v36 = vmul.f32 %v8800_v51, %v8800_v51  ;;  %1437 = vmatmul.mubr.f32.gmra.mrb[118].mxu1 %v255_v50  ;;  %v8841_v51 = vadd.f32 %v1840_v53, %v8790_v29  ;;  %v2556_v13 = vsel %vm1443_vm1, %v2121_v37, 0.0 }
 0x1b7   :  { %v2320_v15 = vsel %vm1443_vm1, %v2003_v55, 0.0  ;;  %v8857_v37 = vadd.f32 %v2556_v13, %v2120_v14  ;;  %v14639_v14 = vld [vmem:[#allocation102_spill] sm:$0xff] }
 0x1b8   :  { %14623 = vst [vmem:[#allocation213_spill] sm:$0xff] %v8812_v45  ;;  %1774 = vadd.xlane.f32.xlu0 %v8079_v24  ;;  %v8828_v24 = vadd.f32 %v1836_v8, %v8767_v54  ;;  %v8859_v54 = vadd.f32 %v2320_v15, %v2002_v47  ;;  %v2560_v29 = vsel %vm1443_vm1, %v2123_v36, 0.0 }
 0x1b9   :  { %1538 = vadd.xlane.f32.xlu1 %v8120_v41  ;;  %v2183_v18 = vpop.xlane.xlu0 %2182  ;;  %v1707_v6 = vpop.xlane.xlu1 %1706  ;;  %v8830_v41 = vmul.f32 0.0051020407, %v1467_v22  ;;  %v8846_v22 = vmul.f32 %v8812_v45, %v8812_v45  ;;  %v8872_v55 = vadd.f32 %v2560_v29, %v2122_v46 }
 0x1ba   :  { %v8832_v2 = vmul.f32 0.0051020407, %v2183_v18  ;;  %v8855_v8 = vmul.f32 0.0051020407, %v1707_v6  ;;  %v1604_v6 = vsel %vm1443_vm1, %v8874_v27, 0.0 }
 0x1bb   :  { %14624 = vst [vmem:[#allocation214_spill] sm:$0xff] %v8830_v41  ;;  %14626 = vst [vmem:[#allocation216_spill] sm:$0xff] %v8846_v22  ;;  %v8864_v18 = vmul.f32 %v8830_v41, %v8830_v41  ;;  %v8885_v29 = vadd.f32 %v1604_v6, %v8870_v25 }
 0x1bc   :  { %14625 = vst [vmem:[#allocation215_spill] sm:$0xff] %v8832_v2  ;;  %2254 = vadd.xlane.f32.xlu0 %v8099_v3  ;;  %14627 = vst [vmem:[#allocation217_spill] sm:$0xff] %v8855_v8  ;;  %v8889_v46 = vmul.f32 %v8855_v8, %v8855_v8  ;;  %v2004_v8 = vmul.f32 %v8870_v25, %v8870_v25 }
 0x1bd   :  { %1778 = vadd.xlane.f32.xlu1 %v8123_v11  ;;  %v2423_v53 = vpop.xlane.xlu0 %2422  ;;  %v2187_v50 = vpop.xlane.xlu1 %2186  ;;  %14628 = vst [vmem:[#allocation218_spill] sm:$0xff] %v8864_v18 }
 0x1be   :  { %v8866_v3 = vmul.f32 0.0051020407, %v2423_v53  ;;  %v8868_v11 = vmul.f32 0.0051020407, %v2187_v50  ;;  %14633 = vst [vmem:[#allocation223_spill] sm:$0xff] %v8889_v46  ;;  %v2005_v53 = vmul.f32 %v8874_v27, %v8874_v27 }
 0x1c0   :  { %14629 = vst [vmem:[#allocation219_spill] sm:$0xff] %v8866_v3  ;;  %14630 = vst [vmem:[#allocation220_spill] sm:$0xff] %v8868_v11  ;;  %2494 = vadd.xlane.f32.xlu0 %v8101_v48  ;;  %v8895_v48 = vpop.f32.mrb[80].mxu1  ;;  %v2324_v3 = vsel %vm1443_vm1, %v2005_v53, 0.0 }
 0x1c1   :  { %2258 = vadd.xlane.f32.xlu1 %v8147_v26  ;;  %v2427_v36 = vpop.xlane.xlu1 %2426  ;;  %v1471_v13 = vpop.xlane.xlu0 %1470  ;;  %14635 = vst [vmem:[#allocation225_spill] sm:$0xff] %v8895_v48  ;;  %v2124_v53 = vmul.f32 %v8895_v48, %v8895_v48 }
 0x1c2   :  { %v8891_v15 = vmul.f32 0.0051020407, %v2427_v36  ;;  %v8897_v26 = vpop.f32.mrb[82].mxu0  ;;  %v8901_v47 = vpop.f32.mrb[81].mxu1  ;;  %v8913_v41 = vmul.f32 0.0051020407, %v1471_v13 }
 0x1c3   :  { %14636 = vst [vmem:[#allocation226_spill] sm:$0xff] %v8897_v26  ;;  %v8899_v50 = vpop.f32.mrb[83].mxu0  ;;  %14638 = vst [vmem:[#allocation228_spill] sm:$0xff] %v8901_v47  ;;  %v8915_v22 = vpop.f32.mrb[82].mxu1  ;;  %v2125_v6 = vmul.f32 %v8901_v47, %v8901_v47  ;;  %v14646_v13 = vld [vmem:[#allocation103_spill] sm:$0xff]  ;;  %v2006_v25 = vmul.f32 %v8897_v26, %v8897_v26 }
 0x1c4   :  { %14634 = vst [vmem:[#allocation224_spill] sm:$0xff] %v8891_v15  ;;  %14637 = vst [vmem:[#allocation227_spill] sm:$0xff] %v8899_v50  ;;  %1542 = vadd.xlane.f32.xlu0 %v14640_v0  ;;  %v1608_v36 = vsel %vm1443_vm1, %v8899_v50, 0.0  ;;  %v1844_v0 = vsel %vm1443_vm1, %v8901_v47, 0.0  ;;  %v2126_v18 = vmul.f32 %v8915_v22, %v8915_v22  ;;  %v8948_v11 = vmul.f32 %v8913_v41, %v8913_v41 }
 0x1c5   :  { %2498 = vadd.xlane.f32.xlu1 %v14639_v14  ;;  %v8909_v45 = vpop.xlane.xlu0 %1710  ;;  %v1475_v27 = vpop.xlane.xlu1 %1474  ;;  %14642 = vst [vmem:[#allocation105_spill] sm:$0xff] %v8913_v41  ;;  %14643 = vst [vmem:[#allocation229_spill] sm:$0xff] %v8915_v22  ;;  %v2007_v14 = vmul.f32 %v8899_v50, %v8899_v50  ;;  %v8927_v46 = vadd.f32 %v1608_v36, %v8897_v26 }
 0x1c6   :  { %14641 = vst [vmem:[#allocation102_spill] sm:$0xff] %v8909_v45  ;;  %v8924_v45 = vpop.f32.mrb[83].mxu1  ;;  %14647 = vst [vmem:[#allocation103_spill] sm:$0xff] %v8948_v11  ;;  %v8950_v26 = vmul.f32 0.0051020407, %v1475_v27 }
 0x1c7   :  { %14644 = vst [vmem:[#allocation230_spill] sm:$0xff] %v8924_v45  ;;  %14645 = vst [vmem:[#allocation231_spill] sm:$0xff] %v8927_v46  ;;  %v1848_v50 = vsel %vm1443_vm1, %v8924_v45, 0.0  ;;  %v2127_v36 = vmul.f32 %v8924_v45, %v8924_v45  ;;  %v2564_v46 = vsel %vm1443_vm1, %v2125_v6, 0.0  ;;  %v2328_v45 = vsel %vm1443_vm1, %v2007_v14, 0.0 }
 0x1c8   :  { %1782 = vadd.xlane.f32.xlu0 %v14646_v13  ;;  %v8942_v13 = vadd.f32 %v1844_v0, %v8895_v48  ;;  %14648 = vst [vmem:[#allocation232_spill] sm:$0xff] %v8950_v26  ;;  %v8955_v2 = vadd.f32 %v1848_v50, %v8915_v22  ;;  %v8964_v27 = vadd.f32 %v2564_v46, %v2124_v53  ;;  %v14659_v53 = vld [vmem:[#allocation110_spill] sm:$0xff] }
 0x1c9   :  { %1546 = vadd.xlane.f32.xlu1 %v8203_v17  ;;  %v2191_v15 = vpop.xlane.xlu0 %2190  ;;  %v1715_v47 = vpop.xlane.xlu1 %1714  ;;  %v8944_v17 = vadd.f32 %v2324_v3, %v2004_v8  ;;  %v2568_v0 = vsel %vm1443_vm1, %v2127_v36, 0.0  ;;  %v14650_v3 = vld [vmem:[#allocation109_spill] sm:$0xff]  ;;  %v8968_v50 = vadd.f32 %v2328_v45, %v2006_v25  ;;  %v8974_v6 = vmul.f32 %v8950_v26, %v8950_v26  ;;  %v14660_v45 = vld [vmem:[#allocation114_spill] sm:$0xff] }
 0x1ca   :  { %v8952_v44 = vmul.f32 0.0051020407, %v2191_v15  ;;  %v8970_v22 = vadd.f32 %v2568_v0, %v2126_v18  ;;  %v8976_v14 = vmul.f32 0.0051020407, %v1715_v47 }
 0x1cb   :  { %14652 = vst [vmem:[#allocation234_spill] sm:$0xff] %v8968_v50  ;;  %14654 = vst [vmem:[#allocation236_spill] sm:$0xff] %v8974_v6 }
 0x1cc   :  { %14649 = vst [vmem:[#allocation233_spill] sm:$0xff] %v8952_v44  ;;  %2262 = vadd.xlane.f32.xlu0 %v14650_v3  ;;  %14653 = vst [vmem:[#allocation235_spill] sm:$0xff] %v8970_v22  ;;  %v8980_v3 = vpop.f32.mrb[84].mxu0 }
 0x1cd   :  { %1786 = vadd.xlane.f32.xlu1 %v8206_v10  ;;  %v8966_v15 = vpop.xlane.xlu0 %2430  ;;  %v2195_v48 = vpop.xlane.xlu1 %2194  ;;  %14655 = vst [vmem:[#allocation237_spill] sm:$0xff] %v8976_v14  ;;  %14657 = vst [vmem:[#allocation239_spill] sm:$0xff] %v8980_v3 }
 0x1ce   :  { %14651 = vst [vmem:[#allocation109_spill] sm:$0xff] %v8966_v15  ;;  %v8978_v36 = vmul.f32 0.0051020407, %v2195_v48  ;;  %v8982_v10 = vpop.f32.mrb[85].mxu0  ;;  %v8995_v48 = vmul.f32 %v8976_v14, %v8976_v14  ;;  %v2008_v15 = vmul.f32 %v8980_v3, %v8980_v3 }
 0x1cf   :  { %14658 = vst [vmem:[#allocation240_spill] sm:$0xff] %v8982_v10  ;;  %v1612_v18 = vsel %vm1443_vm1, %v8982_v10, 0.0  ;;  %v2009_v46 = vmul.f32 %v8982_v10, %v8982_v10 }
 0x1d0   :  { %14656 = vst [vmem:[#allocation238_spill] sm:$0xff] %v8978_v36  ;;  %2502 = vadd.xlane.f32.xlu0 %v14659_v53  ;;  %v8991_v47 = vadd.f32 %v1612_v18, %v8980_v3  ;;  %14662 = vst [vmem:[#allocation114_spill] sm:$0xff] %v8995_v48  ;;  %v9001_v53 = vpop.f32.mrb[84].mxu1 }
 0x1d1   :  { %2266 = vadd.xlane.f32.xlu1 %v14660_v45  ;;  %v2435_v25 = vpop.xlane.xlu1 %2434  ;;  %v1479_v0 = vpop.xlane.xlu0 %1478  ;;  %14664 = vst [vmem:[#allocation242_spill] sm:$0xff] %v9001_v53  ;;  %v2332_v11 = vsel %vm1443_vm1, %v2009_v46, 0.0  ;;  %v2128_v46 = vmul.f32 %v9001_v53, %v9001_v53 }
 0x1d2   :  { %14661 = vst [vmem:[#allocation110_spill] sm:$0xff] %v8991_v47  ;;  %v8997_v8 = vmul.f32 0.0051020407, %v2435_v25  ;;  %v9003_v45 = vpop.f32.mrb[86].mxu0  ;;  %v9007_v26 = vpop.f32.mrb[85].mxu1 }
 0x1d3   :  { %14665 = vst [vmem:[#allocation243_spill] sm:$0xff] %v9003_v45  ;;  %v9005_v41 = vpop.f32.mrb[87].mxu0  ;;  %14667 = vst [vmem:[#allocation245_spill] sm:$0xff] %v9007_v26  ;;  %v9019_v6 = vmul.f32 0.0051020407, %v1479_v0  ;;  %v9021_v36 = vpop.f32.mrb[86].mxu1  ;;  %v2129_v18 = vmul.f32 %v9007_v26, %v9007_v26  ;;  %v2010_v3 = vmul.f32 %v9003_v45, %v9003_v45 }
 0x1d4   :  { %14663 = vst [vmem:[#allocation241_spill] sm:$0xff] %v8997_v8  ;;  %14666 = vst [vmem:[#allocation244_spill] sm:$0xff] %v9005_v41  ;;  %1550 = vadd.xlane.f32.xlu0 %v8242_v56  ;;  %v1616_v25 = vsel %vm1443_vm1, %v9005_v41, 0.0  ;;  %v1852_v56 = vsel %vm1443_vm1, %v9007_v26, 0.0  ;;  %v14673_v0 = vld [vmem:[#allocation116_spill] sm:$0xff]  ;;  %v2130_v44 = vmul.f32 %v9021_v36, %v9021_v36 }
 0x1d5   :  { %2506 = vadd.xlane.f32.xlu1 %v8239_v38  ;;  %v9015_v14 = vpop.xlane.xlu0 %1718  ;;  %v1483_v10 = vpop.xlane.xlu1 %1482  ;;  %14669 = vst [vmem:[#allocation247_spill] sm:$0xff] %v9019_v6  ;;  %14670 = vst [vmem:[#allocation248_spill] sm:$0xff] %v9021_v36  ;;  %v2011_v38 = vmul.f32 %v9005_v41, %v9005_v41  ;;  %v9033_v48 = vadd.f32 %v1616_v25, %v9003_v45  ;;  %v2572_v50 = vsel %vm1443_vm1, %v2129_v18, 0.0 }
 0x1d6   :  { %14668 = vst [vmem:[#allocation246_spill] sm:$0xff] %v9015_v14  ;;  %v9030_v14 = vpop.f32.mrb[87].mxu1  ;;  %v9056_v45 = vmul.f32 0.0051020407, %v1483_v10  ;;  %v9070_v10 = vadd.f32 %v2572_v50, %v2128_v46  ;;  %v14686_v46 = vld [vmem:[#allocation122_spill] sm:$0xff] }
 0x1d7   :  { %14671 = vst [vmem:[#allocation249_spill] sm:$0xff] %v9030_v14  ;;  %14672 = vst [vmem:[#allocation250_spill] sm:$0xff] %v9033_v48  ;;  %v1856_v41 = vsel %vm1443_vm1, %v9030_v14, 0.0  ;;  %v2131_v25 = vmul.f32 %v9030_v14, %v9030_v14  ;;  %v9054_v48 = vmul.f32 %v9019_v6, %v9019_v6  ;;  %v2336_v14 = vsel %vm1443_vm1, %v2011_v38, 0.0 }
 0x1d8   :  { %1790 = vadd.xlane.f32.xlu0 %v14673_v0  ;;  %v9048_v0 = vadd.f32 %v1852_v56, %v9001_v53  ;;  %14675 = vst [vmem:[#allocation251_spill] sm:$0xff] %v9056_v45  ;;  %v9061_v22 = vadd.f32 %v1856_v41, %v9021_v36  ;;  %v9074_v41 = vadd.f32 %v2336_v14, %v2010_v3  ;;  %v14687_v14 = vld [vmem:[#allocation126_spill] sm:$0xff] }
 0x1d9   :  { %1554 = vadd.xlane.f32.xlu1 %v8284_v40  ;;  %v2199_v8 = vpop.xlane.xlu0 %2198  ;;  %v1723_v26 = vpop.xlane.xlu1 %1722  ;;  %v9050_v40 = vadd.f32 %v2332_v11, %v2008_v15  ;;  %14674 = vst [vmem:[#allocation116_spill] sm:$0xff] %v9054_v48  ;;  %v2576_v56 = vsel %vm1443_vm1, %v2131_v25, 0.0  ;;  %v14677_v15 = vld [vmem:[#allocation121_spill] sm:$0xff]  ;;  %v9080_v18 = vmul.f32 %v9056_v45, %v9056_v45 }
 0x1da   :  { %v9058_v47 = vmul.f32 0.0051020407, %v2199_v8  ;;  %14679 = vst [vmem:[#allocation253_spill] sm:$0xff] %v9074_v41  ;;  %v9076_v36 = vadd.f32 %v2576_v56, %v2130_v44  ;;  %v9082_v38 = vmul.f32 0.0051020407, %v1723_v26 }
 0x1db   :  { %14681 = vst [vmem:[#allocation255_spill] sm:$0xff] %v9080_v18 }
 0x1dc   :  { %14676 = vst [vmem:[#allocation252_spill] sm:$0xff] %v9058_v47  ;;  %2270 = vadd.xlane.f32.xlu0 %v14677_v15  ;;  %14680 = vst [vmem:[#allocation254_spill] sm:$0xff] %v9076_v36  ;;  %v9086_v15 = vpop.f32.mrb[88].mxu0 }
 0x1dd   :  { %1794 = vadd.xlane.f32.xlu1 %v8287_v7  ;;  %v9072_v8 = vpop.xlane.xlu0 %2438  ;;  %v2203_v53 = vpop.xlane.xlu1 %2202  ;;  %14682 = vst [vmem:[#allocation256_spill] sm:$0xff] %v9082_v38  ;;  %14684 = vst [vmem:[#allocation258_spill] sm:$0xff] %v9086_v15 }
 0x1de   :  { %14678 = vst [vmem:[#allocation121_spill] sm:$0xff] %v9072_v8  ;;  %v9084_v25 = vmul.f32 0.0051020407, %v2203_v53  ;;  %v9088_v7 = vpop.f32.mrb[89].mxu0  ;;  %v9101_v53 = vmul.f32 %v9082_v38, %v9082_v38  ;;  %v2012_v8 = vmul.f32 %v9086_v15, %v9086_v15 }
 0x1df   :  { %14685 = vst [vmem:[#allocation259_spill] sm:$0xff] %v9088_v7  ;;  %v1620_v44 = vsel %vm1443_vm1, %v9088_v7, 0.0  ;;  %v2013_v50 = vmul.f32 %v9088_v7, %v9088_v7 }
 0x1e0   :  { %14683 = vst [vmem:[#allocation257_spill] sm:$0xff] %v9084_v25  ;;  %2510 = vadd.xlane.f32.xlu0 %v14686_v46  ;;  %v9097_v26 = vadd.f32 %v1620_v44, %v9086_v15  ;;  %14689 = vst [vmem:[#allocation126_spill] sm:$0xff] %v9101_v53  ;;  %v9107_v46 = vpop.f32.mrb[88].mxu1 }
 0x1e1   :  { %2274 = vadd.xlane.f32.xlu1 %v14687_v14  ;;  %v2443_v3 = vpop.xlane.xlu1 %2442  ;;  %v1487_v56 = vpop.xlane.xlu0 %1486  ;;  %14691 = vst [vmem:[#allocation261_spill] sm:$0xff] %v9107_v46  ;;  %v2340_v18 = vsel %vm1443_vm1, %v2013_v50, 0.0  ;;  %v2132_v50 = vmul.f32 %v9107_v46, %v9107_v46 }
 0x1e2   :  { %14688 = vst [vmem:[#allocation122_spill] sm:$0xff] %v9097_v26  ;;  %v9103_v11 = vmul.f32 0.0051020407, %v2443_v3  ;;  %v9109_v14 = vpop.f32.mrb[90].mxu0  ;;  %v9113_v45 = vpop.f32.mrb[89].mxu1 }
 0x1e3   :  { %14692 = vst [vmem:[#allocation262_spill] sm:$0xff] %v9109_v14  ;;  %v9111_v6 = vpop.f32.mrb[91].mxu0  ;;  %14694 = vst [vmem:[#allocation264_spill] sm:$0xff] %v9113_v45  ;;  %v9125_v48 = vmul.f32 0.0051020407, %v1487_v56  ;;  %v9127_v47 = vpop.f32.mrb[90].mxu1  ;;  %v2133_v44 = vmul.f32 %v9113_v45, %v9113_v45  ;;  %v2014_v15 = vmul.f32 %v9109_v14, %v9109_v14 }
 0x1e4   :  { %14690 = vst [vmem:[#allocation260_spill] sm:$0xff] %v9103_v11  ;;  %14693 = vst [vmem:[#allocation263_spill] sm:$0xff] %v9111_v6  ;;  %1558 = vadd.xlane.f32.xlu0 %v8331_v30  ;;  %v1624_v3 = vsel %vm1443_vm1, %v9111_v6, 0.0  ;;  %v1860_v30 = vsel %vm1443_vm1, %v9113_v45, 0.0  ;;  %v14700_v56 = vld [vmem:[#allocation128_spill] sm:$0xff]  ;;  %v2134_v25 = vmul.f32 %v9127_v47, %v9127_v47 }
 0x1e5   :  { %2514 = vadd.xlane.f32.xlu1 %v8328_v9  ;;  %v9121_v38 = vpop.xlane.xlu0 %1726  ;;  %v1491_v7 = vpop.xlane.xlu1 %1490  ;;  %14696 = vst [vmem:[#allocation266_spill] sm:$0xff] %v9125_v48  ;;  %14697 = vst [vmem:[#allocation267_spill] sm:$0xff] %v9127_v47  ;;  %v2015_v9 = vmul.f32 %v9111_v6, %v9111_v6  ;;  %v9139_v53 = vadd.f32 %v1624_v3, %v9109_v14  ;;  %v2580_v41 = vsel %vm1443_vm1, %v2133_v44, 0.0 }
 0x1e6   :  { %14695 = vst [vmem:[#allocation265_spill] sm:$0xff] %v9121_v38  ;;  %v9136_v38 = vpop.f32.mrb[91].mxu1  ;;  %v9162_v14 = vmul.f32 0.0051020407, %v1491_v7  ;;  %v9176_v7 = vadd.f32 %v2580_v41, %v2132_v50  ;;  %v14714_v50 = vld [vmem:[#allocation134_spill] sm:$0xff] }
 0x1e7   :  { %14698 = vst [vmem:[#allocation268_spill] sm:$0xff] %v9136_v38  ;;  %14699 = vst [vmem:[#allocation269_spill] sm:$0xff] %v9139_v53  ;;  %v1864_v6 = vsel %vm1443_vm1, %v9136_v38, 0.0  ;;  %v2135_v3 = vmul.f32 %v9136_v38, %v9136_v38  ;;  %v9160_v53 = vmul.f32 %v9125_v48, %v9125_v48  ;;  %v2344_v38 = vsel %vm1443_vm1, %v2015_v9, 0.0 }
 0x1e8   :  { %1798 = vadd.xlane.f32.xlu0 %v14700_v56  ;;  %v9154_v56 = vadd.f32 %v1860_v30, %v9107_v46  ;;  %14702 = vst [vmem:[#allocation270_spill] sm:$0xff] %v9162_v14  ;;  %v9167_v36 = vadd.f32 %v1864_v6, %v9127_v47  ;;  %v9180_v6 = vadd.f32 %v2344_v38, %v2014_v15  ;;  %v14715_v38 = vld [vmem:[#allocation138_spill] sm:$0xff] }
 0x1e9   :  { %1562 = vadd.xlane.f32.xlu1 %v8367_v19  ;;  %v2207_v11 = vpop.xlane.xlu0 %2206  ;;  %v1731_v45 = vpop.xlane.xlu1 %1730  ;;  %v9156_v19 = vadd.f32 %v2340_v18, %v2012_v8  ;;  %14701 = vst [vmem:[#allocation128_spill] sm:$0xff] %v9160_v53  ;;  %v2584_v30 = vsel %vm1443_vm1, %v2135_v3, 0.0  ;;  %v14704_v18 = vld [vmem:[#allocation133_spill] sm:$0xff]  ;;  %v9186_v44 = vmul.f32 %v9162_v14, %v9162_v14 }
 0x1ea   :  { %v9164_v26 = vmul.f32 0.0051020407, %v2207_v11  ;;  %14705 = vst [vmem:[#allocation133_spill] sm:$0xff] %v9176_v7  ;;  %14707 = vst [vmem:[#allocation273_spill] sm:$0xff] %v9180_v6  ;;  %v9182_v47 = vadd.f32 %v2584_v30, %v2134_v25  ;;  %v9188_v9 = vmul.f32 0.0051020407, %v1731_v45 }
 0x1eb   :  { %14709 = vst [vmem:[#allocation275_spill] sm:$0xff] %v9186_v44 }
 0x1ec   :  { %14703 = vst [vmem:[#allocation271_spill] sm:$0xff] %v9164_v26  ;;  %2278 = vadd.xlane.f32.xlu0 %v14704_v18  ;;  %14708 = vst [vmem:[#allocation274_spill] sm:$0xff] %v9182_v47  ;;  %v9192_v18 = vpop.f32.mrb[92].mxu0 }
 0x1ed   :  { %1802 = vadd.xlane.f32.xlu1 %v8370_v52  ;;  %v9178_v11 = vpop.xlane.xlu0 %2446  ;;  %v2211_v46 = vpop.xlane.xlu1 %2210  ;;  %14710 = vst [vmem:[#allocation276_spill] sm:$0xff] %v9188_v9  ;;  %14712 = vst [vmem:[#allocation278_spill] sm:$0xff] %v9192_v18  ;;  %v2016_v53 = vmul.f32 %v9192_v18, %v9192_v18 }
 0x1ee   :  { %14706 = vst [vmem:[#allocation272_spill] sm:$0xff] %v9178_v11  ;;  %v9190_v3 = vmul.f32 0.0051020407, %v2211_v46  ;;  %v9194_v52 = vpop.f32.mrb[93].mxu0  ;;  %v9207_v46 = vmul.f32 %v9188_v9, %v9188_v9  ;;  %v14723_v9 = vld [vmem:[#allocation140_spill] sm:$0xff] }
 0x1ef   :  { %14713 = vst [vmem:[#allocation279_spill] sm:$0xff] %v9194_v52  ;;  %v1628_v25 = vsel %vm1443_vm1, %v9194_v52, 0.0  ;;  %v2017_v41 = vmul.f32 %v9194_v52, %v9194_v52 }
 0x1f0   :  { %14711 = vst [vmem:[#allocation277_spill] sm:$0xff] %v9190_v3  ;;  %2518 = vadd.xlane.f32.xlu0 %v14714_v50  ;;  %v9203_v45 = vadd.f32 %v1628_v25, %v9192_v18  ;;  %14717 = vst [vmem:[#allocation138_spill] sm:$0xff] %v9207_v46 }
 0x1f1   :  { %2282 = vadd.xlane.f32.xlu1 %v14715_v38  ;;  %v2451_v15 = vpop.xlane.xlu1 %2450  ;;  %v1495_v30 = vpop.xlane.xlu0 %1494  ;;  %v2348_v3 = vsel %vm1443_vm1, %v2017_v41, 0.0 }
 0x1f2   :  { %14716 = vst [vmem:[#allocation134_spill] sm:$0xff] %v9203_v45  ;;  %v9209_v8 = vmul.f32 0.0051020407, %v2451_v15  ;;  %v9213_v50 = vpop.f32.mrb[92].mxu1  ;;  %v9215_v38 = vpop.f32.mrb[94].mxu0 }
 0x1f3   :  { %14719 = vst [vmem:[#allocation281_spill] sm:$0xff] %v9213_v50  ;;  %14720 = vst [vmem:[#allocation282_spill] sm:$0xff] %v9215_v38  ;;  %v9217_v48 = vpop.f32.mrb[95].mxu0  ;;  %v9219_v14 = vpop.f32.mrb[93].mxu1  ;;  %v9231_v26 = vmul.f32 0.0051020407, %v1495_v30  ;;  %v2136_v41 = vmul.f32 %v9213_v50, %v9213_v50  ;;  %v2018_v18 = vmul.f32 %v9215_v38, %v9215_v38 }
 0x1f4   :  { %14718 = vst [vmem:[#allocation280_spill] sm:$0xff] %v9209_v8  ;;  %14721 = vst [vmem:[#allocation283_spill] sm:$0xff] %v9217_v48  ;;  %1566 = vadd.xlane.f32.xlu0 %v14723_v9  ;;  %v1632_v15 = vsel %vm1443_vm1, %v9217_v48, 0.0  ;;  %v1868_v9 = vsel %vm1443_vm1, %v9219_v14, 0.0  ;;  %v2137_v25 = vmul.f32 %v9219_v14, %v9219_v14  ;;  %v14729_v30 = vld [vmem:[#allocation141_spill] sm:$0xff] }
 0x1f5   :  { %14722 = vst [vmem:[#allocation284_spill] sm:$0xff] %v9219_v14  ;;  %2522 = vadd.xlane.f32.xlu1 %v8400_v16  ;;  %v9227_v11 = vpop.xlane.xlu0 %1734  ;;  %v1499_v52 = vpop.xlane.xlu1 %1498  ;;  %14725 = vst [vmem:[#allocation285_spill] sm:$0xff] %v9231_v26  ;;  %v2019_v16 = vmul.f32 %v9217_v48, %v9217_v48  ;;  %v9245_v46 = vadd.f32 %v1632_v15, %v9215_v38 }
 0x1f6   :  { %14724 = vst [vmem:[#allocation140_spill] sm:$0xff] %v9227_v11  ;;  %v9233_v44 = vpop.f32.mrb[94].mxu1  ;;  %v9268_v38 = vmul.f32 0.0051020407, %v1499_v52  ;;  %v2588_v7 = vsel %vm1443_vm1, %v2137_v25, 0.0 }
 0x1f7   :  { %14726 = vst [vmem:[#allocation286_spill] sm:$0xff] %v9233_v44  ;;  %v9242_v11 = vpop.f32.mrb[95].mxu1  ;;  %14728 = vst [vmem:[#allocation288_spill] sm:$0xff] %v9245_v46  ;;  %v2138_v45 = vmul.f32 %v9233_v44, %v9233_v44  ;;  %v9266_v46 = vmul.f32 %v9231_v26, %v9231_v26  ;;  %v9282_v52 = vadd.f32 %v2588_v7, %v2136_v41 }
 0x1f8   :  { %14727 = vst [vmem:[#allocation287_spill] sm:$0xff] %v9242_v11  ;;  %1806 = vadd.xlane.f32.xlu0 %v14729_v30  ;;  %v1872_v48 = vsel %vm1443_vm1, %v9242_v11, 0.0  ;;  %v2139_v15 = vmul.f32 %v9242_v11, %v9242_v11  ;;  %v9260_v30 = vadd.f32 %v1868_v9, %v9213_v50  ;;  %14731 = vst [vmem:[#allocation289_spill] sm:$0xff] %v9268_v38  ;;  %v2352_v11 = vsel %vm1443_vm1, %v2019_v16, 0.0 }
 0x1f9   :  { %1570 = vadd.xlane.f32.xlu1 %v8442_v31  ;;  %v2215_v8 = vpop.xlane.xlu0 %2214  ;;  %v1739_v14 = vpop.xlane.xlu1 %1738  ;;  %v9262_v31 = vadd.f32 %v2348_v3, %v2016_v53  ;;  %14730 = vst [vmem:[#allocation141_spill] sm:$0xff] %v9266_v46  ;;  %v9273_v6 = vadd.f32 %v1872_v48, %v9233_v44  ;;  %v14733_v3 = vld [vmem:[#allocation146_spill] sm:$0xff]  ;;  %v9286_v48 = vadd.f32 %v2352_v11, %v2018_v18 }
 0x1fa   :  { %v9270_v47 = vmul.f32 0.0051020407, %v2215_v8  ;;  %v2592_v9 = vsel %vm1443_vm1, %v2139_v15, 0.0  ;;  %v9292_v25 = vmul.f32 %v9268_v38, %v9268_v38  ;;  %v9294_v16 = vmul.f32 0.0051020407, %v1739_v14 }
 0x1fb   :  { %v9288_v44 = vadd.f32 %v2592_v9, %v2138_v45 }
 0x1fc   :  { %14732 = vst [vmem:[#allocation290_spill] sm:$0xff] %v9270_v47  ;;  %2286 = vadd.xlane.f32.xlu0 %v14733_v3  ;;  %14735 = vst [vmem:[#allocation291_spill] sm:$0xff] %v9292_v25 }
 0x1fd   :  { %1810 = vadd.xlane.f32.xlu1 %v8445_v34  ;;  %v9284_v8 = vpop.xlane.xlu0 %2454  ;;  %14736 = vst [vmem:[#allocation292_spill] sm:$0xff] %v9294_v16 }
 0x1fe   :  { %14734 = vst [vmem:[#allocation146_spill] sm:$0xff] %v9284_v8  ;;  %v2219_v50 = vpop.xlane.xlu1 %2218  ;;  %v9298_v3 = vpop.f32.mrb[96].mxu0 }
 0x1ff   :  { %v9296_v15 = vmul.f32 0.0051020407, %v2219_v50  ;;  %14738 = vst [vmem:[#allocation294_spill] sm:$0xff] %v9298_v3  ;;  %v9300_v34 = vpop.f32.mrb[97].mxu0  ;;  %v9313_v50 = vmul.f32 %v9294_v16, %v9294_v16  ;;  %v2020_v26 = vmul.f32 %v9298_v3, %v9298_v3 }
 0x200   :  { %14739 = vst [vmem:[#allocation295_spill] sm:$0xff] %v9300_v34  ;;  %2526 = vadd.xlane.f32.xlu0 %v8447_v4  ;;  %v1636_v11 = vsel %vm1443_vm1, %v9300_v34, 0.0  ;;  %v2021_v9 = vmul.f32 %v9300_v34, %v9300_v34 }
 0x201   :  { %14737 = vst [vmem:[#allocation293_spill] sm:$0xff] %v9296_v15  ;;  %2290 = vadd.xlane.f32.xlu1 %v8463_v59  ;;  %v1503_v45 = vpop.xlane.xlu0 %1502  ;;  %v9309_v14 = vadd.f32 %v1636_v11, %v9298_v3  ;;  %14740 = vst [vmem:[#allocation296_spill] sm:$0xff] %v9313_v50 }
 0x202   :  { %v2459_v18 = vpop.xlane.xlu1 %2458  ;;  %v9319_v4 = vpop.f32.mrb[96].mxu1  ;;  %v9337_v38 = vmul.f32 0.0051020407, %v1503_v45  ;;  %v2356_v46 = vsel %vm1443_vm1, %v2021_v9, 0.0 }
 0x203   :  { %v9315_v41 = vmul.f32 0.0051020407, %v2459_v18  ;;  %14742 = vst [vmem:[#allocation298_spill] sm:$0xff] %v9319_v4  ;;  %v9321_v59 = vpop.f32.mrb[98].mxu0  ;;  %v9325_v7 = vpop.f32.mrb[97].mxu1  ;;  %v2140_v45 = vmul.f32 %v9319_v4, %v9319_v4 }
 0x204   :  { %14743 = vst [vmem:[#allocation299_spill] sm:$0xff] %v9321_v59  ;;  %v9323_v53 = vpop.f32.mrb[99].mxu0  ;;  %14745 = vst [vmem:[#allocation301_spill] sm:$0xff] %v9325_v7  ;;  %1574 = vadd.xlane.f32.xlu0 %v8477_v20  ;;  %v1876_v20 = vsel %vm1443_vm1, %v9325_v7, 0.0  ;;  %v2141_v11 = vmul.f32 %v9325_v7, %v9325_v7  ;;  %v2022_v9 = vmul.f32 %v9321_v59, %v9321_v59 }
 0x205   :  { %14741 = vst [vmem:[#allocation297_spill] sm:$0xff] %v9315_v41  ;;  %14744 = vst [vmem:[#allocation300_spill] sm:$0xff] %v9323_v53  ;;  %2530 = vadd.xlane.f32.xlu1 %v8465_v60  ;;  %v1640_v18 = vsel %vm1443_vm1, %v9323_v53, 0.0  ;;  %v9333_v16 = vpop.xlane.xlu0 %1742  ;;  %v2023_v60 = vmul.f32 %v9323_v53, %v9323_v53  ;;  %v9372_v47 = vmul.f32 %v9337_v38, %v9337_v38 }
 0x206   :  { %14746 = vst [vmem:[#allocation302_spill] sm:$0xff] %v9333_v16  ;;  %v1507_v34 = vpop.xlane.xlu1 %1506  ;;  %14747 = vst [vmem:[#allocation303_spill] sm:$0xff] %v9337_v38  ;;  %v9339_v8 = vpop.f32.mrb[98].mxu1  ;;  %v9351_v50 = vadd.f32 %v1640_v18, %v9321_v59  ;;  %v14769_v38 = vld [vmem:[#allocation156_spill] sm:$0xff] }
 0x207   :  { %14748 = vst [vmem:[#allocation304_spill] sm:$0xff] %v9339_v8  ;;  %v9348_v16 = vpop.f32.mrb[99].mxu1  ;;  %v2142_v41 = vmul.f32 %v9339_v8, %v9339_v8  ;;  %14751 = vst [vmem:[#allocation307_spill] sm:$0xff] %v9372_v47  ;;  %v9374_v59 = vmul.f32 0.0051020407, %v1507_v34 }
 0x208   :  { %14749 = vst [vmem:[#allocation305_spill] sm:$0xff] %v9348_v16  ;;  %14750 = vst [vmem:[#allocation306_spill] sm:$0xff] %v9351_v50  ;;  %1814 = vadd.xlane.f32.xlu0 %v8505_v62  ;;  %v1880_v3 = vsel %vm1443_vm1, %v9348_v16, 0.0  ;;  %v2143_v18 = vmul.f32 %v9348_v16, %v9348_v16  ;;  %v9366_v62 = vadd.f32 %v1876_v20, %v9319_v4  ;;  %v2596_v50 = vsel %vm1443_vm1, %v2141_v11, 0.0 }
 0x209   :  { %1578 = vadd.xlane.f32.xlu1 %v8508_v63  ;;  %v2223_v53 = vpop.xlane.xlu0 %2222  ;;  %v9368_v63 = vadd.f32 %v2356_v46, %v2020_v26  ;;  %14752 = vst [vmem:[#allocation308_spill] sm:$0xff] %v9374_v59  ;;  %v9379_v15 = vadd.f32 %v1880_v3, %v9339_v8  ;;  %v2360_v16 = vsel %vm1443_vm1, %v2023_v60, 0.0  ;;  %v9388_v46 = vadd.f32 %v2596_v50, %v2140_v45 }
 0x20a   :  { %v1747_v7 = vpop.xlane.xlu1 %1746  ;;  %v9376_v25 = vmul.f32 0.0051020407, %v2223_v53  ;;  %v2600_v20 = vsel %vm1443_vm1, %v2143_v18, 0.0  ;;  %v9392_v3 = vadd.f32 %v2360_v16, %v2022_v9  ;;  %v9398_v11 = vmul.f32 %v9374_v59, %v9374_v59  ;;  %v14761_v16 = vld [vmem:[#allocation155_spill] sm:$0xff] }
 0x20b   :  { %v9394_v4 = vadd.f32 %v2600_v20, %v2142_v41  ;;  %v9400_v60 = vmul.f32 0.0051020407, %v1747_v7 }
 0x20c   :  { %14753 = vst [vmem:[#allocation309_spill] sm:$0xff] %v9376_v25  ;;  %2294 = vadd.xlane.f32.xlu0 %v8492_v28  ;;  %14756 = vst [vmem:[#allocation312_spill] sm:$0xff] %v9398_v11 }
 0x20d   :  { %1818 = vadd.xlane.f32.xlu1 %v8527_v32  ;;  %v9390_v53 = vpop.xlane.xlu0 %2462  ;;  %14755 = vst [vmem:[#allocation311_spill] sm:$0xff] %v9394_v4  ;;  %14757 = vst [vmem:[#allocation313_spill] sm:$0xff] %v9400_v60  ;;  %v9419_v20 = vmul.f32 %v9400_v60, %v9400_v60  ;;  %v14770_v60 = vld [vmem:[#allocation159_spill] sm:$0xff] }
 0x20e   :  { %14754 = vst [vmem:[#allocation310_spill] sm:$0xff] %v9390_v53  ;;  %v2227_v34 = vpop.xlane.xlu1 %2226  ;;  %v9404_v28 = vpop.f32.mrb[100].mxu0 }
 0x20f   :  { %v9402_v18 = vmul.f32 0.0051020407, %v2227_v34  ;;  %14759 = vst [vmem:[#allocation315_spill] sm:$0xff] %v9404_v28  ;;  %v9406_v32 = vpop.f32.mrb[101].mxu0  ;;  %14763 = vst [vmem:[#allocation317_spill] sm:$0xff] %v9419_v20  ;;  %v2024_v53 = vmul.f32 %v9404_v28, %v9404_v28 }
 0x210   :  { %14760 = vst [vmem:[#allocation316_spill] sm:$0xff] %v9406_v32  ;;  %2534 = vadd.xlane.f32.xlu0 %v8513_v43  ;;  %v1644_v41 = vsel %vm1443_vm1, %v9406_v32, 0.0  ;;  %v2025_v26 = vmul.f32 %v9406_v32, %v9406_v32 }
 0x211   :  { %14758 = vst [vmem:[#allocation314_spill] sm:$0xff] %v9402_v18  ;;  %2298 = vadd.xlane.f32.xlu1 %v14761_v16  ;;  %v1511_v9 = vpop.xlane.xlu0 %1510  ;;  %v9415_v7 = vadd.f32 %v1644_v41, %v9404_v28 }
 0x212   :  { %v2467_v45 = vpop.xlane.xlu1 %2466  ;;  %v9425_v43 = vpop.f32.mrb[100].mxu1  ;;  %v9443_v47 = vmul.f32 0.0051020407, %v1511_v9  ;;  %v2364_v11 = vsel %vm1443_vm1, %v2025_v26, 0.0 }
 0x213   :  { %14762 = vst [vmem:[#allocation155_spill] sm:$0xff] %v9415_v7  ;;  %v9421_v34 = vmul.f32 0.0051020407, %v2467_v45  ;;  %14765 = vst [vmem:[#allocation319_spill] sm:$0xff] %v9425_v43  ;;  %v9427_v16 = vpop.f32.mrb[102].mxu0  ;;  %v9431_v8 = vpop.f32.mrb[101].mxu1  ;;  %v2144_v26 = vmul.f32 %v9425_v43, %v9425_v43 }
 0x214   :  { %14766 = vst [vmem:[#allocation320_spill] sm:$0xff] %v9427_v16  ;;  %v9429_v50 = vpop.f32.mrb[103].mxu0  ;;  %14768 = vst [vmem:[#allocation322_spill] sm:$0xff] %v9431_v8  ;;  %1582 = vadd.xlane.f32.xlu0 %v14770_v60  ;;  %v1884_v60 = vsel %vm1443_vm1, %v9431_v8, 0.0  ;;  %v2145_v41 = vmul.f32 %v9431_v8, %v9431_v8  ;;  %v2026_v9 = vmul.f32 %v9427_v16, %v9427_v16 }
 0x215   :  { %14764 = vst [vmem:[#allocation318_spill] sm:$0xff] %v9421_v34  ;;  %14767 = vst [vmem:[#allocation321_spill] sm:$0xff] %v9429_v50  ;;  %2538 = vadd.xlane.f32.xlu1 %v14769_v38  ;;  %v1648_v45 = vsel %vm1443_vm1, %v9429_v50, 0.0  ;;  %v9439_v59 = vpop.xlane.xlu0 %1750  ;;  %v2027_v38 = vmul.f32 %v9429_v50, %v9429_v50  ;;  %v9478_v18 = vmul.f32 %v9443_v47, %v9443_v47 }
 0x216   :  { %14771 = vst [vmem:[#allocation156_spill] sm:$0xff] %v9439_v59  ;;  %v1515_v32 = vpop.xlane.xlu1 %1514  ;;  %14772 = vst [vmem:[#allocation159_spill] sm:$0xff] %v9443_v47  ;;  %v9445_v25 = vpop.f32.mrb[102].mxu1  ;;  %v9457_v20 = vadd.f32 %v1648_v45, %v9427_v16  ;;  %v2604_v4 = vsel %vm1443_vm1, %v2145_v41, 0.0 }
 0x217   :  { %14773 = vst [vmem:[#allocation323_spill] sm:$0xff] %v9445_v25  ;;  %v9454_v59 = vpop.f32.mrb[103].mxu1  ;;  %v2146_v34 = vmul.f32 %v9445_v25, %v9445_v25  ;;  %14777 = vst [vmem:[#allocation327_spill] sm:$0xff] %v9478_v18  ;;  %v9480_v16 = vmul.f32 0.0051020407, %v1515_v32  ;;  %v9494_v32 = vadd.f32 %v2604_v4, %v2144_v26 }
 0x218   :  { %14774 = vst [vmem:[#allocation324_spill] sm:$0xff] %v9454_v59  ;;  %14775 = vst [vmem:[#allocation325_spill] sm:$0xff] %v9457_v20  ;;  %1822 = vadd.xlane.f32.xlu0 %v8575_v23  ;;  %v1888_v28 = vsel %vm1443_vm1, %v9454_v59, 0.0  ;;  %v2147_v45 = vmul.f32 %v9454_v59, %v9454_v59  ;;  %v9472_v23 = vadd.f32 %v1884_v60, %v9425_v43  ;;  %v2368_v59 = vsel %vm1443_vm1, %v2027_v38, 0.0 }
 0x219   :  { %1586 = vadd.xlane.f32.xlu1 %v8582_v33  ;;  %v2231_v50 = vpop.xlane.xlu0 %2230  ;;  %v9474_v33 = vadd.f32 %v2364_v11, %v2024_v53  ;;  %14778 = vst [vmem:[#allocation328_spill] sm:$0xff] %v9480_v16  ;;  %v9485_v7 = vadd.f32 %v1888_v28, %v9445_v25  ;;  %v14781_v11 = vld [vmem:[#allocation164_spill] sm:$0xff]  ;;  %v9498_v28 = vadd.f32 %v2368_v59, %v2026_v9 }
 0x21a   :  { %v1755_v8 = vpop.xlane.xlu1 %1754  ;;  %v9482_v20 = vmul.f32 0.0051020407, %v2231_v50  ;;  %v2608_v60 = vsel %vm1443_vm1, %v2147_v45, 0.0  ;;  %14782 = vst [vmem:[#allocation164_spill] sm:$0xff] %v9494_v32  ;;  %v9504_v41 = vmul.f32 %v9480_v16, %v9480_v16  ;;  %v14791_v59 = vld [vmem:[#allocation168_spill] sm:$0xff] }
 0x21b   :  { %14776 = vst [vmem:[#allocation326_spill] sm:$0xff] %v9474_v33  ;;  %14780 = vst [vmem:[#allocation330_spill] sm:$0xff] %v9485_v7  ;;  %v9500_v25 = vadd.f32 %v2608_v60, %v2146_v34  ;;  %v9506_v38 = vmul.f32 0.0051020407, %v1755_v8 }
 0x21c   :  { %14779 = vst [vmem:[#allocation329_spill] sm:$0xff] %v9482_v20  ;;  %2302 = vadd.xlane.f32.xlu0 %v14781_v11  ;;  %14784 = vst [vmem:[#allocation332_spill] sm:$0xff] %v9498_v28 }
 0x21d   :  { %1826 = vadd.xlane.f32.xlu1 %v8601_v35  ;;  %v9496_v50 = vpop.xlane.xlu0 %2470  ;;  %14785 = vst [vmem:[#allocation333_spill] sm:$0xff] %v9500_v25  ;;  %14786 = vst [vmem:[#allocation334_spill] sm:$0xff] %v9504_v41 }
 0x21e   :  { %14783 = vst [vmem:[#allocation331_spill] sm:$0xff] %v9496_v50  ;;  %v2235_v43 = vpop.xlane.xlu1 %2234  ;;  %14787 = vst [vmem:[#allocation335_spill] sm:$0xff] %v9506_v38  ;;  %v9510_v11 = vpop.f32.mrb[104].mxu0 }
 0x21f   :  { %v9508_v45 = vmul.f32 0.0051020407, %v2235_v43  ;;  %14789 = vst [vmem:[#allocation337_spill] sm:$0xff] %v9510_v11  ;;  %v9512_v35 = vpop.f32.mrb[105].mxu0  ;;  %v9525_v43 = vmul.f32 %v9506_v38, %v9506_v38  ;;  %v14800_v38 = vld [vmem:[#allocation173_spill] sm:$0xff]  ;;  %v2028_v20 = vmul.f32 %v9510_v11, %v9510_v11 }
 0x220   :  { %14790 = vst [vmem:[#allocation338_spill] sm:$0xff] %v9512_v35  ;;  %2542 = vadd.xlane.f32.xlu0 %v8603_v1  ;;  %v1652_v34 = vsel %vm1443_vm1, %v9512_v35, 0.0  ;;  %v2029_v53 = vmul.f32 %v9512_v35, %v9512_v35 }
 0x221   :  { %14788 = vst [vmem:[#allocation336_spill] sm:$0xff] %v9508_v45  ;;  %2306 = vadd.xlane.f32.xlu1 %v14791_v59  ;;  %v1519_v9 = vpop.xlane.xlu0 %1518  ;;  %v9521_v8 = vadd.f32 %v1652_v34, %v9510_v11  ;;  %14793 = vst [vmem:[#allocation339_spill] sm:$0xff] %v9525_v43 }
 0x222   :  { %v2475_v26 = vpop.xlane.xlu1 %2474  ;;  %v9531_v1 = vpop.f32.mrb[104].mxu1  ;;  %v9541_v16 = vmul.f32 0.0051020407, %v1519_v9  ;;  %v2372_v45 = vsel %vm1443_vm1, %v2029_v53, 0.0  ;;  %v14806_v53 = vld [vmem:[#allocation191_spill] sm:$0xff] }
 0x223   :  { %14792 = vst [vmem:[#allocation168_spill] sm:$0xff] %v9521_v8  ;;  %v9527_v60 = vmul.f32 0.0051020407, %v2475_v26  ;;  %14795 = vst [vmem:[#allocation341_spill] sm:$0xff] %v9531_v1  ;;  %v9533_v59 = vpop.f32.mrb[106].mxu0  ;;  %v9537_v47 = vpop.f32.mrb[105].mxu1 }
 0x224   :  { %14796 = vst [vmem:[#allocation342_spill] sm:$0xff] %v9533_v59  ;;  %v9535_v4 = vpop.f32.mrb[107].mxu0  ;;  %14798 = vst [vmem:[#allocation344_spill] sm:$0xff] %v9537_v47  ;;  %v14801_v26 = vld [vmem:[#allocation180_spill] sm:$0xff]  ;;  %v9565_v11 = vmul.f32 %v9541_v16, %v9541_v16 }
 0x225   :  { %14794 = vst [vmem:[#allocation340_spill] sm:$0xff] %v9527_v60  ;;  %14797 = vst [vmem:[#allocation343_spill] sm:$0xff] %v9535_v4  ;;  %2546 = vadd.xlane.f32.xlu1 %v14800_v38  ;;  %1590 = vadd.xlane.f32.xlu0 %v14801_v26  ;;  %v1656_v35 = vsel %vm1443_vm1, %v9535_v4, 0.0  ;;  %v1759_v50 = vpop.xlane.xlu0 %1758  ;;  %v2031_v9 = vmul.f32 %v9535_v4, %v9535_v4  ;;  %v1892_v38 = vsel %vm1443_vm1, %v9537_v47, 0.0 }
 0x226   :  { %14799 = vst [vmem:[#allocation345_spill] sm:$0xff] %v9541_v16  ;;  %v1523_v18 = vpop.xlane.xlu1 %1522  ;;  %v9549_v41 = vpop.f32.mrb[106].mxu1  ;;  %v2149_v26 = vmul.f32 %v9537_v47, %v9537_v47  ;;  %v9561_v43 = vadd.f32 %v1656_v35, %v9533_v59  ;;  %14805 = vst [vmem:[#allocation347_spill] sm:$0xff] %v9565_v11  ;;  %v2148_v4 = vmul.f32 %v9531_v1, %v9531_v1  ;;  %v9584_v25 = vmul.f32 0.0051020407, %v1759_v50 }
 0x227   :  { %14802 = vst [vmem:[#allocation173_spill] sm:$0xff] %v9549_v41  ;;  %v9558_v34 = vpop.f32.mrb[107].mxu1  ;;  %v2030_v60 = vmul.f32 %v9533_v59, %v9533_v59  ;;  %v9586_v28 = vmul.f32 0.0051020407, %v1523_v18  ;;  %v2376_v33 = vsel %vm1443_vm1, %v2031_v9, 0.0 }
 0x228   :  { %14803 = vst [vmem:[#allocation180_spill] sm:$0xff] %v9558_v34  ;;  %14804 = vst [vmem:[#allocation346_spill] sm:$0xff] %v9561_v43  ;;  %v1896_v47 = vsel %vm1443_vm1, %v9558_v34, 0.0  ;;  %v2150_v43 = vmul.f32 %v9549_v41, %v9549_v41  ;;  %v2151_v16 = vmul.f32 %v9558_v34, %v9558_v34  ;;  %v2612_v7 = vsel %vm1443_vm1, %v2149_v26, 0.0 }
 0x229   :  { %1830 = vadd.xlane.f32.xlu0 %v8706_v58  ;;  %1594 = vadd.xlane.f32.xlu1 %v14806_v53  ;;  %v2239_v8 = vpop.xlane.xlu0 %2238  ;;  %v9580_v58 = vadd.f32 %v1892_v38, %v9531_v1  ;;  %v9582_v53 = vadd.f32 %v2372_v45, %v2028_v20  ;;  %14807 = vst [vmem:[#allocation191_spill] sm:$0xff] %v9584_v25  ;;  %14808 = vst [vmem:[#allocation348_spill] sm:$0xff] %v9586_v28 }
 0x22a   :  { %v1763_v35 = vpop.xlane.xlu1 %1762  ;;  %v9588_v59 = vmul.f32 0.0051020407, %v2239_v8  ;;  %v9591_v32 = vadd.f32 %v1896_v47, %v9549_v41  ;;  %v2616_v34 = vsel %vm1443_vm1, %v2151_v16, 0.0  ;;  %v9600_v18 = vadd.f32 %v2612_v7, %v2148_v4 }
 0x22b   :  { %v9602_v20 = vmul.f32 0.0051020407, %v1763_v35  ;;  %v9604_v45 = vadd.f32 %v2376_v33, %v2030_v60  ;;  %v9606_v8 = vadd.f32 %v2616_v34, %v2150_v43  ;;  %v9610_v16 = vmul.f32 %v9584_v25, %v9584_v25 }
 0x22c   :  { %14809 = vst [vmem:[#allocation349_spill] sm:$0xff] %v9588_v59  ;;  %v9614_v9 = vmul.f32 %v9586_v28, %v9586_v28 }
 0x22d   :  { %2310 = vadd.xlane.f32.xlu0 %v8708_v42  ;;  %1834 = vadd.xlane.f32.xlu1 %v8717_v39  ;;  %14810 = vst [vmem:[#allocation350_spill] sm:$0xff] %v9602_v20  ;;  %v2479_v50 = vpop.xlane.xlu0 %2478  ;;  %14811 = vst [vmem:[#allocation351_spill] sm:$0xff] %v9610_v16 }
 0x22e   :  { %v2243_v47 = vpop.xlane.xlu1 %2242  ;;  %14812 = vst [vmem:[#allocation352_spill] sm:$0xff] %v9614_v9  ;;  %v9616_v42 = vmul.f32 0.0051020407, %v2479_v50  ;;  %v9620_v7 = vpop.f32.mrb[108].mxu0  ;;  %v9637_v50 = vmul.f32 %v9602_v20, %v9602_v20 }
 0x22f   :  { %v9618_v39 = vmul.f32 0.0051020407, %v2243_v47  ;;  %14815 = vst [vmem:[#allocation355_spill] sm:$0xff] %v9620_v7  ;;  %v9622_v4 = vpop.f32.mrb[109].mxu0  ;;  %v2032_v25 = vmul.f32 %v9620_v7, %v9620_v7 }
 0x230   :  { %14813 = vst [vmem:[#allocation353_spill] sm:$0xff] %v9616_v42  ;;  %14816 = vst [vmem:[#allocation356_spill] sm:$0xff] %v9622_v4  ;;  %v1660_v60 = vsel %vm1443_vm1, %v9622_v4, 0.0  ;;  %v2033_v33 = vmul.f32 %v9622_v4, %v9622_v4 }
 0x231   :  { %14814 = vst [vmem:[#allocation354_spill] sm:$0xff] %v9618_v39  ;;  %2550 = vadd.xlane.f32.xlu0 %v8726_v61  ;;  %2314 = vadd.xlane.f32.xlu1 %v8730_v57  ;;  %v1527_v26 = vpop.xlane.xlu0 %1526  ;;  %v9633_v35 = vadd.f32 %v1660_v60, %v9620_v7  ;;  %14817 = vst [vmem:[#allocation357_spill] sm:$0xff] %v9637_v50 }
 0x232   :  { %v2483_v34 = vpop.xlane.xlu1 %2482  ;;  %v9643_v61 = vpop.f32.mrb[108].mxu1  ;;  %v9653_v1 = vmul.f32 0.0051020407, %v1527_v26  ;;  %v2380_v28 = vsel %vm1443_vm1, %v2033_v33, 0.0 }
 0x233   :  { %v9639_v47 = vmul.f32 0.0051020407, %v2483_v34  ;;  %14819 = vst [vmem:[#allocation359_spill] sm:$0xff] %v9643_v61  ;;  %v9645_v57 = vpop.f32.mrb[110].mxu0  ;;  %v9649_v43 = vpop.f32.mrb[109].mxu1  ;;  %v2152_v33 = vmul.f32 %v9643_v61, %v9643_v61 }
 0x234   :  { %14820 = vst [vmem:[#allocation360_spill] sm:$0xff] %v9645_v57  ;;  %v9647_v38 = vpop.f32.mrb[111].mxu0  ;;  %14822 = vst [vmem:[#allocation362_spill] sm:$0xff] %v9649_v43  ;;  %v9677_v7 = vmul.f32 %v9653_v1, %v9653_v1 }
 0x235   :  { %14818 = vst [vmem:[#allocation358_spill] sm:$0xff] %v9639_v47  ;;  %14821 = vst [vmem:[#allocation361_spill] sm:$0xff] %v9647_v38  ;;  %2554 = vadd.xlane.f32.xlu1 %v8732_v49  ;;  %1598 = vadd.xlane.f32.xlu0 %v8759_v12  ;;  %v1664_v34 = vsel %vm1443_vm1, %v9647_v38, 0.0  ;;  %v1767_v41 = vpop.xlane.xlu0 %1766  ;;  %v2035_v26 = vmul.f32 %v9647_v38, %v9647_v38  ;;  %v1900_v49 = vsel %vm1443_vm1, %v9649_v43, 0.0 }
 0x236   :  { %14823 = vst [vmem:[#allocation363_spill] sm:$0xff] %v9653_v1  ;;  %v1531_v4 = vpop.xlane.xlu1 %1530  ;;  %v9661_v20 = vpop.f32.mrb[110].mxu1  ;;  %v2153_v12 = vmul.f32 %v9649_v43, %v9649_v43  ;;  %v9673_v16 = vadd.f32 %v1664_v34, %v9645_v57  ;;  %14826 = vst [vmem:[#allocation366_spill] sm:$0xff] %v9677_v7  ;;  %v2034_v38 = vmul.f32 %v9645_v57, %v9645_v57  ;;  %v9696_v47 = vmul.f32 0.0051020407, %v1767_v41 }
 0x237   :  { %14824 = vst [vmem:[#allocation364_spill] sm:$0xff] %v9661_v20  ;;  %v9670_v60 = vpop.f32.mrb[111].mxu1  ;;  %v2154_v50 = vmul.f32 %v9661_v20, %v9661_v20  ;;  %v9698_v11 = vmul.f32 0.0051020407, %v1531_v4  ;;  %v2384_v39 = vsel %vm1443_vm1, %v2035_v26, 0.0 }
 0x238   :  { %14825 = vst [vmem:[#allocation365_spill] sm:$0xff] %v9670_v60  ;;  %v1904_v43 = vsel %vm1443_vm1, %v9670_v60, 0.0  ;;  %v2155_v1 = vmul.f32 %v9670_v60, %v9670_v60  ;;  %14827 = vst [vmem:[#allocation367_spill] sm:$0xff] %v9696_v47  ;;  %v2620_v9 = vsel %vm1443_vm1, %v2153_v12, 0.0  ;;  %v9716_v4 = vadd.f32 %v2384_v39, %v2034_v38 }
 0x239   :  { %1838 = vadd.xlane.f32.xlu0 %v8828_v24  ;;  %1602 = vadd.xlane.f32.xlu1 %v8837_v21  ;;  %v2247_v42 = vpop.xlane.xlu0 %2246  ;;  %v9692_v24 = vadd.f32 %v1900_v49, %v9643_v61  ;;  %v9694_v21 = vadd.f32 %v2380_v28, %v2032_v25  ;;  %14828 = vst [vmem:[#allocation368_spill] sm:$0xff] %v9698_v11 }
 0x23a   :  { %v1771_v34 = vpop.xlane.xlu1 %1770  ;;  %v9700_v57 = vmul.f32 0.0051020407, %v2247_v42  ;;  %v9703_v59 = vadd.f32 %v1904_v43, %v9661_v20  ;;  %v2624_v60 = vsel %vm1443_vm1, %v2155_v1, 0.0  ;;  %v9712_v25 = vadd.f32 %v2620_v9, %v2152_v33 }
 0x23b   :  { %v9714_v28 = vmul.f32 0.0051020407, %v1771_v34  ;;  %v9718_v43 = vadd.f32 %v2624_v60, %v2154_v50  ;;  %v9722_v1 = vmul.f32 %v9696_v47, %v9696_v47  ;;  %v9726_v26 = vmul.f32 %v9698_v11, %v9698_v11 }
 0x23c   :  { %14829 = vst [vmem:[#allocation369_spill] sm:$0xff] %v9700_v57 }
 0x23d   :  { %2318 = vadd.xlane.f32.xlu0 %v8852_v5  ;;  %1842 = vadd.xlane.f32.xlu1 %v8841_v51  ;;  %14830 = vst [vmem:[#allocation370_spill] sm:$0xff] %v9714_v28  ;;  %v2487_v41 = vpop.xlane.xlu0 %2486  ;;  %14831 = vst [vmem:[#allocation371_spill] sm:$0xff] %v9722_v1 }
 0x23e   :  { %v2251_v42 = vpop.xlane.xlu1 %2250  ;;  %14832 = vst [vmem:[#allocation372_spill] sm:$0xff] %v9726_v26  ;;  %v9728_v5 = vmul.f32 0.0051020407, %v2487_v41  ;;  %v9732_v9 = vpop.f32.mrb[112].mxu0  ;;  %v9749_v41 = vmul.f32 %v9714_v28, %v9714_v28 }
 0x23f   :  { %v9730_v51 = vmul.f32 0.0051020407, %v2251_v42  ;;  %14835 = vst [vmem:[#allocation375_spill] sm:$0xff] %v9732_v9  ;;  %v9734_v12 = vpop.f32.mrb[113].mxu0 }
 0x240   :  { %14833 = vst [vmem:[#allocation373_spill] sm:$0xff] %v9728_v5  ;;  %14836 = vst [vmem:[#allocation376_spill] sm:$0xff] %v9734_v12  ;;  %v1668_v50 = vsel %vm1443_vm1, %v9734_v12, 0.0  ;;  %v2037_v38 = vmul.f32 %v9734_v12, %v9734_v12  ;;  %v2036_v12 = vmul.f32 %v9732_v9, %v9732_v9 }
 0x241   :  { %14834 = vst [vmem:[#allocation374_spill] sm:$0xff] %v9730_v51  ;;  %2558 = vadd.xlane.f32.xlu0 %v8857_v37  ;;  %2322 = vadd.xlane.f32.xlu1 %v8859_v54  ;;  %v1535_v33 = vpop.xlane.xlu0 %1534  ;;  %v9745_v34 = vadd.f32 %v1668_v50, %v9732_v9  ;;  %14837 = vst [vmem:[#allocation377_spill] sm:$0xff] %v9749_v41  ;;  %v14847_v9 = vld [vmem:[#allocation231_spill] sm:$0xff] }
 0x242   :  { %v2491_v60 = vpop.xlane.xlu1 %2490  ;;  %v9757_v54 = vpop.f32.mrb[114].mxu0  ;;  %v9771_v47 = vmul.f32 0.0051020407, %v1535_v33  ;;  %v2388_v11 = vsel %vm1443_vm1, %v2037_v38, 0.0 }
 0x243   :  { %v9751_v42 = vmul.f32 0.0051020407, %v2491_v60  ;;  %v9755_v37 = vpop.f32.mrb[112].mxu1  ;;  %14840 = vst [vmem:[#allocation380_spill] sm:$0xff] %v9757_v54  ;;  %v9759_v49 = vpop.f32.mrb[115].mxu0 }
 0x244   :  { %14839 = vst [vmem:[#allocation379_spill] sm:$0xff] %v9755_v37  ;;  %14841 = vst [vmem:[#allocation381_spill] sm:$0xff] %v9759_v49  ;;  %v9761_v39 = vpop.f32.mrb[113].mxu1  ;;  %v1672_v60 = vsel %vm1443_vm1, %v9759_v49, 0.0  ;;  %v2039_v50 = vmul.f32 %v9759_v49, %v9759_v49  ;;  %v2156_v38 = vmul.f32 %v9755_v37, %v9755_v37  ;;  %v2038_v49 = vmul.f32 %v9757_v54, %v9757_v54 }
 0x245   :  { %14838 = vst [vmem:[#allocation378_spill] sm:$0xff] %v9751_v42  ;;  %14842 = vst [vmem:[#allocation382_spill] sm:$0xff] %v9761_v39  ;;  %2562 = vadd.xlane.f32.xlu1 %v8872_v55  ;;  %1606 = vadd.xlane.f32.xlu0 %v8885_v29  ;;  %v1775_v61 = vpop.xlane.xlu0 %1774  ;;  %v1908_v55 = vsel %vm1443_vm1, %v9761_v39, 0.0  ;;  %v2157_v29 = vmul.f32 %v9761_v39, %v9761_v39  ;;  %v9785_v5 = vadd.f32 %v1672_v60, %v9757_v54 }
 0x246   :  { %v1539_v20 = vpop.xlane.xlu1 %1538  ;;  %14843 = vst [vmem:[#allocation383_spill] sm:$0xff] %v9771_v47  ;;  %v9787_v33 = vmul.f32 0.0051020407, %v1775_v61  ;;  %v9808_v7 = vmul.f32 %v9771_v47, %v9771_v47 }
 0x247   :  { %v9773_v28 = vpop.f32.mrb[114].mxu1  ;;  %v9810_v54 = vmul.f32 0.0051020407, %v1539_v20  ;;  %v2628_v51 = vsel %vm1443_vm1, %v2157_v29, 0.0 }
 0x248   :  { %14844 = vst [vmem:[#allocation384_spill] sm:$0xff] %v9773_v28  ;;  %v9782_v1 = vpop.f32.mrb[115].mxu1  ;;  %14846 = vst [vmem:[#allocation386_spill] sm:$0xff] %v9787_v33  ;;  %v2158_v60 = vmul.f32 %v9773_v28, %v9773_v28  ;;  %v9824_v20 = vadd.f32 %v2628_v51, %v2156_v38  ;;  %v14857_v38 = vld [vmem:[#allocation235_spill] sm:$0xff] }
 0x249   :  { %14845 = vst [vmem:[#allocation385_spill] sm:$0xff] %v9782_v1  ;;  %1846 = vadd.xlane.f32.xlu0 %v8942_v13  ;;  %1610 = vadd.xlane.f32.xlu1 %v14847_v9  ;;  %v1912_v39 = vsel %vm1443_vm1, %v9782_v1, 0.0  ;;  %v2255_v41 = vpop.xlane.xlu0 %2254  ;;  %v2159_v61 = vmul.f32 %v9782_v1, %v9782_v1  ;;  %v9802_v13 = vadd.f32 %v1908_v55, %v9755_v37  ;;  %14848 = vst [vmem:[#allocation231_spill] sm:$0xff] %v9810_v54 }
 0x24a   :  { %v1779_v42 = vpop.xlane.xlu1 %1778  ;;  %v9804_v9 = vadd.f32 %v2388_v11, %v2036_v12  ;;  %v9812_v57 = vmul.f32 0.0051020407, %v2255_v41  ;;  %v9815_v26 = vadd.f32 %v1912_v39, %v9773_v28  ;;  %v2392_v1 = vsel %vm1443_vm1, %v2039_v50, 0.0 }
 0x24b   :  { %v2632_v55 = vsel %vm1443_vm1, %v2159_v61, 0.0  ;;  %v9828_v12 = vmul.f32 %v9787_v33, %v9787_v33  ;;  %v9830_v29 = vadd.f32 %v2392_v1, %v2038_v49  ;;  %v9836_v61 = vmul.f32 %v9810_v54, %v9810_v54  ;;  %v14852_v49 = vld [vmem:[#allocation234_spill] sm:$0xff] }
 0x24c   :  { %v9832_v50 = vadd.f32 %v2632_v55, %v2158_v60  ;;  %v9838_v11 = vmul.f32 0.0051020407, %v1779_v42 }
 0x24d   :  { %2326 = vadd.xlane.f32.xlu0 %v8944_v17  ;;  %1850 = vadd.xlane.f32.xlu1 %v8955_v2  ;;  %14849 = vst [vmem:[#allocation387_spill] sm:$0xff] %v9828_v12  ;;  %v2495_v39 = vpop.xlane.xlu0 %2494 }
 0x24e   :  { %v2259_v41 = vpop.xlane.xlu1 %2258  ;;  %14850 = vst [vmem:[#allocation388_spill] sm:$0xff] %v9838_v11  ;;  %v9840_v17 = vmul.f32 0.0051020407, %v2495_v39  ;;  %v9852_v42 = vmul.f32 %v9838_v11, %v9838_v11 }
 0x24f   :  { %v9842_v2 = vmul.f32 0.0051020407, %v2259_v41 }
 0x250   :  { %14851 = vst [vmem:[#allocation389_spill] sm:$0xff] %v9840_v17  ;;  %14853 = vst [vmem:[#allocation234_spill] sm:$0xff] %v9852_v42 }
 0x251   :  { %2566 = vadd.xlane.f32.xlu0 %v8964_v27  ;;  %2330 = vadd.xlane.f32.xlu1 %v14852_v49  ;;  %v1543_v60 = vpop.xlane.xlu0 %1542  ;;  %v9856_v39 = vpop.f32.mrb[116].mxu0  ;;  %v14858_v27 = vld [vmem:[#allocation110_spill] sm:$0xff] }
 0x252   :  { %v2499_v1 = vpop.xlane.xlu1 %2498  ;;  %14855 = vst [vmem:[#allocation391_spill] sm:$0xff] %v9856_v39  ;;  %v9858_v41 = vpop.f32.mrb[117].mxu0 }
 0x253   :  { %v9854_v55 = vmul.f32 0.0051020407, %v2499_v1  ;;  %14856 = vst [vmem:[#allocation392_spill] sm:$0xff] %v9858_v41  ;;  %v1676_v49 = vsel %vm1443_vm1, %v9858_v41, 0.0  ;;  %v9869_v1 = vmul.f32 0.0051020407, %v1543_v60  ;;  %v2041_v47 = vmul.f32 %v9858_v41, %v9858_v41 }
 0x254   :  { %v9867_v33 = vadd.f32 %v1676_v49, %v9856_v39  ;;  %v9871_v11 = vpop.f32.mrb[116].mxu1 }
 0x255   :  { %14854 = vst [vmem:[#allocation390_spill] sm:$0xff] %v9854_v55  ;;  %2570 = vadd.xlane.f32.xlu1 %v14857_v38  ;;  %1614 = vadd.xlane.f32.xlu0 %v14858_v27  ;;  %v1783_v37 = vpop.xlane.xlu0 %1782  ;;  %14859 = vst [vmem:[#allocation235_spill] sm:$0xff] %v9869_v1  ;;  %v9875_v51 = vpop.f32.mrb[117].mxu1  ;;  %v14862_v38 = vld [vmem:[#allocation250_spill] sm:$0xff]  ;;  %v2040_v27 = vmul.f32 %v9856_v39, %v9856_v39  ;;  %v9890_v41 = vmul.f32 %v9869_v1, %v9869_v1  ;;  %v2396_v42 = vsel %vm1443_vm1, %v2041_v47, 0.0 }
 0x256   :  { %v1547_v28 = vpop.xlane.xlu1 %1546  ;;  %14860 = vst [vmem:[#allocation110_spill] sm:$0xff] %v9871_v11  ;;  %14861 = vst [vmem:[#allocation393_spill] sm:$0xff] %v9875_v51  ;;  %v1916_v49 = vsel %vm1443_vm1, %v9875_v51, 0.0  ;;  %v9883_v54 = vmul.f32 0.0051020407, %v1783_v37  ;;  %v2160_v39 = vmul.f32 %v9871_v11, %v9871_v11  ;;  %v2161_v37 = vmul.f32 %v9875_v51, %v9875_v51 }
 0x257   :  { %v9886_v17 = vadd.f32 %v1916_v49, %v9871_v11  ;;  %v9905_v1 = vadd.f32 %v2396_v42, %v2040_v27  ;;  %v14868_v27 = vld [vmem:[#allocation253_spill] sm:$0xff] }
 0x258   :  { %14863 = vst [vmem:[#allocation250_spill] sm:$0xff] %v9883_v54 }
 0x259   :  { %1854 = vadd.xlane.f32.xlu0 %v9048_v0  ;;  %1618 = vadd.xlane.f32.xlu1 %v14862_v38  ;;  %v2263_v60 = vpop.xlane.xlu0 %2262  ;;  %v9892_v0 = vmul.f32 0.0051020407, %v1547_v28  ;;  %v9909_v28 = vmul.f32 %v9883_v54, %v9883_v54 }
 0x25a   :  { %v1787_v12 = vpop.xlane.xlu1 %1786  ;;  %v9894_v38 = vmul.f32 0.0051020407, %v2263_v60 }
 0x25b   :  { %14864 = vst [vmem:[#allocation394_spill] sm:$0xff] %v9892_v0  ;;  %14865 = vst [vmem:[#allocation395_spill] sm:$0xff] %v9909_v28  ;;  %v9911_v60 = vmul.f32 0.0051020407, %v1787_v12  ;;  %v9915_v47 = vmul.f32 %v9892_v0, %v9892_v0 }
 0x25d   :  { %2334 = vadd.xlane.f32.xlu0 %v9050_v40  ;;  %1858 = vadd.xlane.f32.xlu1 %v9061_v22  ;;  %14866 = vst [vmem:[#allocation396_spill] sm:$0xff] %v9911_v60  ;;  %v2503_v11 = vpop.xlane.xlu0 %2502  ;;  %v2636_v22 = vsel %vm1443_vm1, %v2161_v37, 0.0  ;;  %v14871_v37 = vld [vmem:[#allocation254_spill] sm:$0xff] }
 0x25e   :  { %v2267_v55 = vpop.xlane.xlu1 %2266  ;;  %v9917_v51 = vmul.f32 0.0051020407, %v2503_v11  ;;  %v9922_v40 = vadd.f32 %v2636_v22, %v2160_v39  ;;  %v9932_v11 = vmul.f32 %v9911_v60, %v9911_v60  ;;  %v14872_v22 = vld [vmem:[#allocation122_spill] sm:$0xff]  ;;  %v14874_v60 = vld [vmem:[#allocation269_spill] sm:$0xff] }
 0x25f   :  { %v9919_v49 = vmul.f32 0.0051020407, %v2267_v55 }
 0x260   :  { %14867 = vst [vmem:[#allocation397_spill] sm:$0xff] %v9917_v51  ;;  %14869 = vst [vmem:[#allocation253_spill] sm:$0xff] %v9932_v11 }
 0x261   :  { %2574 = vadd.xlane.f32.xlu0 %v9070_v10  ;;  %2338 = vadd.xlane.f32.xlu1 %v14868_v27  ;;  %v1551_v0 = vpop.xlane.xlu0 %1550  ;;  %v6432_v10 = vmov 0  }
 0x262   :  { %v2507_v54 = vpop.xlane.xlu1 %2506  ;;  %6191 = vset.pattern.permute.xlu1 %v6432_v10  ;;  %6190 = vset.pattern.permute.xlu0 %v6432_v10  ;;  %v9940_v27 = vmul.f32 0.0051020407, %v1551_v0  ;;  %v14881_v0 = vld [vmem:[#allocation133_spill] sm:$0xff] }
 0x263   :  { %v9934_v55 = vmul.f32 0.0051020407, %v2507_v54 }
 0x264   :  { %14873 = vst [vmem:[#allocation254_spill] sm:$0xff] %v9940_v27 }
 0x265   :  { %14870 = vst [vmem:[#allocation398_spill] sm:$0xff] %v9934_v55  ;;  %2578 = vadd.xlane.f32.xlu1 %v14871_v37  ;;  %1622 = vadd.xlane.f32.xlu0 %v14872_v22  ;;  %v1791_v42 = vpop.xlane.xlu0 %1790  ;;  %v9948_v37 = vmul.f32 %v9940_v27, %v9940_v27 }
 0x266   :  { %v1555_v12 = vpop.xlane.xlu1 %1554  ;;  %v9944_v54 = vmul.f32 0.0051020407, %v1791_v42 }
 0x267   :  { %14876 = vst [vmem:[#allocation269_spill] sm:$0xff] %v9948_v37  ;;  %v9950_v22 = vmul.f32 0.0051020407, %v1555_v12 }
 0x268   :  { %14875 = vst [vmem:[#allocation122_spill] sm:$0xff] %v9944_v54 }
 0x269   :  { %1862 = vadd.xlane.f32.xlu0 %v9154_v56  ;;  %1626 = vadd.xlane.f32.xlu1 %v14874_v60  ;;  %v2271_v28 = vpop.xlane.xlu0 %2270  ;;  %14877 = vst [vmem:[#allocation399_spill] sm:$0xff] %v9950_v22  ;;  %v9960_v56 = vmul.f32 %v9944_v54, %v9944_v54  ;;  %v9964_v10 = vmul.f32 %v9950_v22, %v9950_v22  ;;  %v14882_v54 = vld [vmem:[#allocation273_spill] sm:$0xff]  ;;  %v14885_v22 = vld [vmem:[#allocation274_spill] sm:$0xff] }
 0x26a   :  { %v1795_v51 = vpop.xlane.xlu1 %1794  ;;  %v9952_v39 = vmul.f32 0.0051020407, %v2271_v28 }
 0x26b   :  { %14878 = vst [vmem:[#allocation400_spill] sm:$0xff] %v9960_v56  ;;  %v9966_v12 = vmul.f32 0.0051020407, %v1795_v51 }
 0x26d   :  { %2342 = vadd.xlane.f32.xlu0 %v9156_v19  ;;  %1866 = vadd.xlane.f32.xlu1 %v9167_v36  ;;  %v2511_v60 = vpop.xlane.xlu0 %2510  ;;  %14879 = vst [vmem:[#allocation401_spill] sm:$0xff] %v9966_v12  ;;  %v9980_v51 = vmul.f32 %v9966_v12, %v9966_v12  ;;  %v14886_v19 = vld [vmem:[#allocation134_spill] sm:$0xff] }
 0x26e   :  { %v2275_v42 = vpop.xlane.xlu1 %2274  ;;  %v9968_v28 = vmul.f32 0.0051020407, %v2511_v60 }
 0x26f   :  { %v9970_v27 = vmul.f32 0.0051020407, %v2275_v42  ;;  %14883 = vst [vmem:[#allocation133_spill] sm:$0xff] %v9980_v51 }
 0x270   :  { %14880 = vst [vmem:[#allocation402_spill] sm:$0xff] %v9968_v28 }
 0x271   :  { %2582 = vadd.xlane.f32.xlu0 %v14881_v0  ;;  %2346 = vadd.xlane.f32.xlu1 %v14882_v54  ;;  %v1559_v55 = vpop.xlane.xlu0 %1558  ;;  %v14888_v54 = vld [vmem:[#allocation288_spill] sm:$0xff] }
 0x272   :  { %v2515_v11 = vpop.xlane.xlu1 %2514  ;;  %v9988_v0 = vmul.f32 0.0051020407, %v1559_v55 }
 0x273   :  { %v9982_v60 = vmul.f32 0.0051020407, %v2515_v11 }
 0x274   :  { %14887 = vst [vmem:[#allocation274_spill] sm:$0xff] %v9988_v0  ;;  %v9996_v37 = vmul.f32 %v9988_v0, %v9988_v0 }
 0x275   :  { %14884 = vst [vmem:[#allocation273_spill] sm:$0xff] %v9982_v60  ;;  %2586 = vadd.xlane.f32.xlu1 %v14885_v22  ;;  %1630 = vadd.xlane.f32.xlu0 %v14886_v19  ;;  %v1799_v36 = vpop.xlane.xlu0 %1798 }
 0x276   :  { %v1563_v56 = vpop.xlane.xlu1 %1562  ;;  %v9992_v28 = vmul.f32 0.0051020407, %v1799_v36 }
 0x277   :  { %v9998_v42 = vmul.f32 0.0051020407, %v1563_v56 }
 0x278   :  { %14889 = vst [vmem:[#allocation134_spill] sm:$0xff] %v9992_v28 }
 0x279   :  { %1870 = vadd.xlane.f32.xlu0 %v9260_v30  ;;  %1634 = vadd.xlane.f32.xlu1 %v14888_v54  ;;  %v2279_v12 = vpop.xlane.xlu0 %2278  ;;  %14890 = vst [vmem:[#allocation288_spill] sm:$0xff] %v9998_v42  ;;  %v10008_v30 = vmul.f32 %v9992_v28, %v9992_v28  ;;  %v10012_v54 = vmul.f32 %v9998_v42, %v9998_v42 }
 0x27a   :  { %v1803_v11 = vpop.xlane.xlu1 %1802  ;;  %v10000_v22 = vmul.f32 0.0051020407, %v2279_v12 }
 0x27b   :  { %14891 = vst [vmem:[#allocation403_spill] sm:$0xff] %v10008_v30  ;;  %v10014_v56 = vmul.f32 0.0051020407, %v1803_v11 }
 0x27d   :  { %2350 = vadd.xlane.f32.xlu0 %v9262_v31  ;;  %1874 = vadd.xlane.f32.xlu1 %v9273_v6  ;;  %v2519_v19 = vpop.xlane.xlu0 %2518  ;;  %14892 = vst [vmem:[#allocation404_spill] sm:$0xff] %v10014_v56  ;;  %v10028_v11 = vmul.f32 %v10014_v56, %v10014_v56 }
 0x27e   :  { %v2283_v36 = vpop.xlane.xlu1 %2282  ;;  %v10016_v12 = vmul.f32 0.0051020407, %v2519_v19 }
 0x27f   :  { %v10018_v0 = vmul.f32 0.0051020407, %v2283_v36  ;;  %14894 = vst [vmem:[#allocation406_spill] sm:$0xff] %v10028_v11 }
 0x280   :  { %14893 = vst [vmem:[#allocation405_spill] sm:$0xff] %v10016_v12 }
 0x281   :  { %2590 = vadd.xlane.f32.xlu0 %v9282_v52  ;;  %2354 = vadd.xlane.f32.xlu1 %v9286_v48  ;;  %v1567_v28 = vpop.xlane.xlu0 %1566  ;;  %v14897_v48 = vld [vmem:[#allocation306_spill] sm:$0xff] }
 0x282   :  { %v2523_v55 = vpop.xlane.xlu1 %2522  ;;  %v10036_v52 = vmul.f32 0.0051020407, %v1567_v28 }
 0x283   :  { %v10030_v19 = vmul.f32 0.0051020407, %v2523_v55 }
 0x284   :  { %14896 = vst [vmem:[#allocation408_spill] sm:$0xff] %v10036_v52  ;;  %v10044_v30 = vmul.f32 %v10036_v52, %v10036_v52 }
 0x285   :  { %14895 = vst [vmem:[#allocation407_spill] sm:$0xff] %v10030_v19  ;;  %2594 = vadd.xlane.f32.xlu1 %v9288_v44  ;;  %1638 = vadd.xlane.f32.xlu0 %v9309_v14  ;;  %v1807_v31 = vpop.xlane.xlu0 %1806 }
 0x286   :  { %v1571_v6 = vpop.xlane.xlu1 %1570  ;;  %v10040_v42 = vmul.f32 0.0051020407, %v1807_v31  ;;  %14899 = vst [vmem:[#allocation409_spill] sm:$0xff] %v10044_v30  ;;  %v10050_v14 = vpop.f32.mrb[118].mxu0 }
 0x287   :  { %v10046_v36 = vmul.f32 0.0051020407, %v1571_v6  ;;  %14901 = vst [vmem:[#allocation411_spill] sm:$0xff] %v10050_v14  ;;  %v2042_v28 = vmul.f32 %v10050_v14, %v10050_v14 }
 0x288   :  { %14898 = vst [vmem:[#allocation306_spill] sm:$0xff] %v10040_v42 }
 0x289   :  { %1878 = vadd.xlane.f32.xlu0 %v9366_v62  ;;  %1642 = vadd.xlane.f32.xlu1 %v14897_v48  ;;  %v2287_v56 = vpop.xlane.xlu0 %2286  ;;  %14900 = vst [vmem:[#allocation410_spill] sm:$0xff] %v10046_v36  ;;  %v10054_v62 = vpop.f32.mrb[119].mxu0  ;;  %v10066_v48 = vmul.f32 %v10040_v42, %v10040_v42 }
 0x28a   :  { %v1811_v55 = vpop.xlane.xlu1 %1810  ;;  %v10048_v44 = vmul.f32 0.0051020407, %v2287_v56  ;;  %14902 = vst [vmem:[#allocation412_spill] sm:$0xff] %v10054_v62  ;;  %v1680_v6 = vsel %vm1443_vm1, %v10054_v62, 0.0  ;;  %v2043_v56 = vmul.f32 %v10054_v62, %v10054_v62  ;;  %v10082_v51 = vpop.f32.mrb[118].mxu1 }
 0x28b   :  { %14903 = vst [vmem:[#allocation413_spill] sm:$0xff] %v10066_v48  ;;  %v10068_v52 = vmul.f32 0.0051020407, %v1811_v55  ;;  %v10071_v31 = vadd.f32 %v1680_v6, %v10050_v14  ;;  %14906 = vst [vmem:[#allocation416_spill] sm:$0xff] %v10082_v51  ;;  %v14910_v48 = vld [vmem:[#allocation311_spill] sm:$0xff] }
 0x28c   :  { %v2400_v62 = vsel %vm1443_vm1, %v2043_v56, 0.0 }
 0x28d   :  { %2358 = vadd.xlane.f32.xlu0 %v9368_v63  ;;  %1882 = vadd.xlane.f32.xlu1 %v9379_v15  ;;  %14904 = vst [vmem:[#allocation414_spill] sm:$0xff] %v10068_v52  ;;  %v2527_v12 = vpop.xlane.xlu0 %2526  ;;  %v10075_v15 = vmul.f32 %v10046_v36, %v10046_v36  ;;  %v10084_v42 = vadd.f32 %v2400_v62, %v2042_v28 }
 0x28e   :  { %v2291_v11 = vpop.xlane.xlu1 %2290  ;;  %v10077_v63 = vmul.f32 0.0051020407, %v2527_v12  ;;  %v2162_v12 = vmul.f32 %v10082_v51, %v10082_v51  ;;  %v10102_v55 = vmul.f32 %v10068_v52, %v10068_v52 }
 0x28f   :  { %v10079_v19 = vmul.f32 0.0051020407, %v2291_v11  ;;  %v10094_v11 = vpop.f32.mrb[119].mxu1 }
 0x290   :  { %14905 = vst [vmem:[#allocation415_spill] sm:$0xff] %v10077_v63  ;;  %14907 = vst [vmem:[#allocation417_spill] sm:$0xff] %v10094_v11  ;;  %v1920_v28 = vsel %vm1443_vm1, %v10094_v11, 0.0  ;;  %v2163_v62 = vmul.f32 %v10094_v11, %v10094_v11  ;;  %v14911_v63 = vld [vmem:[#allocation155_spill] sm:$0xff] }
 0x291   :  { %2598 = vadd.xlane.f32.xlu0 %v9388_v46  ;;  %2362 = vadd.xlane.f32.xlu1 %v9392_v3  ;;  %v1575_v14 = vpop.xlane.xlu0 %1574  ;;  %14908 = vst [vmem:[#allocation418_spill] sm:$0xff] %v10102_v55  ;;  %v10107_v3 = vadd.f32 %v1920_v28, %v10082_v51 }
 0x292   :  { %v2531_v56 = vpop.xlane.xlu1 %2530  ;;  %v2640_v6 = vsel %vm1443_vm1, %v2163_v62, 0.0  ;;  %v10116_v52 = vmul.f32 0.0051020407, %v1575_v14  ;;  %v14929_v14 = vld [vmem:[#allocation346_spill] sm:$0xff] }
 0x293   :  { %v10104_v46 = vmul.f32 0.0051020407, %v2531_v56  ;;  %v10114_v60 = vadd.f32 %v2640_v6, %v2162_v12  ;;  %v14913_v56 = vld [vmem:[#allocation325_spill] sm:$0xff]  ;;  %v14918_v12 = vld [vmem:[#allocation326_spill] sm:$0xff] }
 0x294   :  { %14912 = vst [vmem:[#allocation311_spill] sm:$0xff] %v10116_v52  ;;  %v10124_v62 = vmul.f32 %v10116_v52, %v10116_v52  ;;  %v14923_v52 = vld [vmem:[#allocation332_spill] sm:$0xff] }
 0x295   :  { %14909 = vst [vmem:[#allocation419_spill] sm:$0xff] %v10104_v46  ;;  %2602 = vadd.xlane.f32.xlu1 %v14910_v48  ;;  %1646 = vadd.xlane.f32.xlu0 %v14911_v63  ;;  %v1815_v11 = vpop.xlane.xlu0 %1814 }
 0x296   :  { %v1579_v30 = vpop.xlane.xlu1 %1578  ;;  %14915 = vst [vmem:[#allocation325_spill] sm:$0xff] %v10124_v62  ;;  %v10126_v48 = vmul.f32 0.0051020407, %v1815_v11 }
 0x297   :  { %v10128_v63 = vmul.f32 0.0051020407, %v1579_v30 }
 0x298   :  { %14916 = vst [vmem:[#allocation420_spill] sm:$0xff] %v10126_v48  ;;  %v10138_v55 = vmul.f32 %v10126_v48, %v10126_v48 }
 0x299   :  { %1886 = vadd.xlane.f32.xlu0 %v9472_v23  ;;  %1650 = vadd.xlane.f32.xlu1 %v14913_v56  ;;  %v2295_v28 = vpop.xlane.xlu0 %2294  ;;  %14917 = vst [vmem:[#allocation421_spill] sm:$0xff] %v10128_v63  ;;  %v14919_v23 = vld [vmem:[#allocation330_spill] sm:$0xff]  ;;  %v10142_v11 = vmul.f32 %v10128_v63, %v10128_v63  ;;  %v14926_v63 = vld [vmem:[#allocation168_spill] sm:$0xff] }
 0x29a   :  { %v10120_v51 = vpop.xlane.xlu1 %1818  ;;  %v10130_v6 = vmul.f32 0.0051020407, %v2295_v28  ;;  %14920 = vst [vmem:[#allocation326_spill] sm:$0xff] %v10138_v55 }
 0x29b   :  { %14914 = vst [vmem:[#allocation155_spill] sm:$0xff] %v10120_v51  ;;  %v14925_v51 = vld [vmem:[#allocation333_spill] sm:$0xff] }
 0x29d   :  { %2366 = vadd.xlane.f32.xlu0 %v14918_v12  ;;  %1890 = vadd.xlane.f32.xlu1 %v14919_v23  ;;  %v2535_v56 = vpop.xlane.xlu0 %2534  ;;  %v14922_v23 = vld [vmem:[#allocation164_spill] sm:$0xff] }
 0x29e   :  { %v2299_v36 = vpop.xlane.xlu1 %2298  ;;  %v10144_v30 = vmul.f32 0.0051020407, %v2535_v56 }
 0x29f   :  { %v10146_v28 = vmul.f32 0.0051020407, %v2299_v36 }
 0x2a0   :  { %14921 = vst [vmem:[#allocation330_spill] sm:$0xff] %v10144_v30  ;;  %v14945_v30 = vld [vmem:[#allocation192_spill] sm:$0xff] }
 0x2a1   :  { %2606 = vadd.xlane.f32.xlu0 %v14922_v23  ;;  %2370 = vadd.xlane.f32.xlu1 %v14923_v52  ;;  %v1583_v46 = vpop.xlane.xlu0 %1582 }
 0x2a2   :  { %v10154_v48 = vpop.xlane.xlu1 %2538  ;;  %v10162_v62 = vmul.f32 0.0051020407, %v1583_v46 }
 0x2a3   :  { %14924 = vst [vmem:[#allocation164_spill] sm:$0xff] %v10154_v48 }
 0x2a4   :  { %14928 = vst [vmem:[#allocation333_spill] sm:$0xff] %v10162_v62  ;;  %v10170_v52 = vmul.f32 %v10162_v62, %v10162_v62 }
 0x2a5   :  { %2610 = vadd.xlane.f32.xlu1 %v14925_v51  ;;  %1654 = vadd.xlane.f32.xlu0 %v14926_v63  ;;  %v10158_v56 = vpop.xlane.xlu0 %1822  ;;  %v14941_v63 = vld [vmem:[#allocation187_spill] sm:$0xff] }
 0x2a6   :  { %14927 = vst [vmem:[#allocation332_spill] sm:$0xff] %v10158_v56  ;;  %v10160_v36 = vpop.xlane.xlu1 %1586 }
 0x2a9   :  { %1894 = vadd.xlane.f32.xlu0 %v9580_v58  ;;  %1658 = vadd.xlane.f32.xlu1 %v14929_v14  ;;  %v2303_v23 = vpop.xlane.xlu0 %2302 }
 0x2aa   :  { %v10166_v12 = vpop.xlane.xlu1 %1826  ;;  %v10172_v51 = vmul.f32 0.0051020407, %v2303_v23 }
 0x2ab   :  { %14930 = vst [vmem:[#allocation168_spill] sm:$0xff] %v10166_v12 }
 0x2ad   :  { %2374 = vadd.xlane.f32.xlu0 %v9582_v53  ;;  %1898 = vadd.xlane.f32.xlu1 %v9591_v32  ;;  %v10178_v46 = vpop.xlane.xlu0 %2542 }
 0x2ae   :  { %14931 = vst [vmem:[#allocation346_spill] sm:$0xff] %v10178_v46  ;;  %v10180_v58 = vpop.xlane.xlu1 %2306 }
 0x2b1   :  { %2614 = vadd.xlane.f32.xlu0 %v9600_v18  ;;  %2378 = vadd.xlane.f32.xlu1 %v9604_v45 }
 0x2b2   :  { %v10184_v14 = vpop.xlane.xlu1 %2546  ;;  %v10186_v62 = vpop.xlane.xlu0 %1590 }
 0x2b3   :  { %14932 = vst [vmem:[#allocation422_spill] sm:$0xff] %v10184_v14 }
 0x2b5   :  { %2618 = vadd.xlane.f32.xlu1 %v9606_v8  ;;  %1662 = vadd.xlane.f32.xlu0 %v9633_v35 }
 0x2b6   :  { %v10190_v23 = vpop.xlane.xlu0 %1830  ;;  %v10192_v53 = vpop.xlane.xlu1 %1594 }
 0x2b7   :  { %14933 = vst [vmem:[#allocation423_spill] sm:$0xff] %v10190_v23 }
 0x2b9   :  { %1902 = vadd.xlane.f32.xlu0 %v9692_v24  ;;  %1666 = vadd.xlane.f32.xlu1 %v9673_v16 }
 0x2ba   :  { %v10196_v32 = vpop.xlane.xlu0 %2310  ;;  %v10198_v18 = vpop.xlane.xlu1 %1834 }
 0x2bb   :  { %14934 = vst [vmem:[#allocation424_spill] sm:$0xff] %v10198_v18 }
 0x2bd   :  { %2382 = vadd.xlane.f32.xlu0 %v9694_v21  ;;  %1906 = vadd.xlane.f32.xlu1 %v9703_v59 }
 0x2be   :  { %v10202_v45 = vpop.xlane.xlu0 %2550  ;;  %v10204_v8 = vpop.xlane.xlu1 %2314 }
 0x2bf   :  { %14935 = vst [vmem:[#allocation425_spill] sm:$0xff] %v10202_v45 }
 0x2c1   :  { %2622 = vadd.xlane.f32.xlu0 %v9712_v25  ;;  %2386 = vadd.xlane.f32.xlu1 %v9716_v4 }
 0x2c2   :  { %v10208_v35 = vpop.xlane.xlu1 %2554  ;;  %v10210_v24 = vpop.xlane.xlu0 %1598 }
 0x2c3   :  { %14936 = vst [vmem:[#allocation426_spill] sm:$0xff] %v10208_v35 }
 0x2c5   :  { %2626 = vadd.xlane.f32.xlu1 %v9718_v43  ;;  %1670 = vadd.xlane.f32.xlu0 %v9745_v34  ;;  %v14940_v34 = vld [vmem:[#allocation186_spill] sm:$0xff] }
 0x2c6   :  { %v10214_v16 = vpop.xlane.xlu0 %1838  ;;  %v10216_v21 = vpop.xlane.xlu1 %1602 }
 0x2c7   :  { %14937 = vst [vmem:[#allocation427_spill] sm:$0xff] %v10214_v16  ;;  %v14942_v16 = vsub.f32 %v14940_v34, %v14941_v63 }
 0x2c9   :  { %1910 = vadd.xlane.f32.xlu0 %v9802_v13  ;;  %1674 = vadd.xlane.f32.xlu1 %v9785_v5  ;;  %v3126_v45 = vmax.f32 %v14942_v16, 0.0 }
 0x2ca   :  { %v10220_v59 = vpop.xlane.xlu0 %2318  ;;  %v10222_v25 = vpop.xlane.xlu1 %1842 }
 0x2cb   :  { %14938 = vst [vmem:[#allocation428_spill] sm:$0xff] %v10222_v25  ;;  %v3246_v55 = vadd.f32 0.001, %v3126_v45  ;;  %v14951_v45 = vld [vmem:[#allocation170_spill] sm:$0xff]  ;;  %v14964_v25 = vld [vmem:[#allocation293_spill] sm:$0xff] }
 0x2cd   :  { %2390 = vadd.xlane.f32.xlu0 %v9804_v9  ;;  %1914 = vadd.xlane.f32.xlu1 %v9815_v26  ;;  %v14944_v9 = vld [vmem:[#allocation195_spill] sm:$0xff]  ;;  %6192 = vrsqrt.f32 %v3246_v55 }
 0x2ce   :  { %v10226_v4 = vpop.xlane.xlu0 %2558  ;;  %v10228_v43 = vpop.xlane.xlu1 %2322  ;;  %v14946_v26 = vsub.f32 %v14944_v9, %v14945_v30 }
 0x2cf   :  { %14939 = vst [vmem:[#allocation429_spill] sm:$0xff] %v10226_v4 }
 0x2d0   :  { %v3127_v23 = vmax.f32 %v14946_v26, 0.0 }
 0x2d1   :  { %2630 = vadd.xlane.f32.xlu0 %v9824_v20  ;;  %2394 = vadd.xlane.f32.xlu1 %v9830_v29 }
 0x2d2   :  { %v10235_v5 = vpop.xlane.xlu1 %2562  ;;  %v10237_v13 = vpop.xlane.xlu0 %1606  ;;  %v3247_v20 = vadd.f32 0.001, %v3127_v23 }
 0x2d3   :  { %14943 = vst [vmem:[#allocation186_spill] sm:$0xff] %v10235_v5 }
 0x2d4   :  { %6194 = vrsqrt.f32 %v3247_v20 }
 0x2d5   :  { %2634 = vadd.xlane.f32.xlu1 %v9832_v50  ;;  %1678 = vadd.xlane.f32.xlu0 %v9867_v33  ;;  %v14950_v33 = vld [vmem:[#allocation172_spill] sm:$0xff] }
 0x2d6   :  { %v10244_v4 = vpop.xlane.xlu0 %1846  ;;  %v10246_v63 = vpop.xlane.xlu1 %1610  ;;  %v14952_v34 = vsub.f32 %v14950_v33, %v14951_v45  ;;  %v3487_v45 = vld [vmem:[%s13780_s2 + $0x10] sm:$0xff] }
 0x2d7   :  { %14947 = vst [vmem:[#allocation187_spill] sm:$0xff] %v10244_v4  ;;  %v6193_v26 = vpop.eup %6192  ;;  %v14956_v4 = vld [vmem:[#allocation255_spill] sm:$0xff] }
 0x2d8   :  { %v3125_v9 = vmax.f32 %v14952_v34, 0.0 }
 0x2d9   :  { %1918 = vadd.xlane.f32.xlu0 %v9886_v17  ;;  %v3486_v17 = vld [vmem:[%s13780_s2 + $0x8] sm:$0xff] }
 0x2da   :  { %v10249_v29 = vpop.xlane.xlu0 %2326  ;;  %v10251_v16 = vpop.xlane.xlu1 %1850  ;;  %v10269_v20 = vmul.f32 %v6193_v26, %v3486_v17 }
 0x2db   :  { %14948 = vst [vmem:[#allocation195_spill] sm:$0xff] %v10251_v16 }
 0x2dc   :  { %14954 = vst [vmem:[#allocation170_spill] sm:$0xff] %v10269_v20 }
 0x2dd   :  { %2398 = vadd.xlane.f32.xlu0 %v9905_v1  ;;  %v3245_v1 = vadd.f32 0.001, %v3125_v9  ;;  %v14960_v9 = vld [vmem:[#allocation275_spill] sm:$0xff] }
 0x2de   :  { %v10254_v30 = vpop.xlane.xlu0 %2566  ;;  %v10256_v50 = vpop.xlane.xlu1 %2330 }
 0x2df   :  { %14949 = vst [vmem:[#allocation192_spill] sm:$0xff] %v10254_v30  ;;  %v14955_v30 = vld [vmem:[#allocation257_spill] sm:$0xff]  ;;  %v6195_v33 = vpop.eup %6194  ;;  %6196 = vrsqrt.f32 %v3245_v1 }
 0x2e0   :  { %v14957_v46 = vsub.f32 %v14955_v30, %v14956_v4  ;;  %v10283_v5 = vmul.f32 %v6195_v33, %v3487_v45  ;;  %v14969_v33 = vld [vmem:[#allocation312_spill] sm:$0xff] }
 0x2e1   :  { %2638 = vadd.xlane.f32.xlu0 %v9922_v40 }
 0x2e2   :  { %v10265_v55 = vpop.xlane.xlu1 %2570  ;;  %v10267_v23 = vpop.xlane.xlu0 %1614  ;;  %v3134_v56 = vmax.f32 %v14957_v46, 0.0  ;;  %14962 = vst [vmem:[#allocation255_spill] sm:$0xff] %v10283_v5 }
 0x2e3   :  { %14953 = vst [vmem:[#allocation172_spill] sm:$0xff] %v10265_v55  ;;  %v14959_v55 = vld [vmem:[#allocation277_spill] sm:$0xff] }
 0x2e4   :  { %v3254_v40 = vadd.f32 0.001, %v3134_v56  ;;  %v14961_v26 = vsub.f32 %v14959_v55, %v14960_v9  ;;  %v14968_v9 = vld [vmem:[#allocation314_spill] sm:$0xff] }
 0x2e5   :  { %v14970_v45 = vsub.f32 %v14968_v9, %v14969_v33  ;;  %v14972_v9 = vld [vmem:[#allocation336_spill] sm:$0xff]  ;;  %v14973_v33 = vld [vmem:[#allocation334_spill] sm:$0xff] }
 0x2e6   :  { %v10277_v34 = vpop.xlane.xlu0 %1854  ;;  %v1619_v16 = vpop.xlane.xlu1 %1618  ;;  %4092 = vperm.xlu1 %6191, %v10269_v20   ;;  %v3136_v17 = vmax.f32 %v14961_v26, 0.0  ;;  %6198 = vrsqrt.f32 %v3254_v40  ;;  %v14965_v20 = vld [vmem:[#allocation291_spill] sm:$0xff] }
 0x2e7   :  { %14958 = vst [vmem:[#allocation257_spill] sm:$0xff] %v10277_v34  ;;  %v10290_v30 = vmul.f32 0.0051020407, %v1619_v16  ;;  %v14966_v1 = vsub.f32 %v14964_v25, %v14965_v20  ;;  %v3140_v26 = vmax.f32 %v14970_v45, 0.0  ;;  %v3485_v25 = vld [vmem:[%s13780_s2] sm:$0xff]  ;;  %v14974_v45 = vsub.f32 %v14972_v9, %v14973_v33 }
 0x2e8   :  { %v3256_v34 = vadd.f32 0.001, %v3136_v17 }
 0x2e9   :  { %v3138_v56 = vmax.f32 %v14966_v1, 0.0  ;;  %v6197_v40 = vpop.eup %6196  ;;  %v3260_v20 = vadd.f32 0.001, %v3140_v26  ;;  %v14977_v26 = vld [vmem:[#allocation354_spill] sm:$0xff] }
 0x2ea   :  { %v10285_v4 = vpop.xlane.xlu0 %2334  ;;  %v10287_v46 = vpop.xlane.xlu1 %1858  ;;  %4097 = vperm.xlu1 %6191, %v10283_v5   ;;  %6200 = vrsqrt.f32 %v3256_v34  ;;  %v10312_v34 = vmul.f32 %v6197_v40, %v3485_v25 }
 0x2eb   :  { %14963 = vst [vmem:[#allocation277_spill] sm:$0xff] %v10287_v46  ;;  %v2928_v46 = vmul.f32 %v10290_v30, %v10290_v30  ;;  %v3258_v16 = vadd.f32 0.001, %v3138_v56 }
 0x2ec   :  { %14975 = vst [vmem:[#allocation291_spill] sm:$0xff] %v10312_v34 }
 0x2ed   :  { %6202 = vrsqrt.f32 %v3258_v16  ;;  %v14978_v16 = vld [vmem:[#allocation352_spill] sm:$0xff] }
 0x2ee   :  { %v10295_v35 = vpop.xlane.xlu0 %2574  ;;  %v2339_v55 = vpop.xlane.xlu1 %2338  ;;  %6204 = vrsqrt.f32 %v3260_v20  ;;  %v14979_v12 = vsub.f32 %v14977_v26, %v14978_v16  ;;  %v14982_v26 = vld [vmem:[#allocation374_spill] sm:$0xff] }
 0x2ef   :  { %14967 = vst [vmem:[#allocation275_spill] sm:$0xff] %v10295_v35  ;;  %v2808_v18 = vmul.f32 0.0051020407, %v2339_v55  ;;  %v3142_v35 = vmax.f32 %v14974_v45, 0.0  ;;  %v3496_v45 = vld [vmem:[%s13780_s2 + $0x58] sm:$0xff] }
 0x2f0   :  { %v3144_v9 = vmax.f32 %v14979_v12, 0.0  ;;  %v14983_v12 = vld [vmem:[#allocation372_spill] sm:$0xff] }
 0x2f1   :  { %v3048_v5 = vsub.f32 %v2808_v18, %v2928_v46  ;;  %v6199_v18 = vpop.eup %6198 }
 0x2f2   :  { %v10302_v17 = vpop.xlane.xlu1 %2578  ;;  %v10304_v14 = vpop.xlane.xlu0 %1622 }
 0x2f3   :  { %14971 = vst [vmem:[#allocation293_spill] sm:$0xff] %v10302_v17  ;;  %v3168_v1 = vmax.f32 %v3048_v5, 0.0  ;;  %v3494_v17 = vld [vmem:[%s13780_s2 + $0x48] sm:$0xff]  ;;  %v3262_v5 = vadd.f32 0.001, %v3142_v35 }
 0x2f4   :  { %v6201_v40 = vpop.eup %6200  ;;  %v3264_v35 = vadd.f32 0.001, %v3144_v9 }
 0x2f5   :  { %v3288_v55 = vadd.f32 0.001, %v3168_v1  ;;  %v10323_v1 = vmul.f32 %v6199_v18, %v3494_v17  ;;  %v10338_v18 = vmul.f32 %v6201_v40, %v3496_v45 }
 0x2f6   :  { %v10314_v46 = vpop.xlane.xlu0 %1862  ;;  %v1627_v56 = vpop.xlane.xlu1 %1626 }
 0x2f7   :  { %14976 = vst [vmem:[#allocation314_spill] sm:$0xff] %v10314_v46  ;;  %4087 = vperm.xlu0 %6190, %v10312_v34   ;;  %6206 = vrsqrt.f32 %v3288_v55  ;;  %14980 = vst [vmem:[#allocation312_spill] sm:$0xff] %v10323_v1  ;;  %v10332_v20 = vmul.f32 0.0051020407, %v1627_v56  ;;  %v14984_v55 = vsub.f32 %v14982_v26, %v14983_v12  ;;  %v6203_v16 = vpop.eup %6202  ;;  %v14987_v56 = vsub.f32 %v9842_v2, %v9836_v61  ;;  %v3500_v2 = vld [vmem:[%s13780_s2 + $0x78] sm:$0xff] }
 0x2f8   :  { %6208 = vrsqrt.f32 %v3262_v5  ;;  %14985 = vst [vmem:[#allocation334_spill] sm:$0xff] %v10338_v18  ;;  %v6205_v45 = vpop.eup %6204 }
 0x2f9   :  { %v3146_v17 = vmax.f32 %v14984_v55, 0.0  ;;  %v2930_v5 = vmul.f32 %v10332_v20, %v10332_v20  ;;  %6210 = vrsqrt.f32 %v3264_v35  ;;  %v3528_v55 = vld [vmem:[%s13780_s2 + $0x158] sm:$0xff] }
 0x2fa   :  { %v10325_v25 = vpop.xlane.xlu0 %2342  ;;  %v10327_v33 = vpop.xlane.xlu1 %1866 }
 0x2fb   :  { %14981 = vst [vmem:[#allocation336_spill] sm:$0xff] %v10327_v33  ;;  %4132 = vperm.xlu0 %6190, %v10323_v1   ;;  %v3498_v33 = vld [vmem:[%s13780_s2 + $0x68] sm:$0xff]  ;;  %v3148_v1 = vmax.f32 %v14987_v56, 0.0  ;;  %v3266_v40 = vadd.f32 0.001, %v3146_v17 }
 0x2fc   :  { %v10351_v12 = vmul.f32 %v6203_v16, %v3498_v33  ;;  %v14990_v33 = vsub.f32 %v9919_v49, %v9915_v47  ;;  %v14994_v47 = vsub.f32 %v9970_v27, %v9964_v10 }
 0x2fd   :  { %6212 = vrsqrt.f32 %v3266_v40 }
 0x2fe   :  { %v10340_v34 = vpop.xlane.xlu0 %2582  ;;  %v2347_v46 = vpop.xlane.xlu1 %2346  ;;  %14988 = vst [vmem:[#allocation352_spill] sm:$0xff] %v10351_v12  ;;  %v3150_v17 = vmax.f32 %v14990_v33, 0.0 }
 0x2ff   :  { %14986 = vst [vmem:[#allocation354_spill] sm:$0xff] %v10340_v34  ;;  %v2810_v9 = vmul.f32 0.0051020407, %v2347_v46  ;;  %4142 = vperm.xlu0 %6190, %v10338_v18   ;;  %v3268_v46 = vadd.f32 0.001, %v3148_v1  ;;  %v3502_v1 = vld [vmem:[%s13780_s2 + $0x88] sm:$0xff] }
 0x300   :  { %v3270_v49 = vadd.f32 0.001, %v3150_v17 }
 0x301   :  { %v3050_v26 = vsub.f32 %v2810_v9, %v2930_v5  ;;  %v6207_v34 = vpop.eup %6206  ;;  %v10369_v5 = vmul.f32 %v6205_v45, %v3500_v2  ;;  %6214 = vrsqrt.f32 %v3268_v46  ;;  %v14996_v46 = vsub.f32 %v10018_v0, %v10012_v54  ;;  %v3506_v0 = vld [vmem:[%s13780_s2 + $0xa8] sm:$0xff] }
 0x302   :  { %v10356_v48 = vpop.xlane.xlu1 %2586  ;;  %v10358_v61 = vpop.xlane.xlu0 %1630  ;;  %v10367_v16 = vmul.f32 %v6207_v34, %v3528_v55  ;;  %v3152_v34 = vmax.f32 %v14994_v47, 0.0 }
 0x303   :  { %14989 = vst [vmem:[#allocation374_spill] sm:$0xff] %v10356_v48  ;;  %v3170_v35 = vmax.f32 %v3050_v26, 0.0  ;;  %4152 = vperm.xlu0 %6190, %v10351_v12   ;;  %14991 = vst [vmem:[#allocation372_spill] sm:$0xff] %v10369_v5  ;;  %v6209_v9 = vpop.eup %6208 }
 0x304   :  { %v10378_v40 = vmul.f32 %v10367_v16, %v10290_v30  ;;  %v10384_v45 = vmul.f32 %v6209_v9, %v3502_v1  ;;  %v6211_v26 = vpop.eup %6210  ;;  %v3504_v30 = vld [vmem:[%s13780_s2 + $0x98] sm:$0xff]  ;;  %v3272_v27 = vadd.f32 0.001, %v3152_v34 }
 0x305   :  { %v3290_v56 = vadd.f32 0.001, %v3170_v35  ;;  %v3154_v35 = vmax.f32 %v14996_v46, 0.0  ;;  %v10399_v10 = vmul.f32 %v6211_v26, %v3504_v30  ;;  %v3530_v46 = vld [vmem:[%s13780_s2 + $0x168] sm:$0xff] }
 0x306   :  { %v10371_v18 = vpop.xlane.xlu0 %1870  ;;  %v1635_v48 = vpop.xlane.xlu1 %1634  ;;  %14993 = vst [vmem:[#allocation431_spill] sm:$0xff] %v10378_v40  ;;  %14995 = vst [vmem:[#allocation432_spill] sm:$0xff] %v10384_v45 }
 0x307   :  { %14992 = vst [vmem:[#allocation430_spill] sm:$0xff] %v10371_v18  ;;  %4162 = vperm.xlu0 %6190, %v10369_v5   ;;  %6216 = vrsqrt.f32 %v3290_v56  ;;  %v10396_v33 = vmul.f32 0.0051020407, %v1635_v48  ;;  %14997 = vst [vmem:[#allocation433_spill] sm:$0xff] %v10399_v10  ;;  %v6213_v17 = vpop.eup %6212  ;;  %v10402_v56 = vmul.f32 0.0051020407, %v10160_v36  ;;  %v15000_v48 = vsub.f32 %v10079_v19, %v10075_v15 }
 0x308   :  { %6218 = vrsqrt.f32 %v3270_v49  ;;  %v3274_v54 = vadd.f32 0.001, %v3154_v35  ;;  %v2800_v36 = vmul.f32 0.0051020407, %v10180_v58  ;;  %v10417_v30 = vmul.f32 %v6213_v17, %v3506_v0  ;;  %v3508_v58 = vld [vmem:[%s13780_s2 + $0xb8] sm:$0xff]  ;;  %v15003_v17 = vld [vmem:[#allocation200_spill] sm:$0xff] }
 0x309   :  { %14998 = vst [vmem:[#allocation434_spill] sm:$0xff] %v10402_v56  ;;  %v3156_v49 = vmax.f32 %v15000_v48, 0.0  ;;  %v2932_v47 = vmul.f32 %v10396_v33, %v10396_v33  ;;  %6220 = vrsqrt.f32 %v3272_v27  ;;  %v2920_v19 = vmul.f32 %v10402_v56, %v10402_v56  ;;  %v15004_v0 = vld [vmem:[#allocation198_spill] sm:$0xff] }
 0x30a   :  { %v10386_v55 = vpop.xlane.xlu0 %2350  ;;  %v10388_v2 = vpop.xlane.xlu1 %1874  ;;  %15001 = vst [vmem:[#allocation436_spill] sm:$0xff] %v10417_v30  ;;  %v10425_v15 = vmul.f32 0.0051020407, %v10192_v53  ;;  %v15005_v48 = vsub.f32 %v15003_v17, %v15004_v0  ;;  %6222 = vrsqrt.f32 %v3274_v54  ;;  %v15006_v53 = vsub.f32 %v10146_v28, %v10142_v11 }
 0x30b   :  { %4172 = vperm.xlu0 %6190, %v10384_v45   ;;  %v6215_v26 = vpop.eup %6214  ;;  %v10446_v5 = vmul.f32 0.0051020407, %v10216_v21 }
 0x30c   :  { %15002 = vst [vmem:[#allocation437_spill] sm:$0xff] %v10425_v15  ;;  %v3158_v56 = vmax.f32 %v15006_v53, 0.0  ;;  %v10448_v17 = vmul.f32 %v6215_v26, %v3508_v58  ;;  %v2922_v11 = vmul.f32 %v10425_v15, %v10425_v15  ;;  %v2804_v26 = vmul.f32 0.0051020407, %v10228_v43  ;;  %v3512_v43 = vld [vmem:[%s13780_s2 + $0xd8] sm:$0xff] }
 0x30d   :  { %15007 = vst [vmem:[#allocation200_spill] sm:$0xff] %v10446_v5 }
 0x30e   :  { %v10404_v9 = vpop.xlane.xlu0 %2590  ;;  %v2355_v1 = vpop.xlane.xlu1 %2354  ;;  %1682 = vadd.xlane.f32.xlu1 %v10071_v31  ;;  %15008 = vst [vmem:[#allocation198_spill] sm:$0xff] %v10448_v17 }
 0x30f   :  { %14999 = vst [vmem:[#allocation435_spill] sm:$0xff] %v10404_v9  ;;  %v2812_v34 = vmul.f32 0.0051020407, %v2355_v1  ;;  %4182 = vperm.xlu0 %6190, %v10399_v10   ;;  %v3040_v10 = vsub.f32 %v2800_v36, %v2920_v19 }
 0x311   :  { %v3052_v31 = vsub.f32 %v2812_v34, %v2932_v47  ;;  %v6217_v35 = vpop.eup %6216  ;;  %v3128_v47 = vmax.f32 %v15005_v48, 0.0  ;;  %v3276_v34 = vadd.f32 0.001, %v3156_v49  ;;  %v15009_v49 = vld [vmem:[#allocation215_spill] sm:$0xff] }
 0x312   :  { %v10427_v1 = vpop.xlane.xlu1 %2594  ;;  %v10429_v27 = vpop.xlane.xlu0 %1638  ;;  %1922 = vadd.xlane.f32.xlu1 %v10107_v3  ;;  %v2802_v3 = vmul.f32 0.0051020407, %v10204_v8  ;;  %v10443_v45 = vmul.f32 %v6217_v35, %v3530_v46  ;;  %v3510_v8 = vld [vmem:[%s13780_s2 + $0xc8] sm:$0xff]  ;;  %v3278_v46 = vadd.f32 0.001, %v3158_v56  ;;  %v3160_v35 = vmax.f32 %v3040_v10, 0.0 }
 0x313   :  { %v3172_v40 = vmax.f32 %v3052_v31, 0.0  ;;  %4192 = vperm.xlu0 %6190, %v10417_v30   ;;  %v6219_v54 = vpop.eup %6218  ;;  %v15010_v31 = vld [vmem:[#allocation212_spill] sm:$0xff]  ;;  %6224 = vrsqrt.f32 %v3276_v34  ;;  %v15017_v10 = vld [vmem:[#allocation218_spill] sm:$0xff] }
 0x314   :  { %v15011_v0 = vsub.f32 %v15009_v49, %v15010_v31  ;;  %v10463_v21 = vmul.f32 %v10443_v45, %v10332_v20  ;;  %v3042_v19 = vsub.f32 %v2802_v3, %v2922_v11  ;;  %v10469_v58 = vmul.f32 %v6219_v54, %v3510_v8  ;;  %v6221_v53 = vpop.eup %6220  ;;  %v15020_v8 = vld [vmem:[#allocation233_spill] sm:$0xff] }
 0x315   :  { %v3292_v12 = vadd.f32 0.001, %v3172_v40  ;;  %v3248_v40 = vadd.f32 0.001, %v3128_v47  ;;  %v10472_v20 = vmul.f32 0.0051020407, %v10246_v63  ;;  %v10489_v11 = vmul.f32 %v6221_v53, %v3512_v43 }
 0x316   :  { %v3129_v48 = vmax.f32 %v15011_v0, 0.0  ;;  %v10455_v28 = vpop.xlane.xlu0 %1878  ;;  %v1643_v36 = vpop.xlane.xlu1 %1642  ;;  %2402 = vadd.xlane.f32.xlu1 %v10084_v42  ;;  %15013 = vst [vmem:[#allocation212_spill] sm:$0xff] %v10463_v21  ;;  %v2924_v42 = vmul.f32 %v10446_v5, %v10446_v5  ;;  %15014 = vst [vmem:[#allocation438_spill] sm:$0xff] %v10469_v58  ;;  %v3280_v63 = vadd.f32 0.001, %v3160_v35  ;;  %v3162_v0 = vmax.f32 %v3042_v19, 0.0 }
 0x317   :  { %15012 = vst [vmem:[#allocation215_spill] sm:$0xff] %v10455_v28  ;;  %4202 = vperm.xlu0 %6190, %v10448_v17   ;;  %6226 = vrsqrt.f32 %v3292_v12  ;;  %15015 = vst [vmem:[#allocation439_spill] sm:$0xff] %v10472_v20  ;;  %v15016_v12 = vld [vmem:[#allocation220_spill] sm:$0xff]  ;;  %v10485_v31 = vmul.f32 0.0051020407, %v1643_v36 }
 0x318   :  { %v3249_v49 = vadd.f32 0.001, %v3129_v48  ;;  %6228 = vrsqrt.f32 %v3248_v40  ;;  %v15018_v56 = vsub.f32 %v15016_v12, %v15017_v10  ;;  %v3044_v54 = vsub.f32 %v2804_v26, %v2924_v42  ;;  %15019 = vst [vmem:[#allocation220_spill] sm:$0xff] %v10489_v11  ;;  %v15021_v40 = vld [vmem:[#allocation103_spill] sm:$0xff] }
 0x319   :  { %6230 = vrsqrt.f32 %v3278_v46  ;;  %v2806_v48 = vmul.f32 0.0051020407, %v10256_v50  ;;  %v15022_v21 = vsub.f32 %v15020_v8, %v15021_v40  ;;  %v2926_v26 = vmul.f32 %v10472_v20, %v10472_v20  ;;  %v3514_v46 = vld [vmem:[%s13780_s2 + $0xe8] sm:$0xff] }
 0x31a   :  { %v10474_v47 = vpop.xlane.xlu0 %2358  ;;  %v10476_v34 = vpop.xlane.xlu1 %1882  ;;  %2642 = vadd.xlane.f32.xlu1 %v10114_v60  ;;  %v3130_v3 = vmax.f32 %v15018_v56, 0.0  ;;  %6232 = vrsqrt.f32 %v3249_v49  ;;  %v3164_v50 = vmax.f32 %v3044_v54, 0.0  ;;  %v2934_v19 = vmul.f32 %v10485_v31, %v10485_v31  ;;  %v3532_v56 = vld [vmem:[%s13780_s2 + $0x178] sm:$0xff] }
 0x31b   :  { %4212 = vperm.xlu0 %6190, %v10469_v58   ;;  %v6223_v60 = vpop.eup %6222  ;;  %v3131_v5 = vmax.f32 %v15022_v21, 0.0  ;;  %6234 = vrsqrt.f32 %v3280_v63  ;;  %v3282_v21 = vadd.f32 0.001, %v3162_v0  ;;  %v3046_v49 = vsub.f32 %v2806_v48, %v2926_v26  ;;  %v3516_v63 = vld [vmem:[%s13780_s2 + $0xf8] sm:$0xff]  ;;  %v15025_v0 = vld [vmem:[#allocation238_spill] sm:$0xff]  ;;  %v15026_v48 = vld [vmem:[#allocation236_spill] sm:$0xff] }
 0x31c   :  { %v3250_v35 = vadd.f32 0.001, %v3130_v3  ;;  %v10504_v10 = vmul.f32 %v6223_v60, %v3514_v46  ;;  %v15027_v26 = vsub.f32 %v15025_v0, %v15026_v48  ;;  %v15034_v0 = vld [vmem:[#allocation252_spill] sm:$0xff] }
 0x31d   :  { %v6225_v43 = vpop.eup %6224  ;;  %v3251_v3 = vadd.f32 0.001, %v3131_v5  ;;  %v15035_v48 = vld [vmem:[#allocation116_spill] sm:$0xff] }
 0x31e   :  { %v10496_v36 = vpop.xlane.xlu0 %2598  ;;  %v2363_v42 = vpop.xlane.xlu1 %2362  ;;  %15024 = vst [vmem:[#allocation233_spill] sm:$0xff] %v10504_v10  ;;  %6236 = vrsqrt.f32 %v3250_v35  ;;  %v3132_v60 = vmax.f32 %v15027_v26, 0.0  ;;  %v10522_v15 = vmul.f32 %v6225_v43, %v3516_v63  ;;  %v15032_v43 = vld [vmem:[#allocation174_spill] sm:$0xff]  ;;  %v15036_v26 = vsub.f32 %v15034_v0, %v15035_v48 }
 0x31f   :  { %15023 = vst [vmem:[#allocation218_spill] sm:$0xff] %v10496_v36  ;;  %v2814_v53 = vmul.f32 0.0051020407, %v2363_v42  ;;  %4222 = vperm.xlu0 %6190, %v10489_v11   ;;  %v3284_v42 = vadd.f32 0.001, %v3164_v50  ;;  %6238 = vrsqrt.f32 %v3282_v21  ;;  %v3518_v50 = vld [vmem:[%s13780_s2 + $0x108] sm:$0xff] }
 0x320   :  { %15028 = vst [vmem:[#allocation103_spill] sm:$0xff] %v10522_v15  ;;  %6240 = vrsqrt.f32 %v3251_v3  ;;  %v3488_v21 = vld [vmem:[%s13780_s2 + $0x18] sm:$0xff]  ;;  %v3252_v3 = vadd.f32 0.001, %v3132_v60 }
 0x321   :  { %v3054_v12 = vsub.f32 %v2814_v53, %v2934_v19  ;;  %v6227_v8 = vpop.eup %6226  ;;  %v3166_v19 = vmax.f32 %v3046_v49, 0.0  ;;  %6242 = vrsqrt.f32 %v3284_v42  ;;  %v3520_v60 = vld [vmem:[%s13780_s2 + $0x118] sm:$0xff]  ;;  %v3489_v42 = vld [vmem:[%s13780_s2 + $0x20] sm:$0xff] }
 0x322   :  { %v10509_v54 = vpop.xlane.xlu1 %2602  ;;  %v10511_v40 = vpop.xlane.xlu0 %1646  ;;  %v10520_v5 = vmul.f32 %v6227_v8, %v3532_v56 }
 0x323   :  { %v3174_v46 = vmax.f32 %v3054_v12, 0.0  ;;  %4232 = vperm.xlu0 %6190, %v10504_v10   ;;  %v6229_v53 = vpop.eup %6228  ;;  %v15031_v12 = vld [vmem:[#allocation177_spill] sm:$0xff]  ;;  %v3286_v10 = vadd.f32 0.001, %v3166_v19  ;;  %v15039_v19 = vld [vmem:[#allocation271_spill] sm:$0xff] }
 0x324   :  { %v6231_v11 = vpop.eup %6230  ;;  %v10534_v49 = vmul.f32 %v10520_v5, %v10396_v33  ;;  %v15033_v56 = vsub.f32 %v15031_v12, %v15032_v43  ;;  %v10545_v30 = vmul.f32 %v6229_v53, %v3488_v21  ;;  %v15040_v53 = vld [vmem:[#allocation128_spill] sm:$0xff] }
 0x325   :  { %v3294_v20 = vadd.f32 0.001, %v3174_v46  ;;  %v6233_v63 = vpop.eup %6232  ;;  %v3133_v46 = vmax.f32 %v15036_v26, 0.0  ;;  %v10543_v17 = vmul.f32 %v6231_v11, %v3518_v50  ;;  %v15041_v50 = vsub.f32 %v15039_v19, %v15040_v53 }
 0x326   :  { %v10524_v58 = vpop.xlane.xlu0 %1886  ;;  %v1651_v35 = vpop.xlane.xlu1 %1650  ;;  %15030 = vst [vmem:[#allocation236_spill] sm:$0xff] %v10534_v49  ;;  %v3186_v8 = vmax.f32 %v15033_v56, 0.0  ;;  %15038 = vst [vmem:[#allocation174_spill] sm:$0xff] %v10545_v30  ;;  %v10566_v48 = vmul.f32 %v6233_v63, %v3489_v42  ;;  %v15049_v63 = vld [vmem:[#allocation141_spill] sm:$0xff] }
 0x327   :  { %15029 = vst [vmem:[#allocation238_spill] sm:$0xff] %v10524_v58  ;;  %4242 = vperm.xlu0 %6190, %v10522_v15   ;;  %6244 = vrsqrt.f32 %v3294_v20  ;;  %15037 = vst [vmem:[#allocation177_spill] sm:$0xff] %v10543_v17  ;;  %v6235_v33 = vpop.eup %6234  ;;  %v10557_v20 = vmul.f32 0.0051020407, %v1651_v35  ;;  %v3253_v11 = vadd.f32 0.001, %v3133_v46 }
 0x328   :  { %v3306_v43 = vadd.f32 0.001, %v3186_v8  ;;  %6246 = vrsqrt.f32 %v3252_v3  ;;  %v3135_v21 = vmax.f32 %v15041_v50, 0.0  ;;  %v6237_v56 = vpop.eup %6236  ;;  %v10564_v0 = vmul.f32 %v6235_v33, %v3520_v60  ;;  %15043 = vst [vmem:[#allocation116_spill] sm:$0xff] %v10566_v48  ;;  %v15044_v8 = vld [vmem:[#allocation204_spill] sm:$0xff]  ;;  %v15045_v3 = vld [vmem:[#allocation203_spill] sm:$0xff] }
 0x329   :  { %6248 = vrsqrt.f32 %v3286_v10  ;;  %v6239_v26 = vpop.eup %6238  ;;  %v15046_v35 = vsub.f32 %v15044_v8, %v15045_v3  ;;  %v3522_v46 = vld [vmem:[%s13780_s2 + $0x128] sm:$0xff]  ;;  %v15048_v33 = vld [vmem:[#allocation290_spill] sm:$0xff]  ;;  %v2936_v19 = vmul.f32 %v10557_v20, %v10557_v20 }
 0x32a   :  { %v10547_v49 = vpop.xlane.xlu0 %2366  ;;  %v10549_v12 = vpop.xlane.xlu1 %1890  ;;  %15042 = vst [vmem:[#allocation252_spill] sm:$0xff] %v10564_v0  ;;  %v3490_v10 = vld [vmem:[%s13780_s2 + $0x28] sm:$0xff]  ;;  %6250 = vrsqrt.f32 %v3306_v43  ;;  %v15050_v60 = vsub.f32 %v15048_v33, %v15049_v63  ;;  %v3255_v8 = vadd.f32 0.001, %v3135_v21  ;;  %v3491_v21 = vld [vmem:[%s13780_s2 + $0x30] sm:$0xff] }
 0x32b   :  { %4252 = vperm.xlu0 %6190, %v10543_v17   ;;  %4102 = vperm.xlu1 %6191, %v10545_v30   ;;  %v3188_v15 = vmax.f32 %v15046_v35, 0.0  ;;  %v6241_v50 = vpop.eup %6240  ;;  %6252 = vrsqrt.f32 %v3253_v11  ;;  %v10586_v30 = vmul.f32 %v6239_v26, %v3522_v46  ;;  %v10588_v43 = vmul.f32 %v6237_v56, %v3490_v10  ;;  %v3534_v33 = vld [vmem:[%s13780_s2 + $0x188] sm:$0xff]  ;;  %v3524_v11 = vld [vmem:[%s13780_s2 + $0x138] sm:$0xff] }
 0x32c   :  { %v3137_v42 = vmax.f32 %v15050_v60, 0.0  ;;  %v6243_v3 = vpop.eup %6242  ;;  %6254 = vrsqrt.f32 %v3255_v8  ;;  %v15054_v46 = vld [vmem:[#allocation307_spill] sm:$0xff]  ;;  %v10612_v28 = vmul.f32 %v6241_v50, %v3491_v21 }
 0x32d   :  { %15051 = vst [vmem:[#allocation128_spill] sm:$0xff] %v10586_v30  ;;  %15052 = vst [vmem:[#allocation204_spill] sm:$0xff] %v10588_v43  ;;  %v3308_v60 = vadd.f32 0.001, %v3188_v15  ;;  %v15053_v15 = vld [vmem:[#allocation309_spill] sm:$0xff]  ;;  %v10610_v36 = vmul.f32 %v6243_v3, %v3524_v11  ;;  %v3526_v8 = vld [vmem:[%s13780_s2 + $0x148] sm:$0xff] }
 0x32e   :  { %v10571_v58 = vpop.xlane.xlu0 %2606  ;;  %v2371_v17 = vpop.xlane.xlu1 %2370  ;;  %v3257_v56 = vadd.f32 0.001, %v3137_v42  ;;  %v15055_v10 = vsub.f32 %v15053_v15, %v15054_v46  ;;  %15057 = vst [vmem:[#allocation290_spill] sm:$0xff] %v10612_v28  ;;  %v15060_v3 = vld [vmem:[#allocation224_spill] sm:$0xff]  ;;  %v15061_v50 = vld [vmem:[#allocation223_spill] sm:$0xff] }
 0x32f   :  { %15047 = vst [vmem:[#allocation271_spill] sm:$0xff] %v10571_v58  ;;  %v2816_v53 = vmul.f32 0.0051020407, %v2371_v17  ;;  %4262 = vperm.xlu0 %6190, %v10564_v0   ;;  %4107 = vperm.xlu1 %6191, %v10566_v48   ;;  %15056 = vst [vmem:[#allocation203_spill] sm:$0xff] %v10610_v36  ;;  %6256 = vrsqrt.f32 %v3308_v60  ;;  %v15062_v11 = vsub.f32 %v15060_v3, %v15061_v50  ;;  %v15064_v15 = vld [vmem:[#allocation327_spill] sm:$0xff] }
 0x330   :  { %6258 = vrsqrt.f32 %v3257_v56  ;;  %v3546_v56 = vld [vmem:[%s13780_s2 + $0x1e8] sm:$0xff] }
 0x331   :  { %v3056_v35 = vsub.f32 %v2816_v53, %v2936_v19  ;;  %v6245_v63 = vpop.eup %6244  ;;  %v3139_v19 = vmax.f32 %v15055_v10, 0.0  ;;  %v3190_v21 = vmax.f32 %v15062_v11, 0.0 }
 0x332   :  { %v10593_v17 = vpop.xlane.xlu1 %2610  ;;  %v10595_v0 = vpop.xlane.xlu0 %1654  ;;  %v10608_v53 = vmul.f32 %v6245_v63, %v3534_v33  ;;  %v3492_v33 = vld [vmem:[%s13780_s2 + $0x38] sm:$0xff] }
 0x333   :  { %v3176_v26 = vmax.f32 %v3056_v35, 0.0  ;;  %4272 = vperm.xlu0 %6190, %v10586_v30   ;;  %4112 = vperm.xlu1 %6191, %v10588_v43   ;;  %v6247_v48 = vpop.eup %6246  ;;  %v3259_v60 = vadd.f32 0.001, %v3139_v19  ;;  %v3493_v19 = vld [vmem:[%s13780_s2 + $0x40] sm:$0xff]  ;;  %v3310_v50 = vadd.f32 0.001, %v3190_v21 }
 0x334   :  { %v6249_v9 = vpop.eup %6248  ;;  %v10624_v63 = vmul.f32 %v10608_v53, %v10485_v31  ;;  %v10636_v31 = vmul.f32 %v6247_v48, %v3492_v33  ;;  %v15068_v48 = vld [vmem:[#allocation349_spill] sm:$0xff] }
 0x335   :  { %v3296_v58 = vadd.f32 0.001, %v3176_v26  ;;  %v15063_v26 = vld [vmem:[#allocation329_spill] sm:$0xff]  ;;  %v6251_v30 = vpop.eup %6250  ;;  %v10634_v43 = vmul.f32 %v6249_v9, %v3526_v8  ;;  %v15069_v8 = vld [vmem:[#allocation347_spill] sm:$0xff] }
 0x336   :  { %v10614_v42 = vpop.xlane.xlu0 %1894  ;;  %v1659_v35 = vpop.xlane.xlu1 %1658  ;;  %15059 = vst [vmem:[#allocation309_spill] sm:$0xff] %v10624_v63  ;;  %v15065_v46 = vsub.f32 %v15063_v26, %v15064_v15  ;;  %15067 = vst [vmem:[#allocation224_spill] sm:$0xff] %v10636_v31  ;;  %v15070_v33 = vsub.f32 %v15068_v48, %v15069_v8  ;;  %v10655_v26 = vmul.f32 %v6251_v30, %v3546_v56  ;;  %v15078_v48 = vld [vmem:[#allocation366_spill] sm:$0xff] }
 0x337   :  { %15058 = vst [vmem:[#allocation141_spill] sm:$0xff] %v10614_v42  ;;  %4282 = vperm.xlu0 %6190, %v10610_v36   ;;  %4117 = vperm.xlu1 %6191, %v10612_v28   ;;  %6260 = vrsqrt.f32 %v3296_v58  ;;  %15066 = vst [vmem:[#allocation307_spill] sm:$0xff] %v10634_v43  ;;  %v6253_v63 = vpop.eup %6252  ;;  %v10648_v58 = vmul.f32 0.0051020407, %v1659_v35  ;;  %v15073_v36 = vld [vmem:[#allocation241_spill] sm:$0xff]  ;;  %v15074_v28 = vld [vmem:[#allocation114_spill] sm:$0xff] }
 0x338   :  { %v3141_v10 = vmax.f32 %v15065_v46, 0.0  ;;  %6262 = vrsqrt.f32 %v3259_v60  ;;  %v3143_v11 = vmax.f32 %v15070_v33, 0.0  ;;  %15071 = vst [vmem:[#allocation223_spill] sm:$0xff] %v10655_v26  ;;  %v10657_v15 = vmul.f32 %v6253_v63, %v3493_v19  ;;  %v6255_v46 = vpop.eup %6254  ;;  %v3495_v60 = vld [vmem:[%s13780_s2 + $0x50] sm:$0xff] }
 0x339   :  { %v15075_v21 = vsub.f32 %v15073_v36, %v15074_v28  ;;  %6264 = vrsqrt.f32 %v3310_v50  ;;  %v2938_v63 = vmul.f32 %v10648_v58, %v10648_v58  ;;  %v6257_v28 = vpop.eup %6256  ;;  %v3536_v50 = vld [vmem:[%s13780_s2 + $0x198] sm:$0xff] }
 0x33a   :  { %v10638_v42 = vpop.xlane.xlu0 %2374  ;;  %v10640_v3 = vpop.xlane.xlu1 %1898  ;;  %v3261_v9 = vadd.f32 0.001, %v3141_v10  ;;  %15072 = vst [vmem:[#allocation329_spill] sm:$0xff] %v10657_v15  ;;  %v15077_v10 = vld [vmem:[#allocation369_spill] sm:$0xff]  ;;  %v3263_v36 = vadd.f32 0.001, %v3143_v11 }
 0x33b   :  { %4292 = vperm.xlu0 %6190, %v10634_v43   ;;  %4122 = vperm.xlu1 %6191, %v10636_v31   ;;  %v3192_v35 = vmax.f32 %v15075_v21, 0.0  ;;  %v15079_v8 = vsub.f32 %v15077_v10, %v15078_v48  ;;  %v6259_v19 = vpop.eup %6258  ;;  %v10674_v21 = vmul.f32 %v6255_v46, %v3495_v60 }
 0x33c   :  { %6266 = vrsqrt.f32 %v3261_v9  ;;  %v3497_v9 = vld [vmem:[%s13780_s2 + $0x60] sm:$0xff] }
 0x33d   :  { %v3145_v30 = vmax.f32 %v15079_v8, 0.0  ;;  %v3312_v48 = vadd.f32 0.001, %v3192_v35  ;;  %6268 = vrsqrt.f32 %v3263_v36  ;;  %v15080_v35 = vsub.f32 %v9812_v57, %v9808_v7  ;;  %v15084_v57 = vld [vmem:[#allocation260_spill] sm:$0xff]  ;;  %v15085_v36 = vld [vmem:[#allocation126_spill] sm:$0xff] }
 0x33e   :  { %v10662_v18 = vpop.xlane.xlu0 %2614  ;;  %v2379_v43 = vpop.xlane.xlu1 %2378  ;;  %v10698_v31 = vmul.f32 %v6259_v19, %v3497_v9  ;;  %v15087_v19 = vsub.f32 %v9894_v38, %v9890_v41 }
 0x33f   :  { %15076 = vst [vmem:[#allocation327_spill] sm:$0xff] %v10662_v18  ;;  %v2818_v56 = vmul.f32 0.0051020407, %v2379_v43  ;;  %4392 = vperm.xlu0 %6190, %v10655_v26   ;;  %4127 = vperm.xlu1 %6191, %v10657_v15   ;;  %v3548_v26 = vld [vmem:[%s13780_s2 + $0x1f8] sm:$0xff]  ;;  %v3265_v11 = vadd.f32 0.001, %v3145_v30  ;;  %6270 = vrsqrt.f32 %v3312_v48 }
 0x340   :  { %v3147_v60 = vmax.f32 %v15080_v35, 0.0  ;;  %v10696_v15 = vmul.f32 %v6257_v28, %v3548_v26  ;;  %15082 = vst [vmem:[#allocation347_spill] sm:$0xff] %v10698_v31 }
 0x341   :  { %v3058_v33 = vsub.f32 %v2818_v56, %v2938_v63  ;;  %v6261_v10 = vpop.eup %6260  ;;  %6272 = vrsqrt.f32 %v3265_v11  ;;  %v3550_v11 = vld [vmem:[%s13780_s2 + $0x208] sm:$0xff] }
 0x342   :  { %v10679_v8 = vpop.xlane.xlu1 %2618  ;;  %v10681_v43 = vpop.xlane.xlu0 %1662  ;;  %v10694_v63 = vmul.f32 %v6261_v10, %v3536_v50  ;;  %15081 = vst [vmem:[#allocation349_spill] sm:$0xff] %v10696_v15  ;;  %v15086_v50 = vsub.f32 %v15084_v57, %v15085_v36  ;;  %v3267_v28 = vadd.f32 0.001, %v3147_v60  ;;  %v3149_v10 = vmax.f32 %v15087_v19, 0.0  ;;  %v3501_v60 = vld [vmem:[%s13780_s2 + $0x80] sm:$0xff] }
 0x343   :  { %v3178_v46 = vmax.f32 %v3058_v33, 0.0  ;;  %4302 = vperm.xlu0 %6190, %v10367_v16   ;;  %4137 = vperm.xlu1 %6191, %v10674_v21   ;;  %v6263_v18 = vpop.eup %6262  ;;  %v3499_v16 = vld [vmem:[%s13780_s2 + $0x70] sm:$0xff] }
 0x344   :  { %v10707_v7 = vmul.f32 %v10694_v63, %v10557_v20  ;;  %v3194_v26 = vmax.f32 %v15086_v50, 0.0  ;;  %v6265_v48 = vpop.eup %6264  ;;  %v10717_v9 = vmul.f32 %v6263_v18, %v3499_v16  ;;  %v3269_v38 = vadd.f32 0.001, %v3149_v10  ;;  %v15089_v18 = vld [vmem:[#allocation269_spill] sm:$0xff] }
 0x345   :  { %v3298_v56 = vadd.f32 0.001, %v3178_v46  ;;  %v10736_v36 = vmul.f32 %v6265_v48, %v3550_v11 }
 0x346   :  { %v10700_v30 = vpop.xlane.xlu0 %1902  ;;  %v1667_v33 = vpop.xlane.xlu1 %1666  ;;  %15083 = vst [vmem:[#allocation241_spill] sm:$0xff] %v10707_v7  ;;  %15088 = vst [vmem:[#allocation114_spill] sm:$0xff] %v10717_v9  ;;  %v3314_v57 = vadd.f32 0.001, %v3194_v26  ;;  %v15094_v7 = vld [vmem:[#allocation138_spill] sm:$0xff] }
 0x347   :  { %4402 = vperm.xlu0 %6190, %v10696_v15   ;;  %4147 = vperm.xlu1 %6191, %v10698_v31   ;;  %6274 = vrsqrt.f32 %v3298_v56  ;;  %v6267_v20 = vpop.eup %6266  ;;  %v10729_v41 = vmul.f32 0.0051020407, %v1667_v33  ;;  %v15090_v56 = vsub.f32 %v9952_v39, %v15089_v18  ;;  %15091 = vst [vmem:[#allocation369_spill] sm:$0xff] %v10736_v36  ;;  %v15093_v15 = vld [vmem:[#allocation280_spill] sm:$0xff]  ;;  %v15096_v39 = vsub.f32 %v10000_v22, %v9996_v37  ;;  %v3538_v37 = vld [vmem:[%s13780_s2 + $0x1a8] sm:$0xff] }
 0x348   :  { %6276 = vrsqrt.f32 %v3267_v28  ;;  %v10738_v50 = vmul.f32 %v6267_v20, %v3501_v60  ;;  %v6269_v19 = vpop.eup %6268  ;;  %v15095_v26 = vsub.f32 %v15093_v15, %v15094_v7  ;;  %v3503_v28 = vld [vmem:[%s13780_s2 + $0x90] sm:$0xff] }
 0x349   :  { %v3151_v16 = vmax.f32 %v15090_v56, 0.0  ;;  %6278 = vrsqrt.f32 %v3314_v57  ;;  %v3153_v10 = vmax.f32 %v15096_v39, 0.0  ;;  %v2940_v48 = vmul.f32 %v10729_v41, %v10729_v41  ;;  %v6271_v15 = vpop.eup %6270 }
 0x34a   :  { %v10719_v46 = vpop.xlane.xlu0 %2382  ;;  %v10721_v35 = vpop.xlane.xlu1 %1906  ;;  %15092 = vst [vmem:[#allocation366_spill] sm:$0xff] %v10738_v50  ;;  %v3196_v33 = vmax.f32 %v15095_v26, 0.0  ;;  %6280 = vrsqrt.f32 %v3269_v38  ;;  %v10755_v18 = vmul.f32 %v6269_v19, %v3503_v28  ;;  %v3505_v38 = vld [vmem:[%s13780_s2 + $0xa0] sm:$0xff] }
 0x34b   :  { %4312 = vperm.xlu0 %6190, %v10443_v45   ;;  %4157 = vperm.xlu1 %6191, %v10717_v9   ;;  %v3271_v7 = vadd.f32 0.001, %v3151_v16  ;;  %v6273_v11 = vpop.eup %6272  ;;  %v3273_v16 = vadd.f32 0.001, %v3153_v10 }
 0x34c   :  { %v3316_v57 = vadd.f32 0.001, %v3196_v33  ;;  %v15097_v33 = vld [vmem:[#allocation409_spill] sm:$0xff]  ;;  %v10782_v9 = vmul.f32 %v6273_v11, %v3505_v38  ;;  %v2801_v11 = vmul.f32 0.0051020407, %v10196_v32 }
 0x34d   :  { %6282 = vrsqrt.f32 %v3271_v7  ;;  %v15098_v28 = vsub.f32 %v10048_v44, %v15097_v33  ;;  %v3507_v44 = vld [vmem:[%s13780_s2 + $0xb0] sm:$0xff] }
 0x34e   :  { %v10743_v31 = vpop.xlane.xlu0 %2622  ;;  %v2387_v45 = vpop.xlane.xlu1 %2386  ;;  %6284 = vrsqrt.f32 %v3316_v57 }
 0x34f   :  { %v2820_v20 = vmul.f32 0.0051020407, %v2387_v45  ;;  %4412 = vperm.xlu0 %6190, %v10736_v36   ;;  %4167 = vperm.xlu1 %6191, %v10738_v50   ;;  %v3552_v45 = vld [vmem:[%s13780_s2 + $0x218] sm:$0xff]  ;;  %v3155_v39 = vmax.f32 %v15098_v28, 0.0  ;;  %6286 = vrsqrt.f32 %v3273_v16  ;;  %v10807_v16 = vmul.f32 0.0051020407, %v10210_v24 }
 0x350   :  { %v10780_v50 = vmul.f32 %v6271_v15, %v3552_v45  ;;  %v15105_v45 = vld [vmem:[#allocation325_spill] sm:$0xff] }
 0x351   :  { %v3060_v60 = vsub.f32 %v2820_v20, %v2940_v48  ;;  %v6275_v22 = vpop.eup %6274  ;;  %v10778_v20 = vmul.f32 0.0051020407, %v10186_v62  ;;  %v15102_v62 = vld [vmem:[#allocation297_spill] sm:$0xff]  ;;  %v3275_v57 = vadd.f32 0.001, %v3155_v39  ;;  %v15106_v38 = vsub.f32 %v10130_v6, %v15105_v45  ;;  %15107 = vst [vmem:[#allocation280_spill] sm:$0xff] %v10807_v16 }
 0x352   :  { %v10760_v56 = vpop.xlane.xlu1 %2626  ;;  %v10762_v26 = vpop.xlane.xlu0 %1670  ;;  %v10775_v48 = vmul.f32 %v6275_v22, %v3538_v37  ;;  %15100 = vst [vmem:[#allocation126_spill] sm:$0xff] %v10780_v50  ;;  %v15103_v37 = vld [vmem:[#allocation296_spill] sm:$0xff]  ;;  %v3554_v6 = vld [vmem:[%s13780_s2 + $0x228] sm:$0xff] }
 0x353   :  { %v3180_v19 = vmax.f32 %v3060_v60, 0.0  ;;  %4322 = vperm.xlu0 %6190, %v10520_v5   ;;  %4177 = vperm.xlu1 %6191, %v10755_v18   ;;  %15099 = vst [vmem:[#allocation260_spill] sm:$0xff] %v10778_v20  ;;  %v6277_v10 = vpop.eup %6276  ;;  %v15104_v22 = vsub.f32 %v15102_v62, %v15103_v37 }
 0x354   :  { %v10791_v7 = vmul.f32 %v10775_v48, %v10648_v58  ;;  %v6279_v33 = vpop.eup %6278  ;;  %v2921_v58 = vmul.f32 %v10778_v20, %v10778_v20  ;;  %v10804_v28 = vmul.f32 %v6277_v10, %v3507_v44  ;;  %v15108_v44 = vsub.f32 %v10172_v51, %v10170_v52  ;;  %v3511_v51 = vld [vmem:[%s13780_s2 + $0xd0] sm:$0xff] }
 0x355   :  { %v3300_v36 = vadd.f32 0.001, %v3180_v19  ;;  %v3198_v15 = vmax.f32 %v15104_v22, 0.0  ;;  %v3157_v19 = vmax.f32 %v15106_v38, 0.0  ;;  %v6281_v62 = vpop.eup %6280  ;;  %v2803_v38 = vmul.f32 0.0051020407, %v10220_v59 }
 0x356   :  { %v10784_v5 = vpop.xlane.xlu0 %1910  ;;  %v1675_v60 = vpop.xlane.xlu1 %1674  ;;  %15101 = vst [vmem:[#allocation269_spill] sm:$0xff] %v10791_v7  ;;  %v3041_v22 = vsub.f32 %v2801_v11, %v2921_v58  ;;  %v3159_v45 = vmax.f32 %v15108_v44, 0.0  ;;  %v15111_v11 = vld [vmem:[#allocation318_spill] sm:$0xff]  ;;  %v2805_v44 = vmul.f32 0.0051020407, %v10249_v29 }
 0x357   :  { %4422 = vperm.xlu0 %6190, %v10780_v50   ;;  %4187 = vperm.xlu1 %6191, %v10782_v9   ;;  %6288 = vrsqrt.f32 %v3300_v36  ;;  %v3509_v36 = vld [vmem:[%s13780_s2 + $0xc0] sm:$0xff]  ;;  %v3318_v39 = vadd.f32 0.001, %v3198_v15  ;;  %v10819_v10 = vmul.f32 0.0051020407, %v1675_v60  ;;  %v10827_v50 = vmul.f32 %v6279_v33, %v3554_v6  ;;  %v6283_v15 = vpop.eup %6282  ;;  %v15112_v60 = vld [vmem:[#allocation317_spill] sm:$0xff] }
 0x358   :  { %6290 = vrsqrt.f32 %v3275_v57  ;;  %v3277_v24 = vadd.f32 0.001, %v3157_v19  ;;  %v10829_v7 = vmul.f32 %v6281_v62, %v3509_v36  ;;  %v15113_v58 = vsub.f32 %v15111_v11, %v15112_v60  ;;  %v6285_v6 = vpop.eup %6284  ;;  %v3513_v29 = vld [vmem:[%s13780_s2 + $0xe0] sm:$0xff] }
 0x359   :  { %15109 = vst [vmem:[#allocation138_spill] sm:$0xff] %v10827_v50  ;;  %v10837_v57 = vmul.f32 0.0051020407, %v10237_v13  ;;  %6292 = vrsqrt.f32 %v3318_v39  ;;  %v3161_v59 = vmax.f32 %v3041_v22, 0.0  ;;  %v2942_v33 = vmul.f32 %v10819_v10, %v10819_v10  ;;  %v6287_v11 = vpop.eup %6286  ;;  %v3540_v39 = vld [vmem:[%s13780_s2 + $0x1b8] sm:$0xff] }
 0x35a   :  { %v10809_v32 = vpop.xlane.xlu0 %2390  ;;  %v10811_v37 = vpop.xlane.xlu1 %1914  ;;  %15110 = vst [vmem:[#allocation409_spill] sm:$0xff] %v10829_v7  ;;  %v3200_v20 = vmax.f32 %v15113_v58, 0.0  ;;  %6294 = vrsqrt.f32 %v3277_v24  ;;  %v3279_v13 = vadd.f32 0.001, %v3159_v45  ;;  %v10849_v58 = vmul.f32 %v6283_v15, %v3511_v51  ;;  %v3556_v24 = vld [vmem:[%s13780_s2 + $0x238] sm:$0xff] }
 0x35b   :  { %4332 = vperm.xlu0 %6190, %v10608_v53   ;;  %4197 = vperm.xlu1 %6191, %v10804_v28   ;;  %v2923_v53 = vmul.f32 %v10807_v16, %v10807_v16  ;;  %15114 = vst [vmem:[#allocation297_spill] sm:$0xff] %v10837_v57  ;;  %v3281_v45 = vadd.f32 0.001, %v3161_v59 }
 0x35c   :  { %6296 = vrsqrt.f32 %v3279_v13 }
 0x35d   :  { %v3043_v36 = vsub.f32 %v2803_v38, %v2923_v53 }
 0x35e   :  { %v10839_v19 = vpop.xlane.xlu0 %2630  ;;  %v2395_v52 = vpop.xlane.xlu1 %2394 }
 0x35f   :  { %v2822_v62 = vmul.f32 0.0051020407, %v2395_v52  ;;  %4432 = vperm.xlu0 %6190, %v10827_v50   ;;  %4207 = vperm.xlu1 %6191, %v10829_v7   ;;  %v3320_v52 = vadd.f32 0.001, %v3200_v20  ;;  %v2925_v50 = vmul.f32 %v10837_v57, %v10837_v57  ;;  %v3163_v20 = vmax.f32 %v3043_v36, 0.0  ;;  %v15119_v36 = vld [vmem:[#allocation339_spill] sm:$0xff] }
 0x360   :  { %v10871_v7 = vmul.f32 0.0051020407, %v10267_v23 }
 0x361   :  { %v3062_v60 = vsub.f32 %v2822_v62, %v2942_v33  ;;  %v6289_v22 = vpop.eup %6288  ;;  %v3045_v15 = vsub.f32 %v2805_v44, %v2925_v50  ;;  %v10866_v33 = vmul.f32 %v6285_v6, %v3556_v24  ;;  %v10868_v62 = vmul.f32 %v6287_v11, %v3513_v29  ;;  %v15118_v50 = vld [vmem:[#allocation340_spill] sm:$0xff]  ;;  %v3558_v29 = vld [vmem:[%s13780_s2 + $0x248] sm:$0xff] }
 0x362   :  { %v10856_v16 = vpop.xlane.xlu0 %1678  ;;  %v3660_v53 = vmul.f32 %v6289_v22, %v3540_v39  ;;  %v6291_v57 = vpop.eup %6290  ;;  %6298 = vrsqrt.f32 %v3320_v52  ;;  %15116 = vst [vmem:[#allocation325_spill] sm:$0xff] %v10871_v7  ;;  %v15120_v6 = vsub.f32 %v15118_v50, %v15119_v36  ;;  %v3283_v23 = vadd.f32 0.001, %v3163_v20 }
 0x363   :  { %v3182_v38 = vmax.f32 %v3062_v60, 0.0  ;;  %4342 = vperm.xlu0 %6190, %v10694_v63   ;;  %4217 = vperm.xlu1 %6191, %v10849_v58   ;;  %15115 = vst [vmem:[#allocation296_spill] sm:$0xff] %v10866_v33  ;;  %v3515_v63 = vld [vmem:[%s13780_s2 + $0xf0] sm:$0xff]  ;;  %6300 = vrsqrt.f32 %v3281_v45  ;;  %v3165_v11 = vmax.f32 %v3045_v15, 0.0  ;;  %v2807_v60 = vmul.f32 0.0051020407, %v10285_v4  ;;  %v6293_v39 = vpop.eup %6292 }
 0x364   :  { %v10879_v13 = vmul.f32 %v3660_v53, %v10729_v41  ;;  %v3202_v44 = vmax.f32 %v15120_v6, 0.0  ;;  %v10887_v22 = vmul.f32 %v6291_v57, %v3515_v63  ;;  %v6295_v52 = vpop.eup %6294  ;;  %v2927_v41 = vmul.f32 %v10871_v7, %v10871_v7  ;;  %v3517_v45 = vld [vmem:[%s13780_s2 + $0x100] sm:$0xff]  ;;  %v15121_v4 = vld [vmem:[#allocation176_spill] sm:$0xff]  ;;  %v15122_v57 = vld [vmem:[#allocation175_spill] sm:$0xff] }
 0x365   :  { %v3302_v51 = vadd.f32 0.001, %v3182_v38  ;;  %v15123_v20 = vsub.f32 %v15121_v4, %v15122_v57  ;;  %v10904_v50 = vmul.f32 %v6293_v39, %v3558_v29  ;;  %v10906_v36 = vmul.f32 %v6295_v52, %v3517_v45  ;;  %v15126_v57 = vld [vmem:[#allocation199_spill] sm:$0xff] }
 0x366   :  { %v10873_v59 = vpop.xlane.xlu0 %1918  ;;  %15117 = vst [vmem:[#allocation318_spill] sm:$0xff] %v10879_v13  ;;  %v3322_v38 = vadd.f32 0.001, %v3202_v44  ;;  %v3047_v63 = vsub.f32 %v2807_v60, %v2927_v41  ;;  %v6297_v6 = vpop.eup %6296  ;;  %v2809_v60 = vmul.f32 0.0051020407, %v10325_v25  ;;  %v3521_v25 = vld [vmem:[%s13780_s2 + $0x120] sm:$0xff] }
 0x367   :  { %4442 = vperm.xlu0 %6190, %v10866_v33   ;;  %4227 = vperm.xlu1 %6191, %v10868_v62   ;;  %6302 = vrsqrt.f32 %v3302_v51  ;;  %v3185_v15 = vmax.f32 %v15123_v20, 0.0  ;;  %v3285_v51 = vadd.f32 0.001, %v3165_v11  ;;  %15124 = vst [vmem:[#allocation317_spill] sm:$0xff] %v10904_v50  ;;  %v10909_v33 = vmul.f32 0.0051020407, %v10304_v14 }
 0x368   :  { %6304 = vrsqrt.f32 %v3283_v23  ;;  %v3167_v11 = vmax.f32 %v3047_v63, 0.0  ;;  %v3542_v14 = vld [vmem:[%s13780_s2 + $0x1c8] sm:$0xff]  ;;  %v15127_v20 = vld [vmem:[#allocation197_spill] sm:$0xff] }
 0x369   :  { %15125 = vst [vmem:[#allocation340_spill] sm:$0xff] %v10909_v33  ;;  %6306 = vrsqrt.f32 %v3322_v38  ;;  %v3305_v23 = vadd.f32 0.001, %v3185_v15  ;;  %v2929_v45 = vmul.f32 %v10909_v33, %v10909_v33  ;;  %v3560_v38 = vld [vmem:[%s13780_s2 + $0x258] sm:$0xff]  ;;  %v15128_v15 = vsub.f32 %v15126_v57, %v15127_v20  ;;  %v15135_v57 = vld [vmem:[#allocation219_spill] sm:$0xff] }
 0x36a   :  { %v10891_v24 = vpop.xlane.xlu0 %2398  ;;  %6308 = vrsqrt.f32 %v3285_v51  ;;  %v3287_v63 = vadd.f32 0.001, %v3167_v11 }
 0x36b   :  { %4352 = vperm.xlu0 %6190, %v10775_v48   ;;  %4237 = vperm.xlu1 %6191, %v10887_v22   ;;  %v3519_v48 = vld [vmem:[%s13780_s2 + $0x110] sm:$0xff]  ;;  %6310 = vrsqrt.f32 %v3305_v23  ;;  %v3187_v51 = vmax.f32 %v15128_v15, 0.0 }
 0x36c   :  { %v6299_v44 = vpop.eup %6298  ;;  %v10922_v41 = vmul.f32 %v6297_v6, %v3519_v48  ;;  %v3049_v6 = vsub.f32 %v2809_v60, %v2929_v45  ;;  %v3523_v23 = vld [vmem:[%s13780_s2 + $0x130] sm:$0xff]  ;;  %6312 = vrsqrt.f32 %v3287_v63 }
 0x36d   :  { %v6301_v52 = vpop.eup %6300  ;;  %v10936_v48 = vmul.f32 %v6299_v44, %v3560_v38  ;;  %v3307_v44 = vadd.f32 0.001, %v3187_v51  ;;  %v15138_v51 = vld [vmem:[#allocation109_spill] sm:$0xff] }
 0x36e   :  { %v10917_v39 = vpop.xlane.xlu0 %2638  ;;  %v3169_v11 = vmax.f32 %v3049_v6, 0.0  ;;  %v2831_v63 = vmul.f32 0.0051020407, %v15138_v51 }
 0x36f   :  { %4452 = vperm.xlu0 %6190, %v10904_v50   ;;  %4247 = vperm.xlu1 %6191, %v10906_v36   ;;  %15129 = vst [vmem:[#allocation339_spill] sm:$0xff] %v10936_v48  ;;  %v10938_v50 = vmul.f32 %v6301_v52, %v3521_v25  ;;  %v15132_v52 = vld [vmem:[#allocation102_spill] sm:$0xff]  ;;  %v3562_v25 = vld [vmem:[%s13780_s2 + $0x268] sm:$0xff]  ;;  %6314 = vrsqrt.f32 %v3307_v44 }
 0x370   :  { %v3289_v6 = vadd.f32 0.001, %v3169_v11 }
 0x371   :  { %v6303_v29 = vpop.eup %6302 }
 0x372   :  { %v3662_v4 = vmul.f32 %v6303_v29, %v3542_v14  ;;  %v6305_v33 = vpop.eup %6304  ;;  %v10957_v29 = vmul.f32 0.0051020407, %v15132_v52  ;;  %6316 = vrsqrt.f32 %v3289_v6 }
 0x373   :  { %4362 = vperm.xlu0 %6190, %v3660_v53   ;;  %4257 = vperm.xlu1 %6191, %v10922_v41   ;;  %v10944_v53 = vmul.f32 0.0051020407, %v10358_v61  ;;  %v6307_v60 = vpop.eup %6306  ;;  %v10954_v14 = vmul.f32 %v6305_v33, %v3523_v23  ;;  %v15136_v33 = vld [vmem:[#allocation216_spill] sm:$0xff] }
 0x374   :  { %v10941_v13 = vmul.f32 %v3662_v4, %v10819_v10  ;;  %v2811_v10 = vmul.f32 0.0051020407, %v10386_v55  ;;  %v6309_v61 = vpop.eup %6308  ;;  %15133 = vst [vmem:[#allocation199_spill] sm:$0xff] %v10957_v29  ;;  %v3525_v55 = vld [vmem:[%s13780_s2 + $0x140] sm:$0xff]  ;;  %v15137_v20 = vsub.f32 %v15135_v57, %v15136_v33  ;;  %v10974_v52 = vmul.f32 %v6307_v60, %v3562_v25 }
 0x375   :  { %v2931_v45 = vmul.f32 %v10944_v53, %v10944_v53  ;;  %v2813_v60 = vmul.f32 0.0051020407, %v10474_v47 }
 0x376   :  { %15130 = vst [vmem:[#allocation176_spill] sm:$0xff] %v10941_v13  ;;  %v10946_v7 = vpop.permute.xlu0 %4087  ;;  %v3189_v15 = vmax.f32 %v15137_v20, 0.0  ;;  %15139 = vst [vmem:[#allocation102_spill] sm:$0xff] %v10974_v52  ;;  %v10981_v13 = vmul.f32 0.0051020407, %v10429_v27  ;;  %v3527_v20 = vld [vmem:[%s13780_s2 + $0x150] sm:$0xff] }
 0x377   :  { %15131 = vst [vmem:[#allocation175_spill] sm:$0xff] %v10946_v7  ;;  %4462 = vperm.xlu0 %6190, %v10936_v48   ;;  %4267 = vperm.xlu1 %6191, %v10938_v50   ;;  %v3051_v23 = vsub.f32 %v2811_v10, %v2931_v45  ;;  %v10976_v48 = vmul.f32 %v6309_v61, %v3525_v55  ;;  %v15142_v61 = vld [vmem:[#allocation246_spill] sm:$0xff] }
 0x378   :  { %v2951_v7 = vmul.f32 %v10957_v29, %v10957_v29  ;;  %15140 = vst [vmem:[#allocation219_spill] sm:$0xff] %v10981_v13  ;;  %v3309_v44 = vadd.f32 0.001, %v3189_v15  ;;  %v10992_v45 = vmul.f32 0.0051020407, %v15142_v61  ;;  %v2933_v55 = vmul.f32 %v10981_v13, %v10981_v13  ;;  %v3551_v29 = vld [vmem:[%s13780_s2 + $0x210] sm:$0xff] }
 0x379   :  { %v3171_v10 = vmax.f32 %v3051_v23, 0.0 }
 0x37a   :  { %v10961_v38 = vpop.permute.xlu0 %4132  ;;  %v3071_v11 = vsub.f32 %v2831_v63, %v2951_v7  ;;  %15143 = vst [vmem:[#allocation109_spill] sm:$0xff] %v10992_v45  ;;  %v15146_v7 = vld [vmem:[#allocation121_spill] sm:$0xff]  ;;  %6318 = vrsqrt.f32 %v3309_v44  ;;  %v3053_v63 = vsub.f32 %v2813_v60, %v2933_v55 }
 0x37b   :  { %15134 = vst [vmem:[#allocation197_spill] sm:$0xff] %v10961_v38  ;;  %4372 = vperm.xlu0 %6190, %v3662_v4   ;;  %4277 = vperm.xlu1 %6191, %v10954_v14   ;;  %v6311_v38 = vpop.eup %6310  ;;  %v3545_v4 = vld [vmem:[%s13780_s2 + $0x1e0] sm:$0xff]  ;;  %v2833_v15 = vmul.f32 0.0051020407, %v15146_v7  ;;  %v3291_v51 = vadd.f32 0.001, %v3171_v10 }
 0x37c   :  { %v10994_v27 = vmul.f32 %v6311_v38, %v3545_v4  ;;  %v6313_v25 = vpop.eup %6312  ;;  %v3191_v47 = vmax.f32 %v3071_v11, 0.0  ;;  %v2953_v38 = vmul.f32 %v10992_v45, %v10992_v45  ;;  %v11010_v4 = vmul.f32 0.0051020407, %v10511_v40  ;;  %v3547_v7 = vld [vmem:[%s13780_s2 + $0x1f0] sm:$0xff]  ;;  %v15150_v55 = vld [vmem:[#allocation265_spill] sm:$0xff] }
 0x37d   :  { %v11007_v6 = vmul.f32 %v6313_v25, %v3527_v20  ;;  %v6315_v23 = vpop.eup %6314  ;;  %6320 = vrsqrt.f32 %v3291_v51  ;;  %v3173_v11 = vmax.f32 %v3053_v63, 0.0  ;;  %v2815_v10 = vmul.f32 0.0051020407, %v10547_v49  ;;  %v11031_v51 = vpop.xlane.xlu1 %2634  ;;  %v15153_v49 = vld [vmem:[#allocation272_spill] sm:$0xff] }
 0x37e   :  { %v10983_v57 = vpop.permute.xlu0 %4142  ;;  %15144 = vst [vmem:[#allocation246_spill] sm:$0xff] %v10994_v27  ;;  %15147 = vst [vmem:[#allocation121_spill] sm:$0xff] %v11010_v4  ;;  %v3311_v44 = vadd.f32 0.001, %v3191_v47  ;;  %v11019_v60 = vmul.f32 %v6315_v23, %v3547_v7  ;;  %v6317_v25 = vpop.eup %6316  ;;  %v11022_v40 = vmul.f32 0.0051020407, %v15150_v55  ;;  %v2935_v20 = vmul.f32 %v11010_v4, %v11010_v4 }
 0x37f   :  { %15141 = vst [vmem:[#allocation216_spill] sm:$0xff] %v10983_v57  ;;  %4472 = vperm.xlu0 %6190, %v10974_v52   ;;  %4287 = vperm.xlu1 %6191, %v10976_v48   ;;  %v2835_v63 = vmul.f32 0.0051020407, %v15153_v49  ;;  %v11040_v52 = vmul.f32 0.0051020407, %v10595_v0 }
 0x380   :  { %15149 = vst [vmem:[#allocation442_spill] sm:$0xff] %v11019_v60  ;;  %15151 = vst [vmem:[#allocation265_spill] sm:$0xff] %v11022_v40  ;;  %6322 = vrsqrt.f32 %v3311_v44  ;;  %v3055_v23 = vsub.f32 %v2815_v10, %v2935_v20  ;;  %v15156_v20 = vld [vmem:[#allocation140_spill] sm:$0xff] }
 0x381   :  { %15154 = vst [vmem:[#allocation272_spill] sm:$0xff] %v11040_v52  ;;  %v11052_v49 = vpop.permute.xlu1 %4092 }
 0x382   :  { %v10998_v33 = vpop.permute.xlu0 %4152  ;;  %v3175_v10 = vmax.f32 %v3055_v23, 0.0  ;;  %15158 = vst [vmem:[#allocation445_spill] sm:$0xff] %v11052_v49  ;;  %v15181_v49 = vld [vmem:[#allocation357_spill] sm:$0xff] }
 0x383   :  { %15145 = vst [vmem:[#allocation440_spill] sm:$0xff] %v10998_v33  ;;  %4387 = vperm.xlu1 %6191, %v10994_v27   ;;  %v3073_v33 = vsub.f32 %v2833_v15, %v2953_v38  ;;  %v3529_v15 = vld [vmem:[%s13780_s2 + $0x160] sm:$0xff]  ;;  %v3293_v38 = vadd.f32 0.001, %v3173_v11 }
 0x384   :  { %v11035_v7 = vmul.f32 %v6317_v25, %v3529_v15  ;;  %v6319_v55 = vpop.eup %6318  ;;  %v2817_v25 = vmul.f32 0.0051020407, %v10638_v42  ;;  %v11050_v15 = vmul.f32 0.0051020407, %v15156_v20 }
 0x385   :  { %v3193_v47 = vmax.f32 %v3073_v33, 0.0  ;;  %v3549_v33 = vld [vmem:[%s13780_s2 + $0x200] sm:$0xff]  ;;  %6324 = vrsqrt.f32 %v3293_v38  ;;  %v3295_v38 = vadd.f32 0.001, %v3175_v10 }
 0x386   :  { %v11012_v61 = vpop.permute.xlu0 %4162  ;;  %15157 = vst [vmem:[#allocation140_spill] sm:$0xff] %v11050_v15  ;;  %v11054_v0 = vmul.f32 %v6319_v55, %v3549_v33  ;;  %v2957_v55 = vmul.f32 %v11050_v15, %v11050_v15  ;;  %v11068_v33 = vmul.f32 0.0051020407, %v10681_v43  ;;  %v15166_v43 = vld [vmem:[#allocation302_spill] sm:$0xff] }
 0x387   :  { %15148 = vst [vmem:[#allocation441_spill] sm:$0xff] %v11012_v61  ;;  %4297 = vperm.xlu1 %6191, %v11007_v6   ;;  %v3313_v44 = vadd.f32 0.001, %v3193_v47  ;;  %v15161_v47 = vld [vmem:[#allocation146_spill] sm:$0xff] }
 0x388   :  { %15159 = vst [vmem:[#allocation446_spill] sm:$0xff] %v11054_v0  ;;  %15162 = vst [vmem:[#allocation146_spill] sm:$0xff] %v11068_v33  ;;  %v15169_v15 = vld [vmem:[#allocation310_spill] sm:$0xff] }
 0x389   :  { %6326 = vrsqrt.f32 %v3313_v44  ;;  %v11076_v44 = vpop.permute.xlu1 %4097 }
 0x38a   :  { %v11026_v61 = vpop.permute.xlu0 %4172  ;;  %15164 = vst [vmem:[#allocation449_spill] sm:$0xff] %v11076_v44  ;;  %6328 = vrsqrt.f32 %v3295_v38 }
 0x38b   :  { %15152 = vst [vmem:[#allocation443_spill] sm:$0xff] %v11026_v61  ;;  %4397 = vperm.xlu1 %6191, %v11019_v60   ;;  %v2955_v61 = vmul.f32 %v11022_v40, %v11022_v40  ;;  %v2937_v40 = vmul.f32 %v11040_v52, %v11040_v52 }
 0x38d   :  { %v3075_v11 = vsub.f32 %v2835_v63, %v2955_v61  ;;  %v3531_v61 = vld [vmem:[%s13780_s2 + $0x170] sm:$0xff]  ;;  %v2837_v63 = vmul.f32 0.0051020407, %v15161_v47  ;;  %v3057_v23 = vsub.f32 %v2817_v25, %v2937_v40  ;;  %v2939_v25 = vmul.f32 %v11068_v33, %v11068_v33 }
 0x38e   :  { %v11042_v57 = vpop.permute.xlu0 %4182 }
 0x38f   :  { %15155 = vst [vmem:[#allocation444_spill] sm:$0xff] %v11042_v57  ;;  %4307 = vperm.xlu1 %6191, %v11035_v7   ;;  %v6321_v57 = vpop.eup %6320  ;;  %v3195_v42 = vmax.f32 %v3075_v11, 0.0  ;;  %v3077_v47 = vsub.f32 %v2837_v63, %v2957_v55  ;;  %v3177_v11 = vmax.f32 %v3057_v23, 0.0 }
 0x390   :  { %v11070_v20 = vmul.f32 %v6321_v57, %v3531_v61  ;;  %v11082_v57 = vmul.f32 0.0051020407, %v15166_v43 }
 0x391   :  { %v3315_v40 = vadd.f32 0.001, %v3195_v42  ;;  %v3197_v55 = vmax.f32 %v3077_v47, 0.0  ;;  %v2839_v42 = vmul.f32 0.0051020407, %v15169_v15  ;;  %v3553_v15 = vld [vmem:[%s13780_s2 + $0x220] sm:$0xff] }
 0x392   :  { %v11058_v45 = vpop.permute.xlu0 %4192  ;;  %15163 = vst [vmem:[#allocation448_spill] sm:$0xff] %v11070_v20  ;;  %15167 = vst [vmem:[#allocation302_spill] sm:$0xff] %v11082_v57  ;;  %v3297_v43 = vadd.f32 0.001, %v3177_v11  ;;  %v2821_v11 = vmul.f32 0.0051020407, %v10809_v32 }
 0x393   :  { %15160 = vst [vmem:[#allocation447_spill] sm:$0xff] %v11058_v45  ;;  %4407 = vperm.xlu1 %6191, %v11054_v0   ;;  %v6323_v45 = vpop.eup %6322  ;;  %v2819_v0 = vmul.f32 0.0051020407, %v10719_v46  ;;  %v3533_v46 = vld [vmem:[%s13780_s2 + $0x180] sm:$0xff]  ;;  %6330 = vrsqrt.f32 %v3315_v40 }
 0x394   :  { %v11086_v61 = vmul.f32 %v6323_v45, %v3551_v29  ;;  %v6325_v63 = vpop.eup %6324  ;;  %v11098_v45 = vmul.f32 0.0051020407, %v10762_v26  ;;  %6332 = vrsqrt.f32 %v3297_v43  ;;  %v15173_v26 = vld [vmem:[#allocation156_spill] sm:$0xff] }
 0x395   :  { %v3059_v38 = vsub.f32 %v2819_v0, %v2939_v25  ;;  %v11095_v44 = vmul.f32 %v6325_v63, %v3533_v46  ;;  %v6327_v29 = vpop.eup %6326  ;;  %v3317_v0 = vadd.f32 0.001, %v3197_v55  ;;  %v11112_v46 = vmul.f32 0.0051020407, %v15173_v26 }
 0x396   :  { %v11079_v10 = vpop.permute.xlu0 %4202  ;;  %15168 = vst [vmem:[#allocation451_spill] sm:$0xff] %v11086_v61  ;;  %15171 = vst [vmem:[#allocation452_spill] sm:$0xff] %v11098_v45  ;;  %v2941_v55 = vmul.f32 %v11098_v45, %v11098_v45 }
 0x397   :  { %4317 = vperm.xlu1 %6191, %v11070_v20   ;;  %15165 = vst [vmem:[#allocation450_spill] sm:$0xff] %v11079_v10  ;;  %v2959_v10 = vmul.f32 %v11082_v57, %v11082_v57  ;;  %15170 = vst [vmem:[#allocation310_spill] sm:$0xff] %v11095_v44  ;;  %v3179_v25 = vmax.f32 %v3059_v38, 0.0  ;;  %v6329_v57 = vpop.eup %6328  ;;  %6334 = vrsqrt.f32 %v3317_v0  ;;  %v15176_v38 = vld [vmem:[#allocation331_spill] sm:$0xff]  ;;  %v2961_v0 = vmul.f32 %v11112_v46, %v11112_v46  ;;  %v15282_v20 = vld [vmem:[#allocation336_spill] sm:$0xff] }
 0x398   :  { %15174 = vst [vmem:[#allocation156_spill] sm:$0xff] %v11112_v46  ;;  %v2841_v43 = vmul.f32 0.0051020407, %v15176_v38  ;;  %v3061_v26 = vsub.f32 %v2821_v11, %v2941_v55  ;;  %v15185_v46 = vld [vmem:[#allocation377_spill] sm:$0xff] }
 0x399   :  { %v3079_v47 = vsub.f32 %v2839_v42, %v2959_v10  ;;  %v3535_v10 = vld [vmem:[%s13780_s2 + $0x190] sm:$0xff]  ;;  %v3299_v32 = vadd.f32 0.001, %v3179_v25  ;;  %v15180_v25 = vld [vmem:[#allocation358_spill] sm:$0xff] }
 0x39a   :  { %v11100_v60 = vpop.permute.xlu0 %4212  ;;  %v3081_v33 = vsub.f32 %v2841_v43, %v2961_v0 }
 0x39b   :  { %4417 = vperm.xlu1 %6191, %v11086_v61   ;;  %v1683_v23 = vpop.xlane.xlu1 %1682  ;;  %15172 = vst [vmem:[#allocation453_spill] sm:$0xff] %v11100_v60  ;;  %v11114_v60 = vmul.f32 %v6327_v29, %v3553_v15  ;;  %v3199_v42 = vmax.f32 %v3079_v47, 0.0  ;;  %v11124_v29 = vmul.f32 0.0051020407, %v10856_v16  ;;  %v11132_v47 = vmul.f32 %v6329_v57, %v3535_v10  ;;  %v3555_v16 = vld [vmem:[%s13780_s2 + $0x230] sm:$0xff] }
 0x39c   :  { %v11109_v63 = vmul.f32 0.0051020407, %v1683_v23  ;;  %6336 = vrsqrt.f32 %v3299_v32  ;;  %v2823_v10 = vmul.f32 0.0051020407, %v10891_v24 }
 0x39d   :  { %15175 = vst [vmem:[#allocation454_spill] sm:$0xff] %v11114_v60  ;;  %15177 = vst [vmem:[#allocation331_spill] sm:$0xff] %v11124_v29  ;;  %v6331_v38 = vpop.eup %6330  ;;  %v3319_v55 = vadd.f32 0.001, %v3199_v42  ;;  %v2943_v57 = vmul.f32 %v11124_v29, %v11124_v29 }
 0x39e   :  { %v2944_v15 = vmul.f32 %v11109_v63, %v11109_v63  ;;  %v11128_v61 = vpop.permute.xlu0 %4222  ;;  %15179 = vst [vmem:[#allocation456_spill] sm:$0xff] %v11132_v47 }
 0x39f   :  { %4327 = vperm.xlu1 %6191, %v11095_v44   ;;  %v11106_v40 = vpop.xlane.xlu1 %1922  ;;  %15178 = vst [vmem:[#allocation455_spill] sm:$0xff] %v11128_v61  ;;  %v3181_v61 = vmax.f32 %v3061_v26, 0.0  ;;  %v3537_v26 = vld [vmem:[%s13780_s2 + $0x1a0] sm:$0xff]  ;;  %6338 = vrsqrt.f32 %v3319_v55 }
 0x3a0   :  { %v3557_v55 = vld [vmem:[%s13780_s2 + $0x240] sm:$0xff] }
 0x3a1   :  { %v15267_v44 = vld [vmem:[#allocation346_spill] sm:$0xff] }
 0x3a2   :  { %v11151_v32 = vpop.permute.xlu0 %4232  ;;  %v2859_v13 = vmul.f32 0.0051020407, %v15267_v44 }
 0x3a3   :  { %4427 = vperm.xlu1 %6191, %v11114_v60   ;;  %v2403_v23 = vpop.xlane.xlu1 %2402  ;;  %v15182_v60 = vsub.f32 %v15180_v25, %v15181_v49  ;;  %v15184_v25 = vld [vmem:[#allocation378_spill] sm:$0xff]  ;;  %15187 = vst [vmem:[#allocation357_spill] sm:$0xff] %v11151_v32 }
 0x3a4   :  { %v2824_v27 = vmul.f32 0.0051020407, %v2403_v23  ;;  %v15186_v42 = vsub.f32 %v15184_v25, %v15185_v46  ;;  %v15190_v25 = vld [vmem:[#allocation390_spill] sm:$0xff] }
 0x3a5   :  { %v3204_v45 = vmax.f32 %v15182_v60, 0.0  ;;  %v11146_v60 = vmul.f32 %v6331_v38, %v3555_v16  ;;  %v3201_v38 = vmax.f32 %v3081_v33, 0.0  ;;  %v3063_v16 = vsub.f32 %v2823_v10, %v2943_v57 }
 0x3a6   :  { %v3064_v11 = vsub.f32 %v2824_v27, %v2944_v15  ;;  %v6333_v27 = vpop.eup %6332  ;;  %v3206_v43 = vmax.f32 %v15186_v42, 0.0  ;;  %v11170_v57 = vpop.permute.xlu0 %4242 }
 0x3a7   :  { %4337 = vperm.xlu1 %6191, %v11132_v47   ;;  %v11141_v23 = vpop.xlane.xlu1 %2642  ;;  %15183 = vst [vmem:[#allocation358_spill] sm:$0xff] %v11146_v60  ;;  %v3324_v15 = vadd.f32 0.001, %v3204_v45  ;;  %v6335_v45 = vpop.eup %6334  ;;  %v11159_v29 = vmul.f32 %v6333_v27, %v3537_v26  ;;  %v3321_v33 = vadd.f32 0.001, %v3201_v38 }
 0x3a8   :  { %v3184_v49 = vmax.f32 %v3064_v11, 0.0  ;;  %v3301_v11 = vadd.f32 0.001, %v3181_v61  ;;  %v3326_v46 = vadd.f32 0.001, %v3206_v43  ;;  %v3183_v61 = vmax.f32 %v3063_v16, 0.0  ;;  %v6337_v10 = vpop.eup %6336 }
 0x3a9   :  { %15189 = vst [vmem:[#allocation377_spill] sm:$0xff] %v11159_v29  ;;  %v11172_v27 = vmul.f32 %v6335_v45, %v3557_v55  ;;  %v15196_v43 = vld [vmem:[#allocation398_spill] sm:$0xff]  ;;  %v15201_v16 = vld [vmem:[#allocation351_spill] sm:$0xff] }
 0x3aa   :  { %v3304_v0 = vadd.f32 0.001, %v3184_v49  ;;  %v15191_v49 = vld [vmem:[#allocation234_spill] sm:$0xff]  ;;  %v3303_v55 = vadd.f32 0.001, %v3183_v61  ;;  %v3559_v61 = vld [vmem:[%s13780_s2 + $0x250] sm:$0xff] }
 0x3ab   :  { %4437 = vperm.xlu1 %6191, %v11146_v60   ;;  %v11157_v24 = vpop.permute.xlu1 %4102  ;;  %v15192_v42 = vsub.f32 %v15190_v25, %v15191_v49  ;;  %15194 = vst [vmem:[#allocation234_spill] sm:$0xff] %v11170_v57  ;;  %15195 = vst [vmem:[#allocation457_spill] sm:$0xff] %v11172_v27  ;;  %v3539_v49 = vld [vmem:[%s13780_s2 + $0x1b0] sm:$0xff] }
 0x3ac   :  { %15188 = vst [vmem:[#allocation378_spill] sm:$0xff] %v11157_v24  ;;  %6340 = vrsqrt.f32 %v3304_v0  ;;  %v15197_v0 = vld [vmem:[#allocation253_spill] sm:$0xff] }
 0x3ad   :  { %6342 = vrsqrt.f32 %v3324_v15  ;;  %v3208_v32 = vmax.f32 %v15192_v42, 0.0  ;;  %v15198_v26 = vsub.f32 %v15196_v43, %v15197_v0  ;;  %v15203_v43 = vld [vmem:[#allocation273_spill] sm:$0xff] }
 0x3ae   :  { %6344 = vrsqrt.f32 %v3301_v11  ;;  %v15200_v11 = vld [vmem:[#allocation353_spill] sm:$0xff] }
 0x3af   :  { %4347 = vperm.xlu1 %6191, %v11159_v29   ;;  %v11168_v60 = vpop.permute.xlu1 %4107  ;;  %6346 = vrsqrt.f32 %v3326_v46  ;;  %v3328_v15 = vadd.f32 0.001, %v3208_v32  ;;  %v3210_v25 = vmax.f32 %v15198_v26, 0.0  ;;  %v15202_v42 = vsub.f32 %v15200_v11, %v15201_v16  ;;  %v3544_v32 = vld [vmem:[%s13780_s2 + $0x1d8] sm:$0xff]  ;;  %v6339_v46 = vpop.eup %6338  ;;  %v15209_v16 = vld [vmem:[#allocation371_spill] sm:$0xff] }
 0x3b0   :  { %15193 = vst [vmem:[#allocation390_spill] sm:$0xff] %v11168_v60  ;;  %6348 = vrsqrt.f32 %v3321_v33  ;;  %v15204_v0 = vld [vmem:[#allocation133_spill] sm:$0xff]  ;;  %v11192_v60 = vmul.f32 %v6337_v10, %v3539_v49  ;;  %v11194_v33 = vpop.permute.xlu0 %4252 }
 0x3b1   :  { %v3203_v45 = vmax.f32 %v15202_v42, 0.0  ;;  %v15205_v26 = vsub.f32 %v15203_v43, %v15204_v0  ;;  %6350 = vrsqrt.f32 %v3328_v15  ;;  %15207 = vst [vmem:[#allocation353_spill] sm:$0xff] %v11194_v33  ;;  %v15208_v11 = vld [vmem:[#allocation373_spill] sm:$0xff]  ;;  %v15213_v15 = vld [vmem:[#allocation387_spill] sm:$0xff] }
 0x3b2   :  { %15206 = vst [vmem:[#allocation253_spill] sm:$0xff] %v11192_v60  ;;  %v15210_v42 = vsub.f32 %v15208_v11, %v15209_v16  ;;  %v15212_v0 = vld [vmem:[#allocation389_spill] sm:$0xff]  ;;  %v15215_v33 = vld [vmem:[#allocation155_spill] sm:$0xff]  ;;  %6352 = vrsqrt.f32 %v3303_v55  ;;  %v3541_v55 = vld [vmem:[%s13780_s2 + $0x1c0] sm:$0xff] }
 0x3b3   :  { %4447 = vperm.xlu1 %6191, %v11172_v27   ;;  %v11181_v38 = vpop.permute.xlu1 %4112  ;;  %v3212_v57 = vmax.f32 %v15205_v26, 0.0  ;;  %v3323_v49 = vadd.f32 0.001, %v3203_v45  ;;  %v11209_v52 = vmul.f32 0.0051020407, %v15215_v33  ;;  %v3564_v11 = vld [vmem:[%s13780_s2 + $0x278] sm:$0xff] }
 0x3b4   :  { %15199 = vst [vmem:[#allocation398_spill] sm:$0xff] %v11181_v38  ;;  %v3330_v38 = vadd.f32 0.001, %v3210_v25  ;;  %v3205_v24 = vmax.f32 %v15210_v42, 0.0  ;;  %v15214_v25 = vsub.f32 %v15212_v0, %v15213_v15  ;;  %v15217_v42 = vld [vmem:[#allocation407_spill] sm:$0xff]  ;;  %v15222_v33 = vld [vmem:[#allocation164_spill] sm:$0xff] }
 0x3b5   :  { %15216 = vst [vmem:[#allocation273_spill] sm:$0xff] %v11209_v52  ;;  %v3332_v16 = vadd.f32 0.001, %v3212_v57  ;;  %v2858_v0 = vmul.f32 0.0051020407, %v15222_v33  ;;  %v15223_v57 = vld [vmem:[#allocation397_spill] sm:$0xff] }
 0x3b6   :  { %v6341_v27 = vpop.eup %6340  ;;  %v3207_v26 = vmax.f32 %v15214_v25, 0.0  ;;  %6354 = vrsqrt.f32 %v3330_v38  ;;  %v3325_v15 = vadd.f32 0.001, %v3205_v24  ;;  %v15224_v25 = vld [vmem:[#allocation395_spill] sm:$0xff]  ;;  %v11239_v24 = vpop.permute.xlu0 %4262 }
 0x3b7   :  { %4357 = vperm.xlu1 %6191, %v11192_v60   ;;  %v11203_v29 = vpop.permute.xlu1 %4117  ;;  %v3664_v43 = vmul.f32 %v6341_v27, %v3544_v32  ;;  %v6343_v10 = vpop.eup %6342  ;;  %v15218_v60 = vld [vmem:[#allocation406_spill] sm:$0xff]  ;;  %v11217_v27 = vmul.f32 %v6339_v46, %v3559_v61  ;;  %v15225_v4 = vsub.f32 %v15223_v57, %v15224_v25  ;;  %6356 = vrsqrt.f32 %v3323_v49  ;;  %15230 = vst [vmem:[#allocation155_spill] sm:$0xff] %v11239_v24 }
 0x3b8   :  { %15211 = vst [vmem:[#allocation351_spill] sm:$0xff] %v11203_v29  ;;  %v15219_v47 = vsub.f32 %v15217_v42, %v15218_v60  ;;  %v6345_v32 = vpop.eup %6344  ;;  %v11232_v46 = vmul.f32 %v6343_v10, %v3564_v11  ;;  %v3327_v38 = vadd.f32 0.001, %v3207_v26  ;;  %v2978_v61 = vmul.f32 %v11209_v52, %v11209_v52  ;;  %v15232_v26 = vld [vmem:[#allocation419_spill] sm:$0xff]  ;;  %v15233_v11 = vld [vmem:[#allocation418_spill] sm:$0xff] }
 0x3b9   :  { %4382 = vperm.xlu0 %6190, %v3664_v43   ;;  %15220 = vst [vmem:[#allocation133_spill] sm:$0xff] %v11217_v27  ;;  %v11220_v45 = vmul.f32 %v3664_v43, %v11109_v63  ;;  %v3209_v60 = vmax.f32 %v15225_v4, 0.0  ;;  %v6347_v63 = vpop.eup %6346  ;;  %v15228_v43 = vld [vmem:[#allocation168_spill] sm:$0xff]  ;;  %v3566_v4 = vld [vmem:[%s13780_s2 + $0x288] sm:$0xff]  ;;  %6358 = vrsqrt.f32 %v3332_v16  ;;  %v11245_v10 = vmul.f32 %v6345_v32, %v3541_v55  ;;  %v3561_v16 = vld [vmem:[%s13780_s2 + $0x260] sm:$0xff] }
 0x3ba   :  { %v3214_v29 = vmax.f32 %v15219_v47, 0.0  ;;  %15227 = vst [vmem:[#allocation389_spill] sm:$0xff] %v11232_v46  ;;  %v11237_v42 = vmul.f32 0.0051020407, %v15228_v43  ;;  %v6349_v49 = vpop.eup %6348  ;;  %v15234_v57 = vsub.f32 %v15232_v26, %v15233_v11  ;;  %v3098_v52 = vsub.f32 %v2858_v0, %v2978_v61  ;;  %v15235_v43 = vld [vmem:[#allocation422_spill] sm:$0xff]  ;;  %v15241_v61 = vld [vmem:[#allocation400_spill] sm:$0xff] }
 0x3bb   :  { %15221 = vst [vmem:[#allocation373_spill] sm:$0xff] %v11220_v45  ;;  %4457 = vperm.xlu1 %6191, %v11217_v27   ;;  %v11230_v47 = vpop.permute.xlu1 %4122  ;;  %15231 = vst [vmem:[#allocation407_spill] sm:$0xff] %v11245_v10  ;;  %v2860_v27 = vmul.f32 0.0051020407, %v15235_v43  ;;  %6360 = vrsqrt.f32 %v3325_v15  ;;  %v11260_v55 = vmul.f32 %v6347_v63, %v3566_v4  ;;  %v6351_v26 = vpop.eup %6350  ;;  %v15240_v0 = vld [vmem:[#allocation402_spill] sm:$0xff]  ;;  %v3568_v15 = vld [vmem:[%s13780_s2 + $0x298] sm:$0xff] }
 0x3bc   :  { %15226 = vst [vmem:[#allocation371_spill] sm:$0xff] %v11230_v47  ;;  %15229 = vst [vmem:[#allocation387_spill] sm:$0xff] %v11237_v42  ;;  %v3334_v33 = vadd.f32 0.001, %v3214_v29  ;;  %v3216_v25 = vmax.f32 %v15234_v57, 0.0  ;;  %v15236_v47 = vld [vmem:[#allocation424_spill] sm:$0xff]  ;;  %6362 = vrsqrt.f32 %v3327_v38  ;;  %v15242_v11 = vsub.f32 %v15240_v0, %v15241_v61  ;;  %v6353_v63 = vpop.eup %6352  ;;  %v11276_v61 = vpop.permute.xlu0 %4272 }
 0x3bd   :  { %4482 = vperm.xlu0 %6190, %v11232_v46   ;;  %v11252_v24 = vmul.f32 0.0051020407, %v15236_v47  ;;  %v3329_v29 = vadd.f32 0.001, %v3209_v60  ;;  %15239 = vst [vmem:[#allocation397_spill] sm:$0xff] %v11260_v55  ;;  %v2980_v47 = vmul.f32 %v11237_v42, %v11237_v42  ;;  %v15243_v43 = vld [vmem:[#allocation426_spill] sm:$0xff]  ;;  %v11272_v60 = vmul.f32 %v6349_v49, %v3561_v16 }
 0x3be   :  { %v3211_v57 = vmax.f32 %v15242_v11, 0.0  ;;  %v2862_v46 = vmul.f32 0.0051020407, %v15243_v43  ;;  %6364 = vrsqrt.f32 %v3334_v33  ;;  %v3336_v38 = vadd.f32 0.001, %v3216_v25  ;;  %15245 = vst [vmem:[#allocation168_spill] sm:$0xff] %v11276_v61 }
 0x3bf   :  { %15237 = vst [vmem:[#allocation406_spill] sm:$0xff] %v11252_v24  ;;  %4367 = vperm.xlu1 %6191, %v11245_v10   ;;  %v11258_v32 = vpop.permute.xlu1 %4127  ;;  %15244 = vst [vmem:[#allocation395_spill] sm:$0xff] %v11272_v60  ;;  %v3218_v4 = vmax.f32 %v3098_v52, 0.0  ;;  %v2982_v0 = vmul.f32 %v11252_v24, %v11252_v24  ;;  %v3543_v11 = vld [vmem:[%s13780_s2 + $0x1d0] sm:$0xff]  ;;  %6366 = vrsqrt.f32 %v3329_v29  ;;  %v11284_v49 = vmul.f32 %v6351_v26, %v3568_v15  ;;  %v15248_v52 = vld [vmem:[#allocation405_spill] sm:$0xff] }
 0x3c0   :  { %15238 = vst [vmem:[#allocation164_spill] sm:$0xff] %v11258_v32  ;;  %v3100_v32 = vsub.f32 %v2860_v27, %v2980_v47  ;;  %v6355_v16 = vpop.eup %6354  ;;  %v3331_v25 = vadd.f32 0.001, %v3211_v57  ;;  %v15249_v27 = vld [vmem:[#allocation403_spill] sm:$0xff]  ;;  %v15251_v42 = vld [vmem:[#allocation428_spill] sm:$0xff]  ;;  %6368 = vrsqrt.f32 %v3336_v38  ;;  %v15265_v10 = vld [vmem:[#allocation413_spill] sm:$0xff] }
 0x3c1   :  { %4492 = vperm.xlu0 %6190, %v11260_v55   ;;  %15247 = vst [vmem:[#allocation418_spill] sm:$0xff] %v11284_v49  ;;  %v15250_v47 = vsub.f32 %v15248_v52, %v15249_v27  ;;  %v3102_v24 = vsub.f32 %v2862_v46, %v2982_v0  ;;  %v11290_v61 = vmul.f32 0.0051020407, %v15251_v42  ;;  %v3570_v29 = vld [vmem:[%s13780_s2 + $0x2a8] sm:$0xff]  ;;  %v6357_v26 = vpop.eup %6356  ;;  %v3338_v15 = vadd.f32 0.001, %v3218_v4 }
 0x3c2   :  { %v3220_v57 = vmax.f32 %v3100_v32, 0.0  ;;  %v3563_v46 = vld [vmem:[%s13780_s2 + $0x270] sm:$0xff]  ;;  %v15255_v0 = vld [vmem:[#allocation195_spill] sm:$0xff]  ;;  %6370 = vrsqrt.f32 %v3331_v25 }
 0x3c3   :  { %4467 = vperm.xlu1 %6191, %v11272_v60   ;;  %v11282_v33 = vpop.permute.xlu1 %4137  ;;  %v3213_v43 = vmax.f32 %v15250_v47, 0.0  ;;  %15252 = vst [vmem:[#allocation422_spill] sm:$0xff] %v11290_v61  ;;  %v11296_v60 = vmul.f32 %v6353_v63, %v3543_v11  ;;  %v6359_v42 = vpop.eup %6358  ;;  %v11303_v52 = vmul.f32 0.0051020407, %v15255_v0  ;;  %v11308_v63 = vmul.f32 %v6355_v16, %v3570_v29  ;;  %v15260_v0 = vld [vmem:[#allocation332_spill] sm:$0xff]  ;;  %v3565_v29 = vld [vmem:[%s13780_s2 + $0x280] sm:$0xff] }
 0x3c4   :  { %15246 = vst [vmem:[#allocation419_spill] sm:$0xff] %v11282_v33  ;;  %v15254_v33 = vld [vmem:[#allocation186_spill] sm:$0xff]  ;;  %v3222_v4 = vmax.f32 %v3102_v24, 0.0  ;;  %v2984_v32 = vmul.f32 %v11290_v61, %v11290_v61  ;;  %v11312_v11 = vpop.permute.xlu0 %4282  ;;  %v11322_v16 = vmul.f32 %v6357_v26, %v3563_v46  ;;  %6372 = vrsqrt.f32 %v3338_v15  ;;  %v15264_v61 = vld [vmem:[#allocation415_spill] sm:$0xff] }
 0x3c5   :  { %4502 = vperm.xlu0 %6190, %v11284_v49   ;;  %15253 = vst [vmem:[#allocation424_spill] sm:$0xff] %v11296_v60  ;;  %v2864_v55 = vmul.f32 0.0051020407, %v15254_v33  ;;  %15256 = vst [vmem:[#allocation402_spill] sm:$0xff] %v11303_v52  ;;  %v3333_v38 = vadd.f32 0.001, %v3213_v43  ;;  %v6361_v47 = vpop.eup %6360  ;;  %v15266_v45 = vsub.f32 %v15264_v61, %v15265_v10 }
 0x3c6   :  { %15258 = vst [vmem:[#allocation426_spill] sm:$0xff] %v11308_v63  ;;  %15259 = vst [vmem:[#allocation405_spill] sm:$0xff] %v11312_v11  ;;  %v3572_v33 = vld [vmem:[%s13780_s2 + $0x2b8] sm:$0xff]  ;;  %v11318_v49 = vmul.f32 0.0051020407, %v15260_v0  ;;  %v6363_v24 = vpop.eup %6362 }
 0x3c7   :  { %4377 = vperm.xlu1 %6191, %v11296_v60   ;;  %v11306_v27 = vpop.permute.xlu1 %4147  ;;  %v15262_v60 = vld [vmem:[#allocation172_spill] sm:$0xff]  ;;  %15263 = vst [vmem:[#allocation428_spill] sm:$0xff] %v11322_v16  ;;  %v3340_v25 = vadd.f32 0.001, %v3220_v57  ;;  %v3104_v43 = vsub.f32 %v2864_v55, %v2984_v32  ;;  %v3215_v0 = vmax.f32 %v15266_v45, 0.0  ;;  %v11336_v15 = vmul.f32 %v6359_v42, %v3572_v33  ;;  %v15270_v57 = vld [vmem:[#allocation277_spill] sm:$0xff] }
 0x3c8   :  { %15257 = vst [vmem:[#allocation400_spill] sm:$0xff] %v11306_v27  ;;  %15261 = vst [vmem:[#allocation403_spill] sm:$0xff] %v11318_v49  ;;  %v2866_v27 = vmul.f32 0.0051020407, %v15262_v60  ;;  %v6365_v11 = vpop.eup %6364  ;;  %v2986_v60 = vmul.f32 %v11303_v52, %v11303_v52  ;;  %6374 = vrsqrt.f32 %v3333_v38  ;;  %v3342_v55 = vadd.f32 0.001, %v3222_v4 }
 0x3c9   :  { %4512 = vperm.xlu0 %6190, %v11308_v63   ;;  %15269 = vst [vmem:[#allocation195_spill] sm:$0xff] %v11336_v15  ;;  %v11339_v46 = vmul.f32 0.0051020407, %v15270_v57  ;;  %v3574_v45 = vld [vmem:[%s13780_s2 + $0x2c8] sm:$0xff]  ;;  %v6367_v10 = vpop.eup %6366  ;;  %v2979_v44 = vmul.f32 %v11318_v49, %v11318_v49  ;;  %v11347_v32 = vmul.f32 %v6361_v47, %v3565_v29  ;;  %v3567_v42 = vld [vmem:[%s13780_s2 + $0x290] sm:$0xff]  ;;  %6376 = vrsqrt.f32 %v3340_v25  ;;  %v15275_v57 = vld [vmem:[#allocation293_spill] sm:$0xff] }
 0x3ca   :  { %v3106_v61 = vsub.f32 %v2866_v27, %v2986_v60  ;;  %v15273_v38 = vld [vmem:[#allocation423_spill] sm:$0xff]  ;;  %v3224_v33 = vmax.f32 %v3104_v43, 0.0  ;;  %v2868_v52 = vmul.f32 0.0051020407, %v15275_v57  ;;  %v3569_v27 = vld [vmem:[%s13780_s2 + $0x2a0] sm:$0xff]  ;;  %v6369_v43 = vpop.eup %6368  ;;  %v15281_v57 = vld [vmem:[#allocation425_spill] sm:$0xff]  ;;  %6378 = vrsqrt.f32 %v3342_v55 }
 0x3cb   :  { %4477 = vperm.xlu1 %6191, %v11322_v16   ;;  %v11334_v26 = vpop.permute.xlu1 %4157  ;;  %15271 = vst [vmem:[#allocation332_spill] sm:$0xff] %v11339_v46  ;;  %15272 = vst [vmem:[#allocation172_spill] sm:$0xff] %v11347_v32  ;;  %v11353_v4 = vmul.f32 0.0051020407, %v15273_v38  ;;  %v3335_v60 = vadd.f32 0.001, %v3215_v0  ;;  %v3099_v16 = vsub.f32 %v2859_v13, %v2979_v44  ;;  %v11367_v38 = vmul.f32 %v6365_v11, %v3574_v45 }
 0x3cc   :  { %15268 = vst [vmem:[#allocation186_spill] sm:$0xff] %v11334_v26  ;;  %v11356_v26 = vpop.permute.xlu0 %4292  ;;  %v15277_v47 = vld [vmem:[#allocation330_spill] sm:$0xff]  ;;  %v2861_v63 = vmul.f32 0.0051020407, %v15281_v57  ;;  %v11373_v0 = vmul.f32 0.0051020407, %v15282_v20  ;;  %v11382_v11 = vmul.f32 %v6363_v24, %v3567_v42  ;;  %v11384_v45 = vmul.f32 %v6367_v10, %v3569_v27  ;;  %v6371_v55 = vpop.eup %6370 }
 0x3cd   :  { %4522 = vperm.xlu0 %6190, %v11336_v15   ;;  %15274 = vst [vmem:[#allocation415_spill] sm:$0xff] %v11353_v4  ;;  %15276 = vst [vmem:[#allocation413_spill] sm:$0xff] %v11356_v26  ;;  %v15278_v29 = vld [vmem:[#allocation326_spill] sm:$0xff]  ;;  %v2988_v26 = vmul.f32 %v11339_v46, %v11339_v46  ;;  %v3576_v13 = vld [vmem:[%s13780_s2 + $0x2d8] sm:$0xff]  ;;  %v3344_v20 = vadd.f32 0.001, %v3224_v33  ;;  %6380 = vrsqrt.f32 %v3335_v60 }
 0x3ce   :  { %v15279_v49 = vsub.f32 %v15277_v47, %v15278_v29  ;;  %15283 = vst [vmem:[#allocation277_spill] sm:$0xff] %v11373_v0  ;;  %v3226_v47 = vmax.f32 %v3106_v61, 0.0  ;;  %15286 = vst [vmem:[#allocation293_spill] sm:$0xff] %v11384_v45  ;;  %v2981_v29 = vmul.f32 %v11353_v4, %v11353_v4  ;;  %v15287_v46 = vld [vmem:[#allocation374_spill] sm:$0xff]  ;;  %v11395_v10 = vmul.f32 %v6369_v43, %v3576_v13  ;;  %v6373_v42 = vpop.eup %6372  ;;  %v15289_v4 = vld [vmem:[#allocation429_spill] sm:$0xff] }
 0x3cf   :  { %4487 = vperm.xlu1 %6191, %v11347_v32   ;;  %v11365_v25 = vpop.permute.xlu1 %4167  ;;  %v3108_v57 = vsub.f32 %v2868_v52, %v2988_v26  ;;  %v3219_v32 = vmax.f32 %v3099_v16, 0.0  ;;  %v2863_v33 = vmul.f32 0.0051020407, %v15289_v4  ;;  %v2990_v52 = vmul.f32 %v11373_v0, %v11373_v0  ;;  %v3578_v16 = vld [vmem:[%s13780_s2 + $0x2e8] sm:$0xff]  ;;  %v3573_v0 = vld [vmem:[%s13780_s2 + $0x2c0] sm:$0xff] }
 0x3d0   :  { %v3217_v15 = vmax.f32 %v15279_v49, 0.0  ;;  %15280 = vst [vmem:[#allocation346_spill] sm:$0xff] %v11365_v25  ;;  %v15284_v49 = vld [vmem:[#allocation427_spill] sm:$0xff]  ;;  %v2870_v25 = vmul.f32 0.0051020407, %v15287_v46  ;;  %v3101_v27 = vsub.f32 %v2861_v63, %v2981_v29  ;;  %v11403_v46 = vpop.permute.xlu0 %4392  ;;  %6382 = vrsqrt.f32 %v3344_v20 }
 0x3d1   :  { %v11379_v44 = vmul.f32 0.0051020407, %v15284_v49  ;;  %4532 = vperm.xlu0 %6190, %v11367_v38   ;;  %v3571_v49 = vld [vmem:[%s13780_s2 + $0x2b0] sm:$0xff]  ;;  %v11401_v26 = vmul.f32 0.0051020407, %v10388_v2  ;;  %15291 = vst [vmem:[#allocation425_spill] sm:$0xff] %v11403_v46 }
 0x3d2   :  { %v3337_v61 = vadd.f32 0.001, %v3217_v15  ;;  %v15292_v60 = vld [vmem:[#allocation187_spill] sm:$0xff]  ;;  %v3346_v63 = vadd.f32 0.001, %v3226_v47  ;;  %v11414_v4 = vmul.f32 %v6371_v55, %v3571_v49  ;;  %v6375_v13 = vpop.eup %6374  ;;  %v3228_v2 = vmax.f32 %v3108_v57, 0.0 }
 0x3d3   :  { %15285 = vst [vmem:[#allocation423_spill] sm:$0xff] %v11379_v44  ;;  %4497 = vperm.xlu1 %6191, %v11382_v11   ;;  %v11393_v24 = vpop.permute.xlu1 %4177  ;;  %15290 = vst [vmem:[#allocation326_spill] sm:$0xff] %v11401_v26  ;;  %v2983_v15 = vmul.f32 %v11379_v44, %v11379_v44  ;;  %v11411_v43 = vmul.f32 0.0051020407, %v15292_v60  ;;  %v3110_v29 = vsub.f32 %v2870_v25, %v2990_v52  ;;  %v2872_v46 = vmul.f32 0.0051020407, %v10427_v1  ;;  %v6377_v49 = vpop.eup %6376 }
 0x3d4   :  { %15288 = vst [vmem:[#allocation330_spill] sm:$0xff] %v11393_v24  ;;  %6384 = vrsqrt.f32 %v3337_v61  ;;  %v3339_v44 = vadd.f32 0.001, %v3219_v32  ;;  %v15294_v24 = vld [vmem:[#allocation192_spill] sm:$0xff]  ;;  %v11424_v55 = vmul.f32 %v6373_v42, %v3578_v16  ;;  %v3221_v20 = vmax.f32 %v3101_v27, 0.0  ;;  %v3580_v32 = vld [vmem:[%s13780_s2 + $0x2f8] sm:$0xff] }
 0x3d5   :  { %15293 = vst [vmem:[#allocation336_spill] sm:$0xff] %v11411_v43  ;;  %4542 = vperm.xlu0 %6190, %v11395_v10   ;;  %v2865_v60 = vmul.f32 0.0051020407, %v15294_v24  ;;  %v3103_v57 = vsub.f32 %v2863_v33, %v2983_v15  ;;  %v2992_v1 = vmul.f32 %v11401_v26, %v11401_v26  ;;  %v11429_v25 = vmul.f32 0.0051020407, %v10476_v34  ;;  %v15297_v24 = vld [vmem:[#allocation257_spill] sm:$0xff]  ;;  %v6379_v33 = vpop.eup %6378  ;;  %v11443_v26 = vpop.permute.xlu0 %4302 }
 0x3d6   :  { %v2985_v61 = vmul.f32 %v11411_v43, %v11411_v43  ;;  %6386 = vrsqrt.f32 %v3346_v63  ;;  %v11437_v42 = vmul.f32 0.0051020407, %v15297_v24  ;;  %v11440_v27 = vmul.f32 %v6375_v13, %v3573_v0  ;;  %15299 = vst [vmem:[#allocation187_spill] sm:$0xff] %v11443_v26  ;;  %v3582_v43 = vld [vmem:[%s13780_s2 + $0x308] sm:$0xff] }
 0x3d7   :  { %4507 = vperm.xlu1 %6191, %v11384_v45   ;;  %v11422_v47 = vpop.permute.xlu1 %4187  ;;  %15296 = vst [vmem:[#allocation374_spill] sm:$0xff] %v11429_v25  ;;  %v3348_v52 = vadd.f32 0.001, %v3228_v2  ;;  %v3230_v16 = vmax.f32 %v3110_v29, 0.0  ;;  %v3112_v34 = vsub.f32 %v2872_v46, %v2992_v1  ;;  %v2874_v15 = vmul.f32 0.0051020407, %v10509_v54  ;;  %v6381_v29 = vpop.eup %6380 }
 0x3d8   :  { %15295 = vst [vmem:[#allocation427_spill] sm:$0xff] %v11422_v47  ;;  %15298 = vst [vmem:[#allocation429_spill] sm:$0xff] %v11437_v42  ;;  %v3105_v63 = vsub.f32 %v2865_v60, %v2985_v61  ;;  %v15300_v47 = vld [vmem:[#allocation275_spill] sm:$0xff]  ;;  %v11450_v45 = vmul.f32 0.0051020407, %v10549_v12  ;;  %v11455_v13 = vmul.f32 %v6377_v49, %v3580_v32  ;;  %6388 = vrsqrt.f32 %v3339_v44 }
 0x3d9   :  { %4552 = vperm.xlu0 %6190, %v11424_v55   ;;  %v2867_v24 = vmul.f32 0.0051020407, %v15300_v47  ;;  %v3341_v54 = vadd.f32 0.001, %v3221_v20  ;;  %v3223_v46 = vmax.f32 %v3103_v57, 0.0  ;;  %v2994_v2 = vmul.f32 %v11429_v25, %v11429_v25  ;;  %v15303_v47 = vld [vmem:[#allocation314_spill] sm:$0xff] }
 0x3da   :  { %15301 = vst [vmem:[#allocation192_spill] sm:$0xff] %v11450_v45  ;;  %v2987_v60 = vmul.f32 %v11437_v42, %v11437_v42  ;;  %v11462_v1 = vmul.f32 0.0051020407, %v15303_v47  ;;  %v2876_v12 = vmul.f32 0.0051020407, %v10593_v17  ;;  %v11466_v61 = vmul.f32 %v6379_v33, %v3582_v43  ;;  %v3575_v57 = vld [vmem:[%s13780_s2 + $0x2d0] sm:$0xff]  ;;  %v6383_v43 = vpop.eup %6382 }
 0x3db   :  { %4517 = vperm.xlu1 %6191, %v11414_v4   ;;  %v11453_v0 = vpop.permute.xlu1 %4197  ;;  %6390 = vrsqrt.f32 %v3348_v52  ;;  %v3350_v44 = vadd.f32 0.001, %v3230_v16  ;;  %v3232_v49 = vmax.f32 %v3112_v34, 0.0  ;;  %v3114_v20 = vsub.f32 %v2874_v15, %v2994_v2  ;;  %v15305_v42 = vld [vmem:[#allocation354_spill] sm:$0xff]  ;;  %v11480_v16 = vpop.permute.xlu0 %4402  ;;  %v3584_v34 = vld [vmem:[%s13780_s2 + $0x318] sm:$0xff] }
 0x3dc   :  { %15302 = vst [vmem:[#allocation257_spill] sm:$0xff] %v11453_v0  ;;  %15304 = vst [vmem:[#allocation275_spill] sm:$0xff] %v11462_v1  ;;  %v3225_v32 = vmax.f32 %v3105_v63, 0.0  ;;  %v3107_v25 = vsub.f32 %v2867_v24, %v2987_v60  ;;  %v2869_v26 = vmul.f32 0.0051020407, %v15305_v42  ;;  %v2996_v47 = vmul.f32 %v11450_v45, %v11450_v45  ;;  %v15309_v63 = vld [vmem:[#allocation430_spill] sm:$0xff] }
 0x3dd   :  { %4562 = vperm.xlu0 %6190, %v11455_v13   ;;  %6392 = vrsqrt.f32 %v3341_v54  ;;  %v3343_v33 = vadd.f32 0.001, %v3223_v46  ;;  %v11478_v52 = vmul.f32 0.0051020407, %v10640_v3  ;;  %15308 = vst [vmem:[#allocation458_spill] sm:$0xff] %v11480_v16  ;;  %v2989_v15 = vmul.f32 %v11462_v1, %v11462_v1  ;;  %v3577_v16 = vld [vmem:[%s13780_s2 + $0x2e0] sm:$0xff] }
 0x3de   :  { %v6385_v42 = vpop.eup %6384  ;;  %v11488_v24 = vmul.f32 0.0051020407, %v15309_v63  ;;  %v3116_v2 = vsub.f32 %v2876_v12, %v2996_v47  ;;  %v11491_v54 = vmul.f32 %v6381_v29, %v3575_v57  ;;  %6394 = vrsqrt.f32 %v3350_v44  ;;  %v15311_v29 = vld [vmem:[#allocation435_spill] sm:$0xff] }
 0x3df   :  { %4527 = vperm.xlu1 %6191, %v11440_v27   ;;  %v11475_v17 = vpop.permute.xlu1 %4207  ;;  %15307 = vst [vmem:[#allocation354_spill] sm:$0xff] %v11478_v52  ;;  %v3352_v3 = vadd.f32 0.001, %v3232_v49  ;;  %v3234_v46 = vmax.f32 %v3114_v20, 0.0  ;;  %v2878_v60 = vmul.f32 0.0051020407, %v10679_v8  ;;  %v3109_v0 = vsub.f32 %v2869_v26, %v2989_v15  ;;  %v11520_v63 = vpop.permute.xlu0 %4312 }
 0x3e0   :  { %15306 = vst [vmem:[#allocation314_spill] sm:$0xff] %v11475_v17  ;;  %15310 = vst [vmem:[#allocation430_spill] sm:$0xff] %v11488_v24  ;;  %v6387_v45 = vpop.eup %6386  ;;  %v3345_v17 = vadd.f32 0.001, %v3225_v32  ;;  %v3227_v1 = vmax.f32 %v3107_v25, 0.0  ;;  %v11500_v47 = vmul.f32 %v6383_v43, %v3584_v34  ;;  %6396 = vrsqrt.f32 %v3343_v33  ;;  %v3586_v25 = vld [vmem:[%s13780_s2 + $0x328] sm:$0xff] }
 0x3e1   :  { %4572 = vperm.xlu0 %6190, %v11466_v61   ;;  %v2871_v44 = vmul.f32 0.0051020407, %v15311_v29  ;;  %v2998_v8 = vmul.f32 %v11478_v52, %v11478_v52  ;;  %v11506_v49 = vmul.f32 0.0051020407, %v10721_v35  ;;  %v2991_v26 = vmul.f32 %v11488_v24, %v11488_v24  ;;  %v15313_v20 = vld [vmem:[#allocation215_spill] sm:$0xff]  ;;  %15315 = vst [vmem:[#allocation459_spill] sm:$0xff] %v11520_v63 }
 0x3e2   :  { %v11514_v57 = vmul.f32 0.0051020407, %v15313_v20  ;;  %v3236_v32 = vmax.f32 %v3116_v2, 0.0  ;;  %v11517_v43 = vmul.f32 %v6385_v42, %v3577_v16  ;;  %v6389_v33 = vpop.eup %6388  ;;  %6398 = vrsqrt.f32 %v3352_v3  ;;  %v3579_v29 = vld [vmem:[%s13780_s2 + $0x2f0] sm:$0xff]  ;;  %v3581_v52 = vld [vmem:[%s13780_s2 + $0x300] sm:$0xff]  ;;  %v15320_v63 = vld [vmem:[#allocation271_spill] sm:$0xff] }
 0x3e3   :  { %4537 = vperm.xlu1 %6191, %v11491_v54   ;;  %v11498_v12 = vpop.permute.xlu1 %4217  ;;  %15312 = vst [vmem:[#allocation435_spill] sm:$0xff] %v11506_v49  ;;  %v3354_v34 = vadd.f32 0.001, %v3234_v46  ;;  %v3118_v35 = vsub.f32 %v2878_v60, %v2998_v8  ;;  %v2880_v15 = vmul.f32 0.0051020407, %v10760_v56  ;;  %6400 = vrsqrt.f32 %v3345_v17  ;;  %v15316_v46 = vld [vmem:[#allocation218_spill] sm:$0xff] }
 0x3e4   :  { %15314 = vst [vmem:[#allocation215_spill] sm:$0xff] %v11514_v57  ;;  %v3347_v20 = vadd.f32 0.001, %v3227_v1  ;;  %v3229_v24 = vmax.f32 %v3109_v0, 0.0  ;;  %v11528_v16 = vmul.f32 %v6387_v45, %v3586_v25  ;;  %v3111_v3 = vsub.f32 %v2871_v44, %v2991_v26  ;;  %v3588_v0 = vld [vmem:[%s13780_s2 + $0x338] sm:$0xff]  ;;  %v15318_v17 = vld [vmem:[#allocation238_spill] sm:$0xff] }
 0x3e5   :  { %4582 = vperm.xlu0 %6190, %v11500_v47   ;;  %v6391_v42 = vpop.eup %6390  ;;  %v2873_v60 = vmul.f32 0.0051020407, %v15316_v46  ;;  %v3000_v56 = vmul.f32 %v11506_v49, %v11506_v49  ;;  %v11534_v8 = vmul.f32 0.0051020407, %v10811_v37  ;;  %v2993_v1 = vmul.f32 %v11514_v57, %v11514_v57 }
 0x3e6   :  { %v11542_v45 = vmul.f32 0.0051020407, %v15318_v17  ;;  %v3356_v25 = vadd.f32 0.001, %v3236_v32  ;;  %v11545_v44 = vmul.f32 %v6389_v33, %v3579_v29  ;;  %6402 = vrsqrt.f32 %v3354_v34 }
 0x3e7   :  { %4547 = vperm.xlu1 %6191, %v11517_v43   ;;  %v11526_v2 = vpop.permute.xlu1 %4227  ;;  %15317 = vst [vmem:[#allocation218_spill] sm:$0xff] %v11534_v8  ;;  %v6393_v26 = vpop.eup %6392  ;;  %v3238_v46 = vmax.f32 %v3118_v35, 0.0  ;;  %v3120_v37 = vsub.f32 %v2880_v15, %v3000_v56  ;;  %v2882_v49 = vmul.f32 0.0051020407, %v11031_v51  ;;  %6404 = vrsqrt.f32 %v3347_v20  ;;  %v15325_v20 = vld [vmem:[#allocation141_spill] sm:$0xff] }
 0x3e8   :  { %15319 = vst [vmem:[#allocation238_spill] sm:$0xff] %v11542_v45  ;;  %v3349_v57 = vadd.f32 0.001, %v3229_v24  ;;  %v2875_v17 = vmul.f32 0.0051020407, %v15320_v63  ;;  %v11555_v33 = vmul.f32 %v6391_v42, %v3588_v0  ;;  %v6395_v29 = vpop.eup %6394  ;;  %v3231_v34 = vmax.f32 %v3111_v3, 0.0  ;;  %v11562_v56 = vpop.permute.xlu0 %4412 }
 0x3e9   :  { %4592 = vperm.xlu0 %6190, %v11528_v16   ;;  %v3113_v35 = vsub.f32 %v2873_v60, %v2993_v1  ;;  %v3002_v51 = vmul.f32 %v11534_v8, %v11534_v8  ;;  %v11560_v15 = vmul.f32 0.0051020407, %v11106_v40  ;;  %15324 = vst [vmem:[#allocation462_spill] sm:$0xff] %v11562_v56  ;;  %v3590_v24 = vld [vmem:[%s13780_s2 + $0x348] sm:$0xff]  ;;  %v2995_v63 = vmul.f32 %v11542_v45, %v11542_v45  ;;  %v3583_v8 = vld [vmem:[%s13780_s2 + $0x310] sm:$0xff] }
 0x3ea   :  { %15322 = vst [vmem:[#allocation460_spill] sm:$0xff] %v11555_v33  ;;  %6406 = vrsqrt.f32 %v3356_v25  ;;  %v11570_v42 = vmul.f32 0.0051020407, %v15325_v20  ;;  %v11573_v3 = vmul.f32 %v6393_v26, %v3581_v52  ;;  %v6397_v60 = vpop.eup %6396  ;;  %v3358_v40 = vadd.f32 0.001, %v3238_v46  ;;  %v15327_v45 = vld [vmem:[#allocation327_spill] sm:$0xff] }
 0x3eb   :  { %4557 = vperm.xlu1 %6191, %v11545_v44   ;;  %v11553_v32 = vpop.permute.xlu1 %4237  ;;  %15323 = vst [vmem:[#allocation461_spill] sm:$0xff] %v11560_v15  ;;  %v3240_v0 = vmax.f32 %v3120_v37, 0.0  ;;  %v3122_v1 = vsub.f32 %v2882_v49, %v3002_v51  ;;  %v2884_v56 = vmul.f32 0.0051020407, %v11141_v23  ;;  %v2877_v25 = vmul.f32 0.0051020407, %v15327_v45 }
 0x3ec   :  { %15321 = vst [vmem:[#allocation271_spill] sm:$0xff] %v11553_v32  ;;  %15326 = vst [vmem:[#allocation141_spill] sm:$0xff] %v11570_v42  ;;  %v3115_v32 = vsub.f32 %v2875_v17, %v2995_v63  ;;  %v6399_v52 = vpop.eup %6398  ;;  %6408 = vrsqrt.f32 %v3349_v57  ;;  %v3351_v26 = vadd.f32 0.001, %v3231_v34  ;;  %v3233_v46 = vmax.f32 %v3113_v35, 0.0  ;;  %v3592_v49 = vld [vmem:[%s13780_s2 + $0x358] sm:$0xff]  ;;  %v11598_v51 = vpop.permute.xlu0 %4322 }
 0x3ed   :  { %4602 = vperm.xlu0 %6190, %v11555_v33   ;;  %v11583_v33 = vmul.f32 %v6395_v29, %v3590_v24  ;;  %v3004_v23 = vmul.f32 %v11560_v15, %v11560_v15  ;;  %v6401_v37 = vpop.eup %6400  ;;  %v2997_v45 = vmul.f32 %v11570_v42, %v11570_v42  ;;  %v11593_v17 = vmul.f32 0.0051020407, %v10700_v30  ;;  %v3585_v24 = vld [vmem:[%s13780_s2 + $0x320] sm:$0xff] }
 0x3ee   :  { %v11596_v29 = vmul.f32 %v6397_v60, %v3583_v8  ;;  %6410 = vrsqrt.f32 %v3358_v40  ;;  %v3360_v57 = vadd.f32 0.001, %v3240_v0  ;;  %v3242_v34 = vmax.f32 %v3122_v1, 0.0 }
 0x3ef   :  { %4567 = vperm.xlu1 %6191, %v11573_v3   ;;  %v11581_v20 = vpop.permute.xlu1 %4247  ;;  %15328 = vst [vmem:[#allocation327_spill] sm:$0xff] %v11593_v17  ;;  %v3124_v35 = vsub.f32 %v2884_v56, %v3004_v23  ;;  %v3235_v63 = vmax.f32 %v3115_v32, 0.0  ;;  %v3117_v15 = vsub.f32 %v2877_v25, %v2997_v45  ;;  %v11606_v42 = vmul.f32 %v6399_v52, %v3592_v49  ;;  %v3594_v56 = vld [vmem:[%s13780_s2 + $0x368] sm:$0xff] }
 0x3f0   :  { %v6403_v8 = vpop.eup %6402  ;;  %6412 = vrsqrt.f32 %v3351_v26  ;;  %v3353_v60 = vadd.f32 0.001, %v3233_v46  ;;  %v2879_v40 = vmul.f32 0.0051020407, %v10743_v31  ;;  %v2999_v32 = vmul.f32 %v11593_v17, %v11593_v17  ;;  %v3587_v31 = vld [vmem:[%s13780_s2 + $0x330] sm:$0xff] }
 0x3f1   :  { %4612 = vperm.xlu0 %6190, %v11583_v33   ;;  %v6405_v0 = vpop.eup %6404  ;;  %v11615_v1 = vmul.f32 %v6401_v37, %v3585_v24  ;;  %6414 = vrsqrt.f32 %v3360_v57  ;;  %v11618_v25 = vmul.f32 0.0051020407, %v10784_v5  ;;  %v3362_v52 = vadd.f32 0.001, %v3242_v34  ;;  %v11632_v34 = vpop.permute.xlu0 %4422 }
 0x3f2   :  { %v3244_v26 = vmax.f32 %v3124_v35, 0.0  ;;  %v3355_v23 = vadd.f32 0.001, %v3235_v63  ;;  %v3237_v49 = vmax.f32 %v3117_v15, 0.0  ;;  %v11626_v17 = vmul.f32 %v6403_v8, %v3594_v56  ;;  %15331 = vst [vmem:[#allocation465_spill] sm:$0xff] %v11632_v34  ;;  %v3596_v35 = vld [vmem:[%s13780_s2 + $0x378] sm:$0xff] }
 0x3f3   :  { %4577 = vperm.xlu1 %6191, %v11596_v29   ;;  %v11604_v30 = vpop.permute.xlu1 %4257  ;;  %15329 = vst [vmem:[#allocation463_spill] sm:$0xff] %v11618_v25  ;;  %6416 = vrsqrt.f32 %v3353_v60  ;;  %v3119_v37 = vsub.f32 %v2879_v40, %v2999_v32  ;;  %v2881_v5 = vmul.f32 0.0051020407, %v10839_v19  ;;  %v11630_v57 = vmul.f32 0.0051020407, %v10873_v59  ;;  %v3589_v19 = vld [vmem:[%s13780_s2 + $0x340] sm:$0xff] }
 0x3f4   :  { %v6407_v46 = vpop.eup %6406  ;;  %v11638_v15 = vmul.f32 %v6405_v0, %v3587_v31  ;;  %v3001_v63 = vmul.f32 %v11618_v25, %v11618_v25  ;;  %6418 = vrsqrt.f32 %v3362_v52  ;;  %v3364_v8 = vadd.f32 0.001, %v3244_v26  ;;  %v3598_v26 = vld [vmem:[%s13780_s2 + $0x388] sm:$0xff]  ;;  %v3593_v25 = vld [vmem:[%s13780_s2 + $0x360] sm:$0xff] }
 0x3f5   :  { %4622 = vperm.xlu0 %6190, %v11606_v42   ;;  %15330 = vst [vmem:[#allocation464_spill] sm:$0xff] %v11630_v57  ;;  %6420 = vrsqrt.f32 %v3355_v23  ;;  %v3357_v59 = vadd.f32 0.001, %v3237_v49  ;;  %v11648_v40 = vmul.f32 %v6407_v46, %v3596_v35  ;;  %v3239_v0 = vmax.f32 %v3119_v37, 0.0  ;;  %v11659_v46 = vpop.permute.xlu0 %4332  ;;  %v3591_v37 = vld [vmem:[%s13780_s2 + $0x350] sm:$0xff] }
 0x3f6   :  { %v6409_v24 = vpop.eup %6408  ;;  %v3121_v32 = vsub.f32 %v2881_v5, %v3001_v63  ;;  %v3003_v31 = vmul.f32 %v11630_v57, %v11630_v57  ;;  %v2883_v52 = vmul.f32 0.0051020407, %v10917_v39  ;;  %6422 = vrsqrt.f32 %v3364_v8  ;;  %v3600_v8 = vld [vmem:[%s13780_s2 + $0x398] sm:$0xff] }
 0x3f7   :  { %4587 = vperm.xlu1 %6191, %v11615_v1   ;;  %v11624_v45 = vpop.permute.xlu1 %4267  ;;  %v11657_v23 = vmul.f32 %v6409_v24, %v3589_v19  ;;  %6424 = vrsqrt.f32 %v3357_v59  ;;  %v3359_v63 = vadd.f32 0.001, %v3239_v0 }
 0x3f8   :  { %v6411_v56 = vpop.eup %6410  ;;  %v3241_v34 = vmax.f32 %v3121_v32, 0.0  ;;  %v3123_v24 = vsub.f32 %v2883_v52, %v3003_v31 }
 0x3f9   :  { %4632 = vperm.xlu0 %6190, %v11626_v17   ;;  %v11667_v39 = vmul.f32 %v6411_v56, %v3598_v26  ;;  %6426 = vrsqrt.f32 %v3359_v63  ;;  %v11683_v52 = vpop.permute.xlu0 %4432  ;;  %v3602_v26 = vld [vmem:[%s13780_s2 + $0x3a8] sm:$0xff] }
 0x3fa   :  { %v6413_v49 = vpop.eup %6412  ;;  %v3361_v32 = vadd.f32 0.001, %v3241_v34  ;;  %v3243_v31 = vmax.f32 %v3123_v24, 0.0  ;;  %15334 = vst [vmem:[#allocation468_spill] sm:$0xff] %v11683_v52  ;;  %v3604_v52 = vld [vmem:[%s13780_s2 + $0x3b8] sm:$0xff] }
 0x3fb   :  { %4597 = vperm.xlu1 %6191, %v11638_v15   ;;  %v11646_v60 = vpop.permute.xlu1 %4277  ;;  %v6415_v35 = vpop.eup %6414  ;;  %v11673_v19 = vmul.f32 %v6413_v49, %v3591_v37 }
 0x3fc   :  { %v11681_v59 = vmul.f32 %v6415_v35, %v3600_v8  ;;  %v3595_v35 = vld [vmem:[%s13780_s2 + $0x370] sm:$0xff]  ;;  %6428 = vrsqrt.f32 %v3361_v32  ;;  %v3363_v8 = vadd.f32 0.001, %v3243_v31 }
 0x3fd   :  { %4642 = vperm.xlu0 %6190, %v11648_v40   ;;  %v6417_v57 = vpop.eup %6416 }
 0x3fe   :  { %15333 = vst [vmem:[#allocation467_spill] sm:$0xff] %v11681_v59  ;;  %v6419_v0 = vpop.eup %6418  ;;  %v11689_v37 = vmul.f32 %v6417_v57, %v3593_v25  ;;  %6430 = vrsqrt.f32 %v3363_v8 }
 0x3ff   :  { %4607 = vperm.xlu1 %6191, %v11657_v23   ;;  %v11665_v5 = vpop.permute.xlu1 %4287  ;;  %v6421_v49 = vpop.eup %6420  ;;  %v11697_v34 = vmul.f32 %v6419_v0, %v3602_v26  ;;  %v15340_v0 = vld [vmem:[#allocation181_spill] sm:$0xff]  ;;  %v15341_v26 = vld [vmem:[#allocation170_spill] sm:$0xff] }
 0x400   :  { %15335 = vst [vmem:[#allocation469_spill] sm:$0xff] %v11689_v37  ;;  %v6423_v24 = vpop.eup %6422  ;;  %v11703_v25 = vmul.f32 %v6421_v49, %v3595_v35  ;;  %v3726_v49 = vld [vmem:[%s13781_s3 + $0x8] sm:$0xff] }
 0x401   :  { %4652 = vperm.xlu0 %6190, %v11667_v39   ;;  %15337 = vst [vmem:[#allocation471_spill] sm:$0xff] %v11697_v34  ;;  %v6425_v57 = vpop.eup %6424  ;;  %v11715_v31 = vmul.f32 %v6423_v24, %v3604_v52  ;;  %v15346_v52 = vld [vmem:[#allocation194_spill] sm:$0xff] }
 0x402   :  { %15338 = vst [vmem:[#allocation472_spill] sm:$0xff] %v11703_v25  ;;  %v15347_v24 = vld [vmem:[#allocation174_spill] sm:$0xff] }
 0x403   :  { %4617 = vperm.xlu1 %6191, %v11673_v19   ;;  %v11679_v56 = vpop.permute.xlu1 %4387  ;;  %15343 = vst [vmem:[#allocation170_spill] sm:$0xff] %v11715_v31 }
 0x404   :  { %15332 = vst [vmem:[#allocation466_spill] sm:$0xff] %v11679_v56  ;;  %v11705_v56 = vpop.permute.xlu0 %4342 }
 0x405   :  { %4662 = vperm.xlu0 %6190, %v11681_v59   ;;  %15339 = vst [vmem:[#allocation473_spill] sm:$0xff] %v11705_v56 }
 0x407   :  { %4627 = vperm.xlu1 %6191, %v11689_v37   ;;  %v11695_v63 = vpop.permute.xlu1 %4297  ;;  %v3846_v37 = vmul.f32 %v15341_v26, %v15340_v0  ;;  %v3599_v0 = vld [vmem:[%s13780_s2 + $0x390] sm:$0xff] }
 0x408   :  { %15336 = vst [vmem:[#allocation470_spill] sm:$0xff] %v11695_v63  ;;  %v3597_v63 = vld [vmem:[%s13780_s2 + $0x380] sm:$0xff]  ;;  %v11731_v56 = vpop.permute.xlu0 %4442 }
 0x409   :  { %4672 = vperm.xlu0 %6190, %v11697_v34   ;;  %v11721_v35 = vmul.f32 %v6425_v57, %v3597_v63  ;;  %v6427_v34 = vpop.eup %6426  ;;  %v3966_v26 = vsub.f32 %v3726_v49, %v3846_v37  ;;  %15348 = vst [vmem:[#allocation194_spill] sm:$0xff] %v11731_v56  ;;  %v3728_v63 = vld [vmem:[%s13781_s3 + $0x18] sm:$0xff]  ;;  %v3601_v37 = vld [vmem:[%s13780_s2 + $0x3a0] sm:$0xff] }
 0x40a   :  { %v11736_v8 = vmul.f32 %v6427_v34, %v3599_v0  ;;  %v6429_v57 = vpop.eup %6428 }
 0x40b   :  { %4637 = vperm.xlu1 %6191, %v11703_v25   ;;  %v11713_v32 = vpop.permute.xlu1 %4397  ;;  %15344 = vst [vmem:[#allocation474_spill] sm:$0xff] %v11721_v35  ;;  %v3848_v25 = vmul.f32 %v15347_v24, %v15346_v52  ;;  %v15351_v52 = vld [vmem:[#allocation214_spill] sm:$0xff]  ;;  %v15352_v24 = vld [vmem:[#allocation204_spill] sm:$0xff]  ;;  %v11749_v34 = vmul.f32 %v6429_v57, %v3601_v37  ;;  %v6431_v0 = vpop.eup %6430  ;;  %v15359_v37 = vld [vmem:[#allocation165_spill] sm:$0xff] }
 0x40c   :  { %15342 = vst [vmem:[#allocation181_spill] sm:$0xff] %v11713_v32  ;;  %15349 = vst [vmem:[#allocation174_spill] sm:$0xff] %v11736_v8  ;;  %v3850_v56 = vmul.f32 %v15352_v24, %v15351_v52  ;;  %v15356_v52 = vld [vmem:[#allocation232_spill] sm:$0xff] }
 0x40d   :  { %4682 = vperm.xlu0 %6190, %v11715_v31   ;;  %v3730_v31 = vld [vmem:[%s13781_s3 + $0x28] sm:$0xff]  ;;  %15353 = vst [vmem:[#allocation214_spill] sm:$0xff] %v11749_v34  ;;  %v15357_v24 = vld [vmem:[#allocation224_spill] sm:$0xff] }
 0x40f   :  { %4647 = vperm.xlu1 %6191, %v11721_v35   ;;  %v11727_v32 = vpop.permute.xlu1 %4307  ;;  %v3968_v35 = vsub.f32 %v3728_v63, %v3848_v25  ;;  %v3970_v63 = vsub.f32 %v3730_v31, %v3850_v56 }
 0x410   :  { %15345 = vst [vmem:[#allocation475_spill] sm:$0xff] %v11727_v32 }
 0x411   :  { %4932 = vperm.xlu0 %6190, %v3966_v26   ;;  %v11751_v26 = vpop.permute.xlu0 %4352 }
 0x412   :  { %15354 = vst [vmem:[#allocation204_spill] sm:$0xff] %v11751_v26  ;;  %v15360_v26 = vld [vmem:[#allocation291_spill] sm:$0xff] }
 0x413   :  { %4657 = vperm.xlu1 %6191, %v11736_v8   ;;  %v11742_v49 = vpop.permute.xlu1 %4407  ;;  %v3603_v8 = vld [vmem:[%s13780_s2 + $0x3b0] sm:$0xff]  ;;  %v3845_v32 = vmul.f32 %v15360_v26, %v15359_v37 }
 0x414   :  { %15350 = vst [vmem:[#allocation476_spill] sm:$0xff] %v11742_v49  ;;  %v3852_v49 = vmul.f32 %v15357_v24, %v15356_v52  ;;  %v11764_v57 = vmul.f32 %v6431_v0, %v3603_v8  ;;  %v15362_v52 = vld [vmem:[#allocation251_spill] sm:$0xff]  ;;  %v15363_v24 = vld [vmem:[#allocation312_spill] sm:$0xff] }
 0x415   :  { %4942 = vperm.xlu0 %6190, %v3968_v35   ;;  %v3732_v35 = vld [vmem:[%s13781_s3 + $0x38] sm:$0xff]  ;;  %v11776_v59 = vpop.permute.xlu0 %4452  ;;  %v3734_v8 = vld [vmem:[%s13781_s3 + $0x48] sm:$0xff]  ;;  %v15365_v26 = vld [vmem:[#allocation188_spill] sm:$0xff] }
 0x416   :  { %15358 = vst [vmem:[#allocation232_spill] sm:$0xff] %v11764_v57  ;;  %v3972_v31 = vsub.f32 %v3732_v35, %v3852_v49  ;;  %15364 = vst [vmem:[#allocation165_spill] sm:$0xff] %v11776_v59  ;;  %v3736_v59 = vld [vmem:[%s13781_s3 + $0x58] sm:$0xff] }
 0x417   :  { %4667 = vperm.xlu1 %6191, %v11749_v34   ;;  %v11757_v25 = vpop.permute.xlu1 %4317  ;;  %v3725_v34 = vld [vmem:[%s13781_s3] sm:$0xff] }
 0x418   :  { %15355 = vst [vmem:[#allocation477_spill] sm:$0xff] %v11757_v25  ;;  %v3854_v25 = vmul.f32 %v15363_v24, %v15362_v52  ;;  %v3965_v0 = vsub.f32 %v3725_v34, %v3845_v32  ;;  %v15368_v52 = vld [vmem:[#allocation270_spill] sm:$0xff]  ;;  %v15370_v34 = vld [vmem:[#allocation209_spill] sm:$0xff] }
 0x419   :  { %4952 = vperm.xlu0 %6190, %v3970_v63   ;;  %v15366_v63 = vld [vmem:[#allocation255_spill] sm:$0xff]  ;;  %v15369_v24 = vld [vmem:[#allocation334_spill] sm:$0xff] }
 0x41a   :  { %v3847_v37 = vmul.f32 %v15366_v63, %v15365_v26  ;;  %v3974_v35 = vsub.f32 %v3734_v8, %v3854_v25  ;;  %v11795_v63 = vpop.permute.xlu0 %4362 }
 0x41b   :  { %4677 = vperm.xlu1 %6191, %v11764_v57   ;;  %v11772_v56 = vpop.permute.xlu1 %4417  ;;  %v3727_v57 = vld [vmem:[%s13781_s3 + $0x10] sm:$0xff]  ;;  %15372 = vst [vmem:[#allocation251_spill] sm:$0xff] %v11795_v63 }
 0x41c   :  { %15361 = vst [vmem:[#allocation224_spill] sm:$0xff] %v11772_v56  ;;  %v3856_v56 = vmul.f32 %v15369_v24, %v15368_v52  ;;  %v3967_v32 = vsub.f32 %v3727_v57, %v3847_v37  ;;  %v15374_v52 = vld [vmem:[#allocation289_spill] sm:$0xff]  ;;  %v15375_v24 = vld [vmem:[#allocation352_spill] sm:$0xff]  ;;  %v3738_v57 = vld [vmem:[%s13781_s3 + $0x68] sm:$0xff] }
 0x41d   :  { %4962 = vperm.xlu0 %6190, %v3972_v31   ;;  %v15371_v31 = vld [vmem:[#allocation116_spill] sm:$0xff] }
 0x41e   :  { %v3849_v26 = vmul.f32 %v15371_v31, %v15370_v34  ;;  %v3976_v8 = vsub.f32 %v3736_v59, %v3856_v56  ;;  %v15377_v34 = vld [vmem:[#allocation290_spill] sm:$0xff]  ;;  %v3731_v63 = vld [vmem:[%s13781_s3 + $0x30] sm:$0xff] }
 0x41f   :  { %4927 = vperm.xlu1 %6191, %v3965_v0   ;;  %v11786_v49 = vpop.permute.xlu1 %4327  ;;  %v3729_v0 = vld [vmem:[%s13781_s3 + $0x20] sm:$0xff]  ;;  %v15379_v56 = vld [vmem:[#allocation308_spill] sm:$0xff] }
 0x420   :  { %15367 = vst [vmem:[#allocation291_spill] sm:$0xff] %v11786_v49  ;;  %v3858_v49 = vmul.f32 %v15375_v24, %v15374_v52  ;;  %v3969_v37 = vsub.f32 %v3729_v0, %v3849_v26  ;;  %v11816_v24 = vpop.permute.xlu0 %4462  ;;  %v3740_v26 = vld [vmem:[%s13781_s3 + $0x78] sm:$0xff] }
 0x421   :  { %4972 = vperm.xlu0 %6190, %v3974_v35   ;;  %v15376_v35 = vld [vmem:[#allocation105_spill] sm:$0xff]  ;;  %15381 = vst [vmem:[#allocation255_spill] sm:$0xff] %v11816_v24 }
 0x422   :  { %v3851_v31 = vmul.f32 %v15377_v34, %v15376_v35  ;;  %v3978_v59 = vsub.f32 %v3738_v57, %v3858_v49  ;;  %v15383_v35 = vld [vmem:[#allocation329_spill] sm:$0xff] }
 0x423   :  { %4937 = vperm.xlu1 %6191, %v3967_v32   ;;  %v11800_v25 = vpop.permute.xlu1 %4427 }
 0x424   :  { %15373 = vst [vmem:[#allocation312_spill] sm:$0xff] %v11800_v25  ;;  %v15380_v25 = vld [vmem:[#allocation372_spill] sm:$0xff]  ;;  %v3971_v0 = vsub.f32 %v3731_v63, %v3851_v31  ;;  %v15387_v31 = vld [vmem:[#allocation266_spill] sm:$0xff] }
 0x425   :  { %4982 = vperm.xlu0 %6190, %v3976_v8   ;;  %v3860_v52 = vmul.f32 %v15380_v25, %v15379_v56  ;;  %v15382_v8 = vld [vmem:[#allocation247_spill] sm:$0xff]  ;;  %v15385_v25 = vld [vmem:[#allocation328_spill] sm:$0xff] }
 0x426   :  { %v3853_v34 = vmul.f32 %v15383_v35, %v15382_v8  ;;  %v15386_v56 = vld [vmem:[#allocation432_spill] sm:$0xff]  ;;  %v11835_v8 = vpop.permute.xlu0 %4372 }
 0x427   :  { %4947 = vperm.xlu1 %6191, %v3969_v37   ;;  %v11812_v32 = vpop.permute.xlu1 %4337  ;;  %v3733_v37 = vld [vmem:[%s13781_s3 + $0x40] sm:$0xff]  ;;  %v3980_v57 = vsub.f32 %v3740_v26, %v3860_v52  ;;  %v3862_v24 = vmul.f32 %v15386_v56, %v15385_v25  ;;  %v15389_v35 = vld [vmem:[#allocation348_spill] sm:$0xff]  ;;  %v15390_v25 = vld [vmem:[#allocation433_spill] sm:$0xff] }
 0x428   :  { %15378 = vst [vmem:[#allocation188_spill] sm:$0xff] %v11812_v32  ;;  %v3742_v32 = vld [vmem:[%s13781_s3 + $0x88] sm:$0xff]  ;;  %v3973_v63 = vsub.f32 %v3733_v37, %v3853_v34  ;;  %v3864_v56 = vmul.f32 %v15390_v25, %v15389_v35  ;;  %v3744_v34 = vld [vmem:[%s13781_s3 + $0x98] sm:$0xff] }
 0x429   :  { %4992 = vperm.xlu0 %6190, %v3978_v59   ;;  %v3855_v59 = vmul.f32 %v10674_v21, %v15387_v31  ;;  %v3982_v26 = vsub.f32 %v3742_v32, %v3862_v24  ;;  %v15391_v21 = vld [vmem:[#allocation285_spill] sm:$0xff]  ;;  %v15394_v24 = vld [vmem:[#allocation368_spill] sm:$0xff] }
 0x42a   :  { %v3984_v32 = vsub.f32 %v3744_v34, %v3864_v56  ;;  %v11856_v25 = vpop.permute.xlu0 %4472 }
 0x42b   :  { %4957 = vperm.xlu1 %6191, %v3971_v0   ;;  %v11826_v49 = vpop.permute.xlu1 %4437  ;;  %v3735_v0 = vld [vmem:[%s13781_s3 + $0x50] sm:$0xff]  ;;  %15396 = vst [vmem:[#allocation116_spill] sm:$0xff] %v11856_v25 }
 0x42c   :  { %15384 = vst [vmem:[#allocation270_spill] sm:$0xff] %v11826_v49  ;;  %v3975_v37 = vsub.f32 %v3735_v0, %v3855_v59  ;;  %v3737_v49 = vld [vmem:[%s13781_s3 + $0x60] sm:$0xff]  ;;  %v3746_v59 = vld [vmem:[%s13781_s3 + $0xa8] sm:$0xff] }
 0x42d   :  { %5002 = vperm.xlu0 %6190, %v3980_v57   ;;  %v15392_v57 = vld [vmem:[#allocation347_spill] sm:$0xff] }
 0x42e   :  { %v3857_v31 = vmul.f32 %v15392_v57, %v15391_v21  ;;  %v15398_v21 = vld [vmem:[#allocation114_spill] sm:$0xff] }
 0x42f   :  { %4967 = vperm.xlu1 %6191, %v3973_v63   ;;  %v11840_v52 = vpop.permute.xlu1 %4347 }
 0x430   :  { %15388 = vst [vmem:[#allocation334_spill] sm:$0xff] %v11840_v52  ;;  %v15395_v52 = vld [vmem:[#allocation436_spill] sm:$0xff]  ;;  %v3977_v0 = vsub.f32 %v3737_v49, %v3857_v31  ;;  %v3748_v49 = vld [vmem:[%s13781_s3 + $0xb8] sm:$0xff] }
 0x431   :  { %5012 = vperm.xlu0 %6190, %v3982_v26   ;;  %v3866_v35 = vmul.f32 %v15395_v52, %v15394_v24  ;;  %v15397_v26 = vld [vmem:[#allocation303_spill] sm:$0xff]  ;;  %v15401_v24 = vld [vmem:[#allocation198_spill] sm:$0xff] }
 0x432   :  { %v3859_v57 = vmul.f32 %v15398_v21, %v15397_v26  ;;  %v15400_v52 = vld [vmem:[#allocation231_spill] sm:$0xff]  ;;  %v15404_v26 = vld [vmem:[#allocation366_spill] sm:$0xff] }
 0x433   :  { %4977 = vperm.xlu1 %6191, %v3975_v37   ;;  %v11852_v63 = vpop.permute.xlu1 %4447  ;;  %v3739_v37 = vld [vmem:[%s13781_s3 + $0x70] sm:$0xff]  ;;  %v3986_v34 = vsub.f32 %v3746_v59, %v3866_v35 }
 0x434   :  { %15393 = vst [vmem:[#allocation209_spill] sm:$0xff] %v11852_v63  ;;  %v3868_v63 = vmul.f32 %v15401_v24, %v15400_v52  ;;  %v3979_v31 = vsub.f32 %v3739_v37, %v3859_v57  ;;  %v15406_v52 = vld [vmem:[#allocation394_spill] sm:$0xff]  ;;  %v3750_v57 = vld [vmem:[%s13781_s3 + $0xc8] sm:$0xff] }
 0x435   :  { %5022 = vperm.xlu0 %6190, %v3984_v32   ;;  %v15403_v32 = vld [vmem:[#allocation159_spill] sm:$0xff]  ;;  %v15407_v24 = vld [vmem:[#allocation438_spill] sm:$0xff] }
 0x436   :  { %v3861_v21 = vmul.f32 %v15404_v26, %v15403_v32  ;;  %v3988_v59 = vsub.f32 %v3748_v49, %v3868_v63  ;;  %v15409_v26 = vld [vmem:[#allocation399_spill] sm:$0xff] }
 0x437   :  { %4987 = vperm.xlu1 %6191, %v3977_v0   ;;  %v11866_v56 = vpop.permute.xlu1 %4357  ;;  %v3741_v0 = vld [vmem:[%s13781_s3 + $0x80] sm:$0xff] }
 0x438   :  { %15399 = vst [vmem:[#allocation289_spill] sm:$0xff] %v11866_v56  ;;  %v11870_v25 = vpop.permute.xlu0 %4382  ;;  %v3870_v56 = vmul.f32 %v15407_v24, %v15406_v52  ;;  %v3981_v37 = vsub.f32 %v3741_v0, %v3861_v21  ;;  %v15410_v52 = vld [vmem:[#allocation220_spill] sm:$0xff]  ;;  %v3752_v21 = vld [vmem:[%s13781_s3 + $0xd8] sm:$0xff] }
 0x439   :  { %15402 = vst [vmem:[#allocation352_spill] sm:$0xff] %v11870_v25  ;;  %5032 = vperm.xlu0 %6190, %v3986_v34   ;;  %v15408_v34 = vld [vmem:[#allocation345_spill] sm:$0xff]  ;;  %v3872_v24 = vmul.f32 %v15410_v52, %v15409_v26 }
 0x43a   :  { %v3863_v32 = vmul.f32 %v10755_v18, %v15408_v34  ;;  %v3990_v49 = vsub.f32 %v3750_v57, %v3870_v56  ;;  %v15412_v18 = vld [vmem:[#allocation363_spill] sm:$0xff]  ;;  %v15414_v34 = vld [vmem:[#allocation288_spill] sm:$0xff]  ;;  %v15415_v26 = vld [vmem:[#allocation233_spill] sm:$0xff] }
 0x43b   :  { %4997 = vperm.xlu1 %6191, %v3979_v31   ;;  %v11880_v35 = vpop.permute.xlu1 %4457  ;;  %v3743_v31 = vld [vmem:[%s13781_s3 + $0x90] sm:$0xff]  ;;  %v3992_v57 = vsub.f32 %v3752_v21, %v3872_v24  ;;  %v3874_v52 = vmul.f32 %v15415_v26, %v15414_v34  ;;  %v15419_v34 = vld [vmem:[#allocation103_spill] sm:$0xff] }
 0x43c   :  { %15405 = vst [vmem:[#allocation105_spill] sm:$0xff] %v11880_v35  ;;  %v11884_v25 = vpop.permute.xlu0 %4482  ;;  %v3983_v0 = vsub.f32 %v3743_v31, %v3863_v32  ;;  %v3754_v32 = vld [vmem:[%s13781_s3 + $0xe8] sm:$0xff] }
 0x43d   :  { %5042 = vperm.xlu0 %6190, %v3988_v59   ;;  %v3865_v59 = vmul.f32 %v10782_v9, %v15412_v18  ;;  %v15417_v9 = vld [vmem:[#allocation383_spill] sm:$0xff]  ;;  %v3994_v21 = vsub.f32 %v3754_v32, %v3874_v52  ;;  %v15418_v18 = vld [vmem:[#allocation410_spill] sm:$0xff] }
 0x43e   :  { %v3876_v26 = vmul.f32 %v15419_v34, %v15418_v18  ;;  %v15423_v18 = vld [vmem:[#allocation421_spill] sm:$0xff] }
 0x43f   :  { %5007 = vperm.xlu1 %6191, %v3981_v37   ;;  %v11894_v63 = vpop.permute.xlu1 %4367  ;;  %v3745_v37 = vld [vmem:[%s13781_s3 + $0xa0] sm:$0xff]  ;;  %v15424_v34 = vld [vmem:[#allocation177_spill] sm:$0xff] }
 0x440   :  { %v11898_v35 = vpop.permute.xlu0 %4492  ;;  %v3985_v31 = vsub.f32 %v3745_v37, %v3865_v59  ;;  %v3756_v59 = vld [vmem:[%s13781_s3 + $0xf8] sm:$0xff] }
 0x441   :  { %15411 = vst [vmem:[#allocation290_spill] sm:$0xff] %v11898_v35  ;;  %5052 = vperm.xlu0 %6190, %v3990_v49   ;;  %v3867_v49 = vmul.f32 %v10804_v28, %v15417_v9  ;;  %v15421_v28 = vld [vmem:[#allocation235_spill] sm:$0xff]  ;;  %v3996_v32 = vsub.f32 %v3756_v59, %v3876_v26 }
 0x443   :  { %5017 = vperm.xlu1 %6191, %v3983_v0   ;;  %v11908_v56 = vpop.permute.xlu1 %4467  ;;  %v3747_v0 = vld [vmem:[%s13781_s3 + $0xb0] sm:$0xff] }
 0x444   :  { %15413 = vst [vmem:[#allocation308_spill] sm:$0xff] %v11908_v56  ;;  %v11912_v35 = vpop.permute.xlu0 %4502  ;;  %v3987_v37 = vsub.f32 %v3747_v0, %v3867_v49  ;;  %v3758_v49 = vld [vmem:[%s13781_s3 + $0x108] sm:$0xff] }
 0x445   :  { %15416 = vst [vmem:[#allocation372_spill] sm:$0xff] %v11912_v35  ;;  %5062 = vperm.xlu0 %6190, %v3992_v57   ;;  %v15422_v57 = vld [vmem:[#allocation409_spill] sm:$0xff] }
 0x446   :  { %v3869_v9 = vmul.f32 %v15422_v57, %v15421_v28  ;;  %v15427_v57 = vld [vmem:[#allocation434_spill] sm:$0xff] }
 0x447   :  { %5027 = vperm.xlu1 %6191, %v3985_v31   ;;  %v11922_v24 = vpop.permute.xlu1 %4377  ;;  %v3749_v31 = vld [vmem:[%s13781_s3 + $0xc0] sm:$0xff] }
 0x448   :  { %v11926_v56 = vpop.permute.xlu0 %4512  ;;  %v3989_v0 = vsub.f32 %v3749_v31, %v3869_v9  ;;  %v3760_v9 = vld [vmem:[%s13781_s3 + $0x118] sm:$0xff] }
 0x449   :  { %15420 = vst [vmem:[#allocation247_spill] sm:$0xff] %v11926_v56  ;;  %5072 = vperm.xlu0 %6190, %v3994_v21   ;;  %v3878_v56 = vmul.f32 %v15424_v34, %v15423_v18  ;;  %v15426_v21 = vld [vmem:[#allocation254_spill] sm:$0xff]  ;;  %v15428_v18 = vld [vmem:[#allocation252_spill] sm:$0xff] }
 0x44a   :  { %v3871_v28 = vmul.f32 %v10849_v58, %v15426_v21  ;;  %v3880_v34 = vmul.f32 %v15428_v18, %v15427_v57  ;;  %v15430_v58 = vld [vmem:[#allocation274_spill] sm:$0xff]  ;;  %v15432_v21 = vld [vmem:[#allocation437_spill] sm:$0xff]  ;;  %v15433_v57 = vld [vmem:[#allocation128_spill] sm:$0xff] }
 0x44b   :  { %5037 = vperm.xlu1 %6191, %v3987_v37   ;;  %v11936_v52 = vpop.permute.xlu1 %4477  ;;  %v3751_v37 = vld [vmem:[%s13781_s3 + $0xd0] sm:$0xff]  ;;  %v3998_v59 = vsub.f32 %v3758_v49, %v3878_v56  ;;  %v3882_v18 = vmul.f32 %v15433_v57, %v15432_v21  ;;  %v15438_v21 = vld [vmem:[#allocation203_spill] sm:$0xff] }
 0x44c   :  { %v11940_v35 = vpop.permute.xlu0 %4522  ;;  %v3991_v31 = vsub.f32 %v3751_v37, %v3871_v28  ;;  %v4000_v49 = vsub.f32 %v3760_v9, %v3880_v34  ;;  %v3762_v28 = vld [vmem:[%s13781_s3 + $0x128] sm:$0xff] }
 0x44d   :  { %15425 = vst [vmem:[#allocation329_spill] sm:$0xff] %v11940_v35  ;;  %5082 = vperm.xlu0 %6190, %v3996_v32   ;;  %v3873_v32 = vmul.f32 %v10868_v62, %v15430_v58  ;;  %v15435_v62 = vld [vmem:[#allocation408_spill] sm:$0xff]  ;;  %v4002_v9 = vsub.f32 %v3762_v28, %v3882_v18 }
 0x44e   :  { %v15437_v58 = vld [vmem:[#allocation200_spill] sm:$0xff] }
 0x44f   :  { %5047 = vperm.xlu1 %6191, %v3989_v0   ;;  %v11950_v26 = vpop.permute.xlu1 %4487  ;;  %v3753_v0 = vld [vmem:[%s13781_s3 + $0xe0] sm:$0xff]  ;;  %v3884_v57 = vmul.f32 %v15438_v21, %v15437_v58  ;;  %v15443_v58 = vld [vmem:[#allocation307_spill] sm:$0xff] }
 0x450   :  { %v11954_v35 = vpop.permute.xlu0 %4532  ;;  %v3993_v37 = vsub.f32 %v3753_v0, %v3873_v32  ;;  %v3764_v32 = vld [vmem:[%s13781_s3 + $0x138] sm:$0xff] }
 0x451   :  { %15429 = vst [vmem:[#allocation328_spill] sm:$0xff] %v11954_v35  ;;  %5092 = vperm.xlu0 %6190, %v3998_v59   ;;  %v3875_v59 = vmul.f32 %v10887_v22, %v15435_v62  ;;  %v15440_v22 = vld [vmem:[#allocation311_spill] sm:$0xff]  ;;  %v4004_v28 = vsub.f32 %v3764_v32, %v3884_v57 }
 0x452   :  { %v15442_v62 = vld [vmem:[#allocation439_spill] sm:$0xff] }
 0x453   :  { %5057 = vperm.xlu1 %6191, %v3991_v31   ;;  %v11964_v56 = vpop.permute.xlu1 %4497  ;;  %v3755_v31 = vld [vmem:[%s13781_s3 + $0xf0] sm:$0xff]  ;;  %v3886_v21 = vmul.f32 %v15443_v58, %v15442_v62  ;;  %v3768_v62 = vld [vmem:[%s13781_s3 + $0x158] sm:$0xff] }
 0x454   :  { %15431 = vst [vmem:[#allocation432_spill] sm:$0xff] %v11964_v56  ;;  %v11968_v35 = vpop.permute.xlu0 %4542  ;;  %v3995_v0 = vsub.f32 %v3755_v31, %v3875_v59  ;;  %v3766_v59 = vld [vmem:[%s13781_s3 + $0x148] sm:$0xff]  ;;  %v15546_v56 = vld [vmem:[#allocation449_spill] sm:$0xff] }
 0x455   :  { %15434 = vst [vmem:[#allocation266_spill] sm:$0xff] %v11968_v35  ;;  %5102 = vperm.xlu0 %6190, %v4000_v49   ;;  %v3877_v49 = vmul.f32 %v10906_v36, %v15440_v22  ;;  %v15445_v36 = vld [vmem:[#allocation333_spill] sm:$0xff]  ;;  %v4006_v32 = vsub.f32 %v3766_v59, %v3886_v21 }
 0x457   :  { %5067 = vperm.xlu1 %6191, %v3993_v37   ;;  %v11978_v34 = vpop.permute.xlu1 %4507  ;;  %v3757_v37 = vld [vmem:[%s13781_s3 + $0x100] sm:$0xff] }
 0x458   :  { %15436 = vst [vmem:[#allocation348_spill] sm:$0xff] %v11978_v34  ;;  %v11982_v35 = vpop.permute.xlu0 %4552  ;;  %v3997_v31 = vsub.f32 %v3757_v37, %v3877_v49  ;;  %v15448_v49 = vld [vmem:[#allocation260_spill] sm:$0xff]  ;;  %v15544_v34 = vld [vmem:[#allocation454_spill] sm:$0xff] }
 0x459   :  { %15439 = vst [vmem:[#allocation433_spill] sm:$0xff] %v11982_v35  ;;  %5112 = vperm.xlu0 %6190, %v4002_v9   ;;  %v3879_v9 = vmul.f32 %v10922_v41, %v15445_v36  ;;  %v3881_v37 = vmul.f32 %v10938_v50, %v15448_v49  ;;  %v3761_v41 = vld [vmem:[%s13781_s3 + $0x120] sm:$0xff]  ;;  %v3770_v36 = vld [vmem:[%s13781_s3 + $0x168] sm:$0xff]  ;;  %v15454_v49 = vld [vmem:[#allocation212_spill] sm:$0xff] }
 0x45b   :  { %5077 = vperm.xlu1 %6191, %v3995_v0   ;;  %v11992_v18 = vpop.permute.xlu1 %4517  ;;  %v3759_v0 = vld [vmem:[%s13781_s3 + $0x110] sm:$0xff] }
 0x45c   :  { %15441 = vst [vmem:[#allocation285_spill] sm:$0xff] %v11992_v18  ;;  %v11996_v35 = vpop.permute.xlu0 %4562 }
 0x45d   :  { %15444 = vst [vmem:[#allocation347_spill] sm:$0xff] %v11996_v35  ;;  %5122 = vperm.xlu0 %6190, %v4004_v28   ;;  %v3999_v28 = vsub.f32 %v3759_v0, %v3879_v9  ;;  %v4001_v9 = vsub.f32 %v3761_v41, %v3881_v37  ;;  %v15452_v0 = vld [vmem:[#allocation280_spill] sm:$0xff]  ;;  %v15456_v41 = vld [vmem:[#allocation297_spill] sm:$0xff] }
 0x45e   :  { %v3883_v50 = vmul.f32 %v10954_v14, %v15452_v0  ;;  %v3885_v14 = vmul.f32 %v10976_v48, %v15456_v41  ;;  %v15458_v0 = vld [vmem:[#allocation236_spill] sm:$0xff]  ;;  %v15462_v41 = vld [vmem:[#allocation309_spill] sm:$0xff] }
 0x45f   :  { %5087 = vperm.xlu1 %6191, %v3997_v31   ;;  %v12006_v57 = vpop.permute.xlu1 %4527  ;;  %v15450_v31 = vld [vmem:[#allocation431_spill] sm:$0xff] }
 0x460   :  { %15446 = vst [vmem:[#allocation368_spill] sm:$0xff] %v12006_v57  ;;  %v12008_v22 = vpop.permute.xlu0 %4572  ;;  %v4008_v21 = vsub.f32 %v3768_v62, %v15450_v31  ;;  %v4010_v62 = vsub.f32 %v3770_v36, %v15454_v49  ;;  %v15510_v57 = vld [vmem:[#allocation246_spill] sm:$0xff] }
 0x461   :  { %15447 = vst [vmem:[#allocation436_spill] sm:$0xff] %v12008_v22  ;;  %5132 = vperm.xlu0 %6190, %v4006_v32   ;;  %v3763_v32 = vld [vmem:[%s13781_s3 + $0x130] sm:$0xff] }
 0x462   :  { %v4003_v37 = vsub.f32 %v3763_v32, %v3883_v50  ;;  %v15460_v32 = vld [vmem:[#allocation325_spill] sm:$0xff] }
 0x463   :  { %5097 = vperm.xlu1 %6191, %v3999_v28   ;;  %v12018_v58 = vpop.permute.xlu1 %4537  ;;  %v3887_v48 = vmul.f32 %v11007_v6, %v15460_v32  ;;  %v15466_v32 = vld [vmem:[#allocation241_spill] sm:$0xff] }
 0x464   :  { %15449 = vst [vmem:[#allocation303_spill] sm:$0xff] %v12018_v58  ;;  %v12021_v59 = vpop.permute.xlu0 %4582 }
 0x465   :  { %15451 = vst [vmem:[#allocation114_spill] sm:$0xff] %v12021_v59  ;;  %5142 = vperm.xlu0 %6190, %v4008_v21   ;;  %v3772_v59 = vld [vmem:[%s13781_s3 + $0x178] sm:$0xff]  ;;  %v3765_v21 = vld [vmem:[%s13781_s3 + $0x140] sm:$0xff] }
 0x466   :  { %v4012_v36 = vsub.f32 %v3772_v59, %v15458_v0  ;;  %v4005_v50 = vsub.f32 %v3765_v21, %v3885_v14  ;;  %v15464_v21 = vld [vmem:[#allocation340_spill] sm:$0xff] }
 0x467   :  { %5107 = vperm.xlu1 %6191, %v4001_v9   ;;  %v12031_v28 = vpop.permute.xlu1 %4547  ;;  %v3889_v6 = vmul.f32 %v11035_v7, %v15464_v21  ;;  %v15470_v21 = vld [vmem:[#allocation269_spill] sm:$0xff] }
 0x468   :  { %15453 = vst [vmem:[#allocation231_spill] sm:$0xff] %v12031_v28  ;;  %v12034_v31 = vpop.permute.xlu0 %4592  ;;  %v15507_v28 = vld [vmem:[#allocation237_spill] sm:$0xff] }
 0x469   :  { %15455 = vst [vmem:[#allocation198_spill] sm:$0xff] %v12034_v31  ;;  %5152 = vperm.xlu0 %6190, %v4010_v62   ;;  %v3774_v31 = vld [vmem:[%s13781_s3 + $0x188] sm:$0xff]  ;;  %v3767_v62 = vld [vmem:[%s13781_s3 + $0x150] sm:$0xff] }
 0x46a   :  { %v4014_v59 = vsub.f32 %v3774_v31, %v15462_v41  ;;  %v4007_v14 = vsub.f32 %v3767_v62, %v3887_v48  ;;  %v15468_v62 = vld [vmem:[#allocation448_spill] sm:$0xff] }
 0x46b   :  { %5117 = vperm.xlu1 %6191, %v4003_v37   ;;  %v12044_v9 = vpop.permute.xlu1 %4557  ;;  %v3891_v7 = vmul.f32 %v15468_v62, %v10944_v53  ;;  %v3773_v62 = vld [vmem:[%s13781_s3 + $0x180] sm:$0xff] }
 0x46c   :  { %15457 = vst [vmem:[#allocation159_spill] sm:$0xff] %v12044_v9  ;;  %v12047_v49 = vpop.permute.xlu0 %4602  ;;  %v15505_v9 = vld [vmem:[#allocation9_spill] sm:$0xff] }
 0x46d   :  { %15459 = vst [vmem:[#allocation366_spill] sm:$0xff] %v12047_v49  ;;  %5162 = vperm.xlu0 %6190, %v4012_v36   ;;  %v3776_v49 = vld [vmem:[%s13781_s3 + $0x198] sm:$0xff]  ;;  %v3769_v36 = vld [vmem:[%s13781_s3 + $0x160] sm:$0xff] }
 0x46e   :  { %v4016_v31 = vsub.f32 %v3776_v49, %v15466_v32  ;;  %v4009_v48 = vsub.f32 %v3769_v36, %v3889_v6  ;;  %v15472_v36 = vld [vmem:[#allocation219_spill] sm:$0xff] }
 0x46f   :  { %5127 = vperm.xlu1 %6191, %v4005_v50   ;;  %v12057_v37 = vpop.permute.xlu1 %4567 }
 0x470   :  { %15461 = vst [vmem:[#allocation394_spill] sm:$0xff] %v12057_v37  ;;  %v12060_v0 = vpop.permute.xlu0 %4612 }
 0x471   :  { %15463 = vst [vmem:[#allocation438_spill] sm:$0xff] %v12060_v0  ;;  %5172 = vperm.xlu0 %6190, %v4014_v59   ;;  %v3778_v0 = vld [vmem:[%s13781_s3 + $0x1a8] sm:$0xff]  ;;  %v3771_v59 = vld [vmem:[%s13781_s3 + $0x170] sm:$0xff] }
 0x472   :  { %v4018_v49 = vsub.f32 %v3778_v0, %v15470_v21  ;;  %v4011_v6 = vsub.f32 %v3771_v59, %v3891_v7  ;;  %v15477_v59 = vld [vmem:[#allocation121_spill] sm:$0xff] }
 0x473   :  { %5137 = vperm.xlu1 %6191, %v4007_v14   ;;  %v12070_v50 = vpop.permute.xlu1 %4577 }
 0x474   :  { %15465 = vst [vmem:[#allocation345_spill] sm:$0xff] %v12070_v50  ;;  %v12073_v41 = vpop.permute.xlu0 %4622 }
 0x475   :  { %15467 = vst [vmem:[#allocation399_spill] sm:$0xff] %v12073_v41  ;;  %5182 = vperm.xlu0 %6190, %v4016_v31   ;;  %v3780_v41 = vld [vmem:[%s13781_s3 + $0x1b8] sm:$0xff]  ;;  %v15473_v31 = vld [vmem:[#allocation310_spill] sm:$0xff] }
 0x476   :  { %v3893_v53 = vmul.f32 %v15473_v31, %v15472_v36  ;;  %v3775_v31 = vld [vmem:[%s13781_s3 + $0x190] sm:$0xff] }
 0x477   :  { %5147 = vperm.xlu1 %6191, %v4009_v48   ;;  %v12083_v14 = vpop.permute.xlu1 %4587 }
 0x478   :  { %15469 = vst [vmem:[#allocation220_spill] sm:$0xff] %v12083_v14  ;;  %v12086_v32 = vpop.permute.xlu0 %4632  ;;  %v15475_v14 = vld [vmem:[#allocation318_spill] sm:$0xff]  ;;  %v4013_v7 = vsub.f32 %v3773_v62, %v3893_v53  ;;  %v15482_v62 = vld [vmem:[#allocation272_spill] sm:$0xff] }
 0x479   :  { %15471 = vst [vmem:[#allocation363_spill] sm:$0xff] %v12086_v32  ;;  %5192 = vperm.xlu0 %6190, %v4018_v49   ;;  %v4020_v0 = vsub.f32 %v3780_v41, %v15475_v14  ;;  %v3782_v32 = vld [vmem:[%s13781_s3 + $0x1c8] sm:$0xff]  ;;  %v15478_v49 = vld [vmem:[#allocation456_spill] sm:$0xff] }
 0x47a   :  { %v3895_v36 = vmul.f32 %v15478_v49, %v15477_v59  ;;  %v3777_v49 = vld [vmem:[%s13781_s3 + $0x1a0] sm:$0xff] }
 0x47b   :  { %5157 = vperm.xlu1 %6191, %v4011_v6   ;;  %v12096_v48 = vpop.permute.xlu1 %4597 }
 0x47c   :  { %15474 = vst [vmem:[#allocation288_spill] sm:$0xff] %v12096_v48  ;;  %v12099_v21 = vpop.permute.xlu0 %4642  ;;  %v15480_v48 = vld [vmem:[#allocation176_spill] sm:$0xff]  ;;  %v4015_v53 = vsub.f32 %v3775_v31, %v3895_v36  ;;  %v3786_v36 = vld [vmem:[%s13781_s3 + $0x1e8] sm:$0xff] }
 0x47d   :  { %15476 = vst [vmem:[#allocation233_spill] sm:$0xff] %v12099_v21  ;;  %5202 = vperm.xlu0 %6190, %v4020_v0   ;;  %v4022_v41 = vsub.f32 %v3782_v32, %v15480_v48  ;;  %v3784_v21 = vld [vmem:[%s13781_s3 + $0x1d8] sm:$0xff] }
 0x47e   :  { %v15483_v0 = vld [vmem:[#allocation377_spill] sm:$0xff] }
 0x47f   :  { %5167 = vperm.xlu1 %6191, %v4013_v7   ;;  %v12109_v6 = vpop.permute.xlu1 %4607  ;;  %v3897_v59 = vmul.f32 %v15483_v0, %v15482_v62  ;;  %v15486_v48 = vld [vmem:[#allocation169_spill] sm:$0xff] }
 0x480   :  { %15479 = vst [vmem:[#allocation383_spill] sm:$0xff] %v12109_v6  ;;  %v12112_v14 = vpop.permute.xlu0 %4652  ;;  %v15485_v6 = vld [vmem:[#allocation373_spill] sm:$0xff] }
 0x481   :  { %15481 = vst [vmem:[#allocation410_spill] sm:$0xff] %v12112_v14  ;;  %5212 = vperm.xlu0 %6190, %v4022_v41   ;;  %v4024_v32 = vsub.f32 %v3784_v21, %v15485_v6  ;;  %v15487_v14 = vld [vmem:[#allocation223_spill] sm:$0xff]  ;;  %v4017_v31 = vsub.f32 %v3777_v49, %v3897_v59  ;;  %v15489_v41 = vld [vmem:[#allocation146_spill] sm:$0xff]  ;;  %v15490_v62 = vld [vmem:[#allocation253_spill] sm:$0xff] }
 0x482   :  { %v3906_v50 = vmul.f32 %v15487_v14, %v15486_v48  ;;  %v3899_v0 = vmul.f32 %v15490_v62, %v15489_v41  ;;  %v15492_v14 = vld [vmem:[#allocation196_spill] sm:$0xff]  ;;  %v15493_v48 = vld [vmem:[#allocation349_spill] sm:$0xff]  ;;  %v15496_v41 = vld [vmem:[#allocation407_spill] sm:$0xff] }
 0x483   :  { %5177 = vperm.xlu1 %6191, %v4015_v53   ;;  %v12122_v7 = vpop.permute.xlu1 %4617  ;;  %v3779_v53 = vld [vmem:[%s13781_s3 + $0x1b0] sm:$0xff]  ;;  %v3788_v59 = vld [vmem:[%s13781_s3 + $0x1f8] sm:$0xff] }
 0x484   :  { %15484 = vst [vmem:[#allocation103_spill] sm:$0xff] %v12122_v7  ;;  %v12127_v37 = vpop.permute.xlu0 %4662  ;;  %v4026_v6 = vsub.f32 %v3786_v36, %v3906_v50  ;;  %v4019_v49 = vsub.f32 %v3779_v53, %v3899_v0  ;;  %v3790_v0 = vld [vmem:[%s13781_s3 + $0x208] sm:$0xff] }
 0x485   :  { %15488 = vst [vmem:[#allocation235_spill] sm:$0xff] %v12127_v37  ;;  %5222 = vperm.xlu0 %6190, %v4024_v32   ;;  %v3908_v37 = vmul.f32 %v15493_v48, %v15492_v14  ;;  %v15495_v32 = vld [vmem:[#allocation452_spill] sm:$0xff]  ;;  %v15498_v14 = vld [vmem:[#allocation217_spill] sm:$0xff] }
 0x486   :  { %v3901_v62 = vmul.f32 %v15496_v41, %v15495_v32  ;;  %v15499_v48 = vld [vmem:[#allocation369_spill] sm:$0xff]  ;;  %v15502_v32 = vld [vmem:[#allocation424_spill] sm:$0xff] }
 0x487   :  { %5187 = vperm.xlu1 %6191, %v4017_v31   ;;  %v12137_v21 = vpop.permute.xlu1 %4627  ;;  %v3781_v31 = vld [vmem:[%s13781_s3 + $0x1c0] sm:$0xff]  ;;  %v4028_v36 = vsub.f32 %v3788_v59, %v3908_v37  ;;  %v15504_v37 = vld [vmem:[#allocation445_spill] sm:$0xff] }
 0x488   :  { %15491 = vst [vmem:[#allocation409_spill] sm:$0xff] %v12137_v21  ;;  %v12141_v7 = vpop.permute.xlu0 %4672  ;;  %v4021_v53 = vsub.f32 %v3781_v31, %v3901_v62 }
 0x489   :  { %15494 = vst [vmem:[#allocation421_spill] sm:$0xff] %v12141_v7  ;;  %5232 = vperm.xlu0 %6190, %v4026_v6   ;;  %v3910_v7 = vmul.f32 %v15499_v48, %v15498_v14  ;;  %v15501_v6 = vld [vmem:[#allocation331_spill] sm:$0xff]  ;;  %v4688_v14 = vmul.f32 %v15504_v37, %v15505_v9  ;;  %v3785_v9 = vld [vmem:[%s13781_s3 + $0x1e0] sm:$0xff] }
 0x48a   :  { %v3903_v41 = vmul.f32 %v15502_v32, %v15501_v6  ;;  %v3792_v6 = vld [vmem:[%s13781_s3 + $0x218] sm:$0xff] }
 0x48b   :  { %5197 = vperm.xlu1 %6191, %v4019_v49   ;;  %v12151_v50 = vpop.permute.xlu1 %4637  ;;  %v3783_v49 = vld [vmem:[%s13781_s3 + $0x1d0] sm:$0xff] }
 0x48c   :  { %15497 = vst [vmem:[#allocation177_spill] sm:$0xff] %v12151_v50  ;;  %v12155_v21 = vpop.permute.xlu0 %4682  ;;  %v15503_v50 = vld [vmem:[#allocation6_spill] sm:$0xff]  ;;  %v4023_v22 = vsub.f32 %v3783_v49, %v3903_v41  ;;  %v15515_v41 = vld [vmem:[#allocation256_spill] sm:$0xff] }
 0x48d   :  { %15500 = vst [vmem:[#allocation254_spill] sm:$0xff] %v12155_v21  ;;  %5242 = vperm.xlu0 %6190, %v4028_v36   ;;  %v4687_v59 = vmul.f32 %v15504_v37, %v15503_v50  ;;  %v4030_v21 = vsub.f32 %v3790_v0, %v3910_v7  ;;  %v15508_v36 = vld [vmem:[#allocation126_spill] sm:$0xff]  ;;  %v15509_v50 = vld [vmem:[#allocation171_spill] sm:$0xff] }
 0x48e   :  { %v3912_v62 = vmul.f32 %v15508_v36, %v15507_v28  ;;  %v3905_v35 = vmul.f32 %v15510_v57, %v15509_v50  ;;  %v15511_v7 = vld [vmem:[#allocation14_spill] sm:$0xff]  ;;  %v15513_v28 = vld [vmem:[#allocation16_spill] sm:$0xff]  ;;  %v3794_v36 = vld [vmem:[%s13781_s3 + $0x228] sm:$0xff] }
 0x48f   :  { %5207 = vperm.xlu1 %6191, %v4021_v53   ;;  %v12169_v48 = vpop.permute.xlu1 %4647  ;;  %v15512_v0 = vld [vmem:[#allocation378_spill] sm:$0xff] }
 0x490   :  { %15506 = vst [vmem:[#allocation434_spill] sm:$0xff] %v12169_v48  ;;  %v4933_v31 = vpop.permute.xlu0 %4932  ;;  %v4691_v53 = vmul.f32 %v15512_v0, %v15511_v7  ;;  %v4692_v37 = vmul.f32 %v15512_v0, %v15513_v28  ;;  %v15516_v49 = vld [vmem:[#allocation138_spill] sm:$0xff]  ;;  %v15517_v7 = vld [vmem:[#allocation193_spill] sm:$0xff] }
 0x491   :  { %v5527_v32 = vadd.f32 %v4933_v31, %v4687_v59  ;;  %v5528_v58 = vadd.f32 %v4933_v31, %v4688_v14  ;;  %5252 = vperm.xlu0 %6190, %v4030_v21   ;;  %v4032_v21 = vsub.f32 %v3792_v6, %v3912_v62  ;;  %v3914_v59 = vmul.f32 %v15516_v49, %v15515_v41  ;;  %v15518_v0 = vld [vmem:[#allocation442_spill] sm:$0xff]  ;;  %v15521_v41 = vld [vmem:[#allocation24_spill] sm:$0xff] }
 0x492   :  { %v3907_v28 = vmul.f32 %v15518_v0, %v15517_v7  ;;  %v15520_v62 = vld [vmem:[#allocation398_spill] sm:$0xff]  ;;  %v3796_v7 = vld [vmem:[%s13781_s3 + $0x238] sm:$0xff] }
 0x493   :  { %5767 = vst [vmem:[%s13782_s4 + $0x10] sm:$0xff] %v5527_v32  ;;  %5768 = vst.msk [vmem:[%s13782_s4 + $0x18] sm:$0xff] %vm1443_vm1, %v5528_v58  ;;  %5217 = vperm.xlu1 %6191, %v4023_v22   ;;  %v12192_v57 = vpop.permute.xlu1 %4657  ;;  %v4025_v32 = vsub.f32 %v3785_v9, %v3905_v35  ;;  %v3787_v22 = vld [vmem:[%s13781_s3 + $0x1f0] sm:$0xff]  ;;  %v15519_v58 = vld [vmem:[#allocation22_spill] sm:$0xff]  ;;  %v4696_v49 = vmul.f32 %v15520_v62, %v15521_v41  ;;  %v4034_v9 = vsub.f32 %v3794_v36, %v3914_v59 }
 0x494   :  { %15514 = vst [vmem:[#allocation252_spill] sm:$0xff] %v12192_v57  ;;  %v4943_v14 = vpop.permute.xlu0 %4942  ;;  %v4695_v6 = vmul.f32 %v15520_v62, %v15519_v58  ;;  %v15525_v62 = vld [vmem:[#allocation213_spill] sm:$0xff]  ;;  %v15526_v41 = vld [vmem:[#allocation446_spill] sm:$0xff]  ;;  %v15528_v36 = vld [vmem:[#allocation371_spill] sm:$0xff] }
 0x495   :  { %v5531_v31 = vadd.f32 %v4943_v14, %v4691_v53  ;;  %v5532_v50 = vadd.f32 %v4943_v14, %v4692_v37  ;;  %5262 = vperm.xlu0 %6190, %v4032_v21   ;;  %v15523_v53 = vld [vmem:[#allocation276_spill] sm:$0xff]  ;;  %v3909_v57 = vmul.f32 %v15526_v41, %v15525_v62  ;;  %v15527_v59 = vld [vmem:[#allocation30_spill] sm:$0xff]  ;;  %v3798_v62 = vld [vmem:[%s13781_s3 + $0x248] sm:$0xff] }
 0x496   :  { %v15524_v37 = vld [vmem:[#allocation296_spill] sm:$0xff] }
 0x497   :  { %5771 = vst [vmem:[%s13782_s4 + $0x30] sm:$0xff] %v5531_v31  ;;  %5772 = vst.msk [vmem:[%s13782_s4 + $0x38] sm:$0xff] %vm1443_vm1, %v5532_v50  ;;  %5227 = vperm.xlu1 %6191, %v4025_v32   ;;  %v12215_v35 = vpop.permute.xlu1 %4667  ;;  %v3916_v21 = vmul.f32 %v15524_v37, %v15523_v53  ;;  %v4027_v31 = vsub.f32 %v3787_v22, %v3907_v28  ;;  %v3789_v50 = vld [vmem:[%s13781_s3 + $0x200] sm:$0xff]  ;;  %v4699_v32 = vmul.f32 %v15528_v36, %v15527_v59  ;;  %v15529_v53 = vld [vmem:[#allocation32_spill] sm:$0xff] }
 0x498   :  { %15522 = vst [vmem:[#allocation274_spill] sm:$0xff] %v12215_v35  ;;  %v4953_v14 = vpop.permute.xlu0 %4952  ;;  %v4700_v37 = vmul.f32 %v15528_v36, %v15529_v53  ;;  %v15533_v36 = vld [vmem:[#allocation199_spill] sm:$0xff] }
 0x499   :  { %v5535_v0 = vadd.f32 %v4953_v14, %v4695_v6  ;;  %v5536_v58 = vadd.f32 %v4953_v14, %v4696_v49  ;;  %5272 = vperm.xlu0 %6190, %v4034_v9   ;;  %v4036_v22 = vsub.f32 %v3796_v7, %v3916_v21  ;;  %v15531_v6 = vld [vmem:[#allocation292_spill] sm:$0xff]  ;;  %v15532_v49 = vld [vmem:[#allocation317_spill] sm:$0xff]  ;;  %v15534_v53 = vld [vmem:[#allocation451_spill] sm:$0xff] }
 0x49a   :  { %v3918_v9 = vmul.f32 %v15532_v49, %v15531_v6  ;;  %v3911_v35 = vmul.f32 %v15534_v53, %v15533_v36  ;;  %v3791_v7 = vld [vmem:[%s13781_s3 + $0x210] sm:$0xff]  ;;  %v15538_v6 = vld [vmem:[#allocation38_spill] sm:$0xff]  ;;  %v15539_v49 = vld [vmem:[#allocation197_spill] sm:$0xff] }
 0x49b   :  { %5775 = vst [vmem:[%s13782_s4 + $0x50] sm:$0xff] %v5535_v0  ;;  %5776 = vst.msk [vmem:[%s13782_s4 + $0x58] sm:$0xff] %vm1443_vm1, %v5536_v58  ;;  %5237 = vperm.xlu1 %6191, %v4027_v31   ;;  %v12238_v28 = vpop.permute.xlu1 %4677  ;;  %v4029_v0 = vsub.f32 %v3789_v50, %v3909_v57  ;;  %v15535_v58 = vld [vmem:[#allocation2_spill] sm:$0xff]  ;;  %v15536_v31 = vld [vmem:[#allocation175_spill] sm:$0xff]  ;;  %v4703_v18 = vmul.f32 %v15539_v49, %v15538_v6 }
 0x49c   :  { %15530 = vst [vmem:[#allocation437_spill] sm:$0xff] %v12238_v28  ;;  %v4963_v14 = vpop.permute.xlu0 %4962  ;;  %v4685_v48 = vmul.f32 %v15536_v31, %v15535_v58  ;;  %v15537_v28 = vld [vmem:[#allocation4_spill] sm:$0xff]  ;;  %v4038_v50 = vsub.f32 %v3798_v62, %v3918_v9 }
 0x49d   :  { %v5539_v41 = vadd.f32 %v4963_v14, %v4699_v32  ;;  %v5540_v59 = vadd.f32 %v4963_v14, %v4700_v37  ;;  %5282 = vperm.xlu0 %6190, %v4036_v22   ;;  %v4686_v21 = vmul.f32 %v15536_v31, %v15537_v28  ;;  %v15540_v32 = vld [vmem:[#allocation40_spill] sm:$0xff]  ;;  %v15541_v28 = vld [vmem:[#allocation313_spill] sm:$0xff]  ;;  %v15542_v22 = vld [vmem:[#allocation339_spill] sm:$0xff] }
 0x49e   :  { %v4704_v37 = vmul.f32 %v15539_v49, %v15540_v32  ;;  %v3920_v14 = vmul.f32 %v15542_v22, %v15541_v28  ;;  %v3800_v31 = vld [vmem:[%s13781_s3 + $0x258] sm:$0xff]  ;;  %v4031_v49 = vsub.f32 %v3791_v7, %v3911_v35  ;;  %v15547_v62 = vld [vmem:[#allocation12_spill] sm:$0xff] }
 0x49f   :  { %5779 = vst [vmem:[%s13782_s4 + $0x70] sm:$0xff] %v5539_v41  ;;  %5780 = vst.msk [vmem:[%s13782_s4 + $0x78] sm:$0xff] %vm1443_vm1, %v5540_v59  ;;  %5247 = vperm.xlu1 %6191, %v4029_v0   ;;  %v4928_v57 = vpop.permute.xlu1 %4927  ;;  %v15543_v32 = vld [vmem:[#allocation109_spill] sm:$0xff]  ;;  %v15545_v0 = vld [vmem:[#allocation10_spill] sm:$0xff]  ;;  %v4690_v28 = vmul.f32 %v15546_v56, %v15547_v62 }
 0x4a0   :  { %v5525_v36 = vadd.f32 %v4928_v57, %v4685_v48  ;;  %v5526_v53 = vadd.f32 %v4928_v57, %v4686_v21  ;;  %v4973_v58 = vpop.permute.xlu0 %4972  ;;  %v3913_v59 = vmul.f32 %v15544_v34, %v15543_v32  ;;  %v4689_v9 = vmul.f32 %v15546_v56, %v15545_v0  ;;  %v15548_v34 = vld [vmem:[#allocation46_spill] sm:$0xff]  ;;  %v15549_v48 = vld [vmem:[#allocation216_spill] sm:$0xff]  ;;  %v15551_v57 = vld [vmem:[#allocation335_spill] sm:$0xff] }
 0x4a1   :  { %v5543_v6 = vadd.f32 %v4973_v58, %v4703_v18  ;;  %v5544_v41 = vadd.f32 %v4973_v58, %v4704_v37  ;;  %5292 = vperm.xlu0 %6190, %v4038_v50   ;;  %v3793_v18 = vld [vmem:[%s13781_s3 + $0x220] sm:$0xff]  ;;  %v4707_v35 = vmul.f32 %v15549_v48, %v15548_v34  ;;  %v15550_v21 = vld [vmem:[#allocation48_spill] sm:$0xff]  ;;  %v4040_v37 = vsub.f32 %v3800_v31, %v3920_v14  ;;  %v3802_v32 = vld [vmem:[%s13781_s3 + $0x268] sm:$0xff] }
 0x4a2   :  { %5765 = vst [vmem:[%s13782_s4] sm:$0xff] %v5525_v36  ;;  %5766 = vst.msk [vmem:[%s13782_s4 + $0x8] sm:$0xff] %vm1443_vm1, %v5526_v53  ;;  %v4708_v7 = vmul.f32 %v15549_v48, %v15550_v21  ;;  %v15552_v50 = vld [vmem:[#allocation102_spill] sm:$0xff]  ;;  %v4033_v62 = vsub.f32 %v3793_v18, %v3913_v59  ;;  %v15553_v34 = vld [vmem:[#allocation265_spill] sm:$0xff] }
 0x4a3   :  { %5783 = vst [vmem:[%s13782_s4 + $0x90] sm:$0xff] %v5543_v6  ;;  %5784 = vst.msk [vmem:[%s13782_s4 + $0x98] sm:$0xff] %vm1443_vm1, %v5544_v41  ;;  %5257 = vperm.xlu1 %6191, %v4031_v49   ;;  %v4938_v56 = vpop.permute.xlu1 %4937  ;;  %v3922_v22 = vmul.f32 %v15552_v50, %v15551_v57  ;;  %v15554_v48 = vld [vmem:[#allocation358_spill] sm:$0xff]  ;;  %v15557_v31 = vld [vmem:[#allocation20_spill] sm:$0xff] }
 0x4a4   :  { %v5529_v36 = vadd.f32 %v4938_v56, %v4689_v9  ;;  %v5530_v53 = vadd.f32 %v4938_v56, %v4690_v28  ;;  %v4983_v58 = vpop.permute.xlu0 %4982  ;;  %v3915_v41 = vmul.f32 %v15554_v48, %v15553_v34  ;;  %v15555_v49 = vld [vmem:[#allocation18_spill] sm:$0xff]  ;;  %v3795_v59 = vld [vmem:[%s13781_s3 + $0x230] sm:$0xff] }
 0x4a5   :  { %v5547_v0 = vadd.f32 %v4983_v58, %v4707_v35  ;;  %v5548_v6 = vadd.f32 %v4983_v58, %v4708_v7  ;;  %5302 = vperm.xlu0 %6190, %v4040_v37   ;;  %v15556_v21 = vld [vmem:[#allocation390_spill] sm:$0xff]  ;;  %v15559_v28 = vld [vmem:[#allocation440_spill] sm:$0xff]  ;;  %v4042_v37 = vsub.f32 %v3802_v32, %v3922_v22 }
 0x4a6   :  { %v4693_v14 = vmul.f32 %v15556_v21, %v15555_v49  ;;  %v4694_v57 = vmul.f32 %v15556_v21, %v15557_v31  ;;  %5769 = vst [vmem:[%s13782_s4 + $0x20] sm:$0xff] %v5529_v36  ;;  %5770 = vst.msk [vmem:[%s13782_s4 + $0x28] sm:$0xff] %vm1443_vm1, %v5530_v53  ;;  %v15558_v9 = vld [vmem:[#allocation54_spill] sm:$0xff]  ;;  %v15560_v35 = vld [vmem:[#allocation56_spill] sm:$0xff]  ;;  %v4035_v31 = vsub.f32 %v3795_v59, %v3915_v41 }
 0x4a7   :  { %v4711_v18 = vmul.f32 %v15559_v28, %v15558_v9  ;;  %v4712_v7 = vmul.f32 %v15559_v28, %v15560_v35  ;;  %5787 = vst [vmem:[%s13782_s4 + $0xb0] sm:$0xff] %v5547_v0  ;;  %5788 = vst.msk [vmem:[%s13782_s4 + $0xb8] sm:$0xff] %vm1443_vm1, %v5548_v6  ;;  %5267 = vperm.xlu1 %6191, %v4033_v62   ;;  %v4948_v56 = vpop.permute.xlu1 %4947  ;;  %v15561_v50 = vld [vmem:[#allocation350_spill] sm:$0xff]  ;;  %v15562_v36 = vld [vmem:[#allocation389_spill] sm:$0xff] }
 0x4a8   :  { %v3924_v53 = vmul.f32 %v15562_v36, %v15561_v50  ;;  %v5533_v58 = vadd.f32 %v4948_v56, %v4693_v14  ;;  %v5534_v34 = vadd.f32 %v4948_v56, %v4694_v57  ;;  %v4993_v48 = vpop.permute.xlu0 %4992  ;;  %v3804_v49 = vld [vmem:[%s13781_s3 + $0x278] sm:$0xff]  ;;  %v15563_v9 = vld [vmem:[#allocation140_spill] sm:$0xff]  ;;  %v15565_v62 = vld [vmem:[#allocation26_spill] sm:$0xff] }
 0x4a9   :  { %v5551_v21 = vadd.f32 %v4993_v48, %v4711_v18  ;;  %v5552_v0 = vadd.f32 %v4993_v48, %v4712_v7  ;;  %5312 = vperm.xlu0 %6190, %v4042_v37   ;;  %v15564_v28 = vld [vmem:[#allocation457_spill] sm:$0xff]  ;;  %v15566_v35 = vld [vmem:[#allocation351_spill] sm:$0xff]  ;;  %v15567_v32 = vld [vmem:[#allocation28_spill] sm:$0xff] }
 0x4aa   :  { %v3917_v6 = vmul.f32 %v15564_v28, %v15563_v9  ;;  %v4697_v22 = vmul.f32 %v15566_v35, %v15565_v62  ;;  %v4698_v50 = vmul.f32 %v15566_v35, %v15567_v32  ;;  %5773 = vst [vmem:[%s13782_s4 + $0x40] sm:$0xff] %v5533_v58  ;;  %5774 = vst.msk [vmem:[%s13782_s4 + $0x48] sm:$0xff] %vm1443_vm1, %v5534_v34  ;;  %v3797_v41 = vld [vmem:[%s13781_s3 + $0x240] sm:$0xff]  ;;  %v15569_v57 = vld [vmem:[#allocation441_spill] sm:$0xff] }
 0x4ab   :  { %v15568_v14 = vld [vmem:[#allocation62_spill] sm:$0xff]  ;;  %v15570_v18 = vld [vmem:[#allocation64_spill] sm:$0xff]  ;;  %5791 = vst [vmem:[%s13782_s4 + $0xd0] sm:$0xff] %v5551_v21  ;;  %5792 = vst.msk [vmem:[%s13782_s4 + $0xd8] sm:$0xff] %vm1443_vm1, %v5552_v0  ;;  %5277 = vperm.xlu1 %6191, %v4035_v31   ;;  %v4958_v56 = vpop.permute.xlu1 %4957  ;;  %v4044_v37 = vsub.f32 %v3804_v49, %v3924_v53 }
 0x4ac   :  { %v4715_v59 = vmul.f32 %v15569_v57, %v15568_v14  ;;  %v4716_v7 = vmul.f32 %v15569_v57, %v15570_v18  ;;  %v15571_v36 = vld [vmem:[#allocation370_spill] sm:$0xff]  ;;  %v15572_v58 = vld [vmem:[#allocation397_spill] sm:$0xff]  ;;  %v5537_v48 = vadd.f32 %v4958_v56, %v4697_v22  ;;  %v5538_v9 = vadd.f32 %v4958_v56, %v4698_v50  ;;  %v5003_v28 = vpop.permute.xlu0 %5002  ;;  %v3806_v62 = vld [vmem:[%s13781_s3 + $0x288] sm:$0xff] }
 0x4ad   :  { %v3926_v34 = vmul.f32 %v15572_v58, %v15571_v36  ;;  %5322 = vperm.xlu0 %6190, %v4044_v37   ;;  %v4037_v32 = vsub.f32 %v3797_v41, %v3917_v6  ;;  %v15573_v14 = vld [vmem:[#allocation302_spill] sm:$0xff]  ;;  %v15574_v57 = vld [vmem:[#allocation133_spill] sm:$0xff]  ;;  %v15576_v18 = vld [vmem:[#allocation164_spill] sm:$0xff] }
 0x4ae   :  { %v5555_v35 = vadd.f32 %v5003_v28, %v4715_v59  ;;  %v5556_v21 = vadd.f32 %v5003_v28, %v4716_v7  ;;  %v3919_v0 = vmul.f32 %v15574_v57, %v15573_v14  ;;  %v15575_v31 = vld [vmem:[#allocation34_spill] sm:$0xff]  ;;  %v15577_v49 = vld [vmem:[#allocation36_spill] sm:$0xff]  ;;  %5777 = vst [vmem:[%s13782_s4 + $0x60] sm:$0xff] %v5537_v48  ;;  %5778 = vst.msk [vmem:[%s13782_s4 + $0x68] sm:$0xff] %vm1443_vm1, %v5538_v9 }
 0x4af   :  { %v4701_v53 = vmul.f32 %v15576_v18, %v15575_v31  ;;  %v4702_v36 = vmul.f32 %v15576_v18, %v15577_v49  ;;  %v3799_v6 = vld [vmem:[%s13781_s3 + $0x250] sm:$0xff]  ;;  %v15578_v22 = vld [vmem:[#allocation70_spill] sm:$0xff]  ;;  %v15579_v50 = vld [vmem:[#allocation443_spill] sm:$0xff]  ;;  %5287 = vperm.xlu1 %6191, %v4037_v32   ;;  %v4968_v56 = vpop.permute.xlu1 %4967  ;;  %v4046_v37 = vsub.f32 %v3806_v62, %v3926_v34 }
 0x4b0   :  { %v4719_v41 = vmul.f32 %v15579_v50, %v15578_v22  ;;  %v15580_v59 = vld [vmem:[#allocation72_spill] sm:$0xff]  ;;  %5795 = vst [vmem:[%s13782_s4 + $0xf0] sm:$0xff] %v5555_v35  ;;  %5796 = vst.msk [vmem:[%s13782_s4 + $0xf8] sm:$0xff] %vm1443_vm1, %v5556_v21  ;;  %v15582_v48 = vld [vmem:[#allocation418_spill] sm:$0xff]  ;;  %v5013_v57 = vpop.permute.xlu0 %5012  ;;  %v4039_v49 = vsub.f32 %v3799_v6, %v3919_v0 }
 0x4b1   :  { %v4720_v7 = vmul.f32 %v15579_v50, %v15580_v59  ;;  %v15581_v58 = vld [vmem:[#allocation388_spill] sm:$0xff]  ;;  %v5541_v28 = vadd.f32 %v4968_v56, %v4701_v53  ;;  %v5542_v14 = vadd.f32 %v4968_v56, %v4702_v36  ;;  %v3808_v31 = vld [vmem:[%s13781_s3 + $0x298] sm:$0xff]  ;;  %5332 = vperm.xlu0 %6190, %v4046_v37   ;;  %v15584_v50 = vld [vmem:[#allocation395_spill] sm:$0xff] }
 0x4b2   :  { %v3928_v9 = vmul.f32 %v15582_v48, %v15581_v58  ;;  %v5559_v18 = vadd.f32 %v5013_v57, %v4719_v41  ;;  %v15583_v22 = vld [vmem:[#allocation156_spill] sm:$0xff]  ;;  %v15585_v32 = vld [vmem:[#allocation42_spill] sm:$0xff]  ;;  %v15586_v59 = vld [vmem:[#allocation419_spill] sm:$0xff] }
 0x4b3   :  { %v5560_v35 = vadd.f32 %v5013_v57, %v4720_v7  ;;  %v3921_v21 = vmul.f32 %v15584_v50, %v15583_v22  ;;  %v4705_v34 = vmul.f32 %v15586_v59, %v15585_v32  ;;  %v15587_v62 = vld [vmem:[#allocation44_spill] sm:$0xff]  ;;  %5781 = vst [vmem:[%s13782_s4 + $0x80] sm:$0xff] %v5541_v28  ;;  %5782 = vst.msk [vmem:[%s13782_s4 + $0x88] sm:$0xff] %vm1443_vm1, %v5542_v14  ;;  %v3801_v0 = vld [vmem:[%s13781_s3 + $0x260] sm:$0xff]  ;;  %5297 = vperm.xlu1 %6191, %v4039_v49   ;;  %v4978_v56 = vpop.permute.xlu1 %4977 }
 0x4b4   :  { %v4706_v58 = vmul.f32 %v15586_v59, %v15587_v62  ;;  %v15588_v53 = vld [vmem:[#allocation78_spill] sm:$0xff]  ;;  %v15589_v36 = vld [vmem:[#allocation444_spill] sm:$0xff]  ;;  %5799 = vst [vmem:[%s13782_s4 + $0x110] sm:$0xff] %v5559_v18  ;;  %v4048_v37 = vsub.f32 %v3808_v31, %v3928_v9  ;;  %v5023_v50 = vpop.permute.xlu0 %5022  ;;  %v3810_v32 = vld [vmem:[%s13781_s3 + $0x2a8] sm:$0xff] }
 0x4b5   :  { %v4723_v6 = vmul.f32 %v15589_v36, %v15588_v53  ;;  %v15590_v41 = vld [vmem:[#allocation80_spill] sm:$0xff]  ;;  %5800 = vst.msk [vmem:[%s13782_s4 + $0x118] sm:$0xff] %vm1443_vm1, %v5560_v35  ;;  %v15592_v28 = vld [vmem:[#allocation426_spill] sm:$0xff]  ;;  %v5545_v57 = vadd.f32 %v4978_v56, %v4705_v34  ;;  %v4041_v62 = vsub.f32 %v3801_v0, %v3921_v21  ;;  %v15593_v53 = vld [vmem:[#allocation191_spill] sm:$0xff] }
 0x4b6   :  { %v4724_v7 = vmul.f32 %v15589_v36, %v15590_v41  ;;  %v15591_v48 = vld [vmem:[#allocation396_spill] sm:$0xff]  ;;  %v5546_v22 = vadd.f32 %v4978_v56, %v4706_v58  ;;  %5342 = vperm.xlu0 %6190, %v4048_v37   ;;  %v15595_v49 = vld [vmem:[#allocation50_spill] sm:$0xff]  ;;  %v15599_v58 = vld [vmem:[#allocation447_spill] sm:$0xff] }
 0x4b7   :  { %v3930_v14 = vmul.f32 %v15592_v28, %v15591_v48  ;;  %v5563_v59 = vadd.f32 %v5023_v50, %v4723_v6  ;;  %v15594_v36 = vld [vmem:[#allocation428_spill] sm:$0xff]  ;;  %5785 = vst [vmem:[%s13782_s4 + $0xa0] sm:$0xff] %v5545_v57  ;;  %v15598_v34 = vld [vmem:[#allocation86_spill] sm:$0xff]  ;;  %5307 = vperm.xlu1 %6191, %v4041_v62   ;;  %v4988_v56 = vpop.permute.xlu1 %4987  ;;  %v15601_v28 = vld [vmem:[#allocation401_spill] sm:$0xff] }
 0x4b8   :  { %v5564_v18 = vadd.f32 %v5023_v50, %v4724_v7  ;;  %v3923_v35 = vmul.f32 %v15594_v36, %v15593_v53  ;;  %v15596_v41 = vld [vmem:[#allocation400_spill] sm:$0xff]  ;;  %5786 = vst.msk [vmem:[%s13782_s4 + $0xa8] sm:$0xff] %vm1443_vm1, %v5546_v22  ;;  %v4727_v0 = vmul.f32 %v15599_v58, %v15598_v34  ;;  %v15602_v57 = vld [vmem:[#allocation195_spill] sm:$0xff]  ;;  %v5033_v36 = vpop.permute.xlu0 %5032  ;;  %v15605_v62 = vld [vmem:[#allocation58_spill] sm:$0xff] }
 0x4b9   :  { %v4709_v9 = vmul.f32 %v15596_v41, %v15595_v49  ;;  %v15597_v31 = vld [vmem:[#allocation52_spill] sm:$0xff]  ;;  %5803 = vst [vmem:[%s13782_s4 + $0x130] sm:$0xff] %v5563_v59  ;;  %v4050_v37 = vsub.f32 %v3810_v32, %v3930_v14  ;;  %v3932_v22 = vmul.f32 %v15602_v57, %v15601_v28  ;;  %v3812_v49 = vld [vmem:[%s13781_s3 + $0x2b8] sm:$0xff]  ;;  %v15603_v34 = vld [vmem:[#allocation367_spill] sm:$0xff] }
 0x4ba   :  { %v4710_v48 = vmul.f32 %v15596_v41, %v15597_v31  ;;  %v3803_v21 = vld [vmem:[%s13781_s3 + $0x270] sm:$0xff]  ;;  %5804 = vst.msk [vmem:[%s13782_s4 + $0x138] sm:$0xff] %vm1443_vm1, %v5564_v18  ;;  %v5567_v41 = vadd.f32 %v5033_v36, %v4727_v0 }
 0x4bb   :  { %v15600_v6 = vld [vmem:[#allocation88_spill] sm:$0xff]  ;;  %v5549_v50 = vadd.f32 %v4988_v56, %v4709_v9  ;;  %5352 = vperm.xlu0 %6190, %v4050_v37   ;;  %v4043_v31 = vsub.f32 %v3803_v21, %v3923_v35  ;;  %v3805_v35 = vld [vmem:[%s13781_s3 + $0x280] sm:$0xff]  ;;  %v4052_v37 = vsub.f32 %v3812_v49, %v3932_v22 }
 0x4bc   :  { %v4728_v7 = vmul.f32 %v15599_v58, %v15600_v6  ;;  %v5550_v53 = vadd.f32 %v4988_v56, %v4710_v48  ;;  %v15604_v58 = vld [vmem:[#allocation172_spill] sm:$0xff]  ;;  %v15606_v6 = vld [vmem:[#allocation186_spill] sm:$0xff]  ;;  %5807 = vst [vmem:[%s13782_s4 + $0x150] sm:$0xff] %v5567_v41  ;;  %v4998_v56 = vpop.permute.xlu1 %4997 }
 0x4bd   :  { %v3925_v18 = vmul.f32 %v15604_v58, %v15603_v34  ;;  %v4713_v14 = vmul.f32 %v15606_v6, %v15605_v62  ;;  %v15607_v32 = vld [vmem:[#allocation60_spill] sm:$0xff]  ;;  %5789 = vst [vmem:[%s13782_s4 + $0xc0] sm:$0xff] %v5549_v50  ;;  %v15608_v9 = vld [vmem:[#allocation94_spill] sm:$0xff]  ;;  %5317 = vperm.xlu1 %6191, %v4043_v31   ;;  %v5043_v34 = vpop.permute.xlu0 %5042  ;;  %v3814_v58 = vld [vmem:[%s13781_s3 + $0x2c8] sm:$0xff] }
 0x4be   :  { %v5568_v59 = vadd.f32 %v5033_v36, %v4728_v7  ;;  %v4714_v28 = vmul.f32 %v15606_v6, %v15607_v32  ;;  %5790 = vst.msk [vmem:[%s13782_s4 + $0xc8] sm:$0xff] %vm1443_vm1, %v5550_v53  ;;  %v15609_v48 = vld [vmem:[#allocation450_spill] sm:$0xff]  ;;  %v15610_v0 = vld [vmem:[#allocation96_spill] sm:$0xff] }
 0x4bf   :  { %v4731_v21 = vmul.f32 %v15609_v48, %v15608_v9  ;;  %v4732_v7 = vmul.f32 %v15609_v48, %v15610_v0  ;;  %v15611_v57 = vld [vmem:[#allocation404_spill] sm:$0xff]  ;;  %v5553_v53 = vadd.f32 %v4998_v56, %v4713_v14  ;;  %5362 = vperm.xlu0 %6190, %v4052_v37   ;;  %v4045_v6 = vsub.f32 %v3805_v35, %v3925_v18  ;;  %v15612_v32 = vld [vmem:[#allocation386_spill] sm:$0xff]  ;;  %v15617_v14 = vld [vmem:[#allocation453_spill] sm:$0xff] }
 0x4c0   :  { %5808 = vst.msk [vmem:[%s13782_s4 + $0x158] sm:$0xff] %vm1443_vm1, %v5568_v59  ;;  %v3934_v50 = vmul.f32 %v11367_v38, %v15611_v57  ;;  %v5554_v36 = vadd.f32 %v4998_v56, %v4714_v28  ;;  %v3927_v59 = vmul.f32 %v11382_v11, %v15612_v32  ;;  %v15613_v31 = vld [vmem:[#allocation66_spill] sm:$0xff]  ;;  %v15615_v49 = vld [vmem:[#allocation68_spill] sm:$0xff]  ;;  %v15618_v35 = vld [vmem:[#allocation107_spill] sm:$0xff] }
 0x4c1   :  { %v5571_v62 = vadd.f32 %v5043_v34, %v4731_v21  ;;  %v5572_v41 = vadd.f32 %v5043_v34, %v4732_v7  ;;  %v15614_v9 = vld [vmem:[#allocation346_spill] sm:$0xff]  ;;  %5793 = vst [vmem:[%s13782_s4 + $0xe0] sm:$0xff] %v5553_v53  ;;  %v3807_v18 = vld [vmem:[%s13781_s3 + $0x290] sm:$0xff]  ;;  %v4736_v48 = vmul.f32 %v15617_v14, %v15618_v35  ;;  %5327 = vperm.xlu1 %6191, %v4045_v6   ;;  %v5008_v21 = vpop.permute.xlu1 %5007  ;;  %v5053_v53 = vpop.permute.xlu0 %5052 }
 0x4c2   :  { %v4717_v22 = vmul.f32 %v15614_v9, %v15613_v31  ;;  %v4718_v38 = vmul.f32 %v15614_v9, %v15615_v49  ;;  %5794 = vst.msk [vmem:[%s13782_s4 + $0xe8] sm:$0xff] %vm1443_vm1, %v5554_v36  ;;  %v15616_v11 = vld [vmem:[#allocation104_spill] sm:$0xff]  ;;  %v4054_v0 = vsub.f32 %v3814_v58, %v3934_v50  ;;  %v15619_v7 = vld [vmem:[#allocation414_spill] sm:$0xff]  ;;  %v3816_v36 = vld [vmem:[%s13781_s3 + $0x2d8] sm:$0xff]  ;;  %v4047_v32 = vsub.f32 %v3807_v18, %v3927_v59 }
 0x4c3   :  { %v4735_v28 = vmul.f32 %v15617_v14, %v15616_v11  ;;  %5811 = vst [vmem:[%s13782_s4 + $0x170] sm:$0xff] %v5571_v62  ;;  %5812 = vst.msk [vmem:[%s13782_s4 + $0x178] sm:$0xff] %vm1443_vm1, %v5572_v41  ;;  %v3936_v56 = vmul.f32 %v11395_v10, %v15619_v7  ;;  %v5576_v62 = vadd.f32 %v5053_v53, %v4736_v48  ;;  %v15620_v31 = vld [vmem:[#allocation250_spill] sm:$0xff]  ;;  %v15621_v9 = vld [vmem:[#allocation293_spill] sm:$0xff] }
 0x4c4   :  { %v5557_v37 = vadd.f32 %v5008_v21, %v4717_v22  ;;  %v5558_v57 = vadd.f32 %v5008_v21, %v4718_v38  ;;  %5372 = vperm.xlu0 %6190, %v4054_v0   ;;  %v3929_v41 = vmul.f32 %v15621_v9, %v15620_v31  ;;  %v15622_v6 = vld [vmem:[#allocation74_spill] sm:$0xff]  ;;  %v15624_v58 = vld [vmem:[#allocation76_spill] sm:$0xff]  ;;  %v15625_v22 = vld [vmem:[#allocation117_spill] sm:$0xff] }
 0x4c5   :  { %v5575_v34 = vadd.f32 %v5053_v53, %v4735_v28  ;;  %v15623_v49 = vld [vmem:[#allocation330_spill] sm:$0xff]  ;;  %v15626_v38 = vld [vmem:[#allocation455_spill] sm:$0xff]  ;;  %5816 = vst.msk [vmem:[%s13782_s4 + $0x198] sm:$0xff] %vm1443_vm1, %v5576_v62  ;;  %5337 = vperm.xlu1 %6191, %v4047_v32   ;;  %v5018_v28 = vpop.permute.xlu1 %5017  ;;  %v4056_v35 = vsub.f32 %v3816_v36, %v3936_v56  ;;  %v15628_v48 = vld [vmem:[#allocation273_spill] sm:$0xff] }
 0x4c6   :  { %v4721_v50 = vmul.f32 %v15623_v49, %v15622_v6  ;;  %v4722_v10 = vmul.f32 %v15623_v49, %v15624_v58  ;;  %5797 = vst [vmem:[%s13782_s4 + $0x100] sm:$0xff] %v5557_v37  ;;  %5798 = vst.msk [vmem:[%s13782_s4 + $0x108] sm:$0xff] %vm1443_vm1, %v5558_v57  ;;  %v3809_v59 = vld [vmem:[%s13781_s3 + $0x2a0] sm:$0xff]  ;;  %v4739_v18 = vmul.f32 %v15626_v38, %v15625_v22  ;;  %v15627_v11 = vld [vmem:[#allocation119_spill] sm:$0xff]  ;;  %v5063_v37 = vpop.permute.xlu0 %5062 }
 0x4c7   :  { %v4740_v14 = vmul.f32 %v15626_v38, %v15627_v11  ;;  %5815 = vst [vmem:[%s13782_s4 + $0x190] sm:$0xff] %v5575_v34  ;;  %v3938_v21 = vmul.f32 %v11424_v55, %v15628_v48  ;;  %v3818_v57 = vld [vmem:[%s13781_s3 + $0x2e8] sm:$0xff]  ;;  %v4049_v31 = vsub.f32 %v3809_v59, %v3929_v41  ;;  %v15629_v9 = vld [vmem:[#allocation122_spill] sm:$0xff]  ;;  %v15632_v36 = vld [vmem:[#allocation84_spill] sm:$0xff] }
 0x4c8   :  { %v5561_v0 = vadd.f32 %v5018_v28, %v4721_v50  ;;  %v5562_v7 = vadd.f32 %v5018_v28, %v4722_v10  ;;  %v5579_v53 = vadd.f32 %v5063_v37, %v4739_v18  ;;  %5382 = vperm.xlu0 %6190, %v4056_v35   ;;  %v3931_v62 = vmul.f32 %v11414_v4, %v15629_v9  ;;  %v15630_v32 = vld [vmem:[#allocation82_spill] sm:$0xff]  ;;  %v15631_v6 = vld [vmem:[#allocation427_spill] sm:$0xff]  ;;  %v3811_v41 = vld [vmem:[%s13781_s3 + $0x2b0] sm:$0xff] }
 0x4c9   :  { %v5580_v34 = vadd.f32 %v5063_v37, %v4740_v14  ;;  %v4725_v56 = vmul.f32 %v15631_v6, %v15630_v32  ;;  %v4726_v55 = vmul.f32 %v15631_v6, %v15632_v36  ;;  %v15633_v4 = vld [vmem:[#allocation129_spill] sm:$0xff]  ;;  %v15635_v58 = vld [vmem:[#allocation131_spill] sm:$0xff]  ;;  %5347 = vperm.xlu1 %6191, %v4049_v31   ;;  %v5028_v59 = vpop.permute.xlu1 %5027  ;;  %v4058_v22 = vsub.f32 %v3818_v57, %v3938_v21  ;;  %v15637_v37 = vld [vmem:[#allocation134_spill] sm:$0xff] }
 0x4ca   :  { %5801 = vst [vmem:[%s13782_s4 + $0x120] sm:$0xff] %v5561_v0  ;;  %5802 = vst.msk [vmem:[%s13782_s4 + $0x128] sm:$0xff] %vm1443_vm1, %v5562_v7  ;;  %v15634_v49 = vld [vmem:[#allocation357_spill] sm:$0xff]  ;;  %v15636_v38 = vld [vmem:[#allocation387_spill] sm:$0xff]  ;;  %v5073_v28 = vpop.permute.xlu0 %5072  ;;  %v4051_v7 = vsub.f32 %v3811_v41, %v3931_v62 }
 0x4cb   :  { %v4743_v50 = vmul.f32 %v15634_v49, %v15633_v4  ;;  %v4744_v10 = vmul.f32 %v15634_v49, %v15635_v58  ;;  %5819 = vst [vmem:[%s13782_s4 + $0x1b0] sm:$0xff] %v5579_v53  ;;  %5820 = vst.msk [vmem:[%s13782_s4 + $0x1b8] sm:$0xff] %vm1443_vm1, %v5580_v34  ;;  %v3940_v18 = vmul.f32 %v11455_v13, %v15636_v38  ;;  %v3820_v35 = vld [vmem:[%s13781_s3 + $0x2f8] sm:$0xff]  ;;  %v15638_v34 = vld [vmem:[#allocation90_spill] sm:$0xff] }
 0x4cc   :  { %v5565_v11 = vadd.f32 %v5028_v59, %v4725_v56  ;;  %v5566_v14 = vadd.f32 %v5028_v59, %v4726_v55  ;;  %5392 = vperm.xlu0 %6190, %v4058_v22   ;;  %v3933_v53 = vmul.f32 %v11440_v27, %v15637_v37  ;;  %v15639_v31 = vld [vmem:[#allocation257_spill] sm:$0xff]  ;;  %v15640_v57 = vld [vmem:[#allocation92_spill] sm:$0xff]  ;;  %v3813_v9 = vld [vmem:[%s13781_s3 + $0x2c0] sm:$0xff] }
 0x4cd   :  { %v5583_v48 = vadd.f32 %v5073_v28, %v4743_v50  ;;  %v5584_v0 = vadd.f32 %v5073_v28, %v4744_v10  ;;  %v4729_v21 = vmul.f32 %v15639_v31, %v15638_v34  ;;  %v4730_v13 = vmul.f32 %v15639_v31, %v15640_v57  ;;  %v15641_v27 = vld [vmem:[#allocation142_spill] sm:$0xff]  ;;  %v15643_v6 = vld [vmem:[#allocation144_spill] sm:$0xff]  ;;  %5357 = vperm.xlu1 %6191, %v4051_v7   ;;  %v5038_v36 = vpop.permute.xlu1 %5037  ;;  %v3822_v10 = vld [vmem:[%s13781_s3 + $0x308] sm:$0xff] }
 0x4ce   :  { %5805 = vst [vmem:[%s13782_s4 + $0x140] sm:$0xff] %v5565_v11  ;;  %5806 = vst.msk [vmem:[%s13782_s4 + $0x148] sm:$0xff] %vm1443_vm1, %v5566_v14  ;;  %v15642_v62 = vld [vmem:[#allocation234_spill] sm:$0xff]  ;;  %v4060_v55 = vsub.f32 %v3820_v35, %v3940_v18  ;;  %v5083_v58 = vpop.permute.xlu0 %5082  ;;  %v4053_v38 = vsub.f32 %v3813_v9, %v3933_v53  ;;  %v15648_v35 = vld [vmem:[#allocation100_spill] sm:$0xff] }
 0x4cf   :  { %v4747_v32 = vmul.f32 %v15642_v62, %v15641_v27  ;;  %v4748_v56 = vmul.f32 %v15642_v62, %v15643_v6  ;;  %5823 = vst [vmem:[%s13782_s4 + $0x1d0] sm:$0xff] %v5583_v48  ;;  %5824 = vst.msk [vmem:[%s13782_s4 + $0x1d8] sm:$0xff] %vm1443_vm1, %v5584_v0  ;;  %v15644_v41 = vld [vmem:[#allocation406_spill] sm:$0xff]  ;;  %v5569_v49 = vadd.f32 %v5038_v36, %v4729_v21  ;;  %v3815_v0 = vld [vmem:[%s13781_s3 + $0x2d0] sm:$0xff] }
 0x4d0   :  { %v3942_v4 = vmul.f32 %v11466_v61, %v15644_v41  ;;  %v5570_v50 = vadd.f32 %v5038_v36, %v4730_v13  ;;  %5402 = vperm.xlu0 %6190, %v4060_v55   ;;  %v15645_v11 = vld [vmem:[#allocation306_spill] sm:$0xff]  ;;  %v15650_v7 = vld [vmem:[#allocation353_spill] sm:$0xff]  ;;  %v15651_v53 = vld [vmem:[#allocation152_spill] sm:$0xff] }
 0x4d1   :  { %v5587_v59 = vadd.f32 %v5083_v58, %v4747_v32  ;;  %v5588_v22 = vadd.f32 %v5083_v58, %v4748_v56  ;;  %v3935_v14 = vmul.f32 %v11491_v54, %v15645_v11  ;;  %v15646_v28 = vld [vmem:[#allocation98_spill] sm:$0xff]  ;;  %5809 = vst [vmem:[%s13782_s4 + $0x160] sm:$0xff] %v5569_v49  ;;  %v4752_v34 = vmul.f32 %v15650_v7, %v15651_v53  ;;  %v5048_v31 = vpop.permute.xlu1 %5047  ;;  %v3824_v32 = vld [vmem:[%s13781_s3 + $0x318] sm:$0xff]  ;;  %v15653_v55 = vld [vmem:[#allocation420_spill] sm:$0xff] }
 0x4d2   :  { %v15647_v48 = vld [vmem:[#allocation314_spill] sm:$0xff]  ;;  %5810 = vst.msk [vmem:[%s13782_s4 + $0x168] sm:$0xff] %vm1443_vm1, %v5570_v50  ;;  %5367 = vperm.xlu1 %6191, %v4053_v38   ;;  %v4062_v21 = vsub.f32 %v3822_v10, %v3942_v4  ;;  %v5093_v62 = vpop.permute.xlu0 %5092  ;;  %v3937_v41 = vmul.f32 %v11517_v43, %v15653_v55  ;;  %v15654_v49 = vld [vmem:[#allocation111_spill] sm:$0xff]  ;;  %v15655_v50 = vld [vmem:[#allocation113_spill] sm:$0xff] }
 0x4d3   :  { %v4733_v18 = vmul.f32 %v15647_v48, %v15646_v28  ;;  %v4734_v61 = vmul.f32 %v15647_v48, %v15648_v35  ;;  %v15649_v54 = vld [vmem:[#allocation150_spill] sm:$0xff]  ;;  %5827 = vst [vmem:[%s13782_s4 + $0x1f0] sm:$0xff] %v5587_v59  ;;  %5828 = vst.msk [vmem:[%s13782_s4 + $0x1f8] sm:$0xff] %vm1443_vm1, %v5588_v22  ;;  %v5592_v56 = vadd.f32 %v5093_v62, %v4752_v34  ;;  %v15656_v43 = vld [vmem:[#allocation161_spill] sm:$0xff] }
 0x4d4   :  { %v4751_v37 = vmul.f32 %v15650_v7, %v15649_v54  ;;  %v15652_v57 = vld [vmem:[#allocation422_spill] sm:$0xff]  ;;  %5412 = vperm.xlu0 %6190, %v4062_v21   ;;  %v4055_v36 = vsub.f32 %v3815_v0, %v3935_v14  ;;  %v4737_v4 = vmul.f32 %v11498_v12, %v15654_v49  ;;  %v15657_v10 = vld [vmem:[#allocation155_spill] sm:$0xff]  ;;  %v15662_v21 = vld [vmem:[#allocation125_spill] sm:$0xff] }
 0x4d5   :  { %v3944_v13 = vmul.f32 %v11500_v47, %v15652_v57  ;;  %v5573_v9 = vadd.f32 %v5048_v31, %v4733_v18  ;;  %v5574_v27 = vadd.f32 %v5048_v31, %v4734_v61  ;;  %v4738_v47 = vmul.f32 %v11498_v12, %v15655_v50  ;;  %v3817_v58 = vld [vmem:[%s13781_s3 + $0x2e0] sm:$0xff]  ;;  %5832 = vst.msk [vmem:[%s13782_s4 + $0x218] sm:$0xff] %vm1443_vm1, %v5592_v56  ;;  %v5058_v12 = vpop.permute.xlu1 %5057  ;;  %v3826_v61 = vld [vmem:[%s13781_s3 + $0x328] sm:$0xff]  ;;  %v3819_v57 = vld [vmem:[%s13781_s3 + $0x2f0] sm:$0xff] }
 0x4d6   :  { %v5591_v6 = vadd.f32 %v5093_v62, %v4751_v37  ;;  %v4755_v59 = vmul.f32 %v15657_v10, %v15656_v43  ;;  %v15658_v22 = vld [vmem:[#allocation162_spill] sm:$0xff]  ;;  %5377 = vperm.xlu1 %6191, %v4055_v36   ;;  %v5577_v48 = vadd.f32 %v5058_v12, %v4737_v4  ;;  %v5103_v35 = vpop.permute.xlu0 %5102  ;;  %v4057_v7 = vsub.f32 %v3817_v58, %v3937_v41  ;;  %v15660_v37 = vld [vmem:[#allocation403_spill] sm:$0xff]  ;;  %v15667_v56 = vld [vmem:[#allocation460_spill] sm:$0xff] }
 0x4d7   :  { %5813 = vst [vmem:[%s13782_s4 + $0x180] sm:$0xff] %v5573_v9  ;;  %5814 = vst.msk [vmem:[%s13782_s4 + $0x188] sm:$0xff] %vm1443_vm1, %v5574_v27  ;;  %v4756_v38 = vmul.f32 %v15657_v10, %v15658_v22  ;;  %v4064_v11 = vsub.f32 %v3824_v32, %v3944_v13  ;;  %v15659_v14 = vld [vmem:[#allocation402_spill] sm:$0xff]  ;;  %v5578_v18 = vadd.f32 %v5058_v12, %v4738_v47  ;;  %v15661_v34 = vld [vmem:[#allocation123_spill] sm:$0xff] }
 0x4d8   :  { %5831 = vst [vmem:[%s13782_s4 + $0x210] sm:$0xff] %v5591_v6  ;;  %v3946_v28 = vmul.f32 %v11528_v16, %v15659_v14  ;;  %v5595_v0 = vadd.f32 %v5103_v35, %v4755_v59  ;;  %v3939_v53 = vmul.f32 %v11545_v44, %v15660_v37  ;;  %v4741_v31 = vmul.f32 %v11526_v2, %v15661_v34  ;;  %v15663_v44 = vld [vmem:[#allocation183_spill] sm:$0xff]  ;;  %v15664_v13 = vld [vmem:[#allocation168_spill] sm:$0xff]  ;;  %v3828_v4 = vld [vmem:[%s13781_s3 + $0x338] sm:$0xff] }
 0x4d9   :  { %v5596_v54 = vadd.f32 %v5103_v35, %v4756_v38  ;;  %5422 = vperm.xlu0 %6190, %v4064_v11   ;;  %v4742_v16 = vmul.f32 %v11526_v2, %v15662_v21  ;;  %5817 = vst [vmem:[%s13782_s4 + $0x1a0] sm:$0xff] %v5577_v48  ;;  %5818 = vst.msk [vmem:[%s13782_s4 + $0x1a8] sm:$0xff] %vm1443_vm1, %v5578_v18  ;;  %v4759_v9 = vmul.f32 %v15664_v13, %v15663_v44  ;;  %v15665_v27 = vld [vmem:[#allocation184_spill] sm:$0xff]  ;;  %v5068_v2 = vpop.permute.xlu1 %5067  ;;  %v15668_v43 = vld [vmem:[#allocation415_spill] sm:$0xff] }
 0x4da   :  { %v4760_v62 = vmul.f32 %v15664_v13, %v15665_v27  ;;  %5835 = vst [vmem:[%s13782_s4 + $0x230] sm:$0xff] %v5595_v0  ;;  %5387 = vperm.xlu1 %6191, %v4057_v7   ;;  %v4066_v32 = vsub.f32 %v3826_v61, %v3946_v28  ;;  %v15666_v6 = vld [vmem:[#allocation332_spill] sm:$0xff]  ;;  %v5581_v55 = vadd.f32 %v5068_v2, %v4741_v31  ;;  %v5113_v49 = vpop.permute.xlu0 %5112  ;;  %v15669_v59 = vld [vmem:[#allocation135_spill] sm:$0xff]  ;;  %v15671_v12 = vld [vmem:[#allocation137_spill] sm:$0xff] }
 0x4db   :  { %5836 = vst.msk [vmem:[%s13782_s4 + $0x238] sm:$0xff] %vm1443_vm1, %v5596_v54  ;;  %v3948_v36 = vmul.f32 %v15667_v56, %v15666_v6  ;;  %v5582_v41 = vadd.f32 %v5068_v2, %v4742_v16  ;;  %v5599_v50 = vadd.f32 %v5113_v49, %v4759_v9  ;;  %v4059_v58 = vsub.f32 %v3819_v57, %v3939_v53  ;;  %v15670_v22 = vld [vmem:[#allocation271_spill] sm:$0xff]  ;;  %v3821_v14 = vld [vmem:[%s13781_s3 + $0x300] sm:$0xff]  ;;  %v15673_v28 = vld [vmem:[#allocation405_spill] sm:$0xff] }
 0x4dc   :  { %v5600_v47 = vadd.f32 %v5113_v49, %v4760_v62  ;;  %v3941_v10 = vmul.f32 %v11573_v3, %v15668_v43  ;;  %v4745_v38 = vmul.f32 %v15670_v22, %v15669_v59  ;;  %v4746_v11 = vmul.f32 %v15670_v22, %v15671_v12  ;;  %5821 = vst [vmem:[%s13782_s4 + $0x1c0] sm:$0xff] %v5581_v55  ;;  %v15672_v3 = vld [vmem:[#allocation206_spill] sm:$0xff]  ;;  %v15674_v18 = vld [vmem:[#allocation207_spill] sm:$0xff]  ;;  %v15675_v54 = vld [vmem:[#allocation277_spill] sm:$0xff] }
 0x4dd   :  { %5432 = vperm.xlu0 %6190, %v4066_v32   ;;  %5822 = vst.msk [vmem:[%s13782_s4 + $0x1c8] sm:$0xff] %vm1443_vm1, %v5582_v41  ;;  %v4763_v48 = vmul.f32 %v15673_v28, %v15672_v3  ;;  %v4764_v35 = vmul.f32 %v15673_v28, %v15674_v18  ;;  %5839 = vst [vmem:[%s13782_s4 + $0x250] sm:$0xff] %v5599_v50  ;;  %v5078_v61 = vpop.permute.xlu1 %5077  ;;  %v4068_v0 = vsub.f32 %v3828_v4, %v3948_v36  ;;  %v3830_v31 = vld [vmem:[%s13781_s3 + $0x348] sm:$0xff]  ;;  %v15678_v62 = vld [vmem:[#allocation148_spill] sm:$0xff] }
 0x4de   :  { %5840 = vst.msk [vmem:[%s13782_s4 + $0x258] sm:$0xff] %vm1443_vm1, %v5600_v47  ;;  %5397 = vperm.xlu1 %6191, %v4059_v58   ;;  %v3950_v7 = vmul.f32 %v11583_v33, %v15675_v54  ;;  %v5585_v37 = vadd.f32 %v5078_v61, %v4745_v38  ;;  %v5586_v53 = vadd.f32 %v5078_v61, %v4746_v11  ;;  %v5123_v34 = vpop.permute.xlu0 %5122  ;;  %v15676_v44 = vld [vmem:[#allocation423_spill] sm:$0xff]  ;;  %v3823_v2 = vld [vmem:[%s13781_s3 + $0x310] sm:$0xff]  ;;  %v15680_v32 = vld [vmem:[#allocation413_spill] sm:$0xff] }
 0x4df   :  { %v5603_v21 = vadd.f32 %v5123_v34, %v4763_v48  ;;  %v5604_v16 = vadd.f32 %v5123_v34, %v4764_v35  ;;  %v4061_v57 = vsub.f32 %v3821_v14, %v3941_v10  ;;  %v3943_v13 = vmul.f32 %v11596_v29, %v15676_v44  ;;  %v15677_v9 = vld [vmem:[#allocation147_spill] sm:$0xff]  ;;  %v15679_v29 = vld [vmem:[#allocation226_spill] sm:$0xff]  ;;  %v3832_v58 = vld [vmem:[%s13781_s3 + $0x358] sm:$0xff] }
 0x4e0   :  { %v4749_v27 = vmul.f32 %v11581_v20, %v15677_v9  ;;  %v4750_v33 = vmul.f32 %v11581_v20, %v15678_v62  ;;  %5825 = vst [vmem:[%s13782_s4 + $0x1e0] sm:$0xff] %v5585_v37  ;;  %5826 = vst.msk [vmem:[%s13782_s4 + $0x1e8] sm:$0xff] %vm1443_vm1, %v5586_v53  ;;  %v4767_v6 = vmul.f32 %v15680_v32, %v15679_v29  ;;  %v15681_v56 = vld [vmem:[#allocation227_spill] sm:$0xff]  ;;  %v15682_v41 = vld [vmem:[#allocation326_spill] sm:$0xff] }
 0x4e1   :  { %5442 = vperm.xlu0 %6190, %v4068_v0   ;;  %v4768_v36 = vmul.f32 %v15680_v32, %v15681_v56  ;;  %5843 = vst [vmem:[%s13782_s4 + $0x270] sm:$0xff] %v5603_v21  ;;  %5844 = vst.msk [vmem:[%s13782_s4 + $0x278] sm:$0xff] %vm1443_vm1, %v5604_v16  ;;  %v5088_v20 = vpop.permute.xlu1 %5087  ;;  %v4070_v55 = vsub.f32 %v3830_v31, %v3950_v7  ;;  %v3952_v49 = vmul.f32 %v11606_v42, %v15682_v41  ;;  %v15683_v22 = vld [vmem:[#allocation336_spill] sm:$0xff]  ;;  %v15684_v12 = vld [vmem:[#allocation157_spill] sm:$0xff] }
 0x4e2   :  { %5407 = vperm.xlu1 %6191, %v4061_v57   ;;  %v5589_v4 = vadd.f32 %v5088_v20, %v4749_v27  ;;  %v5590_v50 = vadd.f32 %v5088_v20, %v4750_v33  ;;  %v5133_v47 = vpop.permute.xlu0 %5132  ;;  %v4063_v59 = vsub.f32 %v3823_v2, %v3943_v13  ;;  %v3945_v38 = vmul.f32 %v11615_v1, %v15683_v22  ;;  %v15685_v14 = vld [vmem:[#allocation158_spill] sm:$0xff]  ;;  %v15686_v1 = vld [vmem:[#allocation243_spill] sm:$0xff]  ;;  %v15688_v18 = vld [vmem:[#allocation244_spill] sm:$0xff] }
 0x4e3   :  { %v5607_v43 = vadd.f32 %v5133_v47, %v4767_v6  ;;  %v5608_v10 = vadd.f32 %v5133_v47, %v4768_v36  ;;  %v4753_v11 = vmul.f32 %v11604_v30, %v15684_v12  ;;  %v4754_v42 = vmul.f32 %v11604_v30, %v15685_v14  ;;  %v3825_v3 = vld [vmem:[%s13781_s3 + $0x320] sm:$0xff]  ;;  %v15687_v28 = vld [vmem:[#allocation187_spill] sm:$0xff]  ;;  %v15690_v57 = vld [vmem:[#allocation429_spill] sm:$0xff] }
 0x4e4   :  { %5829 = vst [vmem:[%s13782_s4 + $0x200] sm:$0xff] %v5589_v4  ;;  %5830 = vst.msk [vmem:[%s13782_s4 + $0x208] sm:$0xff] %vm1443_vm1, %v5590_v50  ;;  %v4771_v48 = vmul.f32 %v15687_v28, %v15686_v1  ;;  %v4772_v35 = vmul.f32 %v15687_v28, %v15688_v18  ;;  %v4072_v61 = vsub.f32 %v3832_v58, %v3952_v49  ;;  %v15689_v0 = vld [vmem:[#allocation374_spill] sm:$0xff]  ;;  %v3834_v34 = vld [vmem:[%s13781_s3 + $0x368] sm:$0xff] }
 0x4e5   :  { %5452 = vperm.xlu0 %6190, %v4070_v55   ;;  %5847 = vst [vmem:[%s13782_s4 + $0x290] sm:$0xff] %v5607_v43  ;;  %5848 = vst.msk [vmem:[%s13782_s4 + $0x298] sm:$0xff] %vm1443_vm1, %v5608_v10  ;;  %v5098_v30 = vpop.permute.xlu1 %5097  ;;  %v3954_v54 = vmul.f32 %v11626_v17, %v15689_v0  ;;  %v4065_v16 = vsub.f32 %v3825_v3, %v3945_v38  ;;  %v3947_v44 = vmul.f32 %v11638_v15, %v15690_v57  ;;  %v15691_v13 = vld [vmem:[#allocation178_spill] sm:$0xff]  ;;  %v15692_v27 = vld [vmem:[#allocation179_spill] sm:$0xff] }
 0x4e6   :  { %5417 = vperm.xlu1 %6191, %v4063_v59   ;;  %v5593_v7 = vadd.f32 %v5098_v30, %v4753_v11  ;;  %v5594_v37 = vadd.f32 %v5098_v30, %v4754_v42  ;;  %v5143_v53 = vpop.permute.xlu0 %5142  ;;  %v4757_v9 = vmul.f32 %v11624_v45, %v15691_v13  ;;  %v4758_v17 = vmul.f32 %v11624_v45, %v15692_v27  ;;  %v3827_v62 = vld [vmem:[%s13781_s3 + $0x330] sm:$0xff]  ;;  %v15693_v15 = vld [vmem:[#allocation262_spill] sm:$0xff]  ;;  %v15694_v33 = vld [vmem:[#allocation459_spill] sm:$0xff] }
 0x4e7   :  { %v5611_v31 = vadd.f32 %v5143_v53, %v4771_v48  ;;  %v5612_v21 = vadd.f32 %v5143_v53, %v4772_v35  ;;  %v4775_v2 = vmul.f32 %v15694_v33, %v15693_v15  ;;  %v15695_v29 = vld [vmem:[#allocation263_spill] sm:$0xff]  ;;  %v4074_v6 = vsub.f32 %v3834_v34, %v3954_v54  ;;  %v15696_v56 = vld [vmem:[#allocation192_spill] sm:$0xff]  ;;  %v3836_v49 = vld [vmem:[%s13781_s3 + $0x378] sm:$0xff] }
 0x4e8   :  { %5833 = vst [vmem:[%s13782_s4 + $0x220] sm:$0xff] %v5593_v7  ;;  %5834 = vst.msk [vmem:[%s13782_s4 + $0x228] sm:$0xff] %vm1443_vm1, %v5594_v37  ;;  %v4776_v32 = vmul.f32 %v15694_v33, %v15695_v29  ;;  %v3956_v36 = vmul.f32 %v11648_v40, %v15696_v56  ;;  %v4067_v47 = vsub.f32 %v3827_v62, %v3947_v44  ;;  %v15697_v58 = vld [vmem:[#allocation275_spill] sm:$0xff]  ;;  %v15698_v10 = vld [vmem:[#allocation201_spill] sm:$0xff] }
 0x4e9   :  { %5462 = vperm.xlu0 %6190, %v4072_v61   ;;  %5851 = vst [vmem:[%s13782_s4 + $0x2b0] sm:$0xff] %v5611_v31  ;;  %5852 = vst.msk [vmem:[%s13782_s4 + $0x2b8] sm:$0xff] %vm1443_vm1, %v5612_v21  ;;  %v5108_v45 = vpop.permute.xlu1 %5107  ;;  %v3949_v43 = vmul.f32 %v11657_v23, %v15697_v58  ;;  %v4761_v59 = vmul.f32 %v11646_v60, %v15698_v10  ;;  %v15699_v22 = vld [vmem:[#allocation202_spill] sm:$0xff]  ;;  %v15701_v11 = vld [vmem:[#allocation283_spill] sm:$0xff] }
 0x4ea   :  { %5427 = vperm.xlu1 %6191, %v4065_v16   ;;  %v5597_v20 = vadd.f32 %v5108_v45, %v4757_v9  ;;  %v5598_v55 = vadd.f32 %v5108_v45, %v4758_v17  ;;  %v5153_v41 = vpop.permute.xlu0 %5152  ;;  %v4762_v40 = vmul.f32 %v11646_v60, %v15699_v22  ;;  %v3829_v38 = vld [vmem:[%s13781_s3 + $0x340] sm:$0xff]  ;;  %v4780_v14 = vmul.f32 %v11598_v51, %v15701_v11  ;;  %v15704_v7 = vld [vmem:[#allocation221_spill] sm:$0xff]  ;;  %v3831_v34 = vld [vmem:[%s13781_s3 + $0x350] sm:$0xff] }
 0x4eb   :  { %v5615_v4 = vadd.f32 %v5153_v41, %v4775_v2  ;;  %v5616_v50 = vadd.f32 %v5153_v41, %v4776_v32  ;;  %v15700_v23 = vld [vmem:[#allocation282_spill] sm:$0xff]  ;;  %v4076_v42 = vsub.f32 %v3836_v49, %v3956_v36  ;;  %v4069_v61 = vsub.f32 %v3829_v38, %v3949_v43  ;;  %v15707_v21 = vld [vmem:[#allocation300_spill] sm:$0xff]  ;;  %v15708_v44 = vld [vmem:[#allocation435_spill] sm:$0xff] }
 0x4ec   :  { %5837 = vst [vmem:[%s13782_s4 + $0x240] sm:$0xff] %v5597_v20  ;;  %5838 = vst.msk [vmem:[%s13782_s4 + $0x248] sm:$0xff] %vm1443_vm1, %v5598_v55  ;;  %v4779_v12 = vmul.f32 %v11598_v51, %v15700_v23  ;;  %v15702_v3 = vld [vmem:[#allocation354_spill] sm:$0xff]  ;;  %v3838_v51 = vld [vmem:[%s13781_s3 + $0x388] sm:$0xff]  ;;  %v4765_v37 = vmul.f32 %v11665_v5, %v15704_v7  ;;  %v4784_v16 = vmul.f32 %v11659_v46, %v15707_v21 }
 0x4ed   :  { %5472 = vperm.xlu0 %6190, %v4074_v6   ;;  %5855 = vst [vmem:[%s13782_s4 + $0x2d0] sm:$0xff] %v5615_v4  ;;  %5856 = vst.msk [vmem:[%s13782_s4 + $0x2d8] sm:$0xff] %vm1443_vm1, %v5616_v50  ;;  %v5118_v60 = vpop.permute.xlu1 %5117  ;;  %v3958_v1 = vmul.f32 %v11667_v39, %v15702_v3  ;;  %v15703_v0 = vld [vmem:[#allocation430_spill] sm:$0xff]  ;;  %v15709_v13 = vld [vmem:[#allocation467_spill] sm:$0xff] }
 0x4ee   :  { %5437 = vperm.xlu1 %6191, %v4067_v47   ;;  %v5601_v28 = vadd.f32 %v5118_v60, %v4761_v59  ;;  %v5602_v48 = vadd.f32 %v5118_v60, %v4762_v40  ;;  %v5163_v18 = vpop.permute.xlu0 %5162  ;;  %v3951_v54 = vmul.f32 %v11673_v19, %v15703_v0  ;;  %v15705_v53 = vld [vmem:[#allocation222_spill] sm:$0xff]  ;;  %v15706_v19 = vld [vmem:[#allocation299_spill] sm:$0xff]  ;;  %v3960_v9 = vmul.f32 %v15709_v13, %v15708_v44  ;;  %v15711_v32 = vld [vmem:[#allocation469_spill] sm:$0xff] }
 0x4ef   :  { %v5619_v35 = vadd.f32 %v5163_v18, %v4779_v12  ;;  %v5620_v30 = vadd.f32 %v5163_v18, %v4780_v14  ;;  %v4766_v39 = vmul.f32 %v11665_v5, %v15705_v53  ;;  %v4783_v31 = vmul.f32 %v11659_v46, %v15706_v19  ;;  %v3840_v46 = vld [vmem:[%s13781_s3 + $0x398] sm:$0xff]  ;;  %v15710_v29 = vld [vmem:[#allocation215_spill] sm:$0xff]  ;;  %v15713_v56 = vld [vmem:[#allocation470_spill] sm:$0xff] }
 0x4f0   :  { %5841 = vst [vmem:[%s13782_s4 + $0x260] sm:$0xff] %v5601_v28  ;;  %5842 = vst.msk [vmem:[%s13782_s4 + $0x268] sm:$0xff] %vm1443_vm1, %v5602_v48  ;;  %v4078_v57 = vsub.f32 %v3838_v51, %v3958_v1  ;;  %v4071_v2 = vsub.f32 %v3831_v34, %v3951_v54  ;;  %v3953_v45 = vmul.f32 %v15711_v32, %v15710_v29  ;;  %v15712_v6 = vld [vmem:[#allocation239_spill] sm:$0xff]  ;;  %v15714_v20 = vld [vmem:[#allocation240_spill] sm:$0xff] }
 0x4f1   :  { %5482 = vperm.xlu0 %6190, %v4076_v42   ;;  %5859 = vst [vmem:[%s13782_s4 + $0x2f0] sm:$0xff] %v5619_v35  ;;  %5860 = vst.msk [vmem:[%s13782_s4 + $0x2f8] sm:$0xff] %vm1443_vm1, %v5620_v30  ;;  %v5128_v5 = vpop.permute.xlu1 %5127  ;;  %v4769_v36 = vmul.f32 %v15713_v56, %v15712_v6  ;;  %v4770_v55 = vmul.f32 %v15713_v56, %v15714_v20  ;;  %v3833_v41 = vld [vmem:[%s13781_s3 + $0x360] sm:$0xff]  ;;  %v15715_v49 = vld [vmem:[#allocation320_spill] sm:$0xff]  ;;  %v4080_v10 = vsub.f32 %v3840_v46, %v3960_v9 }
 0x4f2   :  { %5447 = vperm.xlu1 %6191, %v4069_v61   ;;  %v5605_v27 = vadd.f32 %v5128_v5, %v4765_v37  ;;  %v5606_v17 = vadd.f32 %v5128_v5, %v4766_v39  ;;  %v5173_v62 = vpop.permute.xlu0 %5172  ;;  %v15716_v4 = vld [vmem:[#allocation473_spill] sm:$0xff]  ;;  %v15718_v59 = vld [vmem:[#allocation218_spill] sm:$0xff]  ;;  %v15719_v22 = vld [vmem:[#allocation471_spill] sm:$0xff]  ;;  %v4073_v42 = vsub.f32 %v3833_v41, %v3953_v45 }
 0x4f3   :  { %v5623_v15 = vadd.f32 %v5173_v62, %v4783_v31  ;;  %v5624_v33 = vadd.f32 %v5173_v62, %v4784_v16  ;;  %v4787_v50 = vmul.f32 %v15716_v4, %v15715_v49  ;;  %v15717_v47 = vld [vmem:[#allocation321_spill] sm:$0xff]  ;;  %v3962_v40 = vmul.f32 %v15719_v22, %v15718_v59  ;;  %v3842_v11 = vld [vmem:[%s13781_s3 + $0x3a8] sm:$0xff]  ;;  %v15720_v3 = vld [vmem:[#allocation238_spill] sm:$0xff] }
 0x4f4   :  { %5845 = vst [vmem:[%s13782_s4 + $0x280] sm:$0xff] %v5605_v27  ;;  %5846 = vst.msk [vmem:[%s13782_s4 + $0x288] sm:$0xff] %vm1443_vm1, %v5606_v17  ;;  %v4788_v58 = vmul.f32 %v15716_v4, %v15717_v47  ;;  %v15721_v1 = vld [vmem:[#allocation472_spill] sm:$0xff]  ;;  %v15722_v48 = vld [vmem:[#allocation258_spill] sm:$0xff] }
 0x4f5   :  { %5492 = vperm.xlu0 %6190, %v4078_v57   ;;  %5863 = vst [vmem:[%s13782_s4 + $0x310] sm:$0xff] %v5623_v15  ;;  %5864 = vst.msk [vmem:[%s13782_s4 + $0x318] sm:$0xff] %vm1443_vm1, %v5624_v33  ;;  %v5138_v43 = vpop.permute.xlu1 %5137  ;;  %v3955_v28 = vmul.f32 %v15721_v1, %v15720_v3  ;;  %v15723_v18 = vld [vmem:[#allocation475_spill] sm:$0xff]  ;;  %v3835_v61 = vld [vmem:[%s13781_s3 + $0x370] sm:$0xff]  ;;  %v4082_v34 = vsub.f32 %v3842_v11, %v3962_v40 }
 0x4f6   :  { %5457 = vperm.xlu1 %6191, %v4071_v2   ;;  %v5609_v38 = vadd.f32 %v5138_v43, %v4769_v36  ;;  %v5610_v23 = vadd.f32 %v5138_v43, %v4770_v55  ;;  %v5183_v12 = vpop.permute.xlu0 %5182  ;;  %v4773_v51 = vmul.f32 %v15723_v18, %v15722_v48  ;;  %v15724_v35 = vld [vmem:[#allocation259_spill] sm:$0xff]  ;;  %v15725_v0 = vld [vmem:[#allocation342_spill] sm:$0xff]  ;;  %v15726_v54 = vld [vmem:[#allocation204_spill] sm:$0xff] }
 0x4f7   :  { %v5627_v14 = vadd.f32 %v5183_v12, %v4787_v50  ;;  %v5628_v60 = vadd.f32 %v5183_v12, %v4788_v58  ;;  %v4774_v30 = vmul.f32 %v15723_v18, %v15724_v35  ;;  %v4791_v7 = vmul.f32 %v15726_v54, %v15725_v0  ;;  %v15727_v37 = vld [vmem:[#allocation343_spill] sm:$0xff]  ;;  %v15728_v19 = vld [vmem:[#allocation461_spill] sm:$0xff]  ;;  %v15729_v31 = vld [vmem:[#allocation170_spill] sm:$0xff] }
 0x4f8   :  { %5849 = vst [vmem:[%s13782_s4 + $0x2a0] sm:$0xff] %v5609_v38  ;;  %5850 = vst.msk [vmem:[%s13782_s4 + $0x2a8] sm:$0xff] %vm1443_vm1, %v5610_v23  ;;  %v4792_v53 = vmul.f32 %v15726_v54, %v15727_v37  ;;  %v3964_v21 = vmul.f32 %v15729_v31, %v15728_v19  ;;  %v3844_v44 = vld [vmem:[%s13781_s3 + $0x3b8] sm:$0xff]  ;;  %v4075_v27 = vsub.f32 %v3835_v61, %v3955_v28  ;;  %v15731_v62 = vld [vmem:[#allocation474_spill] sm:$0xff] }
 0x4f9   :  { %5502 = vperm.xlu0 %6190, %v4080_v10   ;;  %5867 = vst [vmem:[%s13782_s4 + $0x330] sm:$0xff] %v5627_v14  ;;  %5868 = vst.msk [vmem:[%s13782_s4 + $0x338] sm:$0xff] %vm1443_vm1, %v5628_v60  ;;  %v5148_v39 = vpop.permute.xlu1 %5147  ;;  %v15730_v17 = vld [vmem:[#allocation141_spill] sm:$0xff]  ;;  %v15732_v15 = vld [vmem:[#allocation278_spill] sm:$0xff] }
 0x4fa   :  { %5467 = vperm.xlu1 %6191, %v4073_v42   ;;  %v5613_v16 = vadd.f32 %v5148_v39, %v4773_v51  ;;  %v5614_v5 = vadd.f32 %v5148_v39, %v4774_v30  ;;  %v5193_v57 = vpop.permute.xlu0 %5192  ;;  %v3957_v46 = vmul.f32 %v15731_v62, %v15730_v17  ;;  %v15733_v33 = vld [vmem:[#allocation477_spill] sm:$0xff]  ;;  %v15734_v29 = vld [vmem:[#allocation279_spill] sm:$0xff]  ;;  %v3837_v45 = vld [vmem:[%s13781_s3 + $0x380] sm:$0xff]  ;;  %v4084_v49 = vsub.f32 %v3844_v44, %v3964_v21 }
 0x4fb   :  { %v5631_v13 = vadd.f32 %v5193_v57, %v4791_v7  ;;  %v5632_v9 = vadd.f32 %v5193_v57, %v4792_v53  ;;  %v4777_v2 = vmul.f32 %v15733_v33, %v15732_v15  ;;  %v4778_v32 = vmul.f32 %v15733_v33, %v15734_v29  ;;  %v15735_v6 = vld [vmem:[#allocation360_spill] sm:$0xff]  ;;  %v15736_v56 = vld [vmem:[#allocation251_spill] sm:$0xff]  ;;  %v15737_v20 = vld [vmem:[#allocation361_spill] sm:$0xff] }
 0x4fc   :  { %5853 = vst [vmem:[%s13782_s4 + $0x2c0] sm:$0xff] %v5613_v16  ;;  %5854 = vst.msk [vmem:[%s13782_s4 + $0x2c8] sm:$0xff] %vm1443_vm1, %v5614_v5  ;;  %v4795_v36 = vmul.f32 %v15736_v56, %v15735_v6  ;;  %v4796_v55 = vmul.f32 %v15736_v56, %v15737_v20  ;;  %v4077_v10 = vsub.f32 %v3837_v45, %v3957_v46  ;;  %v15738_v59 = vld [vmem:[#allocation327_spill] sm:$0xff]  ;;  %v15739_v22 = vld [vmem:[#allocation174_spill] sm:$0xff] }
 0x4fd   :  { %5512 = vperm.xlu0 %6190, %v4082_v34   ;;  %5871 = vst [vmem:[%s13782_s4 + $0x350] sm:$0xff] %v5631_v13  ;;  %5872 = vst.msk [vmem:[%s13782_s4 + $0x358] sm:$0xff] %vm1443_vm1, %v5632_v9  ;;  %v5158_v41 = vpop.permute.xlu1 %5157  ;;  %v3959_v40 = vmul.f32 %v15739_v22, %v15738_v59  ;;  %v15740_v38 = vld [vmem:[#allocation294_spill] sm:$0xff]  ;;  %v15741_v23 = vld [vmem:[#allocation291_spill] sm:$0xff] }
 0x4fe   :  { %5477 = vperm.xlu1 %6191, %v4075_v27   ;;  %v5617_v4 = vadd.f32 %v5158_v41, %v4777_v2  ;;  %v5618_v50 = vadd.f32 %v5158_v41, %v4778_v32  ;;  %v5203_v47 = vpop.permute.xlu0 %5202  ;;  %v4781_v12 = vmul.f32 %v15741_v23, %v15740_v38  ;;  %v15742_v11 = vld [vmem:[#allocation295_spill] sm:$0xff]  ;;  %v3839_v60 = vld [vmem:[%s13781_s3 + $0x390] sm:$0xff]  ;;  %v15744_v1 = vld [vmem:[#allocation381_spill] sm:$0xff] }
 0x4ff   :  { %v5635_v58 = vadd.f32 %v5203_v47, %v4795_v36  ;;  %v5636_v43 = vadd.f32 %v5203_v47, %v4796_v55  ;;  %v4782_v14 = vmul.f32 %v15741_v23, %v15742_v11  ;;  %v15743_v42 = vld [vmem:[#allocation380_spill] sm:$0xff]  ;;  %v4800_v28 = vmul.f32 %v11835_v8, %v15744_v1  ;;  %v15745_v54 = vld [vmem:[#allocation463_spill] sm:$0xff]  ;;  %v15746_v7 = vld [vmem:[#allocation214_spill] sm:$0xff] }
 0x500   :  { %5857 = vst [vmem:[%s13782_s4 + $0x2e0] sm:$0xff] %v5617_v4  ;;  %5858 = vst.msk [vmem:[%s13782_s4 + $0x2e8] sm:$0xff] %vm1443_vm1, %v5618_v50  ;;  %v4799_v3 = vmul.f32 %v11835_v8, %v15743_v42  ;;  %v4079_v0 = vsub.f32 %v3839_v60, %v3959_v40  ;;  %v3961_v8 = vmul.f32 %v15746_v7, %v15745_v54  ;;  %v15747_v37 = vld [vmem:[#allocation315_spill] sm:$0xff]  ;;  %v15748_v53 = vld [vmem:[#allocation188_spill] sm:$0xff] }
 0x501   :  { %5522 = vperm.xlu0 %6190, %v4084_v49   ;;  %5875 = vst [vmem:[%s13782_s4 + $0x370] sm:$0xff] %v5635_v58  ;;  %5876 = vst.msk [vmem:[%s13782_s4 + $0x378] sm:$0xff] %vm1443_vm1, %v5636_v43  ;;  %v5168_v48 = vpop.permute.xlu1 %5167  ;;  %v4785_v39 = vmul.f32 %v15748_v53, %v15747_v37  ;;  %v15749_v34 = vld [vmem:[#allocation316_spill] sm:$0xff]  ;;  %v3841_v31 = vld [vmem:[%s13781_s3 + $0x3a0] sm:$0xff] }
 0x502   :  { %5487 = vperm.xlu1 %6191, %v4077_v10   ;;  %v5621_v18 = vadd.f32 %v5168_v48, %v4781_v12  ;;  %v5622_v51 = vadd.f32 %v5168_v48, %v4782_v14  ;;  %v5213_v35 = vpop.permute.xlu0 %5212  ;;  %v4786_v19 = vmul.f32 %v15748_v53, %v15749_v34  ;;  %v15750_v21 = vld [vmem:[#allocation411_spill] sm:$0xff]  ;;  %v15751_v16 = vld [vmem:[#allocation352_spill] sm:$0xff]  ;;  %v4081_v15 = vsub.f32 %v3841_v31, %v3961_v8  ;;  %v15755_v32 = vld [vmem:[#allocation337_spill] sm:$0xff] }
 0x503   :  { %v5639_v30 = vadd.f32 %v5213_v35, %v4799_v3  ;;  %v5640_v61 = vadd.f32 %v5213_v35, %v4800_v28  ;;  %v4803_v5 = vmul.f32 %v15751_v16, %v15750_v21  ;;  %v15752_v57 = vld [vmem:[#allocation412_spill] sm:$0xff]  ;;  %v15756_v45 = vld [vmem:[#allocation334_spill] sm:$0xff]  ;;  %v15758_v55 = vld [vmem:[#allocation7_spill] sm:$0xff] }
 0x504   :  { %5861 = vst [vmem:[%s13782_s4 + $0x300] sm:$0xff] %v5621_v18  ;;  %5862 = vst.msk [vmem:[%s13782_s4 + $0x308] sm:$0xff] %vm1443_vm1, %v5622_v51  ;;  %v4804_v44 = vmul.f32 %v15751_v16, %v15752_v57  ;;  %v15753_v33 = vld [vmem:[#allocation464_spill] sm:$0xff]  ;;  %v4789_v6 = vmul.f32 %v15756_v45, %v15755_v32  ;;  %v15757_v56 = vld [vmem:[#allocation338_spill] sm:$0xff] }
 0x505   :  { %5879 = vst [vmem:[%s13782_s4 + $0x390] sm:$0xff] %v5639_v30  ;;  %5880 = vst.msk [vmem:[%s13782_s4 + $0x398] sm:$0xff] %vm1443_vm1, %v5640_v61  ;;  %v5178_v13 = vpop.permute.xlu1 %5177  ;;  %v15754_v2 = vld [vmem:[#allocation232_spill] sm:$0xff]  ;;  %v4790_v36 = vmul.f32 %v15756_v45, %v15757_v56  ;;  %v15759_v41 = vld [vmem:[#allocation425_spill] sm:$0xff] }
 0x506   :  { %5497 = vperm.xlu1 %6191, %v4079_v0   ;;  %v5625_v9 = vadd.f32 %v5178_v13, %v4785_v39  ;;  %v5626_v27 = vadd.f32 %v5178_v13, %v4786_v19  ;;  %v5223_v17 = vpop.permute.xlu0 %5222  ;;  %v3963_v29 = vmul.f32 %v15754_v2, %v15753_v33  ;;  %v3843_v20 = vld [vmem:[%s13781_s3 + $0x3b0] sm:$0xff]  ;;  %v4807_v49 = vmul.f32 %v15759_v41, %v15758_v55  ;;  %v15761_v38 = vld [vmem:[#allocation355_spill] sm:$0xff]  ;;  %v15762_v23 = vld [vmem:[#allocation289_spill] sm:$0xff] }
 0x507   :  { %v5643_v62 = vadd.f32 %v5223_v17, %v4803_v5  ;;  %v5644_v46 = vadd.f32 %v5223_v17, %v4804_v44  ;;  %v15760_v4 = vld [vmem:[#allocation8_spill] sm:$0xff]  ;;  %v4793_v12 = vmul.f32 %v15762_v23, %v15761_v38  ;;  %v15764_v60 = vld [vmem:[#allocation15_spill] sm:$0xff]  ;;  %v15765_v42 = vld [vmem:[#allocation458_spill] sm:$0xff] }
 0x508   :  { %5865 = vst [vmem:[%s13782_s4 + $0x320] sm:$0xff] %v5625_v9  ;;  %5866 = vst.msk [vmem:[%s13782_s4 + $0x328] sm:$0xff] %vm1443_vm1, %v5626_v27  ;;  %v4808_v50 = vmul.f32 %v15759_v41, %v15760_v4  ;;  %v4083_v40 = vsub.f32 %v3843_v20, %v3963_v29  ;;  %v15763_v11 = vld [vmem:[#allocation356_spill] sm:$0xff]  ;;  %v4811_v3 = vmul.f32 %v15765_v42, %v15764_v60  ;;  %v15766_v1 = vld [vmem:[#allocation17_spill] sm:$0xff] }
 0x509   :  { %5883 = vst [vmem:[%s13782_s4 + $0x3b0] sm:$0xff] %v5643_v62  ;;  %5884 = vst.msk [vmem:[%s13782_s4 + $0x3b8] sm:$0xff] %vm1443_vm1, %v5644_v46  ;;  %v5188_v47 = vpop.permute.xlu1 %5187  ;;  %v4794_v14 = vmul.f32 %v15762_v23, %v15763_v11  ;;  %v4812_v28 = vmul.f32 %v15765_v42, %v15766_v1  ;;  %v15767_v0 = vld [vmem:[#allocation375_spill] sm:$0xff]  ;;  %v15768_v7 = vld [vmem:[#allocation376_spill] sm:$0xff] }
 0x50a   :  { %5507 = vperm.xlu1 %6191, %v4081_v15   ;;  %v5629_v58 = vadd.f32 %v5188_v47, %v4789_v6  ;;  %v5630_v43 = vadd.f32 %v5188_v47, %v4790_v36  ;;  %v5233_v10 = vpop.permute.xlu0 %5232  ;;  %v4797_v54 = vmul.f32 %v11894_v63, %v15767_v0  ;;  %v4798_v8 = vmul.f32 %v11894_v63, %v15768_v7  ;;  %v15769_v37 = vld [vmem:[#allocation23_spill] sm:$0xff]  ;;  %v15770_v53 = vld [vmem:[#allocation462_spill] sm:$0xff]  ;;  %v15771_v34 = vld [vmem:[#allocation25_spill] sm:$0xff] }
 0x50b   :  { %v5647_v59 = vadd.f32 %v5233_v10, %v4807_v49  ;;  %v5648_v22 = vadd.f32 %v5233_v10, %v4808_v50  ;;  %v4815_v39 = vmul.f32 %v15770_v53, %v15769_v37  ;;  %v4816_v19 = vmul.f32 %v15770_v53, %v15771_v34  ;;  %v15772_v44 = vld [vmem:[#allocation391_spill] sm:$0xff]  ;;  %v15773_v9 = vld [vmem:[#allocation392_spill] sm:$0xff]  ;;  %v15775_v62 = vld [vmem:[#allocation465_spill] sm:$0xff] }
 0x50c   :  { %5869 = vst [vmem:[%s13782_s4 + $0x340] sm:$0xff] %v5629_v58  ;;  %5870 = vst.msk [vmem:[%s13782_s4 + $0x348] sm:$0xff] %vm1443_vm1, %v5630_v43  ;;  %v4801_v13 = vmul.f32 %v11922_v24, %v15772_v44  ;;  %v4802_v27 = vmul.f32 %v11922_v24, %v15773_v9  ;;  %v15774_v17 = vld [vmem:[#allocation31_spill] sm:$0xff]  ;;  %v15776_v15 = vld [vmem:[#allocation33_spill] sm:$0xff] }
 0x50d   :  { %5887 = vst [vmem:[%s13782_s4 + $0x3d0] sm:$0xff] %v5647_v59  ;;  %5888 = vst.msk [vmem:[%s13782_s4 + $0x3d8] sm:$0xff] %vm1443_vm1, %v5648_v22  ;;  %v5198_v48 = vpop.permute.xlu1 %5197  ;;  %v4819_v46 = vmul.f32 %v15775_v62, %v15774_v17  ;;  %v4820_v33 = vmul.f32 %v15775_v62, %v15776_v15  ;;  %v15777_v56 = vld [vmem:[#allocation3_spill] sm:$0xff]  ;;  %v15778_v36 = vld [vmem:[#allocation466_spill] sm:$0xff] }
 0x50e   :  { %5517 = vperm.xlu1 %6191, %v4083_v40   ;;  %v5633_v18 = vadd.f32 %v5198_v48, %v4793_v12  ;;  %v5634_v51 = vadd.f32 %v5198_v48, %v4794_v14  ;;  %v5243_v35 = vpop.permute.xlu0 %5242  ;;  %v4805_v20 = vmul.f32 %v15778_v36, %v15777_v56  ;;  %v15779_v55 = vld [vmem:[#allocation5_spill] sm:$0xff]  ;;  %v15780_v49 = vld [vmem:[#allocation39_spill] sm:$0xff]  ;;  %v15781_v4 = vld [vmem:[#allocation468_spill] sm:$0xff] }
 0x50f   :  { %v5651_v30 = vadd.f32 %v5243_v35, %v4811_v3  ;;  %v5652_v61 = vadd.f32 %v5243_v35, %v4812_v28  ;;  %v4806_v41 = vmul.f32 %v15778_v36, %v15779_v55  ;;  %v4823_v50 = vmul.f32 %v15781_v4, %v15780_v49  ;;  %v15782_v47 = vld [vmem:[#allocation41_spill] sm:$0xff]  ;;  %v15783_v23 = vld [vmem:[#allocation11_spill] sm:$0xff]  ;;  %v15787_v3 = vld [vmem:[#allocation194_spill] sm:$0xff] }
 0x510   :  { %5873 = vst [vmem:[%s13782_s4 + $0x360] sm:$0xff] %v5633_v18  ;;  %5874 = vst.msk [vmem:[%s13782_s4 + $0x368] sm:$0xff] %vm1443_vm1, %v5634_v51  ;;  %v4824_v58 = vmul.f32 %v15781_v4, %v15782_v47  ;;  %v15784_v12 = vld [vmem:[#allocation181_spill] sm:$0xff]  ;;  %v15786_v42 = vld [vmem:[#allocation47_spill] sm:$0xff] }
 0x511   :  { %5891 = vst [vmem:[%s13782_s4 + $0x3f0] sm:$0xff] %v5651_v30  ;;  %5892 = vst.msk [vmem:[%s13782_s4 + $0x3f8] sm:$0xff] %vm1443_vm1, %v5652_v61  ;;  %v5208_v63 = vpop.permute.xlu1 %5207  ;;  %v4809_v11 = vmul.f32 %v15784_v12, %v15783_v23  ;;  %v15785_v14 = vld [vmem:[#allocation13_spill] sm:$0xff]  ;;  %v4827_v1 = vmul.f32 %v15787_v3, %v15786_v42  ;;  %v15790_v7 = vld [vmem:[#allocation476_spill] sm:$0xff] }
 0x512   :  { %v5637_v31 = vadd.f32 %v5208_v63, %v4797_v54  ;;  %v5638_v21 = vadd.f32 %v5208_v63, %v4798_v8  ;;  %v5253_v16 = vpop.permute.xlu0 %5252  ;;  %v4810_v60 = vmul.f32 %v15784_v12, %v15785_v14  ;;  %v15788_v28 = vld [vmem:[#allocation49_spill] sm:$0xff]  ;;  %v15789_v54 = vld [vmem:[#allocation19_spill] sm:$0xff] }
 0x513   :  { %v5655_v5 = vadd.f32 %v5253_v16, %v4815_v39  ;;  %v5656_v57 = vadd.f32 %v5253_v16, %v4816_v19  ;;  %v4828_v48 = vmul.f32 %v15787_v3, %v15788_v28  ;;  %v4813_v8 = vmul.f32 %v15790_v7, %v15789_v54  ;;  %v15791_v37 = vld [vmem:[#allocation21_spill] sm:$0xff]  ;;  %v15792_v39 = vld [vmem:[#allocation55_spill] sm:$0xff] }
 0x514   :  { %5877 = vst [vmem:[%s13782_s4 + $0x380] sm:$0xff] %v5637_v31  ;;  %5878 = vst.msk [vmem:[%s13782_s4 + $0x388] sm:$0xff] %vm1443_vm1, %v5638_v21  ;;  %v4814_v53 = vmul.f32 %v15790_v7, %v15791_v37  ;;  %v15793_v34 = vld [vmem:[#allocation165_spill] sm:$0xff]  ;;  %v15795_v9 = vld [vmem:[#allocation27_spill] sm:$0xff] }
 0x515   :  { %5895 = vst [vmem:[%s13782_s4 + $0x410] sm:$0xff] %v5655_v5  ;;  %5896 = vst.msk [vmem:[%s13782_s4 + $0x418] sm:$0xff] %vm1443_vm1, %v5656_v57  ;;  %v5218_v24 = vpop.permute.xlu1 %5217  ;;  %v4831_v19 = vmul.f32 %v15793_v34, %v15792_v39  ;;  %v15794_v63 = vld [vmem:[#allocation57_spill] sm:$0xff]  ;;  %v15798_v15 = vld [vmem:[#allocation63_spill] sm:$0xff] }
 0x516   :  { %v5641_v2 = vadd.f32 %v5218_v24, %v4801_v13  ;;  %v5642_v29 = vadd.f32 %v5218_v24, %v4802_v27  ;;  %v5263_v32 = vpop.permute.xlu0 %5262  ;;  %v4832_v31 = vmul.f32 %v15793_v34, %v15794_v63  ;;  %v15796_v27 = vld [vmem:[#allocation224_spill] sm:$0xff]  ;;  %v15797_v62 = vld [vmem:[#allocation29_spill] sm:$0xff]  ;;  %v15801_v55 = vld [vmem:[#allocation35_spill] sm:$0xff] }
 0x517   :  { %v5659_v45 = vadd.f32 %v5263_v32, %v4819_v46  ;;  %v5660_v6 = vadd.f32 %v5263_v32, %v4820_v33  ;;  %v4817_v17 = vmul.f32 %v15796_v27, %v15795_v9  ;;  %v4818_v46 = vmul.f32 %v15796_v27, %v15797_v62  ;;  %v15799_v33 = vld [vmem:[#allocation255_spill] sm:$0xff]  ;;  %v15803_v4 = vld [vmem:[#allocation37_spill] sm:$0xff] }
 0x518   :  { %5881 = vst [vmem:[%s13782_s4 + $0x3a0] sm:$0xff] %v5641_v2  ;;  %5882 = vst.msk [vmem:[%s13782_s4 + $0x3a8] sm:$0xff] %vm1443_vm1, %v5642_v29  ;;  %v4835_v24 = vmul.f32 %v15799_v33, %v15798_v15  ;;  %v15800_v2 = vld [vmem:[#allocation65_spill] sm:$0xff]  ;;  %v15804_v47 = vld [vmem:[#allocation71_spill] sm:$0xff] }
 0x519   :  { %5899 = vst [vmem:[%s13782_s4 + $0x430] sm:$0xff] %v5659_v45  ;;  %5900 = vst.msk [vmem:[%s13782_s4 + $0x438] sm:$0xff] %vm1443_vm1, %v5660_v6  ;;  %v5228_v43 = vpop.permute.xlu1 %5227  ;;  %v4836_v29 = vmul.f32 %v15799_v33, %v15800_v2  ;;  %v15807_v14 = vld [vmem:[#allocation43_spill] sm:$0xff]  ;;  %v15809_v3 = vld [vmem:[#allocation45_spill] sm:$0xff] }
 0x51a   :  { %v5645_v10 = vadd.f32 %v5228_v43, %v4805_v20  ;;  %v5646_v59 = vadd.f32 %v5228_v43, %v4806_v41  ;;  %v5273_v22 = vpop.permute.xlu0 %5272  ;;  %v15802_v41 = vld [vmem:[#allocation312_spill] sm:$0xff]  ;;  %v15810_v28 = vld [vmem:[#allocation79_spill] sm:$0xff]  ;;  %v15813_v37 = vld [vmem:[#allocation209_spill] sm:$0xff] }
 0x51b   :  { %v5663_v40 = vadd.f32 %v5273_v22, %v4823_v50  ;;  %v5664_v38 = vadd.f32 %v5273_v22, %v4824_v58  ;;  %v4821_v49 = vmul.f32 %v15802_v41, %v15801_v55  ;;  %v4822_v50 = vmul.f32 %v15802_v41, %v15803_v4  ;;  %v15805_v58 = vld [vmem:[#allocation116_spill] sm:$0xff]  ;;  %v15814_v39 = vld [vmem:[#allocation53_spill] sm:$0xff]  ;;  %v15815_v34 = vld [vmem:[#allocation87_spill] sm:$0xff] }
 0x51c   :  { %5885 = vst [vmem:[%s13782_s4 + $0x3c0] sm:$0xff] %v5645_v10  ;;  %5886 = vst.msk [vmem:[%s13782_s4 + $0x3c8] sm:$0xff] %vm1443_vm1, %v5646_v59  ;;  %v4839_v43 = vmul.f32 %v15805_v58, %v15804_v47  ;;  %v15806_v10 = vld [vmem:[#allocation73_spill] sm:$0xff]  ;;  %v15818_v27 = vld [vmem:[#allocation59_spill] sm:$0xff] }
 0x51d   :  { %5903 = vst [vmem:[%s13782_s4 + $0x450] sm:$0xff] %v5663_v40  ;;  %5904 = vst.msk [vmem:[%s13782_s4 + $0x458] sm:$0xff] %vm1443_vm1, %v5664_v38  ;;  %v5238_v18 = vpop.permute.xlu1 %5237  ;;  %v4840_v59 = vmul.f32 %v15805_v58, %v15806_v10  ;;  %v15821_v33 = vld [vmem:[#allocation95_spill] sm:$0xff]  ;;  %v15827_v58 = vld [vmem:[#allocation106_spill] sm:$0xff] }
 0x51e   :  { %v5649_v51 = vadd.f32 %v5238_v18, %v4809_v11  ;;  %v5650_v35 = vadd.f32 %v5238_v18, %v4810_v60  ;;  %v5283_v30 = vpop.permute.xlu0 %5282  ;;  %v15808_v60 = vld [vmem:[#allocation270_spill] sm:$0xff]  ;;  %v15811_v18 = vld [vmem:[#allocation81_spill] sm:$0xff]  ;;  %v15824_v41 = vld [vmem:[#allocation67_spill] sm:$0xff] }
 0x51f   :  { %v5667_v61 = vadd.f32 %v5283_v30, %v4827_v1  ;;  %v5668_v0 = vadd.f32 %v5283_v30, %v4828_v48  ;;  %v4825_v42 = vmul.f32 %v15808_v60, %v15807_v14  ;;  %v4826_v1 = vmul.f32 %v15808_v60, %v15809_v3  ;;  %v15830_v60 = vld [vmem:[#allocation75_spill] sm:$0xff]  ;;  %v15831_v3 = vld [vmem:[#allocation77_spill] sm:$0xff] }
 0x520   :  { %5889 = vst [vmem:[%s13782_s4 + $0x3e0] sm:$0xff] %v5649_v51  ;;  %5890 = vst.msk [vmem:[%s13782_s4 + $0x3e8] sm:$0xff] %vm1443_vm1, %v5650_v35  ;;  %v4843_v48 = vmul.f32 %v11884_v25, %v15810_v28  ;;  %v4844_v51 = vmul.f32 %v11884_v25, %v15811_v18  ;;  %v4830_v25 = vmul.f32 %v15813_v37, %v15814_v39  ;;  %v15832_v28 = vld [vmem:[#allocation118_spill] sm:$0xff] }
 0x521   :  { %5907 = vst [vmem:[%s13782_s4 + $0x470] sm:$0xff] %v5667_v61  ;;  %5908 = vst.msk [vmem:[%s13782_s4 + $0x478] sm:$0xff] %vm1443_vm1, %v5668_v0  ;;  %v5248_v21 = vpop.permute.xlu1 %5247 }
 0x522   :  { %v5653_v16 = vadd.f32 %v5248_v21, %v4813_v8  ;;  %v5654_v5 = vadd.f32 %v5248_v21, %v4814_v53  ;;  %v5293_v57 = vpop.permute.xlu0 %5292  ;;  %v15812_v8 = vld [vmem:[#allocation51_spill] sm:$0xff] }
 0x523   :  { %v5671_v44 = vadd.f32 %v5293_v57, %v4831_v19  ;;  %v5672_v13 = vadd.f32 %v5293_v57, %v4832_v31  ;;  %v4829_v53 = vmul.f32 %v15813_v37, %v15812_v8  ;;  %v15816_v19 = vld [vmem:[#allocation290_spill] sm:$0xff]  ;;  %v15817_v31 = vld [vmem:[#allocation89_spill] sm:$0xff]  ;;  %v15835_v8 = vld [vmem:[#allocation83_spill] sm:$0xff] }
 0x524   :  { %5893 = vst [vmem:[%s13782_s4 + $0x400] sm:$0xff] %v5653_v16  ;;  %5894 = vst.msk [vmem:[%s13782_s4 + $0x408] sm:$0xff] %vm1443_vm1, %v5654_v5  ;;  %v4847_v63 = vmul.f32 %v15816_v19, %v15815_v34  ;;  %v4848_v21 = vmul.f32 %v15816_v19, %v15817_v31  ;;  %v4845_v37 = vmul.f32 %v11950_v26, %v15835_v8  ;;  %v15838_v34 = vld [vmem:[#allocation328_spill] sm:$0xff] }
 0x525   :  { %5911 = vst [vmem:[%s13782_s4 + $0x490] sm:$0xff] %v5671_v44  ;;  %5912 = vst.msk [vmem:[%s13782_s4 + $0x498] sm:$0xff] %vm1443_vm1, %v5672_v13  ;;  %v5258_v32 = vpop.permute.xlu1 %5257  ;;  %v15859_v8 = vld [vmem:[#allocation368_spill] sm:$0xff] }
 0x526   :  { %v5657_v45 = vadd.f32 %v5258_v32, %v4817_v17  ;;  %v5658_v6 = vadd.f32 %v5258_v32, %v4818_v46  ;;  %v5303_v56 = vpop.permute.xlu0 %5302  ;;  %v15819_v17 = vld [vmem:[#allocation105_spill] sm:$0xff] }
 0x527   :  { %v5675_v36 = vadd.f32 %v5303_v56, %v4835_v24  ;;  %v5676_v20 = vadd.f32 %v5303_v56, %v4836_v29  ;;  %v4833_v62 = vmul.f32 %v15819_v17, %v15818_v27  ;;  %v15820_v46 = vld [vmem:[#allocation61_spill] sm:$0xff]  ;;  %v15822_v24 = vld [vmem:[#allocation372_spill] sm:$0xff] }
 0x528   :  { %5897 = vst [vmem:[%s13782_s4 + $0x420] sm:$0xff] %v5657_v45  ;;  %5898 = vst.msk [vmem:[%s13782_s4 + $0x428] sm:$0xff] %vm1443_vm1, %v5658_v6  ;;  %v4834_v15 = vmul.f32 %v15819_v17, %v15820_v46  ;;  %v4851_v2 = vmul.f32 %v15822_v24, %v15821_v33  ;;  %v15823_v29 = vld [vmem:[#allocation97_spill] sm:$0xff]  ;;  %v15843_v46 = vld [vmem:[#allocation143_spill] sm:$0xff] }
 0x529   :  { %5915 = vst [vmem:[%s13782_s4 + $0x4b0] sm:$0xff] %v5675_v36  ;;  %5916 = vst.msk [vmem:[%s13782_s4 + $0x4b8] sm:$0xff] %vm1443_vm1, %v5676_v20  ;;  %v5268_v22 = vpop.permute.xlu1 %5267  ;;  %v4852_v32 = vmul.f32 %v15822_v24, %v15823_v29  ;;  %v15842_v17 = vld [vmem:[#allocation93_spill] sm:$0xff] }
 0x52a   :  { %v5661_v40 = vadd.f32 %v5268_v22, %v4821_v49  ;;  %v5662_v38 = vadd.f32 %v5268_v22, %v4822_v50  ;;  %v5313_v23 = vpop.permute.xlu0 %5312  ;;  %v15825_v49 = vld [vmem:[#allocation308_spill] sm:$0xff]  ;;  %v15826_v50 = vld [vmem:[#allocation69_spill] sm:$0xff] }
 0x52b   :  { %v5679_v12 = vadd.f32 %v5313_v23, %v4839_v43  ;;  %v5680_v11 = vadd.f32 %v5313_v23, %v4840_v59  ;;  %v4837_v4 = vmul.f32 %v15825_v49, %v15824_v41  ;;  %v4838_v47 = vmul.f32 %v15825_v49, %v15826_v50  ;;  %v15828_v43 = vld [vmem:[#allocation247_spill] sm:$0xff]  ;;  %v15829_v59 = vld [vmem:[#allocation108_spill] sm:$0xff]  ;;  %v15845_v24 = vld [vmem:[#allocation145_spill] sm:$0xff] }
 0x52c   :  { %5901 = vst [vmem:[%s13782_s4 + $0x440] sm:$0xff] %v5661_v40  ;;  %5902 = vst.msk [vmem:[%s13782_s4 + $0x448] sm:$0xff] %vm1443_vm1, %v5662_v38  ;;  %v4855_v10 = vmul.f32 %v15828_v43, %v15827_v58  ;;  %v4856_v22 = vmul.f32 %v15828_v43, %v15829_v59  ;;  %v15848_v49 = vld [vmem:[#allocation101_spill] sm:$0xff]  ;;  %v15851_v43 = vld [vmem:[#allocation154_spill] sm:$0xff] }
 0x52d   :  { %5919 = vst [vmem:[%s13782_s4 + $0x4d0] sm:$0xff] %v5679_v12  ;;  %5920 = vst.msk [vmem:[%s13782_s4 + $0x4d8] sm:$0xff] %vm1443_vm1, %v5680_v11  ;;  %v5278_v35 = vpop.permute.xlu1 %5277  ;;  %v15849_v50 = vld [vmem:[#allocation153_spill] sm:$0xff] }
 0x52e   :  { %v5665_v30 = vadd.f32 %v5278_v35, %v4825_v42  ;;  %v5666_v61 = vadd.f32 %v5278_v35, %v4826_v1  ;;  %v5323_v0 = vpop.permute.xlu0 %5322  ;;  %v4841_v42 = vmul.f32 %v11936_v52, %v15830_v60  ;;  %v4842_v1 = vmul.f32 %v11936_v52, %v15831_v3 }
 0x52f   :  { %v5683_v54 = vadd.f32 %v5323_v0, %v4843_v48  ;;  %v5684_v7 = vadd.f32 %v5323_v0, %v4844_v51  ;;  %v15833_v48 = vld [vmem:[#allocation329_spill] sm:$0xff]  ;;  %v15834_v51 = vld [vmem:[#allocation120_spill] sm:$0xff] }
 0x530   :  { %5905 = vst [vmem:[%s13782_s4 + $0x460] sm:$0xff] %v5665_v30  ;;  %5906 = vst.msk [vmem:[%s13782_s4 + $0x468] sm:$0xff] %vm1443_vm1, %v5666_v61  ;;  %v4859_v18 = vmul.f32 %v15833_v48, %v15832_v28  ;;  %v4860_v35 = vmul.f32 %v15833_v48, %v15834_v51  ;;  %v15856_v28 = vld [vmem:[#allocation347_spill] sm:$0xff] }
 0x531   :  { %5923 = vst [vmem:[%s13782_s4 + $0x4f0] sm:$0xff] %v5683_v54  ;;  %5924 = vst.msk [vmem:[%s13782_s4 + $0x4f8] sm:$0xff] %vm1443_vm1, %v5684_v7  ;;  %v5288_v16 = vpop.permute.xlu1 %5287 }
 0x532   :  { %v5669_v5 = vadd.f32 %v5288_v16, %v4829_v53  ;;  %v5670_v57 = vadd.f32 %v5288_v16, %v4830_v25  ;;  %v5333_v44 = vpop.permute.xlu0 %5332  ;;  %v15836_v53 = vld [vmem:[#allocation85_spill] sm:$0xff]  ;;  %v15837_v25 = vld [vmem:[#allocation130_spill] sm:$0xff] }
 0x533   :  { %v5687_v13 = vadd.f32 %v5333_v44, %v4847_v63  ;;  %v5688_v9 = vadd.f32 %v5333_v44, %v4848_v21  ;;  %v4846_v39 = vmul.f32 %v11950_v26, %v15836_v53  ;;  %v4863_v19 = vmul.f32 %v15838_v34, %v15837_v25  ;;  %v15839_v63 = vld [vmem:[#allocation132_spill] sm:$0xff]  ;;  %v15860_v53 = vld [vmem:[#allocation127_spill] sm:$0xff]  ;;  %v15861_v25 = vld [vmem:[#allocation189_spill] sm:$0xff] }
 0x534   :  { %5909 = vst [vmem:[%s13782_s4 + $0x480] sm:$0xff] %v5669_v5  ;;  %5910 = vst.msk [vmem:[%s13782_s4 + $0x488] sm:$0xff] %vm1443_vm1, %v5670_v57  ;;  %v4864_v31 = vmul.f32 %v15838_v34, %v15839_v63  ;;  %v15862_v34 = vld [vmem:[#allocation436_spill] sm:$0xff]  ;;  %v15863_v63 = vld [vmem:[#allocation190_spill] sm:$0xff] }
 0x535   :  { %5927 = vst [vmem:[%s13782_s4 + $0x510] sm:$0xff] %v5687_v13  ;;  %5928 = vst.msk [vmem:[%s13782_s4 + $0x518] sm:$0xff] %vm1443_vm1, %v5688_v9  ;;  %v5298_v45 = vpop.permute.xlu1 %5297  ;;  %v15840_v13 = vld [vmem:[#allocation91_spill] sm:$0xff]  ;;  %v15841_v9 = vld [vmem:[#allocation432_spill] sm:$0xff] }
 0x536   :  { %v5673_v6 = vadd.f32 %v5298_v45, %v4833_v62  ;;  %v5674_v56 = vadd.f32 %v5298_v45, %v4834_v15  ;;  %v5343_v36 = vpop.permute.xlu0 %5342  ;;  %v4849_v27 = vmul.f32 %v15841_v9, %v15840_v13  ;;  %v4850_v62 = vmul.f32 %v15841_v9, %v15842_v17  ;;  %v15844_v15 = vld [vmem:[#allocation266_spill] sm:$0xff]  ;;  %v15864_v13 = vld [vmem:[#allocation136_spill] sm:$0xff]  ;;  %v15865_v9 = vld [vmem:[#allocation303_spill] sm:$0xff] }
 0x537   :  { %v5691_v20 = vadd.f32 %v5343_v36, %v4851_v2  ;;  %v5692_v55 = vadd.f32 %v5343_v36, %v4852_v32  ;;  %v4867_v33 = vmul.f32 %v15844_v15, %v15843_v46  ;;  %v4868_v2 = vmul.f32 %v15844_v15, %v15845_v24  ;;  %v15866_v17 = vld [vmem:[#allocation139_spill] sm:$0xff]  ;;  %v15867_v46 = vld [vmem:[#allocation210_spill] sm:$0xff] }
 0x538   :  { %5913 = vst [vmem:[%s13782_s4 + $0x4a0] sm:$0xff] %v5673_v6  ;;  %5914 = vst.msk [vmem:[%s13782_s4 + $0x4a8] sm:$0xff] %vm1443_vm1, %v5674_v56  ;;  %v15868_v15 = vld [vmem:[#allocation114_spill] sm:$0xff]  ;;  %v15869_v24 = vld [vmem:[#allocation211_spill] sm:$0xff] }
 0x539   :  { %5931 = vst [vmem:[%s13782_s4 + $0x530] sm:$0xff] %v5691_v20  ;;  %5932 = vst.msk [vmem:[%s13782_s4 + $0x538] sm:$0xff] %vm1443_vm1, %v5692_v55  ;;  %v5308_v40 = vpop.permute.xlu1 %5307  ;;  %v15846_v20 = vld [vmem:[#allocation99_spill] sm:$0xff]  ;;  %v15847_v55 = vld [vmem:[#allocation348_spill] sm:$0xff] }
 0x53a   :  { %v5677_v38 = vadd.f32 %v5308_v40, %v4837_v4  ;;  %v5678_v23 = vadd.f32 %v5308_v40, %v4838_v47  ;;  %v5353_v12 = vpop.permute.xlu0 %5352  ;;  %v4853_v41 = vmul.f32 %v15847_v55, %v15846_v20  ;;  %v4854_v4 = vmul.f32 %v15847_v55, %v15848_v49  ;;  %v15850_v47 = vld [vmem:[#allocation433_spill] sm:$0xff]  ;;  %v15871_v55 = vld [vmem:[#allocation231_spill] sm:$0xff] }
 0x53b   :  { %v5695_v11 = vadd.f32 %v5353_v12, %v4855_v10  ;;  %v5696_v14 = vadd.f32 %v5353_v12, %v4856_v22  ;;  %v4871_v58 = vmul.f32 %v15850_v47, %v15849_v50  ;;  %v4872_v10 = vmul.f32 %v15850_v47, %v15851_v43  ;;  %v15870_v20 = vld [vmem:[#allocation149_spill] sm:$0xff]  ;;  %v15872_v49 = vld [vmem:[#allocation151_spill] sm:$0xff]  ;;  %v15874_v47 = vld [vmem:[#allocation198_spill] sm:$0xff] }
 0x53c   :  { %5917 = vst [vmem:[%s13782_s4 + $0x4c0] sm:$0xff] %v5677_v38  ;;  %5918 = vst.msk [vmem:[%s13782_s4 + $0x4c8] sm:$0xff] %vm1443_vm1, %v5678_v23  ;;  %v15873_v50 = vld [vmem:[#allocation229_spill] sm:$0xff]  ;;  %v15875_v43 = vld [vmem:[#allocation230_spill] sm:$0xff] }
 0x53d   :  { %5935 = vst [vmem:[%s13782_s4 + $0x550] sm:$0xff] %v5695_v11  ;;  %5936 = vst.msk [vmem:[%s13782_s4 + $0x558] sm:$0xff] %vm1443_vm1, %v5696_v14  ;;  %v5318_v52 = vpop.permute.xlu1 %5317  ;;  %v15852_v11 = vld [vmem:[#allocation112_spill] sm:$0xff]  ;;  %v15853_v14 = vld [vmem:[#allocation285_spill] sm:$0xff] }
 0x53e   :  { %v5681_v30 = vadd.f32 %v5318_v52, %v4841_v42  ;;  %v5682_v61 = vadd.f32 %v5318_v52, %v4842_v1  ;;  %v5363_v0 = vpop.permute.xlu0 %5362  ;;  %v4857_v60 = vmul.f32 %v15853_v14, %v15852_v11  ;;  %v15854_v42 = vld [vmem:[#allocation115_spill] sm:$0xff]  ;;  %v15855_v1 = vld [vmem:[#allocation166_spill] sm:$0xff]  ;;  %v15876_v11 = vld [vmem:[#allocation160_spill] sm:$0xff] }
 0x53f   :  { %v5699_v54 = vadd.f32 %v5363_v0, %v4859_v18  ;;  %v5700_v7 = vadd.f32 %v5363_v0, %v4860_v35  ;;  %v4858_v3 = vmul.f32 %v15853_v14, %v15854_v42  ;;  %v4875_v48 = vmul.f32 %v15856_v28, %v15855_v1  ;;  %v15857_v18 = vld [vmem:[#allocation167_spill] sm:$0xff]  ;;  %v15879_v1 = vld [vmem:[#allocation248_spill] sm:$0xff] }
 0x540   :  { %5921 = vst [vmem:[%s13782_s4 + $0x4e0] sm:$0xff] %v5681_v30  ;;  %5922 = vst.msk [vmem:[%s13782_s4 + $0x4e8] sm:$0xff] %vm1443_vm1, %v5682_v61  ;;  %v4876_v51 = vmul.f32 %v15856_v28, %v15857_v18  ;;  %v15877_v14 = vld [vmem:[#allocation159_spill] sm:$0xff]  ;;  %v15880_v28 = vld [vmem:[#allocation366_spill] sm:$0xff] }
 0x541   :  { %5939 = vst [vmem:[%s13782_s4 + $0x570] sm:$0xff] %v5699_v54  ;;  %5940 = vst.msk [vmem:[%s13782_s4 + $0x578] sm:$0xff] %vm1443_vm1, %v5700_v7  ;;  %v5328_v26 = vpop.permute.xlu1 %5327  ;;  %v15858_v7 = vld [vmem:[#allocation124_spill] sm:$0xff]  ;;  %v15878_v42 = vld [vmem:[#allocation163_spill] sm:$0xff] }
 0x542   :  { %v5685_v21 = vadd.f32 %v5328_v26, %v4845_v37  ;;  %v5686_v16 = vadd.f32 %v5328_v26, %v4846_v39  ;;  %v4861_v37 = vmul.f32 %v15859_v8, %v15858_v7  ;;  %v4862_v39 = vmul.f32 %v15859_v8, %v15860_v53  ;;  %v15881_v18 = vld [vmem:[#allocation249_spill] sm:$0xff]  ;;  %v15882_v7 = vld [vmem:[#allocation182_spill] sm:$0xff] }
 0x543   :  { %v5373_v5 = vpop.permute.xlu0 %5372  ;;  %v15883_v8 = vld [vmem:[#allocation394_spill] sm:$0xff]  ;;  %v15884_v53 = vld [vmem:[#allocation185_spill] sm:$0xff] }
 0x544   :  { %v5703_v57 = vadd.f32 %v5373_v5, %v4863_v19  ;;  %v5704_v44 = vadd.f32 %v5373_v5, %v4864_v31  ;;  %5925 = vst [vmem:[%s13782_s4 + $0x500] sm:$0xff] %v5685_v21  ;;  %5926 = vst.msk [vmem:[%s13782_s4 + $0x508] sm:$0xff] %vm1443_vm1, %v5686_v16  ;;  %v4879_v19 = vmul.f32 %v15862_v34, %v15861_v25  ;;  %v15885_v25 = vld [vmem:[#allocation267_spill] sm:$0xff] }
 0x545   :  { %v5338_v29 = vpop.permute.xlu1 %5337  ;;  %v4880_v31 = vmul.f32 %v15862_v34, %v15863_v63  ;;  %v15886_v34 = vld [vmem:[#allocation438_spill] sm:$0xff]  ;;  %v15887_v63 = vld [vmem:[#allocation268_spill] sm:$0xff] }
 0x546   :  { %5943 = vst [vmem:[%s13782_s4 + $0x590] sm:$0xff] %v5703_v57  ;;  %5944 = vst.msk [vmem:[%s13782_s4 + $0x598] sm:$0xff] %vm1443_vm1, %v5704_v44  ;;  %v5689_v32 = vadd.f32 %v5338_v29, %v4849_v27  ;;  %v5690_v45 = vadd.f32 %v5338_v29, %v4850_v62  ;;  %v4865_v27 = vmul.f32 %v15865_v9, %v15864_v13  ;;  %v15888_v13 = vld [vmem:[#allocation205_spill] sm:$0xff] }
 0x547   :  { %v5383_v6 = vpop.permute.xlu0 %5382  ;;  %v4866_v62 = vmul.f32 %v15865_v9, %v15866_v17  ;;  %v15889_v9 = vld [vmem:[#allocation345_spill] sm:$0xff]  ;;  %v15890_v17 = vld [vmem:[#allocation208_spill] sm:$0xff] }
 0x548   :  { %v5707_v56 = vadd.f32 %v5383_v6, %v4867_v33  ;;  %v5708_v36 = vadd.f32 %v5383_v6, %v4868_v2  ;;  %5929 = vst [vmem:[%s13782_s4 + $0x520] sm:$0xff] %v5689_v32  ;;  %5930 = vst.msk [vmem:[%s13782_s4 + $0x528] sm:$0xff] %vm1443_vm1, %v5690_v45  ;;  %v4883_v33 = vmul.f32 %v15868_v15, %v15867_v46  ;;  %v15891_v46 = vld [vmem:[#allocation286_spill] sm:$0xff] }
 0x549   :  { %v5348_v59 = vpop.permute.xlu1 %5347  ;;  %v4884_v2 = vmul.f32 %v15868_v15, %v15869_v24  ;;  %v15892_v15 = vld [vmem:[#allocation399_spill] sm:$0xff] }
 0x54a   :  { %5947 = vst [vmem:[%s13782_s4 + $0x5b0] sm:$0xff] %v5707_v56  ;;  %5948 = vst.msk [vmem:[%s13782_s4 + $0x5b8] sm:$0xff] %vm1443_vm1, %v5708_v36  ;;  %v5693_v22 = vadd.f32 %v5348_v59, %v4853_v41  ;;  %v5694_v40 = vadd.f32 %v5348_v59, %v4854_v4  ;;  %v4869_v41 = vmul.f32 %v15871_v55, %v15870_v20  ;;  %v15893_v24 = vld [vmem:[#allocation287_spill] sm:$0xff]  ;;  %v15894_v20 = vld [vmem:[#allocation225_spill] sm:$0xff] }
 0x54b   :  { %v5393_v38 = vpop.permute.xlu0 %5392  ;;  %v4870_v4 = vmul.f32 %v15871_v55, %v15872_v49  ;;  %v15895_v55 = vld [vmem:[#allocation220_spill] sm:$0xff] }
 0x54c   :  { %v5711_v23 = vadd.f32 %v5393_v38, %v4871_v58  ;;  %v5712_v12 = vadd.f32 %v5393_v38, %v4872_v10  ;;  %5933 = vst [vmem:[%s13782_s4 + $0x540] sm:$0xff] %v5693_v22  ;;  %5934 = vst.msk [vmem:[%s13782_s4 + $0x548] sm:$0xff] %vm1443_vm1, %v5694_v40  ;;  %v4887_v58 = vmul.f32 %v15874_v47, %v15873_v50  ;;  %v15896_v49 = vld [vmem:[#allocation228_spill] sm:$0xff] }
 0x54d   :  { %v5358_v35 = vpop.permute.xlu1 %5357  ;;  %v4888_v10 = vmul.f32 %v15874_v47, %v15875_v43  ;;  %v15897_v50 = vld [vmem:[#allocation304_spill] sm:$0xff]  ;;  %v15898_v47 = vld [vmem:[#allocation363_spill] sm:$0xff]  ;;  %v15899_v43 = vld [vmem:[#allocation305_spill] sm:$0xff] }
 0x54e   :  { %5951 = vst [vmem:[%s13782_s4 + $0x5d0] sm:$0xff] %v5711_v23  ;;  %5952 = vst.msk [vmem:[%s13782_s4 + $0x5d8] sm:$0xff] %vm1443_vm1, %v5712_v12  ;;  %v5697_v52 = vadd.f32 %v5358_v35, %v4857_v60  ;;  %v5698_v30 = vadd.f32 %v5358_v35, %v4858_v3  ;;  %v4873_v60 = vmul.f32 %v15877_v14, %v15876_v11  ;;  %v15900_v11 = vld [vmem:[#allocation242_spill] sm:$0xff] }
 0x54f   :  { %v5403_v61 = vpop.permute.xlu0 %5402  ;;  %v4874_v3 = vmul.f32 %v15877_v14, %v15878_v42  ;;  %v15901_v14 = vld [vmem:[#allocation288_spill] sm:$0xff]  ;;  %v15902_v42 = vld [vmem:[#allocation245_spill] sm:$0xff] }
 0x550   :  { %v5715_v0 = vadd.f32 %v5403_v61, %v4875_v48  ;;  %v5716_v54 = vadd.f32 %v5403_v61, %v4876_v51  ;;  %5937 = vst [vmem:[%s13782_s4 + $0x560] sm:$0xff] %v5697_v52  ;;  %5938 = vst.msk [vmem:[%s13782_s4 + $0x568] sm:$0xff] %vm1443_vm1, %v5698_v30  ;;  %v4891_v48 = vmul.f32 %v15880_v28, %v15879_v1  ;;  %v15903_v1 = vld [vmem:[#allocation323_spill] sm:$0xff] }
 0x551   :  { %v5368_v26 = vpop.permute.xlu1 %5367  ;;  %v4892_v51 = vmul.f32 %v15880_v28, %v15881_v18  ;;  %v15904_v28 = vld [vmem:[#allocation233_spill] sm:$0xff]  ;;  %v15905_v18 = vld [vmem:[#allocation324_spill] sm:$0xff] }
 0x552   :  { %5955 = vst [vmem:[%s13782_s4 + $0x5f0] sm:$0xff] %v5715_v0  ;;  %5956 = vst.msk [vmem:[%s13782_s4 + $0x5f8] sm:$0xff] %vm1443_vm1, %v5716_v54  ;;  %v5701_v21 = vadd.f32 %v5368_v26, %v4861_v37  ;;  %v5702_v16 = vadd.f32 %v5368_v26, %v4862_v39  ;;  %v4877_v37 = vmul.f32 %v15883_v8, %v15882_v7  ;;  %v15906_v7 = vld [vmem:[#allocation261_spill] sm:$0xff] }
 0x553   :  { %v5413_v5 = vpop.permute.xlu0 %5412  ;;  %v4878_v39 = vmul.f32 %v15883_v8, %v15884_v53  ;;  %v15907_v8 = vld [vmem:[#allocation383_spill] sm:$0xff]  ;;  %v15908_v53 = vld [vmem:[#allocation264_spill] sm:$0xff] }
 0x554   :  { %v5719_v57 = vadd.f32 %v5413_v5, %v4879_v19  ;;  %v5720_v44 = vadd.f32 %v5413_v5, %v4880_v31  ;;  %5941 = vst [vmem:[%s13782_s4 + $0x580] sm:$0xff] %v5701_v21  ;;  %5942 = vst.msk [vmem:[%s13782_s4 + $0x588] sm:$0xff] %vm1443_vm1, %v5702_v16  ;;  %v4895_v19 = vmul.f32 %v15886_v34, %v15885_v25  ;;  %v15909_v25 = vld [vmem:[#allocation173_spill] sm:$0xff] }
 0x555   :  { %v5378_v29 = vpop.permute.xlu1 %5377  ;;  %v4896_v31 = vmul.f32 %v15886_v34, %v15887_v63  ;;  %v15910_v34 = vld [vmem:[#allocation410_spill] sm:$0xff]  ;;  %v15911_v63 = vld [vmem:[#allocation180_spill] sm:$0xff] }
 0x556   :  { %5959 = vst [vmem:[%s13782_s4 + $0x610] sm:$0xff] %v5719_v57  ;;  %5960 = vst.msk [vmem:[%s13782_s4 + $0x618] sm:$0xff] %vm1443_vm1, %v5720_v44  ;;  %v5705_v32 = vadd.f32 %v5378_v29, %v4865_v27  ;;  %v5706_v45 = vadd.f32 %v5378_v29, %v4866_v62  ;;  %v4881_v27 = vmul.f32 %v15889_v9, %v15888_v13  ;;  %v15912_v13 = vld [vmem:[#allocation281_spill] sm:$0xff] }
 0x557   :  { %v4882_v62 = vmul.f32 %v15889_v9, %v15890_v17  ;;  %v15913_v9 = vld [vmem:[#allocation103_spill] sm:$0xff]  ;;  %v15914_v17 = vld [vmem:[#allocation284_spill] sm:$0xff] }
 0x558   :  { %v5423_v6 = vpop.permute.xlu0 %5422  ;;  %5945 = vst [vmem:[%s13782_s4 + $0x5a0] sm:$0xff] %v5705_v32  ;;  %5946 = vst.msk [vmem:[%s13782_s4 + $0x5a8] sm:$0xff] %vm1443_vm1, %v5706_v45 }
 0x559   :  { %v5723_v56 = vadd.f32 %v5423_v6, %v4883_v33  ;;  %v5724_v36 = vadd.f32 %v5423_v6, %v4884_v2  ;;  %v5388_v59 = vpop.permute.xlu1 %5387  ;;  %v4899_v33 = vmul.f32 %v15892_v15, %v15891_v46  ;;  %v4900_v2 = vmul.f32 %v15892_v15, %v15893_v24  ;;  %v15915_v46 = vld [vmem:[#allocation364_spill] sm:$0xff]  ;;  %v15916_v15 = vld [vmem:[#allocation235_spill] sm:$0xff]  ;;  %v15917_v24 = vld [vmem:[#allocation365_spill] sm:$0xff] }
 0x55a   :  { %v5709_v22 = vadd.f32 %v5388_v59, %v4869_v41  ;;  %v5710_v40 = vadd.f32 %v5388_v59, %v4870_v4  ;;  %v4885_v41 = vmul.f32 %v15895_v55, %v15894_v20  ;;  %v4886_v4 = vmul.f32 %v15895_v55, %v15896_v49  ;;  %v15918_v20 = vld [vmem:[#allocation298_spill] sm:$0xff]  ;;  %v15919_v55 = vld [vmem:[#allocation409_spill] sm:$0xff] }
 0x55b   :  { %5963 = vst [vmem:[%s13782_s4 + $0x630] sm:$0xff] %v5723_v56  ;;  %5964 = vst.msk [vmem:[%s13782_s4 + $0x638] sm:$0xff] %vm1443_vm1, %v5724_v36  ;;  %v15920_v49 = vld [vmem:[#allocation301_spill] sm:$0xff] }
 0x55c   :  { %v5433_v38 = vpop.permute.xlu0 %5432  ;;  %5949 = vst [vmem:[%s13782_s4 + $0x5c0] sm:$0xff] %v5709_v22  ;;  %5950 = vst.msk [vmem:[%s13782_s4 + $0x5c8] sm:$0xff] %vm1443_vm1, %v5710_v40 }
 0x55d   :  { %v5727_v23 = vadd.f32 %v5433_v38, %v4887_v58  ;;  %v5728_v12 = vadd.f32 %v5433_v38, %v4888_v10  ;;  %v5398_v35 = vpop.permute.xlu1 %5397  ;;  %v4903_v58 = vmul.f32 %v15898_v47, %v15897_v50  ;;  %v4904_v10 = vmul.f32 %v15898_v47, %v15899_v43  ;;  %v15921_v50 = vld [vmem:[#allocation384_spill] sm:$0xff]  ;;  %v15922_v47 = vld [vmem:[#allocation421_spill] sm:$0xff] }
 0x55e   :  { %v5713_v52 = vadd.f32 %v5398_v35, %v4873_v60  ;;  %v5714_v30 = vadd.f32 %v5398_v35, %v4874_v3  ;;  %v4889_v60 = vmul.f32 %v15901_v14, %v15900_v11  ;;  %v4890_v3 = vmul.f32 %v15901_v14, %v15902_v42  ;;  %v15923_v43 = vld [vmem:[#allocation385_spill] sm:$0xff]  ;;  %v15924_v11 = vld [vmem:[#allocation319_spill] sm:$0xff]  ;;  %v15926_v42 = vld [vmem:[#allocation322_spill] sm:$0xff] }
 0x55f   :  { %5967 = vst [vmem:[%s13782_s4 + $0x650] sm:$0xff] %v5727_v23  ;;  %5968 = vst.msk [vmem:[%s13782_s4 + $0x658] sm:$0xff] %vm1443_vm1, %v5728_v12  ;;  %v15925_v14 = vld [vmem:[#allocation177_spill] sm:$0xff] }
 0x560   :  { %v5443_v61 = vpop.permute.xlu0 %5442  ;;  %5953 = vst [vmem:[%s13782_s4 + $0x5e0] sm:$0xff] %v5713_v52  ;;  %5954 = vst.msk [vmem:[%s13782_s4 + $0x5e8] sm:$0xff] %vm1443_vm1, %v5714_v30 }
 0x561   :  { %v5731_v0 = vadd.f32 %v5443_v61, %v4891_v48  ;;  %v5732_v54 = vadd.f32 %v5443_v61, %v4892_v51  ;;  %v5408_v26 = vpop.permute.xlu1 %5407  ;;  %v4907_v48 = vmul.f32 %v15904_v28, %v15903_v1  ;;  %v4908_v51 = vmul.f32 %v15904_v28, %v15905_v18  ;;  %v15927_v28 = vld [vmem:[#allocation416_spill] sm:$0xff] }
 0x562   :  { %v5717_v21 = vadd.f32 %v5408_v26, %v4877_v37  ;;  %v5718_v16 = vadd.f32 %v5408_v26, %v4878_v39  ;;  %v4893_v37 = vmul.f32 %v15907_v8, %v15906_v7  ;;  %v4894_v39 = vmul.f32 %v15907_v8, %v15908_v53  ;;  %v15930_v7 = vld [vmem:[#allocation341_spill] sm:$0xff]  ;;  %v15931_v8 = vld [vmem:[#allocation434_spill] sm:$0xff]  ;;  %v15932_v53 = vld [vmem:[#allocation344_spill] sm:$0xff] }
 0x563   :  { %5971 = vst [vmem:[%s13782_s4 + $0x670] sm:$0xff] %v5731_v0  ;;  %5972 = vst.msk [vmem:[%s13782_s4 + $0x678] sm:$0xff] %vm1443_vm1, %v5732_v54 }
 0x564   :  { %v5453_v5 = vpop.permute.xlu0 %5452  ;;  %5957 = vst [vmem:[%s13782_s4 + $0x600] sm:$0xff] %v5717_v21  ;;  %5958 = vst.msk [vmem:[%s13782_s4 + $0x608] sm:$0xff] %vm1443_vm1, %v5718_v16 }
 0x565   :  { %v5735_v57 = vadd.f32 %v5453_v5, %v4895_v19  ;;  %v5736_v44 = vadd.f32 %v5453_v5, %v4896_v31  ;;  %v5418_v29 = vpop.permute.xlu1 %5417  ;;  %v4911_v19 = vmul.f32 %v15910_v34, %v15909_v25  ;;  %v4912_v31 = vmul.f32 %v15910_v34, %v15911_v63  ;;  %v15933_v63 = vld [vmem:[#allocation359_spill] sm:$0xff] }
 0x566   :  { %v5721_v32 = vadd.f32 %v5418_v29, %v4881_v27  ;;  %v5722_v45 = vadd.f32 %v5418_v29, %v4882_v62  ;;  %v4897_v27 = vmul.f32 %v15913_v9, %v15912_v13  ;;  %v4898_v62 = vmul.f32 %v15913_v9, %v15914_v17  ;;  %v15936_v13 = vld [vmem:[#allocation379_spill] sm:$0xff]  ;;  %v15937_v9 = vld [vmem:[#allocation274_spill] sm:$0xff] }
 0x567   :  { %5975 = vst [vmem:[%s13782_s4 + $0x690] sm:$0xff] %v5735_v57  ;;  %5976 = vst.msk [vmem:[%s13782_s4 + $0x698] sm:$0xff] %vm1443_vm1, %v5736_v44  ;;  %v15938_v17 = vld [vmem:[#allocation382_spill] sm:$0xff] }
 0x568   :  { %v5463_v6 = vpop.permute.xlu0 %5462  ;;  %5961 = vst [vmem:[%s13782_s4 + $0x620] sm:$0xff] %v5721_v32  ;;  %5962 = vst.msk [vmem:[%s13782_s4 + $0x628] sm:$0xff] %vm1443_vm1, %v5722_v45 }
 0x569   :  { %v5739_v56 = vadd.f32 %v5463_v6, %v4899_v33  ;;  %v5740_v36 = vadd.f32 %v5463_v6, %v4900_v2  ;;  %v5428_v59 = vpop.permute.xlu1 %5427  ;;  %v4915_v33 = vmul.f32 %v15916_v15, %v15915_v46  ;;  %v4916_v2 = vmul.f32 %v15916_v15, %v15917_v24  ;;  %v15939_v24 = vld [vmem:[#allocation110_spill] sm:$0xff] }
 0x56a   :  { %v5725_v22 = vadd.f32 %v5428_v59, %v4885_v41  ;;  %v5726_v40 = vadd.f32 %v5428_v59, %v4886_v4  ;;  %v4901_v41 = vmul.f32 %v15919_v55, %v15918_v20  ;;  %v4902_v4 = vmul.f32 %v15919_v55, %v15920_v49 }
 0x56b   :  { %5979 = vst [vmem:[%s13782_s4 + $0x6b0] sm:$0xff] %v5739_v56  ;;  %5980 = vst.msk [vmem:[%s13782_s4 + $0x6b8] sm:$0xff] %vm1443_vm1, %v5740_v36 }
 0x56c   :  { %v5473_v38 = vpop.permute.xlu0 %5472  ;;  %5965 = vst [vmem:[%s13782_s4 + $0x640] sm:$0xff] %v5725_v22  ;;  %5966 = vst.msk [vmem:[%s13782_s4 + $0x648] sm:$0xff] %vm1443_vm1, %v5726_v40 }
 0x56d   :  { %v5743_v23 = vadd.f32 %v5473_v38, %v4903_v58  ;;  %v5744_v12 = vadd.f32 %v5473_v38, %v4904_v10  ;;  %v5438_v35 = vpop.permute.xlu1 %5437  ;;  %v4919_v58 = vmul.f32 %v15922_v47, %v15921_v50  ;;  %v4920_v10 = vmul.f32 %v15922_v47, %v15923_v43 }
 0x56e   :  { %v5729_v52 = vadd.f32 %v5438_v35, %v4889_v60  ;;  %v5730_v30 = vadd.f32 %v5438_v35, %v4890_v3  ;;  %v4905_v60 = vmul.f32 %v15925_v14, %v15924_v11  ;;  %v4906_v3 = vmul.f32 %v15925_v14, %v15926_v42 }
 0x56f   :  { %5983 = vst [vmem:[%s13782_s4 + $0x6d0] sm:$0xff] %v5743_v23  ;;  %5984 = vst.msk [vmem:[%s13782_s4 + $0x6d8] sm:$0xff] %vm1443_vm1, %v5744_v12 }
 0x570   :  { %v5483_v61 = vpop.permute.xlu0 %5482  ;;  %5969 = vst [vmem:[%s13782_s4 + $0x660] sm:$0xff] %v5729_v52  ;;  %5970 = vst.msk [vmem:[%s13782_s4 + $0x668] sm:$0xff] %vm1443_vm1, %v5730_v30 }
 0x571   :  { %v5747_v0 = vadd.f32 %v5483_v61, %v4907_v48  ;;  %v5748_v54 = vadd.f32 %v5483_v61, %v4908_v51  ;;  %v5448_v26 = vpop.permute.xlu1 %5447  ;;  %v15928_v48 = vld [vmem:[#allocation254_spill] sm:$0xff]  ;;  %v15929_v51 = vld [vmem:[#allocation417_spill] sm:$0xff] }
 0x572   :  { %v5733_v21 = vadd.f32 %v5448_v26, %v4893_v37  ;;  %v5734_v16 = vadd.f32 %v5448_v26, %v4894_v39  ;;  %v4923_v18 = vmul.f32 %v15928_v48, %v15927_v28  ;;  %v4924_v35 = vmul.f32 %v15928_v48, %v15929_v51 }
 0x573   :  { %5987 = vst [vmem:[%s13782_s4 + $0x6f0] sm:$0xff] %v5747_v0  ;;  %5988 = vst.msk [vmem:[%s13782_s4 + $0x6f8] sm:$0xff] %vm1443_vm1, %v5748_v54  ;;  %v4909_v37 = vmul.f32 %v15931_v8, %v15930_v7  ;;  %v4910_v39 = vmul.f32 %v15931_v8, %v15932_v53 }
 0x574   :  { %v5493_v5 = vpop.permute.xlu0 %5492  ;;  %5973 = vst [vmem:[%s13782_s4 + $0x680] sm:$0xff] %v5733_v21  ;;  %5974 = vst.msk [vmem:[%s13782_s4 + $0x688] sm:$0xff] %vm1443_vm1, %v5734_v16  ;;  %v15935_v21 = vld [vmem:[#allocation362_spill] sm:$0xff] }
 0x575   :  { %v5751_v57 = vadd.f32 %v5493_v5, %v4911_v19  ;;  %v5752_v44 = vadd.f32 %v5493_v5, %v4912_v31  ;;  %v5458_v29 = vpop.permute.xlu1 %5457  ;;  %v15934_v31 = vld [vmem:[#allocation252_spill] sm:$0xff] }
 0x576   :  { %v5737_v32 = vadd.f32 %v5458_v29, %v4897_v27  ;;  %v5738_v45 = vadd.f32 %v5458_v29, %v4898_v62  ;;  %v4913_v26 = vmul.f32 %v15934_v31, %v15933_v63  ;;  %v4914_v16 = vmul.f32 %v15934_v31, %v15935_v21 }
 0x577   :  { %5991 = vst [vmem:[%s13782_s4 + $0x710] sm:$0xff] %v5751_v57  ;;  %5992 = vst.msk [vmem:[%s13782_s4 + $0x718] sm:$0xff] %vm1443_vm1, %v5752_v44  ;;  %v4917_v27 = vmul.f32 %v15937_v9, %v15936_v13  ;;  %v4918_v62 = vmul.f32 %v15937_v9, %v15938_v17 }
 0x578   :  { %v5503_v6 = vpop.permute.xlu0 %5502  ;;  %5977 = vst [vmem:[%s13782_s4 + $0x6a0] sm:$0xff] %v5737_v32  ;;  %5978 = vst.msk [vmem:[%s13782_s4 + $0x6a8] sm:$0xff] %vm1443_vm1, %v5738_v45  ;;  %v15941_v32 = vld [vmem:[#allocation393_spill] sm:$0xff] }
 0x579   :  { %v5755_v56 = vadd.f32 %v5503_v6, %v4915_v33  ;;  %v5756_v36 = vadd.f32 %v5503_v6, %v4916_v2  ;;  %v5468_v59 = vpop.permute.xlu1 %5467  ;;  %v15940_v2 = vld [vmem:[#allocation437_spill] sm:$0xff] }
 0x57a   :  { %v5741_v22 = vadd.f32 %v5468_v59, %v4901_v41  ;;  %v5742_v40 = vadd.f32 %v5468_v59, %v4902_v4  ;;  %v4921_v29 = vmul.f32 %v15940_v2, %v15939_v24  ;;  %v4922_v45 = vmul.f32 %v15940_v2, %v15941_v32 }
 0x57b   :  { %5995 = vst [vmem:[%s13782_s4 + $0x730] sm:$0xff] %v5755_v56  ;;  %5996 = vst.msk [vmem:[%s13782_s4 + $0x738] sm:$0xff] %vm1443_vm1, %v5756_v36 }
 0x57c   :  { %v5513_v38 = vpop.permute.xlu0 %5512  ;;  %5981 = vst [vmem:[%s13782_s4 + $0x6c0] sm:$0xff] %v5741_v22  ;;  %5982 = vst.msk [vmem:[%s13782_s4 + $0x6c8] sm:$0xff] %vm1443_vm1, %v5742_v40 }
 0x57d   :  { %v5759_v23 = vadd.f32 %v5513_v38, %v4919_v58  ;;  %v5760_v12 = vadd.f32 %v5513_v38, %v4920_v10  ;;  %v5478_v1 = vpop.permute.xlu1 %5477 }
 0x57e   :  { %v5745_v52 = vadd.f32 %v5478_v1, %v4905_v60  ;;  %v5746_v30 = vadd.f32 %v5478_v1, %v4906_v3 }
 0x57f   :  { %5999 = vst [vmem:[%s13782_s4 + $0x750] sm:$0xff] %v5759_v23  ;;  %6000 = vst.msk [vmem:[%s13782_s4 + $0x758] sm:$0xff] %vm1443_vm1, %v5760_v12 }
 0x580   :  { %v5523_v61 = vpop.permute.xlu0 %5522  ;;  %5985 = vst [vmem:[%s13782_s4 + $0x6e0] sm:$0xff] %v5745_v52  ;;  %5986 = vst.msk [vmem:[%s13782_s4 + $0x6e8] sm:$0xff] %vm1443_vm1, %v5746_v30 }
 0x581   :  { %v5763_v0 = vadd.f32 %v5523_v61, %v4923_v18  ;;  %v5764_v54 = vadd.f32 %v5523_v61, %v4924_v35  ;;  %v5488_v25 = vpop.permute.xlu1 %5487 }
 0x582   :  { %v5749_v34 = vadd.f32 %v5488_v25, %v4909_v37  ;;  %v5750_v19 = vadd.f32 %v5488_v25, %v4910_v39 }
 0x583   :  { %6003 = vst [vmem:[%s13782_s4 + $0x770] sm:$0xff] %v5763_v0  ;;  %6004 = vst.msk [vmem:[%s13782_s4 + $0x778] sm:$0xff] %vm1443_vm1, %v5764_v54 }
 0x584   :  { %5989 = vst [vmem:[%s13782_s4 + $0x700] sm:$0xff] %v5749_v34  ;;  %5990 = vst.msk [vmem:[%s13782_s4 + $0x708] sm:$0xff] %vm1443_vm1, %v5750_v19 }
 0x585   :  { %v5498_v5 = vpop.permute.xlu1 %5497 }
 0x586   :  { %v5753_v57 = vadd.f32 %v5498_v5, %v4913_v26  ;;  %v5754_v44 = vadd.f32 %v5498_v5, %v4914_v16 }
 0x588   :  { %5993 = vst [vmem:[%s13782_s4 + $0x720] sm:$0xff] %v5753_v57  ;;  %5994 = vst.msk [vmem:[%s13782_s4 + $0x728] sm:$0xff] %vm1443_vm1, %v5754_v44 }
 0x589   :  { %v5508_v46 = vpop.permute.xlu1 %5507 }
 0x58a   :  { %v5757_v15 = vadd.f32 %v5508_v46, %v4917_v27  ;;  %v5758_v33 = vadd.f32 %v5508_v46, %v4918_v62 }
 0x58c   :  { %5997 = vst [vmem:[%s13782_s4 + $0x740] sm:$0xff] %v5757_v15  ;;  %5998 = vst.msk [vmem:[%s13782_s4 + $0x748] sm:$0xff] %vm1443_vm1, %v5758_v33 }
 0x58d   :  { %v5518_v6 = vpop.permute.xlu1 %5517 }
 0x58e   :  { %v5761_v56 = vadd.f32 %v5518_v6, %v4921_v29  ;;  %v5762_v36 = vadd.f32 %v5518_v6, %v4922_v45 }
 0x590   :  { %6001 = vst [vmem:[%s13782_s4 + $0x760] sm:$0xff] %v5761_v56  ;;  %6002 = vst.msk [vmem:[%s13782_s4 + $0x768] sm:$0xff] %vm1443_vm1, %v5762_v36 }

</bundles_post_ra>
